<compile_context>
chip_gen: v7x
topology: tpu7x:2x2x1
jax: 0.10.0
libtpu: 0.0.40
codegen_flags: <defaults>
</compile_context>

<pallas_src>
import functools

import jax
import jax.numpy as jnp
from jax.experimental import pallas as pl
from jax.experimental.pallas import tpu as pltpu


def _round_up(x, m):
    return (x + m - 1) // m * m


def _pick_tile(n):
    """Pad the pixel count to a multiple of 256 and split into two lane tiles.

    Two grid steps let `dimension_semantics=("parallel",)` shard the layer
    across both v7x TensorCores; the extra step is ~0.35us on single-TC chips.
    With the factorized (matmul) smooth-max the per-step live set is well under
    the default scoped-VMEM limit on every generation, so no budget logic.
    """
    n_pad = _round_up(max(n, 256), 256)
    tn = n_pad // 2
    return n_pad, tn


# ----------------------------------------------------------------------------
# Pallas kernels
# ----------------------------------------------------------------------------
def _smorph_relu_kernel(alpha, pt_ref, k1_ref, k2_ref, b_ref, o_ref):
    """SMorph layer + fused ReLU, factorized smooth-max (exp on 2D factors,
    P-reduction on the MXU).

    pt_ref : (P, TN)  im2col patches, output pixels lane-dense
    k1_ref : (F, P)   k1 reshaped ((kh,kw,c)-flattened on P)
    k2_ref : (F, P)
    b_ref  : (F, 1)
    o_ref  : (F, TN)
    """
    x = pt_ref[...]                                   # (P, TN)
    k1 = k1_ref[...]                                  # (F, P)
    k2 = k2_ref[...]                                  # (F, P)

    ax = alpha * x if alpha != 1.0 else x             # alpha is a static float

    # ---- chain 1: smooth-max over P of (x + k1) ------------------------
    # exp(alpha*(x+k1)) = exp(alpha*x) * exp(alpha*k1); the per-lane max of
    # alpha*x and the per-row max of alpha*k1 used for stabilization cancel
    # exactly in the s/d ratio below.
    ex1 = jnp.exp(ax - jnp.max(ax, axis=0, keepdims=True))         # (P, TN)
    ak1 = alpha * k1 if alpha != 1.0 else k1
    ek1 = jnp.exp(ak1 - jnp.max(ak1, axis=1, keepdims=True))       # (F, P)
    d1 = jnp.dot(ek1, ex1, preferred_element_type=jnp.float32)     # (F, TN)
    s1 = (jnp.dot(k1 * ek1, ex1, preferred_element_type=jnp.float32)
          + jnp.dot(ek1, x * ex1, preferred_element_type=jnp.float32))

    # ---- chain 2: smooth-max over P of (-x + k2) -----------------------
    ex2 = jnp.exp(-ax - jnp.max(-ax, axis=0, keepdims=True))       # (P, TN)
    ak2 = alpha * k2 if alpha != 1.0 else k2
    ek2 = jnp.exp(ak2 - jnp.max(ak2, axis=1, keepdims=True))       # (F, P)
    d2 = jnp.dot(ek2, ex2, preferred_element_type=jnp.float32)     # (F, TN)
    s2 = (jnp.dot(k2 * ek2, ex2, preferred_element_type=jnp.float32)
          + jnp.dot(ek2, (-x) * ex2, preferred_element_type=jnp.float32))

    y = s1 / d1 + s2 / d2 + b_ref[...]                # (F, TN), lane-broadcast bias
    o_ref[...] = jnp.maximum(y, 0.0)                  # fused nn.ReLU


def _linear_softmax_kernel(x_ref, w_ref, b_ref, o_ref):
    """Flatten -> Linear -> Softmax(dim=1). Padded class columns carry -1e30."""
    logits = jnp.dot(x_ref[...], w_ref[...],
                     preferred_element_type=jnp.float32) + b_ref[...]
    m = jnp.max(logits, axis=1, keepdims=True)
    e = jnp.exp(logits - m)
    o_ref[...] = e / jnp.sum(e, axis=1, keepdims=True)


# ----------------------------------------------------------------------------
# Wrappers around pallas_call
# ----------------------------------------------------------------------------
def smorph_relu_pallas(pt, k1, k2, bias, alpha):
    """pt: (P, N) f32 ; k1,k2: (F, P) ; bias: (F,) ; alpha: python float -> (F, N)."""
    P, N = pt.shape
    F = k1.shape[0]
    Np, tn = _pick_tile(N)
    pt_p = jnp.pad(pt, ((0, 0), (0, Np - N)))  # zero pad: finite through exp/divide,
                                               # sliced off before the next layer.

    out = pl.pallas_call(
        functools.partial(_smorph_relu_kernel, float(alpha)),
        out_shape=jax.ShapeDtypeStruct((F, Np), jnp.float32),
        grid=(Np // tn,),
        in_specs=[
            pl.BlockSpec((P, tn), lambda i: (0, i)),
            pl.BlockSpec((F, P), lambda i: (0, 0)),
            pl.BlockSpec((F, P), lambda i: (0, 0)),
            pl.BlockSpec((F, 1), lambda i: (0, 0)),
        ],
        out_specs=pl.BlockSpec((F, tn), lambda i: (0, i)),
        compiler_params=pltpu.CompilerParams(
            dimension_semantics=("parallel",)),
    )(pt_p, k1, k2, bias.reshape(F, 1))
    return out[:, :N]


def linear_softmax_pallas(x, w, b):
    """x: (B, D) ; w: (D, C) ; b: (C,) -> (B, C) probabilities."""
    B, D = x.shape
    C = w.shape[1]
    Bp = _round_up(max(B, 8), 8)                 # full f32 sublane tile
    Cp = _round_up(max(C, 128), 128)             # lane-dense logits / stores
    x_p = jnp.pad(x, ((0, Bp - B), (0, 0)))
    w_p = jnp.pad(w, ((0, 0), (0, Cp - C)))
    # padded logits get -1e30 -> exp underflows to exactly 0 -> softmax unchanged
    b_p = jnp.concatenate([b, jnp.full((Cp - C,), -1e30, jnp.float32)]).reshape(1, Cp)

    out = pl.pallas_call(
        _linear_softmax_kernel,
        out_shape=jax.ShapeDtypeStruct((Bp, Cp), jnp.float32),
        grid=(1,),
        in_specs=[
            pl.BlockSpec((Bp, D), lambda i: (0, 0)),
            pl.BlockSpec((D, Cp), lambda i: (0, 0)),
            pl.BlockSpec((1, Cp), lambda i: (0, 0)),
        ],
        out_specs=pl.BlockSpec((Bp, Cp), lambda i: (0, 0)),
    )(x_p, w_p, b_p)
    return out[:B, :C]


# ----------------------------------------------------------------------------
# Glue: patch extraction (pure data layout) and the full network forward
# ----------------------------------------------------------------------------
def extract_patches_cmajor(y, K):
    """y: (C, B, H, W) -> (K*K*C, B*OH*OW); patch flattened in (kh, kw, c) order,
    pixels flattened in (b, oh, ow) order (so the kernel output reshapes straight
    back into channel-major (F, B, OH, OW))."""
    C, B, H, W = y.shape
    OH, OW = H - K + 1, W - K + 1
    cols = [y[:, :, i:i + OH, j:j + OW] for i in range(K) for j in range(K)]
    p = jnp.stack(cols, axis=0)                   # (K*K, C, B, OH, OW)
    p = p.reshape(K * K * C, B * OH * OW)
    return p, (B, OH, OW)


def init_params(key, shape, depth, alpha):
    """Deterministic parameter init mirroring the module shapes.

    Returns (params_pytree, alphas_tuple); alphas are STATIC python floats."""
    C0, H, W = shape
    specs = [(C0, 32, float(alpha))]              # (cin, filters, alpha)
    c = 32
    for _ in range(depth):
        specs.append((c, 16, 2.0))
        c = 16

    keys = jax.random.split(key, 2 * len(specs) + 1)
    smorph, alphas = [], []
    oh, ow = H, W
    for idx, (cin, f, a) in enumerate(specs):
        P = 9 * cin
        # xavier_uniform_ on a (3, 3, cin, f) tensor: fan_in = fan_out = 3*cin*f
        # -> bound = sqrt(6 / (6*cin*f)) = 1/sqrt(cin*f)
        bound = (1.0 / (cin * f)) ** 0.5
        k1 = jax.random.uniform(keys[2 * idx], (f, P), jnp.float32, -bound, bound)
        k2 = jax.random.uniform(keys[2 * idx + 1], (f, P), jnp.float32, -bound, bound)
        bias = jnp.zeros((f,), jnp.float32)
        smorph.append((k1, k2, bias))
        alphas.append(a)
        oh, ow = oh - 2, ow - 2                   # VALID 3x3, stride 1

    f_last = specs[-1][1]
    D = f_last * oh * ow
    lb = 1.0 / (D ** 0.5)
    w = jax.random.uniform(keys[-1], (D, 10), jnp.float32, -lb, lb)
    b = jnp.zeros((10,), jnp.float32)
    return {"smorph": smorph, "w": w, "b": b}, tuple(alphas)


def smorph_net_mae_forward(params, x, alphas):
    """x: (B, C, H, W) -> (B, 10) class probabilities. alphas: static floats."""
    y = jnp.transpose(x, (1, 0, 2, 3))            # channel-major (C, B, H, W)
    for (k1, k2, bias), a in zip(params["smorph"], alphas):
        pt, (B, OH, OW) = extract_patches_cmajor(y, 3)
        out = smorph_relu_pallas(pt, k1, k2, bias, a)        # (F, B*OH*OW)
        y = out.reshape(k1.shape[0], B, OH, OW)              # stays channel-major
    F, B, OH, OW = y.shape
    flat = jnp.transpose(y, (1, 0, 2, 3)).reshape(B, F * OH * OW)  # NCHW flatten
    return linear_softmax_pallas(flat, params["w"], params["b"])


# ----------------------------------------------------------------------------
# Pure-JAX reference (for correctness check only)
# ----------------------------------------------------------------------------
def _smorph_relu_ref(pt, k1, k2, bias, alpha):
    z1 = pt[None, :, :] + k1[:, :, None]
    z2 = -pt[None, :, :] + k2[:, :, None]

    def smax(z):
        az = alpha * z
        e = jnp.exp(az - jnp.max(az, axis=1, keepdims=True))
        w = e / jnp.sum(e, axis=1, keepdims=True)
        return jnp.sum(z * w, axis=1)

    return jnp.maximum(smax(z1) + smax(z2) + bias[:, None], 0.0)


def smorph_net_mae_ref(params, x, alphas):
    y = jnp.transpose(x, (1, 0, 2, 3))
    for (k1, k2, bias), a in zip(params["smorph"], alphas):
        pt, (B, OH, OW) = extract_patches_cmajor(y, 3)
        out = _smorph_relu_ref(pt, k1, k2, bias, a)
        y = out.reshape(k1.shape[0], B, OH, OW)
    F, B, OH, OW = y.shape
    flat = jnp.transpose(y, (1, 0, 2, 3)).reshape(B, F * OH * OW)
    logits = flat @ params["w"] + params["b"][None, :]
    e = jnp.exp(logits - jnp.max(logits, axis=1, keepdims=True))
    return e / jnp.sum(e, axis=1, keepdims=True)


# ----------------------------------------------------------------------------
if __name__ == "__main__":
    # Smorph_Net_MAE(depth=1, shape=(4, 16, 16), alpha=1)
    depth = 1
    shape = (4, 16, 16)       # (C, H, W)
    alpha = 1.0
    batch = 2

    key = jax.random.PRNGKey(0)
    k_params, k_x = jax.random.split(key)
    params, alphas = init_params(k_params, shape, depth, alpha)
    x = jax.random.normal(k_x, (batch,) + shape, dtype=jnp.float32)

    fwd = jax.jit(lambda p, xx: smorph_net_mae_forward(p, xx, alphas))
    out = jax.block_until_ready(fwd(params, x))

    ref = smorph_net_mae_ref(params, x, alphas)
    assert out.shape == (batch, 10), out.shape
    assert bool(jnp.all(jnp.isfinite(out)))
    assert bool(jnp.allclose(out, ref, rtol=1e-4, atol=1e-5)), (
        "max abs diff = %e" % float(jnp.max(jnp.abs(out - ref))))
    # rows of a softmax must sum to 1
    assert bool(jnp.allclose(jnp.sum(out, axis=1), 1.0, atol=1e-4))

    print("KERNEL_OK")
</pallas_src>

<mosaic_0001>
module attributes {stable_mosaic.version = 11 : i64} {
  func.func @_smorph_relu_kernel(%arg0: i32, %arg1: memref<36x256xf32, #tpu.memory_space<vmem>>, %arg2: memref<32x36xf32, #tpu.memory_space<vmem>>, %arg3: memref<32x36xf32, #tpu.memory_space<vmem>>, %arg4: memref<32x1xf32, #tpu.memory_space<vmem>>, %arg5: memref<32x256xf32, #tpu.memory_space<vmem>>) attributes {dimension_semantics = [#tpu.dimension_semantics<parallel>], iteration_bounds = array<i64: 2>, scalar_prefetch = 0 : i64, scratch_operands = 0 : i64, tpu.core_type = #tpu.core_type<tc>, window_params = [{transform_indices = @transform_0, window_bounds = array<i64: 36, 256>}, {pipeline_mode = #tpu.pipeline_mode<synchronous>, transform_indices = @transform_1, window_bounds = array<i64: 32, 36>}, {pipeline_mode = #tpu.pipeline_mode<synchronous>, transform_indices = @transform_2, window_bounds = array<i64: 32, 36>}, {pipeline_mode = #tpu.pipeline_mode<synchronous>, transform_indices = @transform_3, window_bounds = array<i64: 32, 1>}, {transform_indices = @transform_4, window_bounds = array<i64: 32, 256>}]} {
    %c0 = arith.constant 0 : index
    %c0_0 = arith.constant 0 : index
    %0 = vector.load %arg1[%c0, %c0_0] : memref<36x256xf32, #tpu.memory_space<vmem>>, vector<36x256xf32>
    %c0_1 = arith.constant 0 : index
    %c0_2 = arith.constant 0 : index
    %1 = vector.load %arg2[%c0_1, %c0_2] : memref<32x36xf32, #tpu.memory_space<vmem>>, vector<32x36xf32>
    %c0_3 = arith.constant 0 : index
    %c0_4 = arith.constant 0 : index
    %2 = vector.load %arg3[%c0_3, %c0_4] : memref<32x36xf32, #tpu.memory_space<vmem>>, vector<32x36xf32>
    %cst = arith.constant dense<0xFF800000> : vector<256xf32>
    %3 = vector.multi_reduction <maximumf>, %0, %cst [0] : vector<36x256xf32> to vector<256xf32>
    %4 = vector.shape_cast %3 : vector<256xf32> to vector<1x256xf32>
    %5 = vector.broadcast %4 : vector<1x256xf32> to vector<36x256xf32>
    %6 = arith.subf %0, %5 : vector<36x256xf32>
    %7 = math.exp %6 : vector<36x256xf32>
    %cst_5 = arith.constant dense<0xFF800000> : vector<32xf32>
    %8 = vector.multi_reduction <maximumf>, %1, %cst_5 [1] : vector<32x36xf32> to vector<32xf32>
    %9 = vector.shape_cast %8 : vector<32xf32> to vector<32x1xf32>
    %10 = vector.broadcast %9 : vector<32x1xf32> to vector<32x36xf32>
    %11 = arith.subf %1, %10 : vector<32x36xf32>
    %12 = math.exp %11 : vector<32x36xf32>
    %cst_6 = arith.constant dense<0.000000e+00> : vector<32x256xf32>
    %13 = tpu.matmul %12, %7, %cst_6 {dimension_numbers = #tpu.dot_dimension_numbers<[1], [0], [0], [1], [0, 0, 1, 1], [], []>} : vector<32x36xf32>, vector<36x256xf32>, vector<32x256xf32> -> vector<32x256xf32>
    %14 = arith.mulf %1, %12 : vector<32x36xf32>
    %cst_7 = arith.constant dense<0.000000e+00> : vector<32x256xf32>
    %15 = tpu.matmul %14, %7, %cst_7 {dimension_numbers = #tpu.dot_dimension_numbers<[1], [0], [0], [1], [0, 0, 1, 1], [], []>} : vector<32x36xf32>, vector<36x256xf32>, vector<32x256xf32> -> vector<32x256xf32>
    %16 = arith.mulf %0, %7 : vector<36x256xf32>
    %cst_8 = arith.constant dense<0.000000e+00> : vector<32x256xf32>
    %17 = tpu.matmul %12, %16, %cst_8 {dimension_numbers = #tpu.dot_dimension_numbers<[1], [0], [0], [1], [0, 0, 1, 1], [], []>} : vector<32x36xf32>, vector<36x256xf32>, vector<32x256xf32> -> vector<32x256xf32>
    %18 = arith.addf %15, %17 : vector<32x256xf32>
    %cst_9 = arith.constant 0.000000e+00 : f32
    %19 = vector.broadcast %cst_9 : f32 to vector<36x256xf32>
    %20 = arith.subf %19, %0 : vector<36x256xf32>
    %cst_10 = arith.constant 0.000000e+00 : f32
    %21 = vector.broadcast %cst_10 : f32 to vector<36x256xf32>
    %22 = arith.subf %21, %0 : vector<36x256xf32>
    %cst_11 = arith.constant dense<0xFF800000> : vector<256xf32>
    %23 = vector.multi_reduction <maximumf>, %22, %cst_11 [0] : vector<36x256xf32> to vector<256xf32>
    %24 = vector.shape_cast %23 : vector<256xf32> to vector<1x256xf32>
    %25 = vector.broadcast %24 : vector<1x256xf32> to vector<36x256xf32>
    %26 = arith.subf %20, %25 : vector<36x256xf32>
    %27 = math.exp %26 : vector<36x256xf32>
    %cst_12 = arith.constant dense<0xFF800000> : vector<32xf32>
    %28 = vector.multi_reduction <maximumf>, %2, %cst_12 [1] : vector<32x36xf32> to vector<32xf32>
    %29 = vector.shape_cast %28 : vector<32xf32> to vector<32x1xf32>
    %30 = vector.broadcast %29 : vector<32x1xf32> to vector<32x36xf32>
    %31 = arith.subf %2, %30 : vector<32x36xf32>
    %32 = math.exp %31 : vector<32x36xf32>
    %cst_13 = arith.constant dense<0.000000e+00> : vector<32x256xf32>
    %33 = tpu.matmul %32, %27, %cst_13 {dimension_numbers = #tpu.dot_dimension_numbers<[1], [0], [0], [1], [0, 0, 1, 1], [], []>} : vector<32x36xf32>, vector<36x256xf32>, vector<32x256xf32> -> vector<32x256xf32>
    %34 = arith.mulf %2, %32 : vector<32x36xf32>
    %cst_14 = arith.constant dense<0.000000e+00> : vector<32x256xf32>
    %35 = tpu.matmul %34, %27, %cst_14 {dimension_numbers = #tpu.dot_dimension_numbers<[1], [0], [0], [1], [0, 0, 1, 1], [], []>} : vector<32x36xf32>, vector<36x256xf32>, vector<32x256xf32> -> vector<32x256xf32>
    %cst_15 = arith.constant 0.000000e+00 : f32
    %36 = vector.broadcast %cst_15 : f32 to vector<36x256xf32>
    %37 = arith.subf %36, %0 : vector<36x256xf32>
    %38 = arith.mulf %37, %27 : vector<36x256xf32>
    %cst_16 = arith.constant dense<0.000000e+00> : vector<32x256xf32>
    %39 = tpu.matmul %32, %38, %cst_16 {dimension_numbers = #tpu.dot_dimension_numbers<[1], [0], [0], [1], [0, 0, 1, 1], [], []>} : vector<32x36xf32>, vector<36x256xf32>, vector<32x256xf32> -> vector<32x256xf32>
    %40 = arith.addf %35, %39 : vector<32x256xf32>
    %41 = arith.divf %18, %13 : vector<32x256xf32>
    %42 = arith.divf %40, %33 : vector<32x256xf32>
    %43 = arith.addf %41, %42 : vector<32x256xf32>
    %c0_17 = arith.constant 0 : index
    %c0_18 = arith.constant 0 : index
    %44 = vector.load %arg4[%c0_17, %c0_18] : memref<32x1xf32, #tpu.memory_space<vmem>>, vector<32x1xf32>
    %45 = vector.broadcast %44 : vector<32x1xf32> to vector<32x256xf32>
    %46 = arith.addf %43, %45 : vector<32x256xf32>
    %cst_19 = arith.constant 0.000000e+00 : f32
    %47 = vector.broadcast %cst_19 : f32 to vector<32x256xf32>
    %48 = arith.maximumf %46, %47 : vector<32x256xf32>
    %c0_20 = arith.constant 0 : index
    %c0_21 = arith.constant 0 : index
    %49 = vector.load %arg5[%c0_20, %c0_21] : memref<32x256xf32, #tpu.memory_space<vmem>>, vector<32x256xf32>
    tpu.vector_store %arg5[%c0_20, %c0_21], %48 {strides = array<i32>} : memref<32x256xf32, #tpu.memory_space<vmem>>, vector<32x256xf32>,
    return
  }
  func.func @transform_0(%arg0: i32) -> (i32, i32) {
    %c0_i32 = arith.constant 0 : i32
    %c0_i32_0 = arith.constant 0 : i32
    return %c0_i32, %arg0 : i32, i32
  }
  func.func @transform_1(%arg0: i32) -> (i32, i32) {
    %c0_i32 = arith.constant 0 : i32
    %c0_i32_0 = arith.constant 0 : i32
    %c0_i32_1 = arith.constant 0 : i32
    return %c0_i32, %c0_i32_0 : i32, i32
  }
  func.func @transform_2(%arg0: i32) -> (i32, i32) {
    %c0_i32 = arith.constant 0 : i32
    %c0_i32_0 = arith.constant 0 : i32
    %c0_i32_1 = arith.constant 0 : i32
    return %c0_i32, %c0_i32_0 : i32, i32
  }
  func.func @transform_3(%arg0: i32) -> (i32, i32) {
    %c0_i32 = arith.constant 0 : i32
    %c0_i32_0 = arith.constant 0 : i32
    %c0_i32_1 = arith.constant 0 : i32
    return %c0_i32, %c0_i32_0 : i32, i32
  }
  func.func @transform_4(%arg0: i32) -> (i32, i32) {
    %c0_i32 = arith.constant 0 : i32
    %c0_i32_0 = arith.constant 0 : i32
    return %c0_i32, %arg0 : i32, i32
  }
}

module attributes {stable_mosaic.version = 11 : i64} {
  func.func @_smorph_relu_kernel(%arg0: i32, %arg1: memref<288x256xf32, #tpu.memory_space<vmem>>, %arg2: memref<16x288xf32, #tpu.memory_space<vmem>>, %arg3: memref<16x288xf32, #tpu.memory_space<vmem>>, %arg4: memref<16x1xf32, #tpu.memory_space<vmem>>, %arg5: memref<16x256xf32, #tpu.memory_space<vmem>>) attributes {dimension_semantics = [#tpu.dimension_semantics<parallel>], iteration_bounds = array<i64: 2>, scalar_prefetch = 0 : i64, scratch_operands = 0 : i64, tpu.core_type = #tpu.core_type<tc>, window_params = [{transform_indices = @transform_0, window_bounds = array<i64: 288, 256>}, {pipeline_mode = #tpu.pipeline_mode<synchronous>, transform_indices = @transform_1, window_bounds = array<i64: 16, 288>}, {pipeline_mode = #tpu.pipeline_mode<synchronous>, transform_indices = @transform_2, window_bounds = array<i64: 16, 288>}, {pipeline_mode = #tpu.pipeline_mode<synchronous>, transform_indices = @transform_3, window_bounds = array<i64: 16, 1>}, {transform_indices = @transform_4, window_bounds = array<i64: 16, 256>}]} {
    %c0 = arith.constant 0 : index
    %c0_0 = arith.constant 0 : index
    %0 = vector.load %arg1[%c0, %c0_0] : memref<288x256xf32, #tpu.memory_space<vmem>>, vector<288x256xf32>
    %c0_1 = arith.constant 0 : index
    %c0_2 = arith.constant 0 : index
    %1 = vector.load %arg2[%c0_1, %c0_2] : memref<16x288xf32, #tpu.memory_space<vmem>>, vector<16x288xf32>
    %c0_3 = arith.constant 0 : index
    %c0_4 = arith.constant 0 : index
    %2 = vector.load %arg3[%c0_3, %c0_4] : memref<16x288xf32, #tpu.memory_space<vmem>>, vector<16x288xf32>
    %cst = arith.constant 2.000000e+00 : f32
    %3 = vector.broadcast %cst : f32 to vector<288x256xf32>
    %4 = arith.mulf %3, %0 : vector<288x256xf32>
    %cst_5 = arith.constant dense<0xFF800000> : vector<256xf32>
    %5 = vector.multi_reduction <maximumf>, %4, %cst_5 [0] : vector<288x256xf32> to vector<256xf32>
    %6 = vector.shape_cast %5 : vector<256xf32> to vector<1x256xf32>
    %7 = vector.broadcast %6 : vector<1x256xf32> to vector<288x256xf32>
    %8 = arith.subf %4, %7 : vector<288x256xf32>
    %9 = math.exp %8 : vector<288x256xf32>
    %cst_6 = arith.constant 2.000000e+00 : f32
    %10 = vector.broadcast %cst_6 : f32 to vector<16x288xf32>
    %11 = arith.mulf %10, %1 : vector<16x288xf32>
    %cst_7 = arith.constant dense<0xFF800000> : vector<16xf32>
    %12 = vector.multi_reduction <maximumf>, %11, %cst_7 [1] : vector<16x288xf32> to vector<16xf32>
    %13 = vector.shape_cast %12 : vector<16xf32> to vector<16x1xf32>
    %14 = vector.broadcast %13 : vector<16x1xf32> to vector<16x288xf32>
    %15 = arith.subf %11, %14 : vector<16x288xf32>
    %16 = math.exp %15 : vector<16x288xf32>
    %cst_8 = arith.constant dense<0.000000e+00> : vector<16x256xf32>
    %17 = tpu.matmul %16, %9, %cst_8 {dimension_numbers = #tpu.dot_dimension_numbers<[1], [0], [0], [1], [0, 0, 1, 1], [], []>} : vector<16x288xf32>, vector<288x256xf32>, vector<16x256xf32> -> vector<16x256xf32>
    %18 = arith.mulf %1, %16 : vector<16x288xf32>
    %cst_9 = arith.constant dense<0.000000e+00> : vector<16x256xf32>
    %19 = tpu.matmul %18, %9, %cst_9 {dimension_numbers = #tpu.dot_dimension_numbers<[1], [0], [0], [1], [0, 0, 1, 1], [], []>} : vector<16x288xf32>, vector<288x256xf32>, vector<16x256xf32> -> vector<16x256xf32>
    %20 = arith.mulf %0, %9 : vector<288x256xf32>
    %cst_10 = arith.constant dense<0.000000e+00> : vector<16x256xf32>
    %21 = tpu.matmul %16, %20, %cst_10 {dimension_numbers = #tpu.dot_dimension_numbers<[1], [0], [0], [1], [0, 0, 1, 1], [], []>} : vector<16x288xf32>, vector<288x256xf32>, vector<16x256xf32> -> vector<16x256xf32>
    %22 = arith.addf %19, %21 : vector<16x256xf32>
    %cst_11 = arith.constant 0.000000e+00 : f32
    %23 = vector.broadcast %cst_11 : f32 to vector<288x256xf32>
    %24 = arith.subf %23, %4 : vector<288x256xf32>
    %cst_12 = arith.constant 0.000000e+00 : f32
    %25 = vector.broadcast %cst_12 : f32 to vector<288x256xf32>
    %26 = arith.subf %25, %4 : vector<288x256xf32>
    %cst_13 = arith.constant dense<0xFF800000> : vector<256xf32>
    %27 = vector.multi_reduction <maximumf>, %26, %cst_13 [0] : vector<288x256xf32> to vector<256xf32>
    %28 = vector.shape_cast %27 : vector<256xf32> to vector<1x256xf32>
    %29 = vector.broadcast %28 : vector<1x256xf32> to vector<288x256xf32>
    %30 = arith.subf %24, %29 : vector<288x256xf32>
    %31 = math.exp %30 : vector<288x256xf32>
    %cst_14 = arith.constant 2.000000e+00 : f32
    %32 = vector.broadcast %cst_14 : f32 to vector<16x288xf32>
    %33 = arith.mulf %32, %2 : vector<16x288xf32>
    %cst_15 = arith.constant dense<0xFF800000> : vector<16xf32>
    %34 = vector.multi_reduction <maximumf>, %33, %cst_15 [1] : vector<16x288xf32> to vector<16xf32>
    %35 = vector.shape_cast %34 : vector<16xf32> to vector<16x1xf32>
    %36 = vector.broadcast %35 : vector<16x1xf32> to vector<16x288xf32>
    %37 = arith.subf %33, %36 : vector<16x288xf32>
    %38 = math.exp %37 : vector<16x288xf32>
    %cst_16 = arith.constant dense<0.000000e+00> : vector<16x256xf32>
    %39 = tpu.matmul %38, %31, %cst_16 {dimension_numbers = #tpu.dot_dimension_numbers<[1], [0], [0], [1], [0, 0, 1, 1], [], []>} : vector<16x288xf32>, vector<288x256xf32>, vector<16x256xf32> -> vector<16x256xf32>
    %40 = arith.mulf %2, %38 : vector<16x288xf32>
    %cst_17 = arith.constant dense<0.000000e+00> : vector<16x256xf32>
    %41 = tpu.matmul %40, %31, %cst_17 {dimension_numbers = #tpu.dot_dimension_numbers<[1], [0], [0], [1], [0, 0, 1, 1], [], []>} : vector<16x288xf32>, vector<288x256xf32>, vector<16x256xf32> -> vector<16x256xf32>
    %cst_18 = arith.constant 0.000000e+00 : f32
    %42 = vector.broadcast %cst_18 : f32 to vector<288x256xf32>
    %43 = arith.subf %42, %0 : vector<288x256xf32>
    %44 = arith.mulf %43, %31 : vector<288x256xf32>
    %cst_19 = arith.constant dense<0.000000e+00> : vector<16x256xf32>
    %45 = tpu.matmul %38, %44, %cst_19 {dimension_numbers = #tpu.dot_dimension_numbers<[1], [0], [0], [1], [0, 0, 1, 1], [], []>} : vector<16x288xf32>, vector<288x256xf32>, vector<16x256xf32> -> vector<16x256xf32>
    %46 = arith.addf %41, %45 : vector<16x256xf32>
    %47 = arith.divf %22, %17 : vector<16x256xf32>
    %48 = arith.divf %46, %39 : vector<16x256xf32>
    %49 = arith.addf %47, %48 : vector<16x256xf32>
    %c0_20 = arith.constant 0 : index
    %c0_21 = arith.constant 0 : index
    %50 = vector.load %arg4[%c0_20, %c0_21] : memref<16x1xf32, #tpu.memory_space<vmem>>, vector<16x1xf32>
    %51 = vector.broadcast %50 : vector<16x1xf32> to vector<16x256xf32>
    %52 = arith.addf %49, %51 : vector<16x256xf32>
    %cst_22 = arith.constant 0.000000e+00 : f32
    %53 = vector.broadcast %cst_22 : f32 to vector<16x256xf32>
    %54 = arith.maximumf %52, %53 : vector<16x256xf32>
    %c0_23 = arith.constant 0 : index
    %c0_24 = arith.constant 0 : index
    %55 = vector.load %arg5[%c0_23, %c0_24] : memref<16x256xf32, #tpu.memory_space<vmem>>, vector<16x256xf32>
    tpu.vector_store %arg5[%c0_23, %c0_24], %54 {strides = array<i32>} : memref<16x256xf32, #tpu.memory_space<vmem>>, vector<16x256xf32>,
    return
  }
  func.func @transform_0(%arg0: i32) -> (i32, i32) {
    %c0_i32 = arith.constant 0 : i32
    %c0_i32_0 = arith.constant 0 : i32
    return %c0_i32, %arg0 : i32, i32
  }
  func.func @transform_1(%arg0: i32) -> (i32, i32) {
    %c0_i32 = arith.constant 0 : i32
    %c0_i32_0 = arith.constant 0 : i32
    %c0_i32_1 = arith.constant 0 : i32
    return %c0_i32, %c0_i32_0 : i32, i32
  }
  func.func @transform_2(%arg0: i32) -> (i32, i32) {
    %c0_i32 = arith.constant 0 : i32
    %c0_i32_0 = arith.constant 0 : i32
    %c0_i32_1 = arith.constant 0 : i32
    return %c0_i32, %c0_i32_0 : i32, i32
  }
  func.func @transform_3(%arg0: i32) -> (i32, i32) {
    %c0_i32 = arith.constant 0 : i32
    %c0_i32_0 = arith.constant 0 : i32
    %c0_i32_1 = arith.constant 0 : i32
    return %c0_i32, %c0_i32_0 : i32, i32
  }
  func.func @transform_4(%arg0: i32) -> (i32, i32) {
    %c0_i32 = arith.constant 0 : i32
    %c0_i32_0 = arith.constant 0 : i32
    return %c0_i32, %arg0 : i32, i32
  }
}

module attributes {stable_mosaic.version = 11 : i64} {
  func.func @_linear_softmax_kernel(%arg0: i32, %arg1: memref<8x2304xf32, #tpu.memory_space<vmem>>, %arg2: memref<2304x128xf32, #tpu.memory_space<vmem>>, %arg3: memref<1x128xf32, #tpu.memory_space<vmem>>, %arg4: memref<8x128xf32, #tpu.memory_space<vmem>>) attributes {dimension_semantics = [#tpu.dimension_semantics<arbitrary>], iteration_bounds = array<i64: 1>, scalar_prefetch = 0 : i64, scratch_operands = 0 : i64, tpu.core_type = #tpu.core_type<tc>, window_params = [{pipeline_mode = #tpu.pipeline_mode<synchronous>, transform_indices = @transform_0, window_bounds = array<i64: 8, 2304>}, {pipeline_mode = #tpu.pipeline_mode<synchronous>, transform_indices = @transform_1, window_bounds = array<i64: 2304, 128>}, {pipeline_mode = #tpu.pipeline_mode<synchronous>, transform_indices = @transform_2, window_bounds = array<i64: 1, 128>}, {pipeline_mode = #tpu.pipeline_mode<synchronous>, transform_indices = @transform_3, window_bounds = array<i64: 8, 128>}]} {
    %c0 = arith.constant 0 : index
    %c0_0 = arith.constant 0 : index
    %0 = vector.load %arg1[%c0, %c0_0] : memref<8x2304xf32, #tpu.memory_space<vmem>>, vector<8x2304xf32>
    %c0_1 = arith.constant 0 : index
    %c0_2 = arith.constant 0 : index
    %1 = vector.load %arg2[%c0_1, %c0_2] : memref<2304x128xf32, #tpu.memory_space<vmem>>, vector<2304x128xf32>
    %cst = arith.constant dense<0.000000e+00> : vector<8x128xf32>
    %2 = tpu.matmul %0, %1, %cst {dimension_numbers = #tpu.dot_dimension_numbers<[1], [0], [0], [1], [0, 0, 1, 1], [], []>} : vector<8x2304xf32>, vector<2304x128xf32>, vector<8x128xf32> -> vector<8x128xf32>
    %c0_3 = arith.constant 0 : index
    %c0_4 = arith.constant 0 : index
    %3 = vector.load %arg3[%c0_3, %c0_4] : memref<1x128xf32, #tpu.memory_space<vmem>>, vector<1x128xf32>
    %4 = vector.broadcast %3 : vector<1x128xf32> to vector<8x128xf32>
    %5 = arith.addf %2, %4 : vector<8x128xf32>
    %cst_5 = arith.constant dense<0xFF800000> : vector<8xf32>
    %6 = vector.multi_reduction <maximumf>, %5, %cst_5 [1] : vector<8x128xf32> to vector<8xf32>
    %7 = vector.shape_cast %6 : vector<8xf32> to vector<8x1xf32>
    %8 = vector.broadcast %7 : vector<8x1xf32> to vector<8x128xf32>
    %9 = arith.subf %5, %8 : vector<8x128xf32>
    %10 = math.exp %9 : vector<8x128xf32>
    %cst_6 = arith.constant dense<0.000000e+00> : vector<8xf32>
    %11 = vector.multi_reduction <add>, %10, %cst_6 [1] : vector<8x128xf32> to vector<8xf32>
    %12 = vector.shape_cast %11 : vector<8xf32> to vector<8x1xf32>
    %13 = vector.broadcast %12 : vector<8x1xf32> to vector<8x128xf32>
    %14 = arith.divf %10, %13 : vector<8x128xf32>
    %c0_7 = arith.constant 0 : index
    %c0_8 = arith.constant 0 : index
    %15 = vector.load %arg4[%c0_7, %c0_8] : memref<8x128xf32, #tpu.memory_space<vmem>>, vector<8x128xf32>
    tpu.vector_store %arg4[%c0_7, %c0_8], %14 {strides = array<i32>} : memref<8x128xf32, #tpu.memory_space<vmem>>, vector<8x128xf32>,
    return
  }
  func.func @transform_0(%arg0: i32) -> (i32, i32) {
    %c0_i32 = arith.constant 0 : i32
    %c0_i32_0 = arith.constant 0 : i32
    %c0_i32_1 = arith.constant 0 : i32
    return %c0_i32, %c0_i32_0 : i32, i32
  }
  func.func @transform_1(%arg0: i32) -> (i32, i32) {
    %c0_i32 = arith.constant 0 : i32
    %c0_i32_0 = arith.constant 0 : i32
    %c0_i32_1 = arith.constant 0 : i32
    return %c0_i32, %c0_i32_0 : i32, i32
  }
  func.func @transform_2(%arg0: i32) -> (i32, i32) {
    %c0_i32 = arith.constant 0 : i32
    %c0_i32_0 = arith.constant 0 : i32
    %c0_i32_1 = arith.constant 0 : i32
    return %c0_i32, %c0_i32_0 : i32, i32
  }
  func.func @transform_3(%arg0: i32) -> (i32, i32) {
    %c0_i32 = arith.constant 0 : i32
    %c0_i32_0 = arith.constant 0 : i32
    %c0_i32_1 = arith.constant 0 : i32
    return %c0_i32, %c0_i32_0 : i32, i32
  }
}

</mosaic_0001>

<bundles_post_ra>
// kernel: _lambda_.3
= control target key start
LH: loop header
LB: loop body
LE: loop exit
PB: predicated region body
PF: predicated region fallthrough
CT: control target
= control target key end

     0   :  { %s1517_s15 = smov 0   ;;  %s1519_s16 = smov 0   ;;  %s1990_s0 = inlined_call_operand.vmem [shape: f32[36,512], index: 0, kind: input, shape index: {}]   ;;  %s1991_s1 = inlined_call_operand.vmem [shape: f32[32,36], index: 1, kind: input, shape index: {}]   ;;  %s1992_s2 = inlined_call_operand.vmem [shape: f32[32,36], index: 2, kind: input, shape index: {}]   ;;  %s1993_s3 = inlined_call_operand.vmem [shape: f32[32,1], index: 3, kind: input, shape index: {}]   ;;  %s1994_s4 = inlined_call_operand.vmem [shape: f32[32,512], index: 4, kind: output, shape index: {}]  }
   0x1   :  { %s1521_s17 = smov 0  }
   0x2 LB: > { %s1233_s18 = sadd.s32 4294967295, %s1488_s17   ;;  %s1534_s19 = sadd.s32 1, %s1488_s17   ;;  %s1488_s17 = sphi %s1521_s17, %s1998_s17   ;;  %s1484_s16 = sphi %s1519_s16, %s1997_s16   ;;  %s1480_s15 = sphi %s1517_s15, %s1996_s15  }
   0x3   : > { %s18_s20 = ssub.s32 %s1488_s17, %s1534_s19  ;;  %s21_s21 = sadd.s32 1, %s1484_s16 }
   0x4   : > { %p19_p0 = scmp.eq.s32.totalorder %s18_s20, 0  ;;  %p28_p1 = scmp.ne.s32.totalorder %s1484_s16, %s1480_s15 }
   0x5   : > { %p29_p2 = scmp.eq.s32.totalorder %s1488_s17, 0  ;;  %p121_p3 = scmp.eq.s32.totalorder %s1233_s18, 1 }
   0x6   : > { %s1545_s22 = scalar_select %p19_p0, %s1484_s16, %s21_s21  }
   0x7   : > { %p30_p4 = por %p29_p2, %p28_p1  ;;  %p1547_p5 = por %p121_p3, %p28_p1 }
   0x8   : > { %p1236_p6 = scmp.ge.s32.totalorder %s1488_s17, 2 }
   0xa   : > { %152 = sbr.rel (%p1236_p6) target bundleno = 26 (0x1a), region = 28 }
  0x11   : > { %155 = sbr.rel (!%p30_p4) target bundleno = 26 (0x1a), region = 32  ;;  %s157_s24 = sand.u32 (%p30_p4), 1, %s1484_s16  }
  0x12   : > { %s1282_s25 = sshll.u32 (%p30_p4), %s1488_s17, 4  ;;  %s1348_s26 = smul.u32 (%p30_p4), 80, %s157_s24 }
  0x13   : > { %s162_s29 = scalar_lea.vmem (%p30_p4), %s1990_s0, %s1282_s25 }
  0x14   : > { %v175_v0 = vld [vmem:[%s162_s29] sm:$0xff] (%p30_p4)  ;;  %v177_v1 = vld [vmem:[%s162_s29 + $0x8] sm:$0xff] (%p30_p4)  ;;  %s159_s30 = scalar_lea.vmem (%p30_p4), [#allocation2], %s1348_s26 }
  0x15   : > { %v179_v2 = vld [vmem:[%s162_s29 + $0x20] sm:$0xff] (%p30_p4)  ;;  %v181_v3 = vld [vmem:[%s162_s29 + $0x28] sm:$0xff] (%p30_p4)  ;;  %176 = vst [vmem:[%s159_s30] sm:$0xff] (%p30_p4), %v175_v0  ;;  %178 = vst [vmem:[%s159_s30 + $0x8] sm:$0xff] (%p30_p4), %v177_v1 }
  0x16   : > { %v183_v4 = vld [vmem:[%s162_s29 + $0x40] sm:$0xff] (%p30_p4)  ;;  %v185_v5 = vld [vmem:[%s162_s29 + $0x48] sm:$0xff] (%p30_p4)  ;;  %180 = vst [vmem:[%s159_s30 + $0x10] sm:$0xff] (%p30_p4), %v179_v2  ;;  %182 = vst [vmem:[%s159_s30 + $0x18] sm:$0xff] (%p30_p4), %v181_v3 }
  0x17   : > { %184 = vst [vmem:[%s159_s30 + $0x20] sm:$0xff] (%p30_p4), %v183_v4  ;;  %186 = vst [vmem:[%s159_s30 + $0x28] sm:$0xff] (%p30_p4), %v185_v5  ;;  %v187_v6 = vld [vmem:[%s162_s29 + $0x60] sm:$0xff] (%p30_p4)  ;;  %v189_v7 = vld [vmem:[%s162_s29 + $0x68] sm:$0xff] (%p30_p4) }
  0x18   : > { %v191_v8 = vld [vmem:[%s162_s29 + $0x80] sm:$0xff]  ;;  %188 = vst [vmem:[%s159_s30 + $0x30] sm:$0xff] %v187_v6  ;;  %190 = vst [vmem:[%s159_s30 + $0x38] sm:$0xff] %v189_v7  ;;  %v193_v9 = vld [vmem:[%s162_s29 + $0x88] sm:$0xff] }
  0x19   : > { %192 = vst [vmem:[%s159_s30 + $0x40] sm:$0xff] %v191_v8  ;;  %194 = vst [vmem:[%s159_s30 + $0x48] sm:$0xff] %v193_v9 }
  0x1a PF: > { %p1239_p7 = scmp.ge.s32.totalorder %s1488_s17, 1  ;;  %p199_p8 = scmp.lt.s32.totalorder %s1488_s17, 3 }
  0x1c   : > { %p200_p9 = pnand %p1239_p7, %p199_p8 }
  0x1d   : > { %v1562_v10 = vld [vmem:[%s1991_s1] sm:$0xff] (!%p200_p9)  ;;  %vm303_vm0 = vcmask (!%p200_p9), 293888   ;;  %v1567_v11 = vld [vmem:[%s1991_s1 + $0x8] sm:$0xff] (!%p200_p9)  ;;  %s206_s11 = sand.u32 (!%p200_p9), 1, %s1480_s15   ;;  %v1587_v16 = vld [vmem:[%s1991_s1 + $0x10] sm:$0xff] (!%p200_p9)  ;;  %vm252_vm1 = vcmask (!%p200_p9), 1043456  }
  0x1e   : > { %203 = sbr.rel (%p200_p9) target bundleno = 466 (0x1d2), region = 55  ;;  %v1572_v12 = vld [vmem:[%s1992_s2] sm:$0xff] (!%p200_p9)  ;;  %v304_v13 = vsel (!%p200_p9), %vm303_vm0, %v1562_v10, -inf  ;;  %v307_v14 = vsel (!%p200_p9), %vm303_vm0, %v1567_v11, -inf  ;;  %v1582_v15 = vld [vmem:[%s1992_s2 + $0x8] sm:$0xff] (!%p200_p9)  ;;  %v1592_v17 = vld [vmem:[%s1992_s2 + $0x10] sm:$0xff] (!%p200_p9) }
  0x1f   : > { %305 = vmax.xlane.f32.xlu0 (!%p200_p9), %v304_v13  ;;  %308 = vmax.xlane.f32.xlu1 (!%p200_p9), %v307_v14  ;;  %v1597_v18 = vld [vmem:[%s1991_s1 + $0x18] sm:$0xff] (!%p200_p9)  ;;  %s1349_s29 = smul.u32 (!%p200_p9), 80, %s206_s11  ;;  %v707_v20 = vsel (!%p200_p9), %vm303_vm0, %v1572_v12, -inf  ;;  %v710_v21 = vsel (!%p200_p9), %vm303_vm0, %v1582_v15, -inf  ;;  %v310_v22 = vsel (!%p200_p9), %vm303_vm0, %v1587_v16, -inf  ;;  %v713_v23 = vsel (!%p200_p9), %vm303_vm0, %v1592_v17, -inf }
  0x20   : > { %v1602_v19 = vld [vmem:[%s1992_s2 + $0x18] sm:$0xff] (!%p200_p9)  ;;  %v313_v24 = vsel (!%p200_p9), %vm303_vm0, %v1597_v18, -inf  ;;  %s1240_s14 = sshll.u32 (!%p200_p9), %s206_s11, 6 }
  0x21   : > { %v716_v25 = vsel (!%p200_p9), %vm303_vm0, %v1602_v19, -inf  ;;  %s208_s30 = scalar_lea.vmem (!%p200_p9), [#allocation2], %s1349_s29  ;;  %s1955_s15 = scalar_lea.vmem (!%p200_p9), [#allocation3], %s1240_s14 }
  0x22   : > { %v1618_v26 = vld [vmem:[%s208_s30 + $0x8] sm:$0xff] (!%p200_p9)  ;;  %v1620_v27 = vld [vmem:[%s208_s30 + $0x18] sm:$0xff] (!%p200_p9)  ;;  %v1630_v32 = vld [vmem:[%s208_s30] sm:$0xff] (!%p200_p9) }
  0x23   : > { %v1622_v28 = vld [vmem:[%s208_s30 + $0x28] sm:$0xff] (!%p200_p9)  ;;  %708 = vmax.xlane.f32.xlu0 (!%p200_p9), %v707_v20  ;;  %711 = vmax.xlane.f32.xlu1 (!%p200_p9), %v710_v21  ;;  %v1624_v29 = vld [vmem:[%s208_s30 + $0x38] sm:$0xff] (!%p200_p9)  ;;  %v1633_v33 = vsub.f32 (!%p200_p9), 0.0, %v1618_v26  ;;  %v1636_v34 = vsub.f32 (!%p200_p9), 0.0, %v1620_v27  ;;  %v1642_v37 = vld [vmem:[%s208_s30 + $0x10] sm:$0xff] (!%p200_p9)  ;;  %v1670_v50 = vsub.f32 (!%p200_p9), 0.0, %v1630_v32 }
  0x24   : > { %v1626_v30 = vld [vmem:[%s208_s30 + $0x48] sm:$0xf] (!%p200_p9)  ;;  %v262_v31 = vmax.f32 (!%p200_p9), %v1618_v26, %v1622_v28  ;;  %v263_v35 = vmax.f32 (!%p200_p9), %v1620_v27, %v1624_v29  ;;  %v1644_v38 = vld [vmem:[%s208_s30 + $0x20] sm:$0xff] (!%p200_p9)  ;;  %v1646_v39 = vld [vmem:[%s208_s30 + $0x30] sm:$0xff] (!%p200_p9)  ;;  %v1649_v40 = vsub.f32 (!%p200_p9), 0.0, %v1622_v28  ;;  %v1652_v41 = vsub.f32 (!%p200_p9), 0.0, %v1624_v29 }
  0x25   : > { %v264_v36 = vsel %vm252_vm1, %v1626_v30, -inf  ;;  %v1654_v43 = vld [vmem:[%s208_s30 + $0x40] sm:$0xf]  ;;  %v250_v44 = vmax.f32 %v1630_v32, %v1644_v38  ;;  %v251_v45 = vmax.f32 %v1642_v37, %v1646_v39  ;;  %v1661_v46 = vsub.f32 0.0, %v1626_v30  ;;  %s1283_s11 = sshll.u32 (%p1547_p5), %s1233_s18, 4 }
  0x26   : > { %v265_v42 = vmax.f32 %v262_v31, %v264_v36  ;;  %v253_v47 = vsel %vm252_vm1, %v1654_v43, -inf  ;;  %v666_v48 = vmax.f32 %v1633_v33, %v1649_v40  ;;  %v667_v49 = vmax.f32 %v1636_v34, %v1652_v41  ;;  %s1145_s24 = scalar_lea.vmem (%p1547_p5), %s1994_s4, %s1283_s11 }
  0x27   : > { %311 = vmax.xlane.f32.xlu0 %v310_v22  ;;  %714 = vmax.xlane.f32.xlu1 %v713_v23  ;;  %v254_v52 = vmax.f32 %v250_v44, %v253_v47  ;;  %v668_v53 = vsel %vm252_vm1, %v1661_v46, -inf  ;;  %v1675_v54 = vsub.f32 0.0, %v1642_v37  ;;  %v1678_v56 = vsub.f32 0.0, %v1644_v38 }
  0x28   : > { %v266_v51 = vmax.f32 %v265_v42, %v263_v35  ;;  %v669_v55 = vmax.f32 %v666_v48, %v668_v53  ;;  %v1681_v57 = vsub.f32 0.0, %v1646_v39  ;;  %v1684_v58 = vsub.f32 0.0, %v1654_v43 }
  0x29   : > { %v255_v60 = vmax.f32 %v254_v52, %v251_v45  ;;  %v655_v62 = vmax.f32 %v1670_v50, %v1678_v56 }
  0x2a   : > { %v267_v59 = vrot.slane %v266_v51, 4  ;;  %v670_v61 = vmax.f32 %v669_v55, %v667_v49  ;;  %v656_v63 = vmax.f32 %v1675_v54, %v1681_v57  ;;  %v657_v0 = vsel %vm252_vm1, %v1684_v58, -inf }
  0x2b   : > { %314 = vmax.xlane.f32.xlu0 %v313_v24  ;;  %717 = vmax.xlane.f32.xlu1 %v716_v25  ;;  %v256_v2 = vrot.slane %v255_v60, 4  ;;  %v658_v4 = vmax.f32 %v655_v62, %v657_v0 }
  0x2c   : > { %v268_v1 = vmax.f32 %v266_v51, %v267_v59  ;;  %v671_v3 = vrot.slane %v670_v61, 4 }
  0x2d   : > { %v257_v6 = vmax.f32 %v255_v60, %v256_v2  ;;  %v659_v8 = vmax.f32 %v658_v4, %v656_v63 }
  0x2e   : > { %v269_v5 = vrot.slane %v268_v1, 2  ;;  %v672_v7 = vmax.f32 %v670_v61, %v671_v3 }
  0x2f   : > { %v258_v13 = vrot.slane %v257_v6, 2  ;;  %v660_v20 = vrot.slane %v659_v8, 4 }
  0x30   : > { %v270_v9 = vmax.f32 %v268_v1, %v269_v5  ;;  %v673_v14 = vrot.slane %v672_v7, 2 }
  0x31   : > { %v259_v22 = vmax.f32 %v257_v6, %v258_v13  ;;  %v661_v31 = vmax.f32 %v659_v8, %v660_v20  ;;  %v1490_v8 = vmov 0.0  }
  0x32   : > { %v271_v21 = vrot.slane %v270_v9, 1  ;;  %v674_v23 = vmax.f32 %v672_v7, %v673_v14  ;;  %410 = vmatprep.mubr.f32.mxu1 %v1490_v8  ;;  %813 = vmatprep.mubr.f32.mxu0 %v1490_v8 }
  0x33   : > { %v260_v36 = vrot.slane %v259_v22, 1  ;;  %v662_v25 = vrot.slane %v661_v31, 2 }
  0x34   : > { %v272_v35 = vmax.f32 %v270_v9, %v271_v21  ;;  %v675_v24 = vrot.slane %v674_v23, 1 }
  0x35   : > { %v261_v45 = vmax.f32 %v259_v22, %v260_v36  ;;  %v663_v59 = vmax.f32 %v661_v31, %v662_v25 }
  0x36   : > { %v274_v42 = vsub.f32 %v1618_v26, %v272_v35  ;;  %v276_v44 = vsub.f32 %v1620_v27, %v272_v35  ;;  %v1694_v47 = vmax.f32 %v674_v23, %v675_v24  ;;  %v282_v60 = vsub.f32 %v1626_v30, %v272_v35 }
  0x37   : > { %v273_v51 = vsub.f32 %v1630_v32, %v261_v45  ;;  %v275_v52 = vsub.f32 %v1642_v37, %v261_v45  ;;  %v278_v63 = vsub.f32 %v1622_v28, %v272_v35  ;;  %v280_v1 = vsub.f32 %v1624_v29, %v272_v35 }
  0x38   : > { %v285_v48 = vmul.f32 1.442695, %v274_v42  ;;  %v289_v49 = vmul.f32 1.442695, %v276_v44  ;;  %v678_v53 = vsub.f32 %v1633_v33, %v1694_v47  ;;  %v680_v55 = vsub.f32 %v1636_v34, %v1694_v47 }
  0x39   : > { %v283_v61 = vmul.f32 1.442695, %v273_v51  ;;  %v287_v62 = vmul.f32 1.442695, %v275_v52  ;;  %v664_v3 = vrot.slane %v663_v59, 1  ;;  %v281_v5 = vsub.f32 %v1654_v43, %v261_v45 }
  0x3a   : > { %1378 = vpow2.f32 %v285_v48  ;;  %v689_v0 = vmul.f32 1.442695, %v678_v53  ;;  %v693_v2 = vmul.f32 1.442695, %v680_v55  ;;  %v301_v4 = vmul.f32 1.442695, %v282_v60 }
  0x3b   : > { %1380 = vpow2.f32 %v289_v49  ;;  %v293_v6 = vmul.f32 1.442695, %v278_v63  ;;  %v665_v7 = vmax.f32 %v663_v59, %v664_v3  ;;  %v297_v9 = vmul.f32 1.442695, %v280_v1 }
  0x3c   : > { %1382 = vpow2.f32 %v283_v61  ;;  %v277_v13 = vsub.f32 %v1644_v38, %v261_v45  ;;  %v279_v21 = vsub.f32 %v1646_v39, %v261_v45  ;;  %v299_v22 = vmul.f32 1.442695, %v281_v5 }
  0x3d   : > { %1384 = vpow2.f32 %v287_v62  ;;  %v677_v14 = vsub.f32 %v1670_v50, %v665_v7  ;;  %v679_v20 = vsub.f32 %v1675_v54, %v665_v7  ;;  %v682_v23 = vsub.f32 %v1649_v40, %v1694_v47 }
  0x3e   : > { %1386 = vpow2.f32 %v689_v0  ;;  %v684_v36 = vsub.f32 %v1652_v41, %v1694_v47  ;;  %v291_v25 = vmul.f32 1.442695, %v277_v13  ;;  %v681_v42 = vsub.f32 %v1678_v56, %v665_v7 }
  0x3f   : > { %1388 = vpow2.f32 %v693_v2  ;;  %v687_v31 = vmul.f32 1.442695, %v677_v14  ;;  %v691_v35 = vmul.f32 1.442695, %v679_v20  ;;  %v295_v48 = vmul.f32 1.442695, %v279_v21 }
  0x40   : > { %1390 = vpow2.f32 %v301_v4  ;;  %v683_v45 = vsub.f32 %v1681_v57, %v665_v7  ;;  %v686_v51 = vsub.f32 %v1661_v46, %v1694_v47  ;;  %v697_v52 = vmul.f32 1.442695, %v682_v23 }
  0x41   : > { %1392 = vpow2.f32 %v293_v6  ;;  %v701_v55 = vmul.f32 1.442695, %v684_v36  ;;  %v685_v60 = vsub.f32 %v1684_v58, %v665_v7  ;;  %v695_v61 = vmul.f32 1.442695, %v681_v42 }
  0x42   : > { %1394 = vpow2.f32 %v297_v9  ;;  %v699_v0 = vmul.f32 1.442695, %v683_v45  ;;  %v705_v2 = vmul.f32 1.442695, %v686_v51 }
  0x43   : > { %1396 = vpow2.f32 %v687_v31  ;;  %v703_v7 = vmul.f32 1.442695, %v685_v60 }
  0x44   : > { %v1379_v24 = vpop.eup %1378  ;;  %1398 = vpow2.f32 %v691_v35 }
  0x45   : > { %v1381_v44 = vpop.eup %1380  ;;  %1400 = vpow2.f32 %v299_v22 }
  0x46   : > { %v1718_v49 = vpack.c.bf16 %v1381_v44, %v1379_v24  ;;  %v1383_v53 = vpop.eup %1382  ;;  %1402 = vpow2.f32 %v291_v25  ;;  %v442_v25 = vmul.f32 %v1381_v44, %v1620_v27 }
  0x47   : > { %v1385_v59 = vpop.eup %1384  ;;  %v1725_v62 = vmul.f32 %v1383_v53, %v1630_v32  ;;  %1404 = vpow2.f32 %v295_v48 }
  0x48   : > { %1285 = vmatprep.subr.bf16.mxu1 %v1718_v49  ;;  %v1727_v63 = vpack.c.bf16 %v1385_v59, %v1383_v53  ;;  %v1730_v47 = vmul.f32 %v1385_v59, %v1642_v37  ;;  %v1387_v1 = vpop.eup %1386  ;;  %1406 = vpow2.f32 %v697_v52 }
  0x49   : > { %v1389_v3 = vpop.eup %1388  ;;  %1408 = vpow2.f32 %v701_v55  ;;  %v843_v44 = vmul.f32 %v1387_v1, %v1633_v33 }
  0x4a   : > { %1287 = vmatpush1.bf16.msra.mxu1 %v1727_v63  ;;  %v1294_v4 = vpack.c.bf16 %v1730_v47, %v1725_v62  ;;  %v1735_v5 = vpop.eup %1390  ;;  %v1737_v32 = vpack.c.bf16 %v1389_v3, %v1387_v1  ;;  %1410 = vpow2.f32 %v695_v61  ;;  %v1088_v1 = vld [vmem:[%s1993_s3] sm:$0xff] }
  0x4b   : > { %v1393_v6 = vpop.eup %1392  ;;  %1412 = vpow2.f32 %v699_v0  ;;  %v448_v62 = vmul.f32 %v1735_v5, %v1626_v30 }
  0x4c   : > { %v1395_v37 = vpop.eup %1394  ;;  %1414 = vpow2.f32 %v705_v2  ;;  %1309 = vmatprep.subr.bf16.mxu0 %v1737_v32  ;;  %v1741_v9 = vmul.f32 %v1393_v6, %v1622_v28  ;;  %v1491_v2 = vmov 0  }
  0x4d   : > { %v1397_v13 = vpop.eup %1396  ;;  %v1743_v14 = vpack.c.bf16 %v1395_v37, %v1393_v6  ;;  %v1746_v20 = vmul.f32 %v1395_v37, %v1624_v29  ;;  %1416 = vpow2.f32 %v703_v7  ;;  %1377 = vset.pattern.permute.xlu1 %v1491_v2  ;;  %1376 = vset.pattern.permute.xlu0 %v1491_v2  ;;  %v1091_v6 = vld [vmem:[%s1993_s3 + $0x18] sm:$0xff] }
  0x4e   : > { %v1399_v21 = vpop.eup %1398  ;;  %v1749_v22 = vmul.f32 %v1397_v13, %v1670_v50  ;;  %v440_v50 = vmul.f32 %v1379_v24, %v1618_v26  ;;  %1094 = vperm.xlu0 %1376, %v1088_v1  }
  0x4f   : > { %v1751_v23 = vpop.eup %1400  ;;  %1289 = vmatprep.subr.bf16.mxu1 %v1743_v14  ;;  %v1754_v31 = vpack.c.bf16 %v1399_v21, %v1397_v13  ;;  %v1757_v28 = vmul.f32 %v1399_v21, %v1675_v54  ;;  %v1296_v35 = vpack.c.bf16 %v1746_v20, %v1741_v9 }
  0x50   : > { %v1403_v36 = vpop.eup %1402  ;;  %v447_v9 = vmul.f32 %v1751_v23, %v1654_v43 }
  0x51   : > { %v1405_v29 = vpop.eup %1404  ;;  %1311 = vmatpush1.bf16.msra.mxu0 %v1754_v31  ;;  %v1318_v42 = vpack.c.bf16 %v1757_v28, %v1749_v22  ;;  %v1767_v48 = vmul.f32 %v1403_v36, %v1644_v38 }
  0x52   : > { %v1407_v45 = vpop.eup %1406  ;;  %v1769_v54 = vpack.c.bf16 %v1405_v29, %v1403_v36  ;;  %v1772_v51 = vmul.f32 %v1405_v29, %v1646_v39  ;;  %v1292_v39 = vpack.c.bf16 %v442_v25, %v440_v50 }
  0x53   : > { %v1409_v52 = vpop.eup %1408  ;;  %v1775_v53 = vmul.f32 %v1407_v45, %v1649_v40  ;;  %v845_v40 = vmul.f32 %v1389_v3, %v1636_v34  ;;  %v1090_v3 = vld [vmem:[%s1993_s3 + $0x10] sm:$0xff] }
  0x54   : > { %v1411_v55 = vpop.eup %1410  ;;  %1291 = vmatpush1.bf16.msra.mxu1 %v1769_v54  ;;  %v1778_v26 = vpack.c.bf16 %v1409_v52, %v1407_v45  ;;  %v1781_v27 = vmul.f32 %v1409_v52, %v1652_v41  ;;  %v1298_v38 = vpack.c.bf16 %v1772_v51, %v1767_v48 }
  0x55   : > { %v1413_v24 = vpop.eup %1412  ;;  %1241 = vmatprep.subr.msk.mxu1 %vm252_vm1, %v1735_v5  ;;  %v1790_v59 = vmul.f32 %v1411_v55, %v1678_v56  ;;  %v1316_v56 = vpack.c.bf16 %v845_v40, %v843_v44 }
  0x56   : > { %v1792_v60 = vpop.eup %1414  ;;  %1313 = vmatprep.subr.bf16.mxu0 %v1778_v26  ;;  %v1795_v41 = vpack.c.bf16 %v1413_v24, %v1411_v55  ;;  %v1320_v61 = vpack.c.bf16 %v1781_v27, %v1775_v53  ;;  %v1800_v0 = vmul.f32 %v1413_v24, %v1681_v57  ;;  %v1089_v57 = vld [vmem:[%s1993_s3 + $0x8] sm:$0xff] }
  0x57   : > { %v1807_v34 = vpop.eup %1416  ;;  %1099 = vperm.xlu1 %1377, %v1089_v57  }
  0x58   : > { %1315 = vmatpush1.bf16.msra.mxu0 %v1795_v41  ;;  %1242 = vmatpush1.msk.msra.mxu1 %vm252_vm1, %v1751_v23  ;;  %v1322_v33 = vpack.c.bf16 %v1800_v0, %v1790_v59  ;;  %v850_v30 = vmul.f32 %v1807_v34, %v1684_v58 }
  0x59   : > { %1259 = vmatprep.subr.msk.mxu0 %vm252_vm1, %v1792_v60  ;;  %1293 = vmatprep.subr.bf16.mxu1 %v1292_v39 }
  0x5b   : > { %1104 = vperm.xlu1 %1377, %v1090_v3  }
  0x5c   : > { %1260 = vmatpush1.msk.msra.mxu0 %vm252_vm1, %v1807_v34 }
  0x5d   : > { %1317 = vmatprep.subr.bf16.mxu0 %v1316_v56 }
  0x5f   : > { %1109 = vperm.xlu1 %1377, %v1091_v6  }
  0xac   : > { %v306_v7 = vpop.xlane.xlu0 %305  ;;  %v309_v37 = vpop.xlane.xlu1 %308 }
  0xad   : > { %v316_v13 = vsub.f32 %v1562_v10, %v306_v7  ;;  %v317_v21 = vsub.f32 %v1567_v11, %v309_v37 }
  0xaf   : > { %v320_v36 = vmul.f32 1.442695, %v316_v13  ;;  %v322_v29 = vmul.f32 1.442695, %v317_v21 }
  0xb0   : > { %v709_v50 = vpop.xlane.xlu0 %708  ;;  %v712_v25 = vpop.xlane.xlu1 %711 }
  0xb1   : > { %1418 = vpow2.f32 %v320_v36  ;;  %v719_v45 = vsub.f32 %v1572_v12, %v709_v50  ;;  %v720_v52 = vsub.f32 %v1582_v15, %v712_v25 }
  0xb2   : > { %1420 = vpow2.f32 %v322_v29 }
  0xb3   : > { %v723_v55 = vmul.f32 1.442695, %v719_v45  ;;  %v725_v24 = vmul.f32 1.442695, %v720_v52 }
  0xb4   : > { %v312_v39 = vpop.xlane.xlu0 %311  ;;  %v715_v44 = vpop.xlane.xlu1 %714 }
  0xb5   : > { %1422 = vpow2.f32 %v723_v55  ;;  %v318_v40 = vsub.f32 %v1587_v16, %v312_v39  ;;  %v721_v56 = vsub.f32 %v1592_v17, %v715_v44 }
  0xb6   : > { %1424 = vpow2.f32 %v725_v24 }
  0xb7   : > { %v324_v57 = vmul.f32 1.442695, %v318_v40  ;;  %v727_v1 = vmul.f32 1.442695, %v721_v56 }
  0xb8   : > { %v315_v2 = vpop.xlane.xlu0 %314  ;;  %v718_v3 = vpop.xlane.xlu1 %717 }
  0xb9   : > { %1426 = vpow2.f32 %v324_v57  ;;  %v319_v6 = vsub.f32 %v1597_v18, %v315_v2  ;;  %v722_v7 = vsub.f32 %v1602_v19, %v718_v3 }
  0xba   : > { %1428 = vpow2.f32 %v727_v1 }
  0xbb   : > { %v1833_v37 = vpop.eup %1418  ;;  %v326_v13 = vmul.f32 1.442695, %v319_v6  ;;  %v729_v21 = vmul.f32 1.442695, %v722_v7 }
  0xbc   : > { %1243 = vmatmul.mubr.msk.f32.vlgmr.msra.gmra.mrb[0].mxu1 %vm303_vm0, %v1833_v37  ;;  %v1837_v36 = vpop.eup %1420  ;;  %v435_v58 = vmul.f32 %v1833_v37, %v1562_v10 }
  0xbd   : > { %1430 = vpow2.f32 %v326_v13  ;;  %416 = vmatprep.mubr.f32.mxu1 %v1490_v8  ;;  %1295 = vmatpush1.bf16.msra.mxu1 %v1294_v4  ;;  %v851_v4 = vmul.f32 %v1792_v60, %v1661_v46 }
  0xbe   : > { %1297 = vmatprep.subr.bf16.mxu1 %v1296_v35  ;;  %1432 = vpow2.f32 %v729_v21 }
  0xbf   : > { %v1846_v29 = vpop.eup %1422 }
  0xc0   : > { %1244 = vmatmul.mubr.msk.f32.gmra.mrb[2].mxu1 %vm303_vm0, %v1837_v36  ;;  %1261 = vmatmul.mubr.msk.f32.vlgmr.msra.gmra.mrb[0].mxu0 %vm303_vm0, %v1846_v29  ;;  %v1852_v50 = vpop.eup %1424 }
  0xc1   : > { %1319 = vmatpush1.bf16.msra.mxu0 %v1318_v42  ;;  %422 = vmatprep.mubr.f32.mxu1 %v1490_v8 }
  0xc2   : > { %819 = vmatprep.mubr.f32.mxu0 %v1490_v8  ;;  %1321 = vmatprep.subr.bf16.mxu0 %v1320_v61 }
  0xc3   : > { %v1427_v47 = vpop.eup %1426  ;;  %1299 = vmatpush1.bf16.msra.mxu1 %v1298_v38 }
  0xc4   : > { %1245 = vmatmul.mubr.msk.f32.gmra.mrb[4].mxu1 %vm303_vm0, %v1427_v47  ;;  %1262 = vmatmul.mubr.msk.f32.gmra.mrb[2].mxu0 %vm303_vm0, %v1852_v50  ;;  %v1429_v20 = vpop.eup %1428  ;;  %v437_v10 = vmul.f32 %v1427_v47, %v1587_v16 }
  0xc5   : > { %1323 = vmatpush1.bf16.msra.mxu0 %v1322_v33  ;;  %428 = vmatprep.mubr.f32.mxu1 %v1490_v8 }
  0xc6   : > { %825 = vmatprep.mubr.f32.mxu0 %v1490_v8  ;;  %1247 = vmatprep.subr.msk.mxu1 %vm252_vm1, %v448_v62 }
  0xc7   : > { %v1431_v43 = vpop.eup %1430  ;;  %1265 = vmatprep.subr.msk.mxu0 %vm252_vm1, %v851_v4  ;;  %1248 = vmatpush1.msk.msra.mxu1 %vm252_vm1, %v447_v9 }
  0xc8   : > { %1246 = vmatmul.mubr.msk.f32.gmra.mrb[6].mxu1 %vm303_vm0, %v1431_v43  ;;  %1263 = vmatmul.mubr.msk.f32.gmra.mrb[4].mxu0 %vm303_vm0, %v1429_v20  ;;  %v1433_v46 = vpop.eup %1432 }
  0xc9   : > { %519 = vmatprep.mubr.f32.mxu1 %v1490_v8  ;;  %831 = vmatprep.mubr.f32.mxu0 %v1490_v8 }
  0xca   : > { %1266 = vmatpush1.msk.msra.mxu0 %vm252_vm1, %v850_v30  ;;  %1301 = vmatprep.subr.bf16.mxu1 %v1718_v49  ;;  %v436_v49 = vmul.f32 %v1837_v36, %v1567_v11  ;;  %v438_v11 = vmul.f32 %v1431_v43, %v1597_v18 }
  0xcb   : > { %1325 = vmatprep.subr.bf16.mxu0 %v1737_v32 }
  0xcc   : > { %1249 = vmatmul.mubr.msk.f32.vlgmr.msra.gmra.mrb[8].mxu1 %vm303_vm0, %v1833_v37  ;;  %1264 = vmatmul.mubr.msk.f32.gmra.mrb[6].mxu0 %vm303_vm0, %v1433_v46 }
  0xcd   : > { %525 = vmatprep.mubr.f32.mxu1 %v1490_v8  ;;  %922 = vmatprep.mubr.f32.mxu0 %v1490_v8  ;;  %v1095_v56 = vpop.permute.xlu0 %1094 }
  0xce   : > { %1303 = vmatpush1.bf16.msra.mxu1 %v1727_v63  ;;  %v838_v63 = vmul.f32 %v1846_v29, %v1572_v12  ;;  %v840_v12 = vmul.f32 %v1429_v20, %v1592_v17 }
  0xcf   : > { %1305 = vmatprep.subr.bf16.mxu1 %v1743_v14 }
  0xd0   : > { %1250 = vmatmul.mubr.msk.f32.gmra.mrb[10].mxu1 %vm303_vm0, %v1837_v36  ;;  %1267 = vmatmul.mubr.msk.f32.vlgmr.msra.gmra.mrb[8].mxu0 %vm303_vm0, %v1846_v29 }
  0xd1   : > { %1327 = vmatpush1.bf16.msra.mxu0 %v1754_v31  ;;  %531 = vmatprep.mubr.f32.mxu1 %v1490_v8 }
  0xd2   : > { %928 = vmatprep.mubr.f32.mxu0 %v1490_v8  ;;  %1329 = vmatprep.subr.bf16.mxu0 %v1778_v26 }
  0xd3   : > { %1307 = vmatpush1.bf16.msra.mxu1 %v1769_v54 }
  0xd4   : > { %1251 = vmatmul.mubr.msk.f32.gmra.mrb[12].mxu1 %vm303_vm0, %v1427_v47  ;;  %1268 = vmatmul.mubr.msk.f32.gmra.mrb[10].mxu0 %vm303_vm0, %v1852_v50 }
  0xd5   : > { %1331 = vmatpush1.bf16.msra.mxu0 %v1795_v41  ;;  %537 = vmatprep.mubr.f32.mxu1 %v1490_v8 }
  0xd6   : > { %934 = vmatprep.mubr.f32.mxu0 %v1490_v8  ;;  %1253 = vmatprep.subr.msk.mxu1 %vm252_vm1, %v1735_v5  ;;  %v839_v5 = vmul.f32 %v1852_v50, %v1582_v15  ;;  %v841_v15 = vmul.f32 %v1433_v46, %v1602_v19  ;;  %v1100_v1 = vpop.permute.xlu1 %1099 }
  0xd7   : > { %1271 = vmatprep.subr.msk.mxu0 %vm252_vm1, %v1792_v60  ;;  %1254 = vmatpush1.msk.msra.mxu1 %vm252_vm1, %v1751_v23 }
  0xd8   : > { %1252 = vmatmul.mubr.msk.f32.gmra.mrb[14].mxu1 %vm303_vm0, %v1431_v43  ;;  %1269 = vmatmul.mubr.msk.f32.gmra.mrb[12].mxu0 %vm303_vm0, %v1429_v20 }
  0xd9   : > { %620 = vmatprep.mubr.f32.mxu1 %v1490_v8  ;;  %940 = vmatprep.mubr.f32.mxu0 %v1490_v8 }
  0xda   : > { %1272 = vmatpush1.msk.msra.mxu0 %vm252_vm1, %v1807_v34 }
  0xdc   : > { %1255 = vmatmul.mubr.msk.f32.vlgmr.msra.gmra.mrb[8].mxu1 %vm303_vm0, %v435_v58  ;;  %1270 = vmatmul.mubr.msk.f32.gmra.mrb[14].mxu0 %vm303_vm0, %v1433_v46 }
  0xdd   : > { %626 = vmatprep.mubr.f32.mxu1 %v1490_v8  ;;  %1023 = vmatprep.mubr.f32.mxu0 %v1490_v8 }
  0xe0   : > { %1256 = vmatmul.mubr.msk.f32.gmra.mrb[10].mxu1 %vm303_vm0, %v436_v49  ;;  %1273 = vmatmul.mubr.msk.f32.vlgmr.msra.gmra.mrb[8].mxu0 %vm303_vm0, %v838_v63 }
  0xe1   : > { %632 = vmatprep.mubr.f32.mxu1 %v1490_v8  ;;  %1029 = vmatprep.mubr.f32.mxu0 %v1490_v8 }
  0xe4   : > { %1257 = vmatmul.mubr.msk.f32.gmra.mrb[12].mxu1 %vm303_vm0, %v437_v10  ;;  %1274 = vmatmul.mubr.msk.f32.gmra.mrb[10].mxu0 %vm303_vm0, %v839_v5 }
  0xe5   : > { %638 = vmatprep.mubr.f32.mxu1 %v1490_v8  ;;  %1035 = vmatprep.mubr.f32.mxu0 %v1490_v8 }
  0xe8   : > { %1258 = vmatmul.mubr.msk.f32.gmra.mrb[14].mxu1 %vm303_vm0, %v438_v11  ;;  %1275 = vmatmul.mubr.msk.f32.gmra.mrb[12].mxu0 %vm303_vm0, %v840_v12 }
  0xe9   : > { %1041 = vmatprep.mubr.f32.mxu0 %v1490_v8 }
  0xec   : > { %1276 = vmatmul.mubr.msk.f32.gmra.mrb[14].mxu0 %vm303_vm0, %v841_v15 }
 0x18f   : > { %v412_v16 = vpop.f32.mrb[0].mxu1 }
 0x190   : > { %v414_v32 = vpop.f32.mrb[1].mxu1  ;;  %1434 = vrcp.f32 %v412_v16 }
 0x191   : > { %1436 = vrcp.f32 %v414_v32 }
 0x193   : > { %v418_v14 = vpop.f32.mrb[2].mxu1  ;;  %v815_v22 = vpop.f32.mrb[0].mxu0 }
 0x194   : > { %v420_v23 = vpop.f32.mrb[3].mxu1  ;;  %v817_v31 = vpop.f32.mrb[1].mxu0  ;;  %1438 = vrcp.f32 %v418_v14 }
 0x195   : > { %1440 = vrcp.f32 %v815_v22  ;;  %v1105_v22 = vpop.permute.xlu1 %1104 }
 0x196   : > { %1442 = vrcp.f32 %v420_v23 }
 0x197   : > { %v821_v28 = vpop.f32.mrb[2].mxu0  ;;  %v424_v18 = vpop.f32.mrb[4].mxu1  ;;  %1444 = vrcp.f32 %v817_v31 }
 0x198   : > { %v823_v35 = vpop.f32.mrb[3].mxu0  ;;  %v426_v17 = vpop.f32.mrb[5].mxu1  ;;  %1446 = vrcp.f32 %v821_v28 }
 0x199   : > { %1448 = vrcp.f32 %v823_v35 }
 0x19a   : > { %1450 = vrcp.f32 %v424_v18  ;;  %v1435_v19 = vpop.eup %1434 }
 0x19b   : > { %v827_v42 = vpop.f32.mrb[4].mxu0  ;;  %v430_v48 = vpop.f32.mrb[6].mxu1  ;;  %1452 = vrcp.f32 %v426_v17 }
 0x19c   : > { %v829_v54 = vpop.f32.mrb[5].mxu0  ;;  %v432_v51 = vpop.f32.mrb[7].mxu1  ;;  %1454 = vrcp.f32 %v827_v42 }
 0x19d   : > { %v1437_v27 = vpop.eup %1436  ;;  %1456 = vrcp.f32 %v829_v54 }
 0x19e   : > { %v1439_v60 = vpop.eup %1438  ;;  %1458 = vrcp.f32 %v430_v48 }
 0x19f   : > { %v833_v53 = vpop.f32.mrb[6].mxu0  ;;  %v1441_v61 = vpop.eup %1440  ;;  %1460 = vrcp.f32 %v432_v51 }
 0x1a0   : > { %v835_v8 = vpop.f32.mrb[7].mxu0  ;;  %v1443_v0 = vpop.eup %1442  ;;  %1462 = vrcp.f32 %v833_v53 }
 0x1a1   : > { %v1445_v25 = vpop.eup %1444  ;;  %1464 = vrcp.f32 %v835_v8 }
 0x1a2   : > { %v1447_v39 = vpop.eup %1446 }
 0x1a3   : > { %v1449_v57 = vpop.eup %1448 }
 0x1a4   : > { %v1451_v3 = vpop.eup %1450 }
 0x1a5   : > { %v1453_v13 = vpop.eup %1452 }
 0x1a6   : > { %v1455_v47 = vpop.eup %1454 }
 0x1a7   : > { %v1457_v30 = vpop.eup %1456 }
 0x1a8   : > { %v1459_v58 = vpop.eup %1458 }
 0x1a9   : > { %v1461_v11 = vpop.eup %1460 }
 0x1aa   : > { %v1463_v17 = vpop.eup %1462 }
 0x1ab   : > { %v1465_v51 = vpop.eup %1464 }
 0x1af   : > { %v622_v26 = vpop.f32.mrb[8].mxu1 }
 0x1b0   : > { %v1049_v38 = vmul.f32 %v1435_v19, %v622_v26  ;;  %v624_v59 = vpop.f32.mrb[9].mxu1 }
 0x1b1   : > { %v1051_v41 = vmul.f32 %v1437_v27, %v624_v59 }
 0x1b3   : > { %v628_v33 = vpop.f32.mrb[10].mxu1  ;;  %v1025_v34 = vpop.f32.mrb[8].mxu0 }
 0x1b4   : > { %v1053_v45 = vmul.f32 %v1439_v60, %v628_v33  ;;  %v1065_v52 = vmul.f32 %v1441_v61, %v1025_v34  ;;  %v630_v55 = vpop.f32.mrb[11].mxu1  ;;  %v1027_v24 = vpop.f32.mrb[9].mxu0 }
 0x1b5   : > { %v1055_v44 = vmul.f32 %v1443_v0, %v630_v55  ;;  %v1067_v40 = vmul.f32 %v1445_v25, %v1027_v24  ;;  %v1110_v60 = vpop.permute.xlu1 %1109 }
 0x1b6   : > { %v1080_v2 = vadd.f32 %v1065_v52, %v1049_v38 }
 0x1b7   : > { %v1081_v6 = vadd.f32 %v1067_v40, %v1051_v41  ;;  %v634_v7 = vpop.f32.mrb[12].mxu1  ;;  %v1031_v37 = vpop.f32.mrb[10].mxu0 }
 0x1b8   : > { %v1112_v21 = vadd.f32 %v1095_v56, %v1080_v2  ;;  %v1057_v36 = vmul.f32 %v1451_v3, %v634_v7  ;;  %v1069_v29 = vmul.f32 %v1447_v39, %v1031_v37  ;;  %v636_v50 = vpop.f32.mrb[13].mxu1  ;;  %v1033_v62 = vpop.f32.mrb[11].mxu0 }
 0x1b9   : > { %v1113_v4 = vadd.f32 %v1095_v56, %v1081_v6  ;;  %v1059_v9 = vmul.f32 %v1453_v13, %v636_v50  ;;  %v1071_v20 = vmul.f32 %v1449_v57, %v1033_v62 }
 0x1ba   : > { %v1120_v43 = vmax.f32 %v1112_v21, 0.0  ;;  %v1082_v46 = vadd.f32 %v1069_v29, %v1053_v45 }
 0x1bb   : > { %v1121_v49 = vmax.f32 %v1113_v4, 0.0  ;;  %v1083_v63 = vadd.f32 %v1071_v20, %v1055_v44  ;;  %v640_v10 = vpop.f32.mrb[14].mxu1  ;;  %v1037_v5 = vpop.f32.mrb[12].mxu0 }
 0x1bc   : > { %1128 = vst [vmem:[%s1955_s15] sm:$0xff] %v1120_v43  ;;  %v1114_v12 = vadd.f32 %v1100_v1, %v1082_v46  ;;  %v1061_v15 = vmul.f32 %v1459_v58, %v640_v10  ;;  %v1073_v16 = vmul.f32 %v1455_v47, %v1037_v5  ;;  %v642_v32 = vpop.f32.mrb[15].mxu1  ;;  %v1039_v14 = vpop.f32.mrb[13].mxu0 }
 0x1bd   : > { %1129 = vst [vmem:[%s1955_s15 + $0x8] sm:$0xff] %v1121_v49  ;;  %v1115_v23 = vadd.f32 %v1100_v1, %v1083_v63  ;;  %v1063_v31 = vmul.f32 %v1461_v11, %v642_v32  ;;  %v1075_v28 = vmul.f32 %v1457_v30, %v1039_v14 }
 0x1be   : > { %v1122_v18 = vmax.f32 %v1114_v12, 0.0  ;;  %v1084_v35 = vadd.f32 %v1073_v16, %v1057_v36 }
 0x1bf   : > { %v1123_v42 = vmax.f32 %v1115_v23, 0.0  ;;  %v1085_v48 = vadd.f32 %v1075_v28, %v1059_v9  ;;  %v1043_v54 = vpop.f32.mrb[14].mxu0 }
 0x1c0   : > { %1130 = vst [vmem:[%s1955_s15 + $0x10] sm:$0xff] %v1122_v18  ;;  %v1116_v53 = vadd.f32 %v1105_v22, %v1084_v35  ;;  %v1077_v8 = vmul.f32 %v1463_v17, %v1043_v54  ;;  %v1045_v19 = vpop.f32.mrb[15].mxu0 }
 0x1c1   : > { %1131 = vst [vmem:[%s1955_s15 + $0x18] sm:$0xff] %v1123_v42  ;;  %v1117_v26 = vadd.f32 %v1105_v22, %v1085_v48  ;;  %v1079_v27 = vmul.f32 %v1465_v51, %v1045_v19 }
 0x1c2   : > { %v1124_v38 = vmax.f32 %v1116_v53, 0.0  ;;  %v1086_v59 = vadd.f32 %v1077_v8, %v1061_v15 }
 0x1c3   : > { %v1125_v41 = vmax.f32 %v1117_v26, 0.0  ;;  %v1087_v61 = vadd.f32 %v1079_v27, %v1063_v31  ;;  %1142 = sbr.rel (!%p1547_p5) target bundleno = 466 (0x1d2), region = 63  ;;  %v1158_v45 = vld [vmem:[%s1955_s15] sm:$0xff] (%p1547_p5) }
 0x1c4   : > { %1132 = vst [vmem:[%s1955_s15 + $0x20] sm:$0xff] %v1124_v38  ;;  %v1118_v0 = vadd.f32 %v1110_v60, %v1086_v59  ;;  %v1160_v52 = vld [vmem:[%s1955_s15 + $0x8] sm:$0xff] (%p1547_p5)  ;;  %1159 = vst [vmem:[%s1145_s24] sm:$0xff] (%p1547_p5), %v1158_v45 }
 0x1c5   : > { %1133 = vst [vmem:[%s1955_s15 + $0x28] sm:$0xff] %v1125_v41  ;;  %v1119_v33 = vadd.f32 %v1110_v60, %v1087_v61  ;;  %1161 = vst [vmem:[%s1145_s24 + $0x8] sm:$0xff] (%p1547_p5), %v1160_v52 }
 0x1c6   : > { %v1126_v34 = vmax.f32 %v1118_v0, 0.0 }
 0x1c7   : > { %v1127_v25 = vmax.f32 %v1119_v33, 0.0  ;;  %v1162_v55 = vld [vmem:[%s1955_s15 + $0x10] sm:$0xff] (%p1547_p5) }
 0x1c8   : > { %1134 = vst [vmem:[%s1955_s15 + $0x30] sm:$0xff] %v1126_v34  ;;  %v1164_v24 = vld [vmem:[%s1955_s15 + $0x18] sm:$0xff] (%p1547_p5)  ;;  %1163 = vst [vmem:[%s1145_s24 + $0x20] sm:$0xff] (%p1547_p5), %v1162_v55 }
 0x1c9   : > { %1135 = vst [vmem:[%s1955_s15 + $0x38] sm:$0xff] %v1127_v25  ;;  %1165 = vst [vmem:[%s1145_s24 + $0x28] sm:$0xff] (%p1547_p5), %v1164_v24 }
 0x1cb   : > { %v1166_v39 = vld [vmem:[%s1955_s15 + $0x20] sm:$0xff] }
 0x1cc   : > { %v1168_v44 = vld [vmem:[%s1955_s15 + $0x28] sm:$0xff]  ;;  %1167 = vst [vmem:[%s1145_s24 + $0x40] sm:$0xff] %v1166_v39 }
 0x1cd   : > { %1169 = vst [vmem:[%s1145_s24 + $0x48] sm:$0xff] %v1168_v44 }
 0x1cf   : > { %v1170_v40 = vld [vmem:[%s1955_s15 + $0x30] sm:$0xff] }
 0x1d0   : > { %v1172_v56 = vld [vmem:[%s1955_s15 + $0x38] sm:$0xff]  ;;  %1171 = vst [vmem:[%s1145_s24 + $0x60] sm:$0xff] %v1170_v40 }
 0x1d1   : > { %1173 = vst [vmem:[%s1145_s24 + $0x68] sm:$0xff] %v1172_v56 }
 0x1d2 PF: > { %p11_p10 = scmp.ge.s32.totalorder %s1534_s19, 4   ;;  %s1996_s15 = smov %s1484_s16 }
 0x1d3   : > { %s1997_s16 = smov %s1545_s22  ;;  %s1998_s17 = smov %s1534_s19 }
 0x1d4   :  { %13 = sbr.rel (!%p11_p10) target bundleno = 2 (0x2), region = 117 }

// kernel: _lambda_.4
= control target key start
LH: loop header
LB: loop body
LE: loop exit
PB: predicated region body
PF: predicated region fallthrough
CT: control target
= control target key end

     0   :  { %s3542_s15 = smov 0   ;;  %s3544_s16 = smov 0   ;;  %s6693_s0 = inlined_call_operand.vmem [shape: f32[288,512], index: 0, kind: input, shape index: {}]   ;;  %s6694_s1 = inlined_call_operand.vmem [shape: f32[16,288], index: 1, kind: input, shape index: {}]   ;;  %s6695_s2 = inlined_call_operand.vmem [shape: f32[16,288], index: 2, kind: input, shape index: {}]   ;;  %s6696_s3 = inlined_call_operand.vmem [shape: f32[16,1], index: 3, kind: input, shape index: {}]   ;;  %s6697_s4 = inlined_call_operand.vmem [shape: f32[16,512], index: 4, kind: output, shape index: {}]  }
   0x1   :  { %s3546_s17 = smov 0  }
   0x2 LB: > { %s2558_s18 = sadd.s32 4294967295, %s3513_s17   ;;  %s3559_s19 = sadd.s32 1, %s3513_s17   ;;  %s3513_s17 = sphi %s3546_s17, %s8001_s17   ;;  %s3509_s16 = sphi %s3544_s16, %s8000_s16   ;;  %s3505_s15 = sphi %s3542_s15, %s7999_s15  }
   0x3   : > { %s18_s20 = ssub.s32 %s3513_s17, %s3559_s19  ;;  %s21_s21 = sadd.s32 1, %s3509_s16 }
   0x4   : > { %p19_p0 = scmp.eq.s32.totalorder %s18_s20, 0  ;;  %p28_p1 = scmp.ne.s32.totalorder %s3509_s16, %s3505_s15 }
   0x5   : > { %p29_p2 = scmp.eq.s32.totalorder %s3513_s17, 0  ;;  %p121_p3 = scmp.eq.s32.totalorder %s2558_s18, 1 }
   0x6   : > { %s3570_s22 = scalar_select %p19_p0, %s3509_s16, %s21_s21  }
   0x7   : > { %p30_p4 = por %p29_p2, %p28_p1  ;;  %p3572_p5 = por %p121_p3, %p28_p1 }
   0x8   : > { %p2561_p6 = scmp.ge.s32.totalorder %s3513_s17, 2 }
   0xa   : > { %152 = sbr.rel (%p2561_p6) target bundleno = 57 (0x39), region = 28 }
  0x11   : > { %155 = sbr.rel (!%p30_p4) target bundleno = 57 (0x39), region = 32  ;;  %s157_s24 = sand.u32 (%p30_p4), 1, %s3509_s16  }
  0x12   : > { %s2583_s25 = sshll.u32 (%p30_p4), %s3513_s17, 4  ;;  %s3049_s26 = smul.u32 (%p30_p4), 576, %s157_s24 }
  0x13   : > { %s3582_s29 = scalar_lea.vmem (%p30_p4), %s6693_s0, %s2583_s25 }
  0x14   : > { %v175_v0 = vld [vmem:[%s3582_s29] sm:$0xff] (%p30_p4)  ;;  %v177_v1 = vld [vmem:[%s3582_s29 + $0x8] sm:$0xff] (%p30_p4)  ;;  %s3590_s30 = scalar_lea.vmem (%p30_p4), [#allocation2], %s3049_s26 }
  0x15   : > { %v179_v2 = vld [vmem:[%s3582_s29 + $0x20] sm:$0xff] (%p30_p4)  ;;  %v181_v3 = vld [vmem:[%s3582_s29 + $0x28] sm:$0xff] (%p30_p4)  ;;  %176 = vst [vmem:[%s3590_s30] sm:$0xff] (%p30_p4), %v175_v0  ;;  %178 = vst [vmem:[%s3590_s30 + $0x8] sm:$0xff] (%p30_p4), %v177_v1 }
  0x16   : > { %v183_v4 = vld [vmem:[%s3582_s29 + $0x40] sm:$0xff] (%p30_p4)  ;;  %v185_v5 = vld [vmem:[%s3582_s29 + $0x48] sm:$0xff] (%p30_p4)  ;;  %180 = vst [vmem:[%s3590_s30 + $0x10] sm:$0xff] (%p30_p4), %v179_v2  ;;  %182 = vst [vmem:[%s3590_s30 + $0x18] sm:$0xff] (%p30_p4), %v181_v3 }
  0x17   : > { %184 = vst [vmem:[%s3590_s30 + $0x20] sm:$0xff] (%p30_p4), %v183_v4  ;;  %186 = vst [vmem:[%s3590_s30 + $0x28] sm:$0xff] (%p30_p4), %v185_v5  ;;  %v187_v6 = vld [vmem:[%s3582_s29 + $0x60] sm:$0xff] (%p30_p4)  ;;  %v189_v7 = vld [vmem:[%s3582_s29 + $0x68] sm:$0xff] (%p30_p4) }
  0x18   : > { %v191_v8 = vld [vmem:[%s3582_s29 + $0x80] sm:$0xff]  ;;  %188 = vst [vmem:[%s3590_s30 + $0x30] sm:$0xff] %v187_v6  ;;  %190 = vst [vmem:[%s3590_s30 + $0x38] sm:$0xff] %v189_v7  ;;  %v193_v9 = vld [vmem:[%s3582_s29 + $0x88] sm:$0xff] }
  0x19   : > { %192 = vst [vmem:[%s3590_s30 + $0x40] sm:$0xff] %v191_v8  ;;  %v195_v10 = vld [vmem:[%s3582_s29 + $0xa0] sm:$0xff]  ;;  %v197_v11 = vld [vmem:[%s3582_s29 + $0xa8] sm:$0xff]  ;;  %194 = vst [vmem:[%s3590_s30 + $0x48] sm:$0xff] %v193_v9 }
  0x1a   : > { %196 = vst [vmem:[%s3590_s30 + $0x50] sm:$0xff] %v195_v10  ;;  %198 = vst [vmem:[%s3590_s30 + $0x58] sm:$0xff] %v197_v11  ;;  %v199_v12 = vld [vmem:[%s3582_s29 + $0xc0] sm:$0xff]  ;;  %v201_v13 = vld [vmem:[%s3582_s29 + $0xc8] sm:$0xff] }
  0x1b   : > { %v203_v14 = vld [vmem:[%s3582_s29 + $0xe0] sm:$0xff]  ;;  %200 = vst [vmem:[%s3590_s30 + $0x60] sm:$0xff] %v199_v12  ;;  %202 = vst [vmem:[%s3590_s30 + $0x68] sm:$0xff] %v201_v13  ;;  %v205_v15 = vld [vmem:[%s3582_s29 + $0xe8] sm:$0xff] }
  0x1c   : > { %204 = vst [vmem:[%s3590_s30 + $0x70] sm:$0xff] %v203_v14  ;;  %v207_v16 = vld [vmem:[%s3582_s29 + $0x100] sm:$0xff]  ;;  %v209_v17 = vld [vmem:[%s3582_s29 + $0x108] sm:$0xff]  ;;  %206 = vst [vmem:[%s3590_s30 + $0x78] sm:$0xff] %v205_v15 }
  0x1d   : > { %208 = vst [vmem:[%s3590_s30 + $0x80] sm:$0xff] %v207_v16  ;;  %210 = vst [vmem:[%s3590_s30 + $0x88] sm:$0xff] %v209_v17  ;;  %v211_v18 = vld [vmem:[%s3582_s29 + $0x120] sm:$0xff]  ;;  %v213_v19 = vld [vmem:[%s3582_s29 + $0x128] sm:$0xff] }
  0x1e   : > { %v215_v20 = vld [vmem:[%s3582_s29 + $0x140] sm:$0xff]  ;;  %212 = vst [vmem:[%s3590_s30 + $0x90] sm:$0xff] %v211_v18  ;;  %214 = vst [vmem:[%s3590_s30 + $0x98] sm:$0xff] %v213_v19  ;;  %v217_v21 = vld [vmem:[%s3582_s29 + $0x148] sm:$0xff] }
  0x1f   : > { %216 = vst [vmem:[%s3590_s30 + $0xa0] sm:$0xff] %v215_v20  ;;  %v219_v22 = vld [vmem:[%s3582_s29 + $0x160] sm:$0xff]  ;;  %v221_v23 = vld [vmem:[%s3582_s29 + $0x168] sm:$0xff]  ;;  %218 = vst [vmem:[%s3590_s30 + $0xa8] sm:$0xff] %v217_v21 }
  0x20   : > { %220 = vst [vmem:[%s3590_s30 + $0xb0] sm:$0xff] %v219_v22  ;;  %222 = vst [vmem:[%s3590_s30 + $0xb8] sm:$0xff] %v221_v23  ;;  %v223_v24 = vld [vmem:[%s3582_s29 + $0x180] sm:$0xff]  ;;  %v225_v25 = vld [vmem:[%s3582_s29 + $0x188] sm:$0xff] }
  0x21   : > { %v227_v26 = vld [vmem:[%s3582_s29 + $0x1a0] sm:$0xff]  ;;  %224 = vst [vmem:[%s3590_s30 + $0xc0] sm:$0xff] %v223_v24  ;;  %226 = vst [vmem:[%s3590_s30 + $0xc8] sm:$0xff] %v225_v25  ;;  %v229_v27 = vld [vmem:[%s3582_s29 + $0x1a8] sm:$0xff] }
  0x22   : > { %228 = vst [vmem:[%s3590_s30 + $0xd0] sm:$0xff] %v227_v26  ;;  %v231_v28 = vld [vmem:[%s3582_s29 + $0x1c0] sm:$0xff]  ;;  %v233_v29 = vld [vmem:[%s3582_s29 + $0x1c8] sm:$0xff]  ;;  %230 = vst [vmem:[%s3590_s30 + $0xd8] sm:$0xff] %v229_v27 }
  0x23   : > { %232 = vst [vmem:[%s3590_s30 + $0xe0] sm:$0xff] %v231_v28  ;;  %234 = vst [vmem:[%s3590_s30 + $0xe8] sm:$0xff] %v233_v29  ;;  %v235_v30 = vld [vmem:[%s3582_s29 + $0x1e0] sm:$0xff]  ;;  %v237_v31 = vld [vmem:[%s3582_s29 + $0x1e8] sm:$0xff] }
  0x24   : > { %v239_v32 = vld [vmem:[%s3582_s29 + $0x200] sm:$0xff]  ;;  %236 = vst [vmem:[%s3590_s30 + $0xf0] sm:$0xff] %v235_v30  ;;  %238 = vst [vmem:[%s3590_s30 + $0xf8] sm:$0xff] %v237_v31  ;;  %v241_v33 = vld [vmem:[%s3582_s29 + $0x208] sm:$0xff] }
  0x25   : > { %240 = vst [vmem:[%s3590_s30 + $0x100] sm:$0xff] %v239_v32  ;;  %v243_v34 = vld [vmem:[%s3582_s29 + $0x220] sm:$0xff]  ;;  %v245_v35 = vld [vmem:[%s3582_s29 + $0x228] sm:$0xff]  ;;  %242 = vst [vmem:[%s3590_s30 + $0x108] sm:$0xff] %v241_v33 }
  0x26   : > { %244 = vst [vmem:[%s3590_s30 + $0x110] sm:$0xff] %v243_v34  ;;  %246 = vst [vmem:[%s3590_s30 + $0x118] sm:$0xff] %v245_v35  ;;  %v247_v36 = vld [vmem:[%s3582_s29 + $0x240] sm:$0xff]  ;;  %v249_v37 = vld [vmem:[%s3582_s29 + $0x248] sm:$0xff] }
  0x27   : > { %v251_v38 = vld [vmem:[%s3582_s29 + $0x260] sm:$0xff]  ;;  %248 = vst [vmem:[%s3590_s30 + $0x120] sm:$0xff] %v247_v36  ;;  %250 = vst [vmem:[%s3590_s30 + $0x128] sm:$0xff] %v249_v37  ;;  %v253_v39 = vld [vmem:[%s3582_s29 + $0x268] sm:$0xff] }
  0x28   : > { %252 = vst [vmem:[%s3590_s30 + $0x130] sm:$0xff] %v251_v38  ;;  %v255_v40 = vld [vmem:[%s3582_s29 + $0x280] sm:$0xff]  ;;  %v257_v41 = vld [vmem:[%s3582_s29 + $0x288] sm:$0xff]  ;;  %254 = vst [vmem:[%s3590_s30 + $0x138] sm:$0xff] %v253_v39 }
  0x29   : > { %256 = vst [vmem:[%s3590_s30 + $0x140] sm:$0xff] %v255_v40  ;;  %258 = vst [vmem:[%s3590_s30 + $0x148] sm:$0xff] %v257_v41  ;;  %v259_v42 = vld [vmem:[%s3582_s29 + $0x2a0] sm:$0xff]  ;;  %v261_v43 = vld [vmem:[%s3582_s29 + $0x2a8] sm:$0xff] }
  0x2a   : > { %v263_v44 = vld [vmem:[%s3582_s29 + $0x2c0] sm:$0xff]  ;;  %260 = vst [vmem:[%s3590_s30 + $0x150] sm:$0xff] %v259_v42  ;;  %262 = vst [vmem:[%s3590_s30 + $0x158] sm:$0xff] %v261_v43  ;;  %v265_v45 = vld [vmem:[%s3582_s29 + $0x2c8] sm:$0xff] }
  0x2b   : > { %264 = vst [vmem:[%s3590_s30 + $0x160] sm:$0xff] %v263_v44  ;;  %v267_v46 = vld [vmem:[%s3582_s29 + $0x2e0] sm:$0xff]  ;;  %v269_v47 = vld [vmem:[%s3582_s29 + $0x2e8] sm:$0xff]  ;;  %266 = vst [vmem:[%s3590_s30 + $0x168] sm:$0xff] %v265_v45 }
  0x2c   : > { %268 = vst [vmem:[%s3590_s30 + $0x170] sm:$0xff] %v267_v46  ;;  %270 = vst [vmem:[%s3590_s30 + $0x178] sm:$0xff] %v269_v47  ;;  %v271_v48 = vld [vmem:[%s3582_s29 + $0x300] sm:$0xff]  ;;  %v273_v49 = vld [vmem:[%s3582_s29 + $0x308] sm:$0xff] }
  0x2d   : > { %v275_v50 = vld [vmem:[%s3582_s29 + $0x320] sm:$0xff]  ;;  %272 = vst [vmem:[%s3590_s30 + $0x180] sm:$0xff] %v271_v48  ;;  %274 = vst [vmem:[%s3590_s30 + $0x188] sm:$0xff] %v273_v49  ;;  %v277_v51 = vld [vmem:[%s3582_s29 + $0x328] sm:$0xff] }
  0x2e   : > { %276 = vst [vmem:[%s3590_s30 + $0x190] sm:$0xff] %v275_v50  ;;  %v279_v52 = vld [vmem:[%s3582_s29 + $0x340] sm:$0xff]  ;;  %v281_v53 = vld [vmem:[%s3582_s29 + $0x348] sm:$0xff]  ;;  %278 = vst [vmem:[%s3590_s30 + $0x198] sm:$0xff] %v277_v51 }
  0x2f   : > { %280 = vst [vmem:[%s3590_s30 + $0x1a0] sm:$0xff] %v279_v52  ;;  %282 = vst [vmem:[%s3590_s30 + $0x1a8] sm:$0xff] %v281_v53  ;;  %v283_v54 = vld [vmem:[%s3582_s29 + $0x360] sm:$0xff]  ;;  %v285_v55 = vld [vmem:[%s3582_s29 + $0x368] sm:$0xff] }
  0x30   : > { %v287_v56 = vld [vmem:[%s3582_s29 + $0x380] sm:$0xff]  ;;  %284 = vst [vmem:[%s3590_s30 + $0x1b0] sm:$0xff] %v283_v54  ;;  %286 = vst [vmem:[%s3590_s30 + $0x1b8] sm:$0xff] %v285_v55  ;;  %v289_v57 = vld [vmem:[%s3582_s29 + $0x388] sm:$0xff] }
  0x31   : > { %288 = vst [vmem:[%s3590_s30 + $0x1c0] sm:$0xff] %v287_v56  ;;  %v291_v58 = vld [vmem:[%s3582_s29 + $0x3a0] sm:$0xff]  ;;  %v293_v59 = vld [vmem:[%s3582_s29 + $0x3a8] sm:$0xff]  ;;  %290 = vst [vmem:[%s3590_s30 + $0x1c8] sm:$0xff] %v289_v57 }
  0x32   : > { %292 = vst [vmem:[%s3590_s30 + $0x1d0] sm:$0xff] %v291_v58  ;;  %294 = vst [vmem:[%s3590_s30 + $0x1d8] sm:$0xff] %v293_v59  ;;  %v295_v60 = vld [vmem:[%s3582_s29 + $0x3c0] sm:$0xff]  ;;  %v297_v61 = vld [vmem:[%s3582_s29 + $0x3c8] sm:$0xff] }
  0x33   : > { %v299_v62 = vld [vmem:[%s3582_s29 + $0x3e0] sm:$0xff]  ;;  %296 = vst [vmem:[%s3590_s30 + $0x1e0] sm:$0xff] %v295_v60  ;;  %298 = vst [vmem:[%s3590_s30 + $0x1e8] sm:$0xff] %v297_v61  ;;  %v301_v63 = vld [vmem:[%s3582_s29 + $0x3e8] sm:$0xff] }
  0x34   : > { %300 = vst [vmem:[%s3590_s30 + $0x1f0] sm:$0xff] %v299_v62  ;;  %v303_v0 = vld [vmem:[%s3582_s29 + $0x400] sm:$0xff]  ;;  %v305_v1 = vld [vmem:[%s3582_s29 + $0x408] sm:$0xff]  ;;  %302 = vst [vmem:[%s3590_s30 + $0x1f8] sm:$0xff] %v301_v63 }
  0x35   : > { %304 = vst [vmem:[%s3590_s30 + $0x200] sm:$0xff] %v303_v0  ;;  %306 = vst [vmem:[%s3590_s30 + $0x208] sm:$0xff] %v305_v1  ;;  %v307_v2 = vld [vmem:[%s3582_s29 + $0x420] sm:$0xff]  ;;  %v309_v3 = vld [vmem:[%s3582_s29 + $0x428] sm:$0xff] }
  0x36   : > { %v311_v4 = vld [vmem:[%s3582_s29 + $0x440] sm:$0xff]  ;;  %308 = vst [vmem:[%s3590_s30 + $0x210] sm:$0xff] %v307_v2  ;;  %310 = vst [vmem:[%s3590_s30 + $0x218] sm:$0xff] %v309_v3  ;;  %v313_v5 = vld [vmem:[%s3582_s29 + $0x448] sm:$0xff] }
  0x37   : > { %312 = vst [vmem:[%s3590_s30 + $0x220] sm:$0xff] %v311_v4  ;;  %v315_v6 = vld [vmem:[%s3582_s29 + $0x460] sm:$0xff]  ;;  %v317_v7 = vld [vmem:[%s3582_s29 + $0x468] sm:$0xff]  ;;  %314 = vst [vmem:[%s3590_s30 + $0x228] sm:$0xff] %v313_v5 }
  0x38   : > { %316 = vst [vmem:[%s3590_s30 + $0x230] sm:$0xff] %v315_v6  ;;  %318 = vst [vmem:[%s3590_s30 + $0x238] sm:$0xff] %v317_v7 }
  0x39 PF: > { %p2564_p7 = scmp.ge.s32.totalorder %s3513_s17, 1  ;;  %p323_p8 = scmp.lt.s32.totalorder %s3513_s17, 3 }
  0x3b   : > { %p324_p9 = pnand %p2564_p7, %p323_p8 }
  0x3d   : > { %327 = sbr.rel (%p324_p9) target bundleno = 753 (0x2f1), region = 55 }
  0x44   : > { %v428_v8 = vld [vmem:[%s6694_s1] sm:$0xff]  ;;  %v429_v9 = vld [vmem:[%s6694_s1 + $0x8] sm:$0xff]  ;;  %v430_v10 = vld [vmem:[%s6694_s1 + $0x10] sm:$0xff]  ;;  %vm816_vm0 = vcmask 261120   ;;  %s330_s24 = sand.u32 1, %s3505_s15   ;;  %s2584_s15 = sshll.u32 (%p3572_p5), %s2558_s18, 4 }
  0x45   : > { %v3741_v11 = vmul.f32 2.0, %v428_v8  ;;  %v3743_v12 = vmul.f32 2.0, %v430_v10  ;;  %v431_v13 = vld [vmem:[%s6694_s1 + $0x18] sm:$0xff]  ;;  %v432_v14 = vld [vmem:[%s6694_s1 + $0x20] sm:$0xff]  ;;  %v433_v15 = vld [vmem:[%s6694_s1 + $0x28] sm:$0xff]  ;;  %v3755_v16 = vmul.f32 2.0, %v429_v9  ;;  %s2478_s8 = scalar_lea.vmem (%p3572_p5), %s6697_s4, %s2584_s15 }
  0x46   : > { %v3757_v17 = vmul.f32 2.0, %v431_v13  ;;  %v3759_v18 = vmul.f32 2.0, %v433_v15  ;;  %v434_v19 = vld [vmem:[%s6695_s2] sm:$0xff]  ;;  %v435_v20 = vld [vmem:[%s6695_s2 + $0x8] sm:$0xff]  ;;  %v436_v21 = vld [vmem:[%s6695_s2 + $0x10] sm:$0xff]  ;;  %v3772_v23 = vmul.f32 2.0, %v432_v14 }
  0x47   : > { %7090 = vst [vmem:[#allocation4_spill] sm:$0xff] %v3741_v11  ;;  %7091 = vst [vmem:[#allocation5_spill] sm:$0xff] %v3743_v12  ;;  %v817_v22 = vsel %vm816_vm0, %v3743_v12, -inf  ;;  %v3774_v24 = vmul.f32 2.0, %v434_v19  ;;  %v3776_v25 = vmul.f32 2.0, %v436_v21  ;;  %v437_v26 = vld [vmem:[%s6695_s2 + $0x18] sm:$0xff] }
  0x48   : > { %7092 = vst [vmem:[#allocation6_spill] sm:$0xff] %v3755_v16  ;;  %7093 = vst [vmem:[#allocation7_spill] sm:$0xff] %v3757_v17  ;;  %v438_v27 = vld [vmem:[%s6695_s2 + $0x20] sm:$0xff]  ;;  %v818_v28 = vmax.f32 %v3741_v11, %v817_v22  ;;  %v822_v29 = vsel %vm816_vm0, %v3759_v18, -inf  ;;  %v3787_v30 = vmul.f32 2.0, %v435_v20  ;;  %v439_v31 = vld [vmem:[%s6695_s2 + $0x28] sm:$0xff] }
  0x49   : > { %7094 = vst [vmem:[#allocation8_spill] sm:$0xff] %v3759_v18  ;;  %7095 = vst [vmem:[#allocation9_spill] sm:$0xff] %v3772_v23  ;;  %v3792_v32 = vmul.f32 2.0, %v437_v26  ;;  %s3050_s11 = smul.u32 576, %s330_s24  ;;  %v823_v33 = vmax.f32 %v3757_v17, %v822_v29  ;;  %v1773_v34 = vsel %vm816_vm0, %v3776_v25, -inf  ;;  %v3799_v35 = vmul.f32 2.0, %v439_v31 }
  0x4a   : > { %7096 = vst [vmem:[#allocation10_spill] sm:$0xff] %v3774_v24  ;;  %7097 = vst [vmem:[#allocation11_spill] sm:$0xff] %v3776_v25  ;;  %v819_v36 = vmax.f32 %v818_v28, %v3755_v16  ;;  %v1774_v37 = vmax.f32 %v3774_v24, %v1773_v34  ;;  %v3803_v38 = vmul.f32 2.0, %v438_v27  ;;  %s2565_s5 = sshll.u32 %s330_s24, 5 }
  0x4b   : > { %7098 = vst [vmem:[#allocation12_spill] sm:$0xff] %v3787_v30  ;;  %7099 = vst [vmem:[#allocation13_spill] sm:$0xff] %v3792_v32  ;;  %v824_v39 = vmax.f32 %v823_v33, %v3772_v23  ;;  %v1778_v40 = vsel %vm816_vm0, %v3799_v35, -inf  ;;  %s3808_s12 = scalar_lea.vmem [#allocation2], %s3050_s11  ;;  %s353_s6 = scalar_lea.vmem [#allocation3], %s2565_s5 }
  0x4c   : > { %7100 = vst [vmem:[#allocation14_spill] sm:$0xff] %v3799_v35  ;;  %7101 = vst [vmem:[#allocation15_spill] sm:$0xff] %v3803_v38  ;;  %v357_v41 = vld [vmem:[%s3808_s12 + $0x8] sm:$0xff]  ;;  %v359_v42 = vld [vmem:[%s3808_s12 + $0x18] sm:$0xff]  ;;  %820 = vmax.xlane.f32.xlu0 %v819_v36  ;;  %v1775_v44 = vmax.f32 %v1774_v37, %v3787_v30  ;;  %v1779_v45 = vmax.f32 %v3792_v32, %v1778_v40 }
  0x4d   : > { %v361_v43 = vld [vmem:[%s3808_s12 + $0x28] sm:$0xff]  ;;  %v363_v46 = vld [vmem:[%s3808_s12 + $0x38] sm:$0xff]  ;;  %v3818_v49 = vmul.f32 2.0, %v357_v41  ;;  %v3820_v50 = vmul.f32 2.0, %v359_v42  ;;  %825 = vmax.xlane.f32.xlu1 %v824_v39  ;;  %v384_v18 = vld [vmem:[%s3808_s12 + $0xe0] sm:$0xff] }
  0x4e   : > { %v365_v47 = vld [vmem:[%s3808_s12 + $0x48] sm:$0xff]  ;;  %v367_v48 = vld [vmem:[%s3808_s12 + $0x58] sm:$0xff]  ;;  %v3825_v54 = vmul.f32 2.0, %v361_v43  ;;  %v3827_v55 = vmul.f32 2.0, %v363_v46  ;;  %v1780_v57 = vmax.f32 %v1779_v45, %v3803_v38  ;;  %v376_v38 = vld [vmem:[%s3808_s12 + $0xa0] sm:$0xff] }
  0x4f   : > { %7102 = vst [vmem:[#allocation16_spill] sm:$0xff] %v3818_v49  ;;  %7103 = vst [vmem:[#allocation17_spill] sm:$0xff] %v3820_v50  ;;  %v369_v51 = vld [vmem:[%s3808_s12 + $0x68] sm:$0xff]  ;;  %v371_v52 = vld [vmem:[%s3808_s12 + $0x78] sm:$0xff]  ;;  %v3829_v56 = vmul.f32 2.0, %v365_v47  ;;  %v3835_v61 = vmul.f32 2.0, %v367_v48 }
  0x50   : > { %v373_v53 = vld [vmem:[%s3808_s12 + $0x88] sm:$0xff]  ;;  %7104 = vst [vmem:[#allocation18_spill] sm:$0xff] %v3825_v54  ;;  %7105 = vst [vmem:[#allocation19_spill] sm:$0xff] %v3827_v55  ;;  %v375_v58 = vld [vmem:[%s3808_s12 + $0x98] sm:$0xff]  ;;  %v3837_v62 = vmul.f32 2.0, %v369_v51  ;;  %v3839_v63 = vmul.f32 2.0, %v371_v52  ;;  %v553_v6 = vmax.f32 %v3818_v49, %v3825_v54  ;;  %1776 = vmax.xlane.f32.xlu0 %v1775_v44  ;;  %v554_v15 = vmax.f32 %v3820_v50, %v3827_v55 }
  0x51   : > { %v377_v59 = vld [vmem:[%s3808_s12 + $0xa8] sm:$0xff]  ;;  %v379_v60 = vld [vmem:[%s3808_s12 + $0xb8] sm:$0xff]  ;;  %7106 = vst [vmem:[#allocation20_spill] sm:$0xff] %v3835_v61  ;;  %v3844_v3 = vmul.f32 2.0, %v373_v53  ;;  %v3846_v4 = vmul.f32 2.0, %v375_v58  ;;  %1781 = vmax.xlane.f32.xlu1 %v1780_v57  ;;  %v386_v23 = vld [vmem:[%s3808_s12 + $0xf0] sm:$0xff] }
  0x52   : > { %7107 = vst [vmem:[#allocation21_spill] sm:$0xff] %v3837_v62  ;;  %7108 = vst [vmem:[#allocation22_spill] sm:$0xff] %v3839_v63  ;;  %v381_v0 = vld [vmem:[%s3808_s12 + $0xc8] sm:$0xff]  ;;  %v383_v1 = vld [vmem:[%s3808_s12 + $0xd8] sm:$0xff]  ;;  %v3848_v5 = vmul.f32 2.0, %v377_v59  ;;  %v3855_v10 = vmul.f32 2.0, %v379_v60  ;;  %v555_v28 = vmax.f32 %v553_v6, %v3829_v56  ;;  %v556_v39 = vmax.f32 %v554_v15, %v3835_v61 }
  0x53   : > { %v385_v2 = vld [vmem:[%s3808_s12 + $0xe8] sm:$0xff]  ;;  %7109 = vst [vmem:[#allocation23_spill] sm:$0xff] %v3844_v3  ;;  %7110 = vst [vmem:[#allocation24_spill] sm:$0xff] %v3846_v4  ;;  %v387_v7 = vld [vmem:[%s3808_s12 + $0xf8] sm:$0xff]  ;;  %v3857_v13 = vmul.f32 2.0, %v381_v0  ;;  %v3859_v14 = vmul.f32 2.0, %v383_v1 }
  0x54   : > { %7111 = vst [vmem:[#allocation25_spill] sm:$0xff] %v3848_v5  ;;  %v389_v8 = vld [vmem:[%s3808_s12 + $0x108] sm:$0xff]  ;;  %v391_v9 = vld [vmem:[%s3808_s12 + $0x118] sm:$0xff]  ;;  %7112 = vst [vmem:[#allocation26_spill] sm:$0xff] %v3855_v10  ;;  %v3866_v22 = vmul.f32 2.0, %v385_v2  ;;  %v3868_v26 = vmul.f32 2.0, %v387_v7  ;;  %v557_v46 = vmax.f32 %v555_v28, %v3837_v62  ;;  %v558_v58 = vmax.f32 %v556_v39, %v3839_v63 }
  0x55   : > { %7113 = vst [vmem:[#allocation27_spill] sm:$0xff] %v3857_v13  ;;  %7114 = vst [vmem:[#allocation28_spill] sm:$0xff] %v3859_v14  ;;  %v393_v19 = vld [vmem:[%s3808_s12 + $0x128] sm:$0xff]  ;;  %v395_v20 = vld [vmem:[%s3808_s12 + $0x138] sm:$0xff]  ;;  %v3870_v27 = vmul.f32 2.0, %v389_v8  ;;  %v3876_v34 = vmul.f32 2.0, %v391_v9 }
  0x56   : > { %v397_v21 = vld [vmem:[%s3808_s12 + $0x148] sm:$0xff]  ;;  %7115 = vst [vmem:[#allocation29_spill] sm:$0xff] %v3866_v22  ;;  %7116 = vst [vmem:[#allocation30_spill] sm:$0xff] %v3868_v26  ;;  %v399_v29 = vld [vmem:[%s3808_s12 + $0x158] sm:$0xff]  ;;  %v3878_v36 = vmul.f32 2.0, %v393_v19  ;;  %v3880_v37 = vmul.f32 2.0, %v395_v20  ;;  %v559_v7 = vmax.f32 %v557_v46, %v3844_v3  ;;  %v560_v28 = vmax.f32 %v558_v58, %v3846_v4 }
  0x57   : > { %7117 = vst [vmem:[#allocation31_spill] sm:$0xff] %v3870_v27  ;;  %v401_v31 = vld [vmem:[%s3808_s12 + $0x168] sm:$0xff]  ;;  %v403_v33 = vld [vmem:[%s3808_s12 + $0x178] sm:$0xff]  ;;  %7118 = vst [vmem:[#allocation32_spill] sm:$0xff] %v3876_v34  ;;  %v3886_v43 = vmul.f32 2.0, %v397_v21  ;;  %v3888_v44 = vmul.f32 2.0, %v399_v29 }
  0x58   : > { %7119 = vst [vmem:[#allocation33_spill] sm:$0xff] %v3878_v36  ;;  %7120 = vst [vmem:[#allocation34_spill] sm:$0xff] %v3880_v37  ;;  %v405_v40 = vld [vmem:[%s3808_s12 + $0x188] sm:$0xff]  ;;  %v407_v41 = vld [vmem:[%s3808_s12 + $0x198] sm:$0xff]  ;;  %v3890_v45 = vmul.f32 2.0, %v401_v31  ;;  %v3896_v52 = vmul.f32 2.0, %v403_v33  ;;  %v562_v46 = vmax.f32 %v560_v28, %v3855_v10 }
  0x59   : > { %v409_v42 = vld [vmem:[%s3808_s12 + $0x1a8] sm:$0xff]  ;;  %7121 = vst [vmem:[#allocation35_spill] sm:$0xff] %v3886_v43  ;;  %7122 = vst [vmem:[#allocation36_spill] sm:$0xff] %v3888_v44  ;;  %v411_v47 = vld [vmem:[%s3808_s12 + $0x1b8] sm:$0xff]  ;;  %v3898_v53 = vmul.f32 2.0, %v405_v40  ;;  %v3900_v57 = vmul.f32 2.0, %v407_v41 }
  0x5a   : > { %7123 = vst [vmem:[#allocation37_spill] sm:$0xff] %v3890_v45  ;;  %v413_v48 = vld [vmem:[%s3808_s12 + $0x1c8] sm:$0xff]  ;;  %v415_v51 = vld [vmem:[%s3808_s12 + $0x1d8] sm:$0xff]  ;;  %7124 = vst [vmem:[#allocation38_spill] sm:$0xff] %v3896_v52  ;;  %v3906_v1 = vmul.f32 2.0, %v409_v42  ;;  %v3908_v2 = vmul.f32 2.0, %v411_v47  ;;  %v561_v42 = vmax.f32 %v559_v7, %v3848_v5  ;;  %v564_v35 = vmax.f32 %v562_v46, %v3859_v14 }
  0x5b   : > { %7125 = vst [vmem:[#allocation39_spill] sm:$0xff] %v3898_v53  ;;  %7126 = vst [vmem:[#allocation40_spill] sm:$0xff] %v3900_v57  ;;  %v417_v59 = vld [vmem:[%s3808_s12 + $0x1e8] sm:$0xff]  ;;  %v419_v60 = vld [vmem:[%s3808_s12 + $0x1f8] sm:$0xff]  ;;  %v3910_v6 = vmul.f32 2.0, %v413_v48  ;;  %v3916_v19 = vmul.f32 2.0, %v415_v51 }
  0x5c   : > { %v421_v0 = vld [vmem:[%s3808_s12 + $0x208] sm:$0xff]  ;;  %7127 = vst [vmem:[#allocation41_spill] sm:$0xff] %v3906_v1  ;;  %7128 = vst [vmem:[#allocation42_spill] sm:$0xff] %v3908_v2  ;;  %v423_v8 = vld [vmem:[%s3808_s12 + $0x218] sm:$0xff]  ;;  %v3918_v20 = vmul.f32 2.0, %v417_v59  ;;  %v3920_v21 = vmul.f32 2.0, %v419_v60  ;;  %v563_v28 = vmax.f32 %v561_v42, %v3857_v13 }
  0x5d   : > { %7129 = vst [vmem:[#allocation43_spill] sm:$0xff] %v3910_v6  ;;  %v425_v9 = vld [vmem:[%s3808_s12 + $0x228] sm:$0xff]  ;;  %v427_v15 = vld [vmem:[%s3808_s12 + $0x238] sm:$0xff]  ;;  %7130 = vst [vmem:[#allocation44_spill] sm:$0xff] %v3916_v19  ;;  %v3923_v29 = vmul.f32 2.0, %v421_v0  ;;  %v3925_v31 = vmul.f32 2.0, %v423_v8 }
  0x5e   : > { %7131 = vst [vmem:[#allocation45_spill] sm:$0xff] %v3918_v20  ;;  %7132 = vst [vmem:[#allocation46_spill] sm:$0xff] %v3920_v21  ;;  %v3927_v33 = vmul.f32 2.0, %v425_v9  ;;  %v3929_v39 = vmul.f32 2.0, %v427_v15  ;;  %v356_v40 = vld [vmem:[%s3808_s12] sm:$0xff]  ;;  %v358_v41 = vld [vmem:[%s3808_s12 + $0x10] sm:$0xff] }
  0x5f   : > { %7133 = vst [vmem:[#allocation47_spill] sm:$0xff] %v3923_v29  ;;  %7134 = vst [vmem:[#allocation48_spill] sm:$0xff] %v3925_v31  ;;  %v360_v47 = vld [vmem:[%s3808_s12 + $0x20] sm:$0xff]  ;;  %v362_v48 = vld [vmem:[%s3808_s12 + $0x30] sm:$0xff]  ;;  %v3938_v58 = vmul.f32 2.0, %v356_v40  ;;  %v3940_v59 = vmul.f32 2.0, %v358_v41 }
  0x60   : > { %7135 = vst [vmem:[#allocation49_spill] sm:$0xff] %v3927_v33  ;;  %7136 = vst [vmem:[#allocation50_spill] sm:$0xff] %v3929_v39  ;;  %v364_v51 = vld [vmem:[%s3808_s12 + $0x40] sm:$0xff]  ;;  %v366_v60 = vld [vmem:[%s3808_s12 + $0x50] sm:$0xff]  ;;  %v3945_v9 = vmul.f32 2.0, %v360_v47  ;;  %v3947_v7 = vmul.f32 2.0, %v362_v48 }
  0x61   : > { %7137 = vst [vmem:[#allocation51_spill] sm:$0xff] %v3938_v58  ;;  %7138 = vst [vmem:[#allocation52_spill] sm:$0xff] %v3940_v59  ;;  %v368_v0 = vld [vmem:[%s3808_s12 + $0x60] sm:$0xff]  ;;  %v370_v8 = vld [vmem:[%s3808_s12 + $0x70] sm:$0xff]  ;;  %v3949_v15 = vmul.f32 2.0, %v364_v51  ;;  %v3956_v32 = vmul.f32 2.0, %v366_v60  ;;  %v565_v60 = vmax.f32 %v563_v28, %v3866_v22 }
  0x62   : > { %7139 = vst [vmem:[#allocation53_spill] sm:$0xff] %v3945_v9  ;;  %7140 = vst [vmem:[#allocation54_spill] sm:$0xff] %v3947_v7  ;;  %v372_v40 = vld [vmem:[%s3808_s12 + $0x80] sm:$0xff]  ;;  %v374_v41 = vld [vmem:[%s3808_s12 + $0x90] sm:$0xff]  ;;  %v3958_v25 = vmul.f32 2.0, %v368_v0  ;;  %v3963_v30 = vmul.f32 2.0, %v370_v8  ;;  %v512_v24 = vmax.f32 %v3938_v58, %v3945_v9  ;;  %v566_v0 = vmax.f32 %v564_v35, %v3868_v26 }
  0x63   : > { %7141 = vst [vmem:[#allocation55_spill] sm:$0xff] %v3949_v15  ;;  %v378_v47 = vld [vmem:[%s3808_s12 + $0xb0] sm:$0xff]  ;;  %v380_v48 = vld [vmem:[%s3808_s12 + $0xc0] sm:$0xff]  ;;  %v3965_v42 = vmul.f32 2.0, %v372_v40  ;;  %v3967_v46 = vmul.f32 2.0, %v374_v41  ;;  %v3976_v8 = vmul.f32 2.0, %v376_v38  ;;  %v567_v35 = vmax.f32 %v565_v60, %v3870_v27 }
  0x64   : > { %v382_v51 = vld [vmem:[%s3808_s12 + $0xd0] sm:$0xff]  ;;  %v388_v17 = vld [vmem:[%s3808_s12 + $0x100] sm:$0xff]  ;;  %v3978_v40 = vmul.f32 2.0, %v378_v47  ;;  %v3983_v11 = vmul.f32 2.0, %v380_v48  ;;  %v3987_v9 = vmul.f32 2.0, %v384_v18  ;;  %v568_v38 = vmax.f32 %v566_v0, %v3876_v34  ;;  %v7172_v10 = vld [vmem:[#allocation33_spill] sm:$0xff] }
  0x65   : > { %7142 = vst [vmem:[#allocation56_spill] sm:$0xff] %v3967_v46  ;;  %7143 = vst [vmem:[#allocation57_spill] sm:$0xff] %v3976_v8  ;;  %v390_v41 = vld [vmem:[%s3808_s12 + $0x110] sm:$0xff]  ;;  %v392_v12 = vld [vmem:[%s3808_s12 + $0x120] sm:$0xff]  ;;  %v3985_v28 = vmul.f32 2.0, %v382_v51  ;;  %v3994_v33 = vmul.f32 2.0, %v386_v23  ;;  %v513_v48 = vmax.f32 %v3940_v59, %v3947_v7  ;;  %v569_v0 = vmax.f32 %v567_v35, %v3878_v36 }
  0x66   : > { %7144 = vst [vmem:[#allocation58_spill] sm:$0xff] %v3978_v40  ;;  %v394_v16 = vld [vmem:[%s3808_s12 + $0x130] sm:$0xff]  ;;  %7145 = vst [vmem:[#allocation59_spill] sm:$0xff] %v3983_v11  ;;  %v396_v58 = vld [vmem:[%s3808_s12 + $0x140] sm:$0xff]  ;;  %v4001_v22 = vmul.f32 2.0, %v388_v17  ;;  %v4003_v60 = vmul.f32 2.0, %v390_v41  ;;  %v570_v23 = vmax.f32 %v568_v38, %v3880_v37  ;;  %v514_v17 = vmax.f32 %v512_v24, %v3949_v15 }
  0x67   : > { %7146 = vst [vmem:[#allocation60_spill] sm:$0xff] %v3985_v28  ;;  %7147 = vst [vmem:[#allocation61_spill] sm:$0xff] %v3987_v9  ;;  %v398_v47 = vld [vmem:[%s3808_s12 + $0x150] sm:$0xff]  ;;  %v400_v39 = vld [vmem:[%s3808_s12 + $0x160] sm:$0xff]  ;;  %v4005_v27 = vmul.f32 2.0, %v392_v12  ;;  %v4012_v7 = vmul.f32 2.0, %v394_v16  ;;  %v571_v38 = vmax.f32 %v569_v0, %v3886_v43  ;;  %v515_v24 = vmax.f32 %v513_v48, %v3956_v32 }
  0x68   : > { %7148 = vst [vmem:[#allocation62_spill] sm:$0xff] %v3994_v33  ;;  %v402_v51 = vld [vmem:[%s3808_s12 + $0x170] sm:$0xff]  ;;  %v404_v18 = vld [vmem:[%s3808_s12 + $0x180] sm:$0xff]  ;;  %7149 = vst [vmem:[#allocation63_spill] sm:$0xff] %v4001_v22  ;;  %v4019_v12 = vmul.f32 2.0, %v398_v47  ;;  %v572_v37 = vmax.f32 %v570_v23, %v3888_v44 }
  0x69   : > { %v406_v26 = vld [vmem:[%s3808_s12 + $0x190] sm:$0xff]  ;;  %7150 = vst [vmem:[#allocation64_spill] sm:$0xff] %v4003_v60  ;;  %7151 = vst [vmem:[#allocation65_spill] sm:$0xff] %v4005_v27  ;;  %v408_v34 = vld [vmem:[%s3808_s12 + $0x1a0] sm:$0xff]  ;;  %v4017_v60 = vmul.f32 2.0, %v396_v58  ;;  %v4021_v27 = vmul.f32 2.0, %v400_v39  ;;  %v573_v0 = vmax.f32 %v571_v38, %v3890_v45 }
  0x6a   : > { %v410_v33 = vld [vmem:[%s3808_s12 + $0x1b0] sm:$0xff]  ;;  %v412_v31 = vld [vmem:[%s3808_s12 + $0x1c0] sm:$0xff]  ;;  %7152 = vst [vmem:[#allocation66_spill] sm:$0xff] %v4012_v7  ;;  %v4023_v35 = vmul.f32 2.0, %v402_v51  ;;  %v4030_v22 = vmul.f32 2.0, %v404_v18  ;;  %v4034_v15 = vmul.f32 2.0, %v406_v26  ;;  %v574_v23 = vmax.f32 %v572_v37, %v3896_v52 }
  0x6b   : > { %v414_v59 = vld [vmem:[%s3808_s12 + $0x1d0] sm:$0xff]  ;;  %v416_v41 = vld [vmem:[%s3808_s12 + $0x1e0] sm:$0xff]  ;;  %7153 = vst [vmem:[#allocation67_spill] sm:$0xff] %v4021_v27  ;;  %v4036_v47 = vmul.f32 2.0, %v408_v34  ;;  %v4038_v39 = vmul.f32 2.0, %v410_v33  ;;  %v4040_v51 = vmul.f32 2.0, %v412_v31  ;;  %v516_v34 = vmax.f32 %v514_v17, %v3958_v25 }
  0x6c   : > { %7154 = vst [vmem:[#allocation68_spill] sm:$0xff] %v4023_v35  ;;  %v418_v36 = vld [vmem:[%s3808_s12 + $0x1f0] sm:$0xff]  ;;  %v420_v16 = vld [vmem:[%s3808_s12 + $0x200] sm:$0xff]  ;;  %7155 = vst [vmem:[#allocation69_spill] sm:$0xff] %v4030_v22  ;;  %v4045_v27 = vmul.f32 2.0, %v414_v59  ;;  %v4047_v18 = vmul.f32 2.0, %v416_v41  ;;  %v575_v31 = vmax.f32 %v573_v0, %v3898_v53  ;;  %v576_v33 = vmax.f32 %v574_v23, %v3900_v57 }
  0x6d   : > { %v422_v7 = vld [vmem:[%s3808_s12 + $0x210] sm:$0xff]  ;;  %v424_v58 = vld [vmem:[%s3808_s12 + $0x220] sm:$0xff]  ;;  %7156 = vst [vmem:[#allocation70_spill] sm:$0xff] %v4034_v15  ;;  %7157 = vst [vmem:[#allocation71_spill] sm:$0xff] %v4038_v39  ;;  %v4049_v22 = vmul.f32 2.0, %v418_v36  ;;  %v4051_v48 = vmul.f32 2.0, %v420_v16  ;;  %v517_v37 = vmax.f32 %v515_v24, %v3963_v30  ;;  %v518_v41 = vmax.f32 %v516_v34, %v3965_v42 }
  0x6e   : > { %v426_v35 = vld [vmem:[%s3808_s12 + $0x230] sm:$0xff]  ;;  %7158 = vst [vmem:[#allocation72_spill] sm:$0xff] %v4045_v27  ;;  %v4053_v26 = vmul.f32 2.0, %v422_v7  ;;  %v4058_v38 = vmul.f32 2.0, %v424_v58  ;;  %v577_v7 = vmax.f32 %v575_v31, %v3906_v1  ;;  %v578_v17 = vmax.f32 %v576_v33, %v3908_v2  ;;  %v7183_v1 = vld [vmem:[#allocation51_spill] sm:$0xff] }
  0x6f   : > { %v4061_v59 = vmul.f32 2.0, %v426_v35  ;;  %v519_v0 = vmax.f32 %v517_v37, %v3967_v46  ;;  %v520_v58 = vmax.f32 %v518_v41, %v3976_v8  ;;  %v7169_v8 = vld [vmem:[#allocation49_spill] sm:$0xff]  ;;  %v7170_v13 = vld [vmem:[#allocation50_spill] sm:$0xff] }
  0x70   : > { %7159 = vst [vmem:[#allocation73_spill] sm:$0xff] %v4053_v26  ;;  %7160 = vst [vmem:[#allocation74_spill] sm:$0xff] %v4058_v38  ;;  %v579_v36 = vmax.f32 %v577_v7, %v3910_v6  ;;  %v580_v16 = vmax.f32 %v578_v17, %v3916_v19  ;;  %v7165_v38 = vld [vmem:[#allocation63_spill] sm:$0xff]  ;;  %v7171_v14 = vld [vmem:[#allocation64_spill] sm:$0xff]  ;;  %v7184_v17 = vsub.f32 0.0, %v3829_v56  ;;  %v7193_v6 = vsub.f32 0.0, %v3846_v4 }
  0x71   : > { %7161 = vst [vmem:[#allocation75_spill] sm:$0xff] %v4061_v59  ;;  %v521_v31 = vmax.f32 %v519_v0, %v3978_v40  ;;  %v522_v37 = vmax.f32 %v520_v58, %v3983_v11  ;;  %v7162_v11 = vld [vmem:[#allocation48_spill] sm:$0xff]  ;;  %v7163_v40 = vld [vmem:[#allocation62_spill] sm:$0xff]  ;;  %v7164_v59 = vld [vmem:[#allocation29_spill] sm:$0xff] }
  0x72   : > { %v581_v35 = vmax.f32 %v579_v36, %v3918_v20  ;;  %v582_v34 = vmax.f32 %v580_v16, %v3920_v21  ;;  %v7173_v5 = vld [vmem:[#allocation65_spill] sm:$0xff]  ;;  %v7192_v21 = vsub.f32 0.0, %v3844_v3  ;;  %v7196_v3 = vld [vmem:[#allocation26_spill] sm:$0xff]  ;;  %v7206_v4 = vsub.f32 0.0, %v7164_v59 }
  0x73   : > { %v523_v7 = vmax.f32 %v521_v31, %v3985_v28  ;;  %v524_v0 = vmax.f32 %v522_v37, %v3987_v9  ;;  %v7166_v28 = vld [vmem:[#allocation30_spill] sm:$0xff]  ;;  %v7168_v9 = vld [vmem:[#allocation32_spill] sm:$0xff] }
  0x74   : > { %v583_v41 = vmax.f32 %v581_v35, %v3923_v29  ;;  %v584_v24 = vmax.f32 %v582_v34, %v7162_v11  ;;  %v7175_v37 = vld [vmem:[#allocation66_spill] sm:$0xff]  ;;  %v7177_v53 = vld [vmem:[#allocation68_spill] sm:$0xff]  ;;  %v7185_v29 = vsub.f32 0.0, %v3835_v61  ;;  %v7189_v11 = vsub.f32 0.0, %v3837_v62  ;;  %v7194_v61 = vld [vmem:[#allocation25_spill] sm:$0xff] }
  0x75   : > { %v525_v36 = vmax.f32 %v523_v7, %v7163_v40  ;;  %v526_v31 = vmax.f32 %v524_v0, %v7165_v38  ;;  %v7174_v40 = vld [vmem:[#allocation34_spill] sm:$0xff] }
  0x76   : > { %v585_v58 = vmax.f32 %v583_v41, %v7169_v8  ;;  %v586_v23 = vmax.f32 %v584_v24, %v7170_v13  ;;  %v7181_v41 = vsub.f32 0.0, %v3827_v55  ;;  %v7190_v13 = vsub.f32 0.0, %v3839_v63  ;;  %v7208_v46 = vld [vmem:[#allocation58_spill] sm:$0xff] }
  0x77   : > { %v527_v35 = vmax.f32 %v525_v36, %v7171_v14  ;;  %v528_v7 = vmax.f32 %v526_v31, %v7173_v5 }
  0x78   : > { %v587_v38 = vmax.f32 %v585_v58, %v586_v23  ;;  %v7176_v58 = vld [vmem:[#allocation67_spill] sm:$0xff]  ;;  %v7179_v23 = vsub.f32 0.0, %v3825_v54 }
  0x79   : > { %v529_v26 = vmax.f32 %v527_v35, %v7175_v37  ;;  %v530_v24 = vmax.f32 %v528_v7, %v4017_v60  ;;  %v7182_v7 = vsub.f32 0.0, %v3820_v50  ;;  %v7205_v63 = vld [vmem:[#allocation75_spill] sm:$0xff] }
  0x7a   : > { %v588_v16 = vrot.slane %v587_v38, 4 }
  0x7b   : > { %v531_v0 = vmax.f32 %v529_v26, %v4019_v12  ;;  %v532_v35 = vmax.f32 %v530_v24, %v7176_v58  ;;  %v7178_v26 = vld [vmem:[#allocation69_spill] sm:$0xff]  ;;  %v7180_v24 = vsub.f32 0.0, %v3818_v49 }
  0x7c   : > { %v589_v36 = vmax.f32 %v587_v38, %v588_v16  ;;  %v1511_v38 = vmax.f32 %v7182_v7, %v7181_v41  ;;  %v7187_v7 = vld [vmem:[#allocation53_spill] sm:$0xff] }
  0x7d   : > { %v533_v34 = vmax.f32 %v531_v0, %v7177_v53  ;;  %v534_v57 = vmax.f32 %v532_v35, %v7178_v26  ;;  %v1510_v33 = vmax.f32 %v7180_v24, %v7179_v23  ;;  %v7186_v24 = vld [vmem:[#allocation52_spill] sm:$0xff] }
  0x7e   : > { %v590_v16 = vrot.slane %v589_v36, 2  ;;  %v1513_v23 = vmax.f32 %v1511_v38, %v7185_v29 }
  0x7f   : > { %v535_v0 = vmax.f32 %v533_v34, %v4034_v15  ;;  %v536_v35 = vmax.f32 %v534_v57, %v4036_v47  ;;  %v1512_v8 = vmax.f32 %v1510_v33, %v7184_v17  ;;  %v7188_v34 = vld [vmem:[#allocation54_spill] sm:$0xff]  ;;  %v7191_v17 = vld [vmem:[#allocation55_spill] sm:$0xff] }
  0x80   : > { %v591_v20 = vmax.f32 %v589_v36, %v590_v16  ;;  %v1515_v33 = vmax.f32 %v1513_v23, %v7190_v13 }
  0x81   : > { %v537_v41 = vmax.f32 %v535_v0, %v4038_v39  ;;  %v538_v31 = vmax.f32 %v536_v35, %v4040_v51  ;;  %v1514_v57 = vmax.f32 %v1512_v8, %v7189_v11 }
  0x82   : > { %v592_v29 = vrot.slane %v591_v20, 1  ;;  %v1517_v11 = vmax.f32 %v1515_v33, %v7193_v6  ;;  %v7203_v6 = vld [vmem:[#allocation28_spill] sm:$0xff] }
  0x83   : > { %v539_v38 = vmax.f32 %v537_v41, %v4045_v27  ;;  %v540_v0 = vmax.f32 %v538_v31, %v4047_v18  ;;  %v1516_v35 = vmax.f32 %v1514_v57, %v7192_v21  ;;  %v7195_v31 = vsub.f32 0.0, %v7194_v61 }
  0x84   : > { %v4160_v13 = vmax.f32 %v591_v20, %v592_v29  ;;  %v7197_v21 = vsub.f32 0.0, %v7196_v3  ;;  %v7199_v29 = vld [vmem:[#allocation73_spill] sm:$0xff]  ;;  %v7204_v8 = vsub.f32 0.0, %v7203_v6  ;;  %v7210_v6 = vld [vmem:[#allocation60_spill] sm:$0xff] }
  0x85   : > { %v541_v23 = vmax.f32 %v539_v38, %v4049_v22  ;;  %v542_v16 = vmax.f32 %v540_v0, %v4051_v48  ;;  %v1518_v19 = vmax.f32 %v1516_v35, %v7195_v31  ;;  %v7200_v0 = vld [vmem:[#allocation74_spill] sm:$0xff]  ;;  %v7201_v31 = vld [vmem:[#allocation27_spill] sm:$0xff] }
  0x86   : > { %v1519_v57 = vmax.f32 %v1517_v11, %v7197_v21  ;;  %v595_v20 = vsub.f32 %v3818_v49, %v4160_v13  ;;  %v597_v33 = vsub.f32 %v3820_v50, %v4160_v13  ;;  %v599_v36 = vsub.f32 %v3825_v54, %v4160_v13 }
  0x87   : > { %v543_v38 = vmax.f32 %v541_v23, %v7199_v29  ;;  %v544_v41 = vmax.f32 %v542_v16, %v7200_v0  ;;  %v601_v35 = vsub.f32 %v3827_v55, %v4160_v13  ;;  %v7202_v11 = vsub.f32 0.0, %v7201_v31  ;;  %v7216_v55 = vld [vmem:[#allocation63_spill] sm:$0xff] }
  0x88   : > { %v1521_v3 = vmax.f32 %v1519_v57, %v7204_v8  ;;  %v668_v49 = vmul.f32 1.442695, %v595_v20  ;;  %v672_v61 = vmul.f32 1.442695, %v597_v33  ;;  %v676_v62 = vmul.f32 1.442695, %v599_v36 }
  0x89   : > { %v1520_v21 = vmax.f32 %v1518_v19, %v7202_v11  ;;  %v545_v50 = vmax.f32 %v543_v38, %v7205_v63  ;;  %v680_v23 = vmul.f32 1.442695, %v601_v35  ;;  %v7207_v16 = vsub.f32 0.0, %v7166_v28  ;;  %v7209_v19 = vld [vmem:[#allocation59_spill] sm:$0xff]  ;;  %v7214_v35 = vld [vmem:[#allocation61_spill] sm:$0xff]  ;;  %v7225_v11 = vld [vmem:[#allocation40_spill] sm:$0xff] }
  0x8a   : > { %3079 = vpow2.f32 %v668_v49  ;;  %v7211_v57 = vld [vmem:[#allocation31_spill] sm:$0xff]  ;;  %v7213_v36 = vsub.f32 0.0, %v7168_v9 }
  0x8b   : > { %v1522_v54 = vmax.f32 %v1520_v21, %v7206_v4  ;;  %v1523_v0 = vmax.f32 %v1521_v3, %v7207_v16  ;;  %v546_v31 = vmax.f32 %v544_v41, %v545_v50  ;;  %3081 = vpow2.f32 %v672_v61  ;;  %v7215_v3 = vld [vmem:[#allocation62_spill] sm:$0xff] }
  0x8c   : > { %v7212_v20 = vsub.f32 0.0, %v7211_v57  ;;  %3083 = vpow2.f32 %v676_v62  ;;  %v7217_v50 = vsub.f32 0.0, %v7172_v10  ;;  %v7218_v61 = vsub.f32 0.0, %v7174_v40 }
  0x8d   : > { %v1525_v38 = vmax.f32 %v1523_v0, %v7213_v36  ;;  %v547_v21 = vrot.slane %v546_v31, 4  ;;  %3085 = vpow2.f32 %v680_v23  ;;  %v7219_v16 = vsub.f32 0.0, %v3886_v43  ;;  %v7244_v43 = vld [vmem:[#allocation44_spill] sm:$0xff] }
  0x8e   : > { %v1524_v33 = vmax.f32 %v1522_v54, %v7212_v20  ;;  %v7220_v23 = vsub.f32 0.0, %v3888_v44  ;;  %v7221_v36 = vsub.f32 0.0, %v3890_v45  ;;  %v7222_v0 = vsub.f32 0.0, %v3896_v52 }
  0x8f   : > { %v1527_v8 = vmax.f32 %v1525_v38, %v7218_v61  ;;  %v548_v20 = vmax.f32 %v546_v31, %v547_v21  ;;  %v7223_v31 = vld [vmem:[#allocation39_spill] sm:$0xff]  ;;  %v7226_v45 = vsub.f32 0.0, %v7225_v11  ;;  %v7245_v40 = vsub.f32 0.0, %v7244_v43 }
  0x90   : > { %v1526_v41 = vmax.f32 %v1524_v33, %v7217_v50  ;;  %v7224_v54 = vsub.f32 0.0, %v7223_v31  ;;  %v7229_v33 = vsub.f32 0.0, %v7183_v1  ;;  %v7230_v50 = vsub.f32 0.0, %v7188_v34  ;;  %v7236_v31 = vld [vmem:[#allocation20_spill] sm:$0xff] }
  0x91   : > { %v1529_v49 = vmax.f32 %v1527_v8, %v7220_v23  ;;  %v549_v38 = vrot.slane %v548_v20, 2  ;;  %v605_v52 = vsub.f32 %v7236_v31, %v4160_v13 }
  0x92   : > { %v1528_v4 = vmax.f32 %v1526_v41, %v7219_v16  ;;  %v7235_v41 = vsub.f32 0.0, %v3908_v2  ;;  %v7242_v2 = vld [vmem:[#allocation43_spill] sm:$0xff] }
  0x93   : > { %v1531_v16 = vmax.f32 %v1529_v49, %v7222_v0  ;;  %v550_v23 = vmax.f32 %v548_v20, %v549_v38  ;;  %v7228_v38 = vsub.f32 0.0, %v7187_v7  ;;  %v603_v20 = vsub.f32 %v3829_v56, %v4160_v13 }
  0x94   : > { %v1530_v62 = vmax.f32 %v1528_v4, %v7221_v36  ;;  %v4232_v0 = vpop.eup %3079  ;;  %v688_v57 = vmul.f32 1.442695, %v605_v52 }
  0x95   : > { %v1533_v4 = vmax.f32 %v1531_v16, %v7226_v45  ;;  %7227 = vst [vmem:[#allocation29_spill] sm:$0xff] %v4232_v0  ;;  %v551_v8 = vrot.slane %v550_v23, 1  ;;  %v1469_v61 = vmax.f32 %v7229_v33, %v7228_v38  ;;  %v4243_v45 = vpop.eup %3081  ;;  %v7233_v16 = vld [vmem:[#allocation41_spill] sm:$0xff]  ;;  %v684_v9 = vmul.f32 1.442695, %v603_v20 }
  0x96   : > { %v1532_v21 = vmax.f32 %v1530_v62, %v7224_v54  ;;  %v7231_v54 = vsub.f32 0.0, %v7186_v24  ;;  %7232 = vst [vmem:[#allocation30_spill] sm:$0xff] %v4243_v45  ;;  %v7234_v36 = vsub.f32 0.0, %v7233_v16  ;;  %v4253_v33 = vpop.eup %3083  ;;  %v4257_v38 = vpack.c.bf16 %v4243_v45, %v4232_v0 }
  0x97   : > { %v1535_v11 = vmax.f32 %v1533_v4, %v7235_v41  ;;  %7237 = vst [vmem:[#allocation64_spill] sm:$0xff] %v4253_v33  ;;  %v4265_v4 = vpop.eup %3085  ;;  %v7243_v16 = vsub.f32 0.0, %v7242_v2  ;;  %v7253_v2 = vld [vmem:[#allocation47_spill] sm:$0xff] }
  0x98   : > { %v1470_v62 = vmax.f32 %v7231_v54, %v7230_v50  ;;  %v1534_v49 = vmax.f32 %v1532_v21, %v7234_v36  ;;  %7238 = vst [vmem:[#allocation65_spill] sm:$0xff] %v4257_v38  ;;  %v4259_v50 = vmax.f32 %v550_v23, %v551_v8  ;;  %v7239_v54 = vsub.f32 0.0, %v7191_v17  ;;  %7241 = vst [vmem:[#allocation66_spill] sm:$0xff] %v4265_v4 }
  0x99   : > { %v7240_v36 = vsub.f32 0.0, %v3956_v32  ;;  %v1537_v10 = vmax.f32 %v1535_v11, %v7245_v40  ;;  %2586 = vmatprep.subr.bf16.mxu1 %v4257_v38  ;;  %v4278_v23 = vpack.c.bf16 %v4265_v4, %v4253_v33  ;;  %v7249_v11 = vld [vmem:[#allocation46_spill] sm:$0xff]  ;;  %v7252_v4 = vsub.f32 0.0, %v3963_v30 }
  0x9a   : > { %v1471_v21 = vmax.f32 %v1469_v61, %v7239_v54  ;;  %v1536_v44 = vmax.f32 %v1534_v49, %v7243_v16  ;;  %v594_v8 = vsub.f32 %v7183_v1, %v4259_v50  ;;  %v596_v61 = vsub.f32 %v7186_v24, %v4259_v50 }
  0x9b   : > { %v1472_v41 = vmax.f32 %v1470_v62, %v7240_v36  ;;  %7246 = vst [vmem:[#allocation67_spill] sm:$0xff] %v4278_v23  ;;  %v598_v49 = vsub.f32 %v7187_v7, %v4259_v50  ;;  %v7247_v62 = vld [vmem:[#allocation45_spill] sm:$0xff]  ;;  %v7250_v52 = vsub.f32 0.0, %v7249_v11  ;;  %v600_v54 = vsub.f32 %v7188_v34, %v4259_v50  ;;  %v7258_v34 = vld [vmem:[#allocation56_spill] sm:$0xff] }
  0x9c   : > { %v7248_v16 = vsub.f32 0.0, %v7247_v62  ;;  %v7251_v36 = vsub.f32 0.0, %v3958_v25  ;;  %v666_v45 = vmul.f32 1.442695, %v594_v8  ;;  %v670_v0 = vmul.f32 1.442695, %v596_v61 }
  0x9d   : > { %v1539_v20 = vmax.f32 %v1537_v10, %v7250_v52  ;;  %v674_v43 = vmul.f32 1.442695, %v598_v49  ;;  %v1474_v33 = vmax.f32 %v1472_v41, %v7252_v4  ;;  %v7254_v7 = vsub.f32 0.0, %v7253_v2  ;;  %v7255_v62 = vld [vmem:[#allocation48_spill] sm:$0xff]  ;;  %v7260_v4 = vld [vmem:[#allocation49_spill] sm:$0xff]  ;;  %v7262_v49 = vld [vmem:[#allocation50_spill] sm:$0xff] }
  0x9e   : > { %v1538_v40 = vmax.f32 %v1536_v44, %v7248_v16  ;;  %v1473_v38 = vmax.f32 %v1471_v21, %v7251_v36  ;;  %v7256_v44 = vsub.f32 0.0, %v7255_v62  ;;  %v678_v11 = vmul.f32 1.442695, %v600_v54  ;;  %v7264_v54 = vld [vmem:[#allocation57_spill] sm:$0xff] }
  0x9f   : > { %v7257_v10 = vsub.f32 0.0, %v3965_v42  ;;  %3087 = vpow2.f32 %v666_v45  ;;  %v7259_v1 = vsub.f32 0.0, %v7258_v34  ;;  %v602_v8 = vsub.f32 %v7191_v17, %v4259_v50 }
  0xa0   : > { %v1540_v24 = vmax.f32 %v1538_v40, %v7254_v7  ;;  %v1541_v16 = vmax.f32 %v1539_v20, %v7256_v44  ;;  %v604_v41 = vsub.f32 %v3956_v32, %v4259_v50  ;;  %3089 = vpow2.f32 %v670_v0 }
  0xa1   : > { %v1475_v52 = vmax.f32 %v1473_v38, %v7257_v10  ;;  %v1476_v21 = vmax.f32 %v1474_v33, %v7259_v1  ;;  %v7261_v7 = vsub.f32 0.0, %v7260_v4  ;;  %v7263_v40 = vsub.f32 0.0, %v7262_v49  ;;  %v7268_v4 = vld [vmem:[#allocation21_spill] sm:$0xff] }
  0xa2   : > { %v7265_v36 = vsub.f32 0.0, %v7264_v54  ;;  %3091 = vpow2.f32 %v674_v43  ;;  %v7266_v45 = vsub.f32 0.0, %v7208_v46  ;;  %v682_v33 = vmul.f32 1.442695, %v602_v8 }
  0xa3   : > { %v1542_v61 = vmax.f32 %v1540_v24, %v7261_v7  ;;  %v1543_v20 = vmax.f32 %v1541_v16, %v7263_v40  ;;  %v686_v44 = vmul.f32 1.442695, %v604_v41  ;;  %3093 = vpow2.f32 %v678_v11 }
  0xa4   : > { %v1477_v38 = vmax.f32 %v1475_v52, %v7265_v36  ;;  %v1478_v1 = vmax.f32 %v1476_v21, %v7266_v45  ;;  %v7267_v62 = vsub.f32 0.0, %v7209_v19  ;;  %v607_v24 = vsub.f32 %v7268_v4, %v4160_v13  ;;  %v7270_v52 = vld [vmem:[#allocation22_spill] sm:$0xff] }
  0xa5   : > { %v1544_v10 = vmax.f32 %v1542_v61, %v1543_v20  ;;  %v7269_v7 = vsub.f32 0.0, %v7210_v6  ;;  %3095 = vpow2.f32 %v684_v9  ;;  %v609_v43 = vsub.f32 %v7270_v52, %v4160_v13 }
  0xa6   : > { %v1479_v0 = vmax.f32 %v1477_v38, %v7267_v62  ;;  %v606_v21 = vsub.f32 %v3958_v25, %v4259_v50  ;;  %v7271_v41 = vsub.f32 0.0, %v7214_v35  ;;  %3097 = vpow2.f32 %v688_v57 }
  0xa7   : > { %v1480_v16 = vmax.f32 %v1478_v1, %v7269_v7  ;;  %v1545_v8 = vrot.slane %v1544_v10, 4  ;;  %v692_v61 = vmul.f32 1.442695, %v607_v24  ;;  %v7272_v62 = vsub.f32 0.0, %v7215_v3 }
  0xa8   : > { %v1481_v11 = vmax.f32 %v1479_v0, %v7271_v41  ;;  %3099 = vpow2.f32 %v682_v33  ;;  %v696_v20 = vmul.f32 1.442695, %v609_v43  ;;  %v608_v9 = vsub.f32 %v3963_v30, %v4259_v50  ;;  %v7275_v0 = vld [vmem:[#allocation23_spill] sm:$0xff] }
  0xa9   : > { %v1482_v40 = vmax.f32 %v1480_v16, %v7272_v62  ;;  %v1546_v36 = vmax.f32 %v1544_v10, %v1545_v8  ;;  %v7273_v38 = vsub.f32 0.0, %v7216_v55  ;;  %3101 = vpow2.f32 %v686_v44  ;;  %v7277_v10 = vld [vmem:[#allocation24_spill] sm:$0xff]  ;;  %v4338_v41 = vpop.eup %3087 }
  0xaa   : > { %v690_v1 = vmul.f32 1.442695, %v606_v21  ;;  %v7274_v7 = vsub.f32 0.0, %v7171_v14  ;;  %3103 = vpow2.f32 %v692_v61  ;;  %v694_v57 = vmul.f32 1.442695, %v608_v9  ;;  %7278 = vst [vmem:[#allocation68_spill] sm:$0xff] %v4338_v41  ;;  %v4344_v62 = vpop.eup %3089 }
  0xab   : > { %v1483_v45 = vmax.f32 %v1481_v11, %v7273_v38  ;;  %v611_v24 = vsub.f32 %v7275_v0, %v4160_v13  ;;  %v1547_v16 = vrot.slane %v1546_v36, 2  ;;  %v7276_v33 = vsub.f32 0.0, %v7173_v5  ;;  %7280 = vst [vmem:[#allocation55_spill] sm:$0xff] %v4344_v62 }
  0xac   : > { %v1484_v49 = vmax.f32 %v1482_v40, %v7274_v7  ;;  %3105 = vpow2.f32 %v696_v20  ;;  %v613_v8 = vsub.f32 %v7277_v10, %v4160_v13  ;;  %v7279_v44 = vsub.f32 0.0, %v7175_v37 }
  0xad   : > { %v1485_v43 = vmax.f32 %v1483_v45, %v7276_v33  ;;  %3107 = vpow2.f32 %v690_v1  ;;  %v700_v11 = vmul.f32 1.442695, %v611_v24  ;;  %v610_v61 = vsub.f32 %v3965_v42, %v4259_v50  ;;  %v4348_v45 = vpop.eup %3091 }
  0xae   : > { %v1486_v21 = vmax.f32 %v1484_v49, %v7279_v44  ;;  %v1548_v40 = vmax.f32 %v1546_v36, %v1547_v16  ;;  %v7281_v9 = vsub.f32 0.0, %v4017_v60  ;;  %3109 = vpow2.f32 %v694_v57  ;;  %7282 = vst [vmem:[#allocation73_spill] sm:$0xff] %v4348_v45  ;;  %v4358_v33 = vpop.eup %3093 }
  0xaf   : > { %v704_v20 = vmul.f32 1.442695, %v613_v8  ;;  %v4352_v7 = vpack.c.bf16 %v4344_v62, %v4338_v41  ;;  %v7284_v49 = vsub.f32 0.0, %v4019_v12  ;;  %3111 = vpow2.f32 %v700_v11  ;;  %7285 = vst [vmem:[#allocation58_spill] sm:$0xff] %v4358_v33  ;;  %v4362_v8 = vpop.eup %3095 }
  0xb0   : > { %v1487_v38 = vmax.f32 %v1485_v43, %v7281_v9  ;;  %v612_v24 = vsub.f32 %v7258_v34, %v4259_v50  ;;  %v1549_v36 = vrot.slane %v1548_v40, 1  ;;  %v7286_v16 = vsub.f32 0.0, %v7176_v58  ;;  %7287 = vst [vmem:[#allocation59_spill] sm:$0xff] %v4362_v8  ;;  %v4372_v41 = vpop.eup %3097 }
  0xb1   : > { %7283 = vst [vmem:[#allocation75_spill] sm:$0xff] %v4352_v7  ;;  %v1488_v1 = vmax.f32 %v1486_v21, %v7284_v49  ;;  %3113 = vpow2.f32 %v704_v20  ;;  %v698_v43 = vmul.f32 1.442695, %v610_v61  ;;  %2588 = vmatpush1.bf16.msra.mxu1 %v4352_v7  ;;  %v4367_v44 = vpack.c.bf16 %v4358_v33, %v4348_v45  ;;  %v7289_v21 = vld [vmem:[#allocation74_spill] sm:$0xff]  ;;  %7291 = vst [vmem:[#allocation61_spill] sm:$0xff] %v4372_v41 }
  0xb2   : > { %v1489_v57 = vmax.f32 %v1487_v38, %v7286_v16  ;;  %v7290_v9 = vsub.f32 0.0, %v7177_v53  ;;  %v702_v62 = vmul.f32 1.442695, %v612_v24  ;;  %2590 = vmatprep.subr.bf16.mxu1 %v4278_v23  ;;  %v4375_v38 = vmax.f32 %v1548_v40, %v1549_v36  ;;  %v4380_v7 = vpop.eup %3099  ;;  %v7296_v24 = vld [vmem:[#allocation25_spill] sm:$0xff] }
  0xb3   : > { %7288 = vst [vmem:[#allocation60_spill] sm:$0xff] %v4367_v44  ;;  %v7292_v20 = vsub.f32 0.0, %v7178_v26  ;;  %3115 = vpow2.f32 %v698_v43  ;;  %7293 = vst [vmem:[#allocation62_spill] sm:$0xff] %v4380_v7  ;;  %v7294_v11 = vsub.f32 0.0, %v4034_v15  ;;  %v615_v40 = vsub.f32 %v7296_v24, %v4160_v13  ;;  %v4390_v36 = vpop.eup %3101  ;;  %v7300_v43 = vld [vmem:[#allocation17_spill] sm:$0xff] }
  0xb4   : > { %v1490_v49 = vmax.f32 %v1488_v1, %v7290_v9  ;;  %v4386_v1 = vpack.c.bf16 %v4372_v41, %v4362_v8  ;;  %3117 = vpow2.f32 %v702_v62  ;;  %7297 = vst [vmem:[#allocation20_spill] sm:$0xff] %v4390_v36  ;;  %v7298_v9 = vld [vmem:[#allocation16_spill] sm:$0xff]  ;;  %v7303_v41 = vld [vmem:[#allocation18_spill] sm:$0xff]  ;;  %v4403_v45 = vpop.eup %3103  ;;  %v7306_v2 = vsub.f32 0.0, %v4038_v39 }
  0xb5   : > { %v1491_v16 = vmax.f32 %v1489_v57, %v7292_v20  ;;  %v7299_v61 = vsub.f32 0.0, %v7298_v9  ;;  %v7301_v20 = vsub.f32 0.0, %v7300_v43  ;;  %v7304_v8 = vsub.f32 0.0, %v7303_v41  ;;  %7305 = vst [vmem:[#allocation56_spill] sm:$0xff] %v4403_v45  ;;  %2592 = vmatpush1.bf16.msra.mxu1 %v4367_v44 }
  0xb6   : > { %v1492_v33 = vmax.f32 %v1490_v49, %v7294_v11  ;;  %7295 = vst [vmem:[#allocation63_spill] sm:$0xff] %v4386_v1  ;;  %v7302_v11 = vsub.f32 0.0, %v4036_v47  ;;  %v4413_v43 = vpack.c.bf16 %v4390_v36, %v4380_v7  ;;  %v7312_v44 = vsub.f32 0.0, %v4040_v51  ;;  %2594 = vmatprep.subr.bf16.mxu1 %v4386_v1 }
  0xb7   : > { %v1552_v57 = vsub.f32 %v7299_v61, %v4375_v38  ;;  %v1554_v23 = vsub.f32 %v7301_v20, %v4375_v38  ;;  %v1556_v62 = vsub.f32 %v7304_v8, %v4375_v38  ;;  %v7307_v61 = vld [vmem:[#allocation19_spill] sm:$0xff]  ;;  %v4418_v8 = vpop.eup %3105 }
  0xb8   : > { %v1493_v49 = vmax.f32 %v1491_v16, %v7302_v11  ;;  %v1494_v15 = vmax.f32 %v1492_v33, %v7306_v2  ;;  %v7308_v9 = vsub.f32 0.0, %v7307_v61  ;;  %7309 = vst [vmem:[#allocation57_spill] sm:$0xff] %v4413_v43  ;;  %v7310_v16 = vsub.f32 0.0, %v3829_v56  ;;  %7311 = vst [vmem:[#allocation21_spill] sm:$0xff] %v4418_v8  ;;  %v7313_v2 = vld [vmem:[#allocation26_spill] sm:$0xff]  ;;  %v4425_v61 = vpop.eup %3107 }
  0xb9   : > { %v1625_v20 = vmul.f32 1.442695, %v1552_v57  ;;  %v1629_v11 = vmul.f32 1.442695, %v1554_v23  ;;  %v617_v33 = vsub.f32 %v7313_v2, %v4160_v13  ;;  %7314 = vst [vmem:[#allocation22_spill] sm:$0xff] %v4425_v61  ;;  %v4431_v56 = vpack.c.bf16 %v4418_v8, %v4403_v45  ;;  %2596 = vmatpush1.bf16.msra.mxu1 %v4413_v43 }
  0xba   : > { %v1558_v26 = vsub.f32 %v7308_v9, %v4375_v38  ;;  %v1560_v41 = vsub.f32 %v7310_v16, %v4375_v38  ;;  %v1495_v39 = vmax.f32 %v1493_v49, %v7312_v44  ;;  %v7315_v9 = vsub.f32 0.0, %v4045_v27  ;;  %v4436_v44 = vpop.eup %3109 }
  0xbb   : > { %v1633_v7 = vmul.f32 1.442695, %v1556_v62  ;;  %7316 = vst [vmem:[#allocation23_spill] sm:$0xff] %v4431_v56  ;;  %v7317_v23 = vsub.f32 0.0, %v7236_v31  ;;  %7318 = vst [vmem:[#allocation24_spill] sm:$0xff] %v4436_v44  ;;  %3119 = vpow2.f32 %v1625_v20  ;;  %v7319_v49 = vsub.f32 0.0, %v4047_v18  ;;  %v4443_v62 = vpop.eup %3111  ;;  %2598 = vmatprep.subr.bf16.mxu1 %v4431_v56 }
  0xbc   : > { %v1496_v36 = vmax.f32 %v1494_v15, %v7315_v9  ;;  %v1637_v1 = vmul.f32 1.442695, %v1558_v26  ;;  %v7320_v27 = vsub.f32 0.0, %v7268_v4  ;;  %7321 = vst [vmem:[#allocation74_spill] sm:$0xff] %v4443_v62  ;;  %3121 = vpow2.f32 %v1629_v11 }
  0xbd   : > { %v1562_v57 = vsub.f32 %v7317_v23, %v4375_v38  ;;  %v1497_v16 = vmax.f32 %v1495_v39, %v7319_v49  ;;  %v7322_v9 = vsub.f32 0.0, %v4049_v22  ;;  %v1641_v31 = vmul.f32 1.442695, %v1560_v41  ;;  %v4452_v23 = vpop.eup %3113 }
  0xbe   : > { %v1564_v15 = vsub.f32 %v7320_v27, %v4375_v38  ;;  %v4450_v20 = vpack.c.bf16 %v4436_v44, %v4425_v61  ;;  %7324 = vst [vmem:[#allocation16_spill] sm:$0xff] %v4452_v23  ;;  %v7325_v39 = vsub.f32 0.0, %v4051_v48  ;;  %v7326_v4 = vsub.f32 0.0, %v7270_v52  ;;  %v4466_v43 = vpop.eup %3115 }
  0xbf   : > { %v1498_v8 = vmax.f32 %v1496_v36, %v7322_v9  ;;  %v1645_v27 = vmul.f32 1.442695, %v1562_v57  ;;  %v7327_v36 = vsub.f32 0.0, %v7199_v29  ;;  %3123 = vpow2.f32 %v1633_v7  ;;  %7329 = vst [vmem:[#allocation18_spill] sm:$0xff] %v4466_v43  ;;  %v4473_v56 = vpop.eup %3117 }
  0xc0   : > { %7323 = vst [vmem:[#allocation25_spill] sm:$0xff] %v4450_v20  ;;  %v1499_v26 = vmax.f32 %v1497_v16, %v7325_v39  ;;  %v1566_v11 = vsub.f32 %v7326_v4, %v4375_v38  ;;  %v4464_v41 = vpack.c.bf16 %v4452_v23, %v4443_v62  ;;  %v1649_v9 = vmul.f32 1.442695, %v1564_v15  ;;  %7332 = vst [vmem:[#allocation19_spill] sm:$0xff] %v4473_v56  ;;  %v7357_v23 = vld [vmem:[#allocation52_spill] sm:$0xff] }
  0xc1   : > { %v1500_v49 = vmax.f32 %v1498_v8, %v7327_v36  ;;  %v7330_v16 = vsub.f32 0.0, %v7289_v21  ;;  %3125 = vpow2.f32 %v1637_v1  ;;  %v708_v57 = vmul.f32 1.442695, %v615_v40  ;;  %2600 = vmatpush1.bf16.msra.mxu1 %v4450_v20 }
  0xc2   : > { %7328 = vst [vmem:[#allocation17_spill] sm:$0xff] %v4464_v41  ;;  %v7331_v52 = vsub.f32 0.0, %v7275_v0  ;;  %v7333_v7 = vsub.f32 0.0, %v7205_v63  ;;  %3127 = vpow2.f32 %v1641_v31  ;;  %v712_v15 = vmul.f32 1.442695, %v617_v33  ;;  %2602 = vmatprep.subr.bf16.mxu1 %v4464_v41 }
  0xc3   : > { %v1501_v39 = vmax.f32 %v1499_v26, %v7330_v16  ;;  %v614_v36 = vsub.f32 %v7264_v54, %v4259_v50  ;;  %3129 = vpow2.f32 %v1645_v27  ;;  %v1653_v1 = vmul.f32 1.442695, %v1566_v11  ;;  %v7336_v27 = vld [vmem:[#allocation27_spill] sm:$0xff]  ;;  %v7337_v11 = vld [vmem:[#allocation28_spill] sm:$0xff] }
  0xc4   : > { %v1568_v4 = vsub.f32 %v7331_v52, %v4375_v38  ;;  %v1502_v8 = vmax.f32 %v1500_v49, %v7333_v7  ;;  %v4483_v0 = vpack.c.bf16 %v4473_v56, %v4466_v43  ;;  %v616_v40 = vsub.f32 %v7208_v46, %v4259_v50 }
  0xc5   : > { %3131 = vpow2.f32 %v1649_v9  ;;  %v7335_v31 = vsub.f32 0.0, %v7277_v10  ;;  %v706_v16 = vmul.f32 1.442695, %v614_v36  ;;  %v619_v52 = vsub.f32 %v7336_v27, %v4160_v13  ;;  %v4498_v10 = vpop.eup %3119 }
  0xc6   : > { %7334 = vst [vmem:[#allocation26_spill] sm:$0xff] %v4483_v0  ;;  %v1503_v26 = vmax.f32 %v1501_v39, %v1502_v8  ;;  %v1657_v49 = vmul.f32 1.442695, %v1568_v4  ;;  %3133 = vpow2.f32 %v708_v57  ;;  %v621_v7 = vsub.f32 %v7337_v11, %v4160_v13  ;;  %2604 = vmatpush1.bf16.msra.mxu1 %v4483_v0  ;;  %v4502_v8 = vpop.eup %3121 }
  0xc7   : > { %v1570_v33 = vsub.f32 %v7335_v31, %v4375_v38  ;;  %3135 = vpow2.f32 %v712_v15  ;;  %v710_v20 = vmul.f32 1.442695, %v616_v40  ;;  %v7338_v9 = vsub.f32 0.0, %v7296_v24 }
  0xc8   : > { %v1504_v41 = vrot.slane %v1503_v26, 4  ;;  %3137 = vpow2.f32 %v1653_v1  ;;  %v716_v57 = vmul.f32 1.442695, %v619_v52  ;;  %v618_v4 = vsub.f32 %v7209_v19, %v4259_v50 }
  0xc9   : > { %v1572_v39 = vsub.f32 %v7338_v9, %v4375_v38  ;;  %3139 = vpow2.f32 %v1657_v49  ;;  %v1661_v31 = vmul.f32 1.442695, %v1570_v33  ;;  %v720_v56 = vmul.f32 1.442695, %v621_v7  ;;  %v4513_v52 = vpop.eup %3123 }
  0xca   : > { %v1505_v36 = vmax.f32 %v1503_v26, %v1504_v41  ;;  %v4506_v15 = vpack.c.bf16 %v4502_v8, %v4498_v10  ;;  %3141 = vpow2.f32 %v706_v16  ;;  %v7340_v24 = vsub.f32 0.0, %v7313_v2  ;;  %7341 = vst [vmem:[#allocation28_spill] sm:$0xff] %v4513_v52 }
  0xcb   : > { %v620_v1 = vsub.f32 %v7210_v6, %v4259_v50  ;;  %3143 = vpow2.f32 %v710_v20  ;;  %v1665_v41 = vmul.f32 1.442695, %v1572_v39  ;;  %v4515_v26 = vpop.eup %3125  ;;  %v714_v33 = vmul.f32 1.442695, %v618_v4 }
  0xcc   : > { %7339 = vst [vmem:[#allocation27_spill] sm:$0xff] %v4506_v15  ;;  %v1574_v40 = vsub.f32 %v7340_v24, %v4375_v38  ;;  %v1506_v9 = vrot.slane %v1505_v36, 2  ;;  %7342 = vst [vmem:[#allocation76_spill] sm:$0xff] %v4515_v26  ;;  %2802 = vmatprep.subr.bf16.mxu0 %v4506_v15  ;;  %3145 = vpow2.f32 %v716_v57  ;;  %v623_v49 = vsub.f32 %v7164_v59, %v4160_v13  ;;  %v4520_v16 = vpop.eup %3127 }
  0xcd   : > { %7343 = vst [vmem:[#allocation77_spill] sm:$0xff] %v4520_v16  ;;  %3147 = vpow2.f32 %v720_v56  ;;  %v718_v7 = vmul.f32 1.442695, %v620_v1  ;;  %v625_v24 = vsub.f32 %v7166_v28, %v4160_v13  ;;  %v4524_v0 = vpop.eup %3129  ;;  %v7345_v39 = vsub.f32 0.0, %v7336_v27 }
  0xce   : > { %v1507_v2 = vmax.f32 %v1505_v36, %v1506_v9  ;;  %7344 = vst [vmem:[#allocation78_spill] sm:$0xff] %v4524_v0  ;;  %3149 = vpow2.f32 %v1661_v31  ;;  %v1669_v20 = vmul.f32 1.442695, %v1574_v40  ;;  %v4535_v56 = vpack.c.bf16 %v4515_v26, %v4513_v52 }
  0xcf   : > { %v1576_v57 = vsub.f32 %v7345_v39, %v4375_v38  ;;  %v4529_v4 = vpop.eup %3131  ;;  %3151 = vpow2.f32 %v1665_v41  ;;  %v724_v36 = vmul.f32 1.442695, %v623_v49  ;;  %v4543_v27 = vpack.c.bf16 %v4524_v0, %v4520_v16  ;;  %v7355_v39 = vld [vmem:[#allocation51_spill] sm:$0xff]  ;;  %v7361_v0 = vld [vmem:[#allocation54_spill] sm:$0xff] }
  0xd0   : > { %7346 = vst [vmem:[#allocation79_spill] sm:$0xff] %v4529_v4  ;;  %v1508_v15 = vrot.slane %v1507_v2, 1  ;;  %v4531_v43 = vpop.eup %3133  ;;  %7348 = vst [vmem:[#allocation81_spill] sm:$0xff] %v4535_v56  ;;  %3153 = vpow2.f32 %v714_v33  ;;  %v4545_v40 = vmul.f32 1.442695, %v625_v24  ;;  %v7353_v33 = vsub.f32 0.0, %v7337_v11 }
  0xd1   : > { %7347 = vst [vmem:[#allocation80_spill] sm:$0xff] %v4531_v43  ;;  %v4537_v1 = vpop.eup %3135  ;;  %7350 = vst [vmem:[#allocation83_spill] sm:$0xff] %v4543_v27  ;;  %3155 = vpow2.f32 %v718_v7  ;;  %v7356_v7 = vsub.f32 0.0, %v7355_v39  ;;  %v7358_v62 = vsub.f32 0.0, %v7357_v23  ;;  %v7362_v11 = vsub.f32 0.0, %v7361_v0 }
  0xd2   : > { %7349 = vst [vmem:[#allocation82_spill] sm:$0xff] %v4537_v1  ;;  %v4539_v31 = vmax.f32 %v1507_v2, %v1508_v15  ;;  %v4547_v9 = vpop.eup %3137  ;;  %v4551_v41 = vpack.c.bf16 %v4537_v1, %v4531_v43  ;;  %3157 = vpow2.f32 %v1669_v20  ;;  %v1578_v49 = vsub.f32 %v7353_v33, %v4375_v38  ;;  %v7359_v1 = vld [vmem:[#allocation53_spill] sm:$0xff] }
  0xd3   : > { %7351 = vst [vmem:[#allocation84_spill] sm:$0xff] %v4547_v9  ;;  %v4556_v15 = vmul.f32 1.442695, %v1576_v57  ;;  %v4558_v2 = vpop.eup %3139  ;;  %v7360_v43 = vsub.f32 0.0, %v7359_v1  ;;  %v7364_v16 = vsub.f32 0.0, %v7191_v17  ;;  %v7365_v39 = vsub.f32 0.0, %v3956_v32 }
  0xd4   : > { %7352 = vst [vmem:[#allocation85_spill] sm:$0xff] %v4551_v41  ;;  %7354 = vst [vmem:[#allocation86_spill] sm:$0xff] %v4558_v2  ;;  %v1551_v24 = vsub.f32 %v7356_v7, %v4539_v31  ;;  %v1553_v44 = vsub.f32 %v7358_v62, %v4539_v31  ;;  %v1557_v33 = vsub.f32 %v7362_v11, %v4539_v31  ;;  %v4572_v57 = vpop.eup %3141  ;;  %2606 = vmatprep.subr.bf16.mxu1 %v4551_v41 }
  0xd5   : > { %v1555_v20 = vsub.f32 %v7360_v43, %v4539_v31  ;;  %7363 = vst [vmem:[#allocation51_spill] sm:$0xff] %v4572_v57  ;;  %v1559_v61 = vsub.f32 %v7364_v16, %v4539_v31  ;;  %v1561_v7 = vsub.f32 %v7365_v39, %v4539_v31  ;;  %v622_v62 = vsub.f32 %v7214_v35, %v4259_v50  ;;  %v4585_v23 = vpop.eup %3143 }
  0xd6   : > { %v624_v43 = vsub.f32 %v7215_v3, %v4259_v50  ;;  %7366 = vst [vmem:[#allocation52_spill] sm:$0xff] %v4585_v23  ;;  %v1623_v0 = vmul.f32 1.442695, %v1551_v24  ;;  %v1627_v1 = vmul.f32 1.442695, %v1553_v44  ;;  %v7367_v17 = vsub.f32 0.0, %v3958_v25  ;;  %v4590_v45 = vpop.eup %3145 }
  0xd7   : > { %v1631_v11 = vmul.f32 1.442695, %v1555_v20  ;;  %7368 = vst [vmem:[#allocation53_spill] sm:$0xff] %v4590_v45  ;;  %v1635_v32 = vmul.f32 1.442695, %v1557_v33  ;;  %v7369_v39 = vsub.f32 0.0, %v3963_v30  ;;  %v4597_v26 = vpack.c.bf16 %v4585_v23, %v4572_v57  ;;  %v4599_v52 = vpop.eup %3147 }
  0xd8   : > { %v1563_v16 = vsub.f32 %v7367_v17, %v4539_v31  ;;  %3159 = vpow2.f32 %v724_v36  ;;  %7371 = vst [vmem:[#allocation87_spill] sm:$0xff] %v4599_v52  ;;  %v1639_v44 = vmul.f32 1.442695, %v1559_v61  ;;  %v4603_v25 = vpack.c.bf16 %v4547_v9, %v4529_v4  ;;  %v4608_v33 = vpop.eup %3149  ;;  %v7406_v9 = vld [vmem:[#allocation35_spill] sm:$0xff] }
  0xd9   : > { %v1565_v41 = vsub.f32 %v7369_v39, %v4539_v31  ;;  %7370 = vst [vmem:[#allocation54_spill] sm:$0xff] %v4597_v26  ;;  %3161 = vpow2.f32 %v1623_v0  ;;  %v7373_v24 = vsub.f32 0.0, %v3965_v42  ;;  %7374 = vst [vmem:[#allocation89_spill] sm:$0xff] %v4608_v33  ;;  %v1643_v30 = vmul.f32 1.442695, %v1561_v7  ;;  %2608 = vmatpush1.bf16.msra.mxu1 %v4597_v26  ;;  %v4618_v0 = vpop.eup %3151 }
  0xda   : > { %7372 = vst [vmem:[#allocation88_spill] sm:$0xff] %v4603_v25  ;;  %3163 = vpow2.f32 %v1627_v1  ;;  %v7375_v36 = vsub.f32 0.0, %v7258_v34  ;;  %v4616_v61 = vpack.c.bf16 %v4599_v52, %v4590_v45  ;;  %7377 = vst [vmem:[#allocation91_spill] sm:$0xff] %v4618_v0  ;;  %v1647_v39 = vmul.f32 1.442695, %v1563_v16  ;;  %v4623_v7 = vpop.eup %3153  ;;  %v7381_v52 = vld [vmem:[#allocation31_spill] sm:$0xff] }
  0xdb   : > { %v1567_v20 = vsub.f32 %v7373_v24, %v4539_v31  ;;  %3165 = vpow2.f32 %v1631_v11  ;;  %v7378_v42 = vsub.f32 0.0, %v7264_v54  ;;  %v1677_v1 = vmul.f32 1.442695, %v1578_v49  ;;  %7379 = vst [vmem:[#allocation92_spill] sm:$0xff] %v4623_v7  ;;  %v4631_v11 = vpop.eup %3155 }
  0xdc   : > { %v1569_v17 = vsub.f32 %v7375_v36, %v4539_v31  ;;  %7376 = vst [vmem:[#allocation90_spill] sm:$0xff] %v4616_v61  ;;  %3167 = vpow2.f32 %v1635_v32  ;;  %v1651_v26 = vmul.f32 1.442695, %v1565_v41  ;;  %2610 = vmatprep.subr.bf16.mxu1 %v4616_v61  ;;  %v7380_v34 = vsub.f32 0.0, %v7208_v46  ;;  %7382 = vst [vmem:[#allocation31_spill] sm:$0xff] %v4631_v11  ;;  %v4633_v49 = vpop.eup %3157 }
  0xdd   : > { %v1571_v24 = vsub.f32 %v7378_v42, %v4539_v31  ;;  %v627_v45 = vsub.f32 %v7381_v52, %v4160_v13  ;;  %3169 = vpow2.f32 %v1639_v44  ;;  %v1655_v16 = vmul.f32 1.442695, %v1567_v20  ;;  %7383 = vst [vmem:[#allocation93_spill] sm:$0xff] %v4633_v49 }
  0xde   : > { %v1573_v36 = vsub.f32 %v7380_v34, %v4539_v31  ;;  %v722_v54 = vmul.f32 1.442695, %v622_v62  ;;  %v726_v42 = vmul.f32 1.442695, %v624_v43  ;;  %3171 = vpow2.f32 %v1643_v30  ;;  %v7387_v62 = vld [vmem:[#allocation32_spill] sm:$0xff] }
  0xdf   : > { %v1659_v32 = vmul.f32 1.442695, %v1569_v17  ;;  %v4637_v41 = vpack.c.bf16 %v4631_v11, %v4623_v7  ;;  %v7385_v46 = vsub.f32 0.0, %v7209_v19  ;;  %3173 = vpow2.f32 %v1647_v39 }
  0xe0   : > { %v1663_v61 = vmul.f32 1.442695, %v1571_v24  ;;  %v7386_v44 = vsub.f32 0.0, %v7210_v6  ;;  %v629_v43 = vsub.f32 %v7387_v62, %v4160_v13  ;;  %3175 = vpow2.f32 %v1651_v26 }
  0xe1   : > { %7384 = vst [vmem:[#allocation94_spill] sm:$0xff] %v4637_v41  ;;  %v1575_v34 = vsub.f32 %v7385_v46, %v4539_v31  ;;  %2612 = vmatpush1.bf16.msra.mxu1 %v4637_v41  ;;  %v1667_v30 = vmul.f32 1.442695, %v1573_v36  ;;  %v7388_v17 = vsub.f32 0.0, %v7164_v59  ;;  %v7389_v19 = vsub.f32 0.0, %v7166_v28 }
  0xe2   : > { %v1577_v20 = vsub.f32 %v7386_v44, %v4539_v31  ;;  %v4656_v24 = vpack.c.bf16 %v4608_v33, %v4558_v2  ;;  %3177 = vpow2.f32 %v1655_v16  ;;  %v732_v6 = vmul.f32 1.442695, %v627_v45  ;;  %v4660_v46 = vpop.eup %3159 }
  0xe3   : > { %v1580_v11 = vsub.f32 %v7388_v17, %v4375_v38  ;;  %v1582_v39 = vsub.f32 %v7389_v19, %v4375_v38  ;;  %v626_v26 = vsub.f32 %v7216_v55, %v4259_v50  ;;  %7391 = vst [vmem:[#allocation95_spill] sm:$0xff] %v4660_v46  ;;  %3179 = vpow2.f32 %v1659_v32  ;;  %v4668_v44 = vpop.eup %3161 }
  0xe4   : > { %7390 = vst [vmem:[#allocation32_spill] sm:$0xff] %v4656_v24  ;;  %v4664_v59 = vpack.c.bf16 %v4633_v49, %v4618_v0  ;;  %v1671_v36 = vmul.f32 1.442695, %v1575_v34  ;;  %v628_v28 = vsub.f32 %v7171_v14, %v4259_v50  ;;  %3181 = vpow2.f32 %v1663_v61  ;;  %v4673_v41 = vpop.eup %3163 }
  0xe5   : > { %v1675_v17 = vmul.f32 1.442695, %v1577_v20  ;;  %v736_v16 = vmul.f32 1.442695, %v629_v43  ;;  %v7393_v45 = vsub.f32 0.0, %v7214_v35  ;;  %3183 = vpow2.f32 %v1667_v30  ;;  %v4678_v0 = vpop.eup %3165  ;;  %v7396_v35 = vld [vmem:[#allocation33_spill] sm:$0xff] }
  0xe6   : > { %7392 = vst [vmem:[#allocation96_spill] sm:$0xff] %v4664_v59  ;;  %v1681_v32 = vmul.f32 1.442695, %v1580_v11  ;;  %v1685_v7 = vmul.f32 1.442695, %v1582_v39  ;;  %v7394_v34 = vsub.f32 0.0, %v7215_v3  ;;  %v4682_v61 = vpack.c.bf16 %v4673_v41, %v4668_v44 }
  0xe7   : > { %v1579_v19 = vsub.f32 %v7393_v45, %v4539_v31  ;;  %3185 = vpow2.f32 %v4545_v40  ;;  %v730_v20 = vmul.f32 1.442695, %v626_v26  ;;  %v631_v43 = vsub.f32 %v7396_v35, %v4160_v13  ;;  %v4687_v45 = vpop.eup %3167  ;;  %v7397_v3 = vld [vmem:[#allocation34_spill] sm:$0xff] }
  0xe8   : > { %v1581_v49 = vsub.f32 %v7394_v34, %v4539_v31  ;;  %7395 = vst [vmem:[#allocation97_spill] sm:$0xff] %v4682_v61  ;;  %3187 = vpow2.f32 %v4556_v15  ;;  %v734_v11 = vmul.f32 1.442695, %v628_v28  ;;  %v633_v30 = vsub.f32 %v7397_v3, %v4160_v13  ;;  %v4695_v23 = vpop.eup %3169  ;;  %2804 = vmatpush1.bf16.msra.mxu0 %v4682_v61 }
  0xe9   : > { %v7398_v39 = vsub.f32 0.0, %v7381_v52  ;;  %7399 = vst [vmem:[#allocation33_spill] sm:$0xff] %v4695_v23  ;;  %v4700_v40 = vpack.c.bf16 %v4687_v45, %v4678_v0  ;;  %3189 = vpow2.f32 %v1677_v1  ;;  %v1679_v26 = vmul.f32 1.442695, %v1579_v19  ;;  %v4705_v33 = vpop.eup %3171  ;;  %2806 = vmatprep.subr.bf16.mxu0 %v4535_v56 }
  0xea   : > { %v7401_v15 = vsub.f32 0.0, %v7387_v62  ;;  %7402 = vst [vmem:[#allocation98_spill] sm:$0xff] %v4705_v33  ;;  %3191 = vpow2.f32 %v722_v54  ;;  %v1683_v52 = vmul.f32 1.442695, %v1581_v49  ;;  %v632_v61 = vsub.f32 %v7175_v37, %v4259_v50  ;;  %v4712_v57 = vpop.eup %3173 }
  0xeb   : > { %v1584_v34 = vsub.f32 %v7398_v39, %v4375_v38  ;;  %7400 = vst [vmem:[#allocation34_spill] sm:$0xff] %v4700_v40  ;;  %v630_v39 = vsub.f32 %v7173_v5, %v4259_v50  ;;  %3193 = vpow2.f32 %v726_v42  ;;  %v4714_v1 = vmul.f32 1.442695, %v631_v43  ;;  %v4722_v49 = vpop.eup %3175  ;;  %v7409_v43 = vld [vmem:[#allocation36_spill] sm:$0xff] }
  0xec   : > { %v1586_v28 = vsub.f32 %v7401_v15, %v4375_v38  ;;  %v7403_v62 = vsub.f32 0.0, %v7216_v55  ;;  %v7404_v15 = vsub.f32 0.0, %v7171_v14  ;;  %7405 = vst [vmem:[#allocation99_spill] sm:$0xff] %v4722_v49  ;;  %3195 = vpow2.f32 %v1671_v36  ;;  %v4728_v42 = vpop.eup %3177  ;;  %2808 = vmatpush1.bf16.msra.mxu0 %v4700_v40 }
  0xed   : > { %v744_v56 = vmul.f32 1.442695, %v633_v30  ;;  %v4724_v2 = vmul.f32 1.442695, %v1584_v34  ;;  %v635_v4 = vsub.f32 %v7406_v9, %v4160_v13  ;;  %7407 = vst [vmem:[#allocation35_spill] sm:$0xff] %v4728_v42  ;;  %v4733_v55 = vpack.c.bf16 %v4705_v33, %v4695_v23  ;;  %v4739_v30 = vpop.eup %3179  ;;  %2810 = vmatprep.subr.bf16.mxu0 %v4543_v27 }
  0xee   : > { %v1583_v19 = vsub.f32 %v7403_v62, %v4539_v31  ;;  %v1585_v54 = vsub.f32 %v7404_v15, %v4539_v31  ;;  %3197 = vpow2.f32 %v1675_v17  ;;  %v4735_v14 = vmul.f32 1.442695, %v1586_v28  ;;  %7410 = vst [vmem:[#allocation36_spill] sm:$0xff] %v4739_v30  ;;  %v4749_v33 = vpop.eup %3181 }
  0xef   : > { %7408 = vst [vmem:[#allocation100_spill] sm:$0xff] %v4733_v55  ;;  %v637_v36 = vsub.f32 %v7409_v43, %v4160_v13  ;;  %3199 = vpow2.f32 %v732_v6  ;;  %v4742_v34 = vmul.f32 1.442695, %v630_v39  ;;  %v4744_v62 = vmul.f32 1.442695, %v632_v61  ;;  %7412 = vst [vmem:[#allocation101_spill] sm:$0xff] %v4749_v33  ;;  %v4758_v6 = vpop.eup %3183 }
  0xf0   : > { %v7411_v15 = vsub.f32 0.0, %v7396_v35  ;;  %3201 = vpow2.f32 %v736_v16  ;;  %v4751_v17 = vmul.f32 1.442695, %v1583_v19  ;;  %v4753_v28 = vmul.f32 1.442695, %v1585_v54  ;;  %7414 = vst [vmem:[#allocation102_spill] sm:$0xff] %v4758_v6  ;;  %2812 = vmatpush1.bf16.msra.mxu0 %v4733_v55 }
  0xf1   : > { %v7413_v23 = vsub.f32 0.0, %v7397_v3  ;;  %3203 = vpow2.f32 %v1681_v32  ;;  %v4760_v61 = vmul.f32 1.442695, %v635_v4  ;;  %v634_v35 = vsub.f32 %v4017_v60, %v4259_v50  ;;  %v4766_v16 = vpop.eup %3185  ;;  %2814 = vmatprep.subr.bf16.mxu0 %v4603_v25  ;;  %v7423_v55 = vld [vmem:[#allocation37_spill] sm:$0xff] }
  0xf2   : > { %v1588_v40 = vsub.f32 %v7411_v15, %v4375_v38  ;;  %v636_v39 = vsub.f32 %v4019_v12, %v4259_v50  ;;  %7415 = vst [vmem:[#allocation103_spill] sm:$0xff] %v4766_v16  ;;  %v4771_v19 = vpack.c.bf16 %v4722_v49, %v4712_v57  ;;  %3205 = vpow2.f32 %v1685_v7  ;;  %v4778_v3 = vpop.eup %3187 }
  0xf3   : > { %v1590_v27 = vsub.f32 %v7413_v23, %v4375_v38  ;;  %v4773_v23 = vmul.f32 1.442695, %v637_v36  ;;  %v7417_v4 = vsub.f32 0.0, %v7173_v5  ;;  %7418 = vst [vmem:[#allocation105_spill] sm:$0xff] %v4778_v3  ;;  %v4783_v54 = vpack.c.bf16 %v4739_v30, %v4728_v42  ;;  %v4791_v36 = vpop.eup %3189 }
  0xf4   : > { %7416 = vst [vmem:[#allocation104_spill] sm:$0xff] %v4771_v19  ;;  %v4787_v15 = vpack.c.bf16 %v4766_v16, %v4660_v46  ;;  %3207 = vpow2.f32 %v730_v20  ;;  %v4789_v7 = vmul.f32 1.442695, %v1588_v40  ;;  %7421 = vst [vmem:[#allocation108_spill] sm:$0xff] %v4791_v36  ;;  %v639_v30 = vsub.f32 %v7423_v55, %v4160_v13  ;;  %v4800_v42 = vpop.eup %3191  ;;  %2816 = vmatpush1.bf16.msra.mxu0 %v4771_v19 }
  0xf5   : > { %v1587_v32 = vsub.f32 %v7417_v4, %v4539_v31  ;;  %7419 = vst [vmem:[#allocation106_spill] sm:$0xff] %v4783_v54  ;;  %3209 = vpow2.f32 %v734_v11  ;;  %v4793_v5 = vmul.f32 1.442695, %v1590_v27  ;;  %v7422_v4 = vsub.f32 0.0, %v7175_v37  ;;  %7424 = vst [vmem:[#allocation37_spill] sm:$0xff] %v4800_v42  ;;  %v7425_v11 = vld [vmem:[#allocation38_spill] sm:$0xff]  ;;  %v4809_v16 = vpop.eup %3193  ;;  %2818 = vmatprep.subr.bf16.mxu0 %v4656_v24  ;;  %v821_v24 = vpop.xlane.xlu0 %820 }
  0xf6   : > { %7420 = vst [vmem:[#allocation107_spill] sm:$0xff] %v4787_v15  ;;  %2614 = vmatprep.subr.bf16.mxu1 %v4787_v15  ;;  %3211 = vpow2.f32 %v1679_v26  ;;  %v4803_v20 = vmul.f32 1.442695, %v634_v35  ;;  %v4805_v40 = vmul.f32 1.442695, %v636_v39  ;;  %v641_v27 = vsub.f32 %v7425_v11, %v4160_v13  ;;  %7426 = vst [vmem:[#allocation38_spill] sm:$0xff] %v4809_v16  ;;  %v4820_v39 = vpop.eup %3195 }
  0xf7   : > { %v1589_v25 = vsub.f32 %v7422_v4, %v4539_v31  ;;  %3213 = vpow2.f32 %v1683_v52  ;;  %v4812_v37 = vmul.f32 1.442695, %v1587_v32  ;;  %v7427_v4 = vsub.f32 0.0, %v7406_v9  ;;  %7429 = vst [vmem:[#allocation109_spill] sm:$0xff] %v4820_v39 }
  0xf8   : > { %v7428_v26 = vsub.f32 0.0, %v7409_v43  ;;  %v4825_v15 = vpack.c.bf16 %v4758_v6, %v4749_v33  ;;  %v4829_v52 = vpack.c.bf16 %v4809_v16, %v4800_v42  ;;  %3215 = vpow2.f32 %v4714_v1  ;;  %v4834_v32 = vpop.eup %3197  ;;  %2820 = vmatpush1.bf16.msra.mxu0 %v4783_v54 }
  0xf9   : > { %v1592_v46 = vsub.f32 %v7427_v4, %v4375_v38  ;;  %v638_v9 = vsub.f32 %v7176_v58, %v4259_v50  ;;  %7432 = vst [vmem:[#allocation112_spill] sm:$0xff] %v4834_v32  ;;  %3217 = vpow2.f32 %v744_v56  ;;  %v4836_v43 = vmul.f32 1.442695, %v1589_v25  ;;  %v4842_v19 = vpop.eup %3199  ;;  %2822 = vmatprep.subr.bf16.mxu0 %v4664_v59 }
  0xfa   : > { %v1594_v35 = vsub.f32 %v7428_v26, %v4375_v38  ;;  %7430 = vst [vmem:[#allocation110_spill] sm:$0xff] %v4825_v15  ;;  %7431 = vst [vmem:[#allocation111_spill] sm:$0xff] %v4829_v52  ;;  %v4838_v4 = vmul.f32 1.442695, %v639_v30  ;;  %v640_v26 = vsub.f32 %v7177_v53, %v4259_v50  ;;  %v4846_v16 = vpack.c.bf16 %v4791_v36, %v4778_v3  ;;  %v4855_v30 = vpop.eup %3201  ;;  %v7443_v3 = vld [vmem:[#allocation5_spill] sm:$0xff] }
  0xfb   : > { %7433 = vst [vmem:[#allocation113_spill] sm:$0xff] %v4842_v19  ;;  %2616 = vmatpush1.bf16.msra.mxu1 %v4829_v52  ;;  %3219 = vpow2.f32 %v4724_v2  ;;  %v4850_v1 = vmul.f32 1.442695, %v641_v27  ;;  %v7435_v56 = vsub.f32 0.0, %v4017_v60  ;;  %7436 = vst [vmem:[#allocation115_spill] sm:$0xff] %v4855_v30  ;;  %v7437_v52 = vsub.f32 0.0, %v4019_v12  ;;  %v4866_v27 = vpop.eup %3203 }
  0xfc   : > { %7434 = vst [vmem:[#allocation114_spill] sm:$0xff] %v4846_v16  ;;  %3221 = vpow2.f32 %v4735_v14  ;;  %v4859_v42 = vmul.f32 1.442695, %v1592_v46  ;;  %v4861_v36 = vmul.f32 1.442695, %v1594_v35  ;;  %7438 = vst [vmem:[#allocation116_spill] sm:$0xff] %v4866_v27  ;;  %v4871_v60 = vpack.c.bf16 %v4855_v30, %v4842_v19  ;;  %v4877_v35 = vpop.eup %3205  ;;  %2824 = vmatpush1.bf16.msra.mxu0 %v4825_v15 }
  0xfd   : > { %v1591_v25 = vsub.f32 %v7435_v56, %v4539_v31  ;;  %v1593_v2 = vsub.f32 %v7437_v52, %v4539_v31  ;;  %3223 = vpow2.f32 %v4742_v34  ;;  %v4874_v56 = vmul.f32 1.442695, %v638_v9  ;;  %v7440_v46 = vld [vmem:[#allocation4_spill] sm:$0xff]  ;;  %v7442_v52 = vld [vmem:[#allocation6_spill] sm:$0xff]  ;;  %v7445_v9 = vld [vmem:[#allocation39_spill] sm:$0xff]  ;;  %2826 = vmatprep.subr.bf16.mxu0 %v4846_v16 }
  0xfe   : > { %7439 = vst [vmem:[#allocation117_spill] sm:$0xff] %v4871_v60  ;;  %v827_v14 = vsub.f32 %v7440_v46, %v821_v24  ;;  %7441 = vst [vmem:[#allocation4_spill] sm:$0xff] %v4877_v35  ;;  %3225 = vpow2.f32 %v4744_v62  ;;  %v4880_v12 = vmul.f32 1.442695, %v640_v26  ;;  %v828_v54 = vsub.f32 %v7442_v52, %v821_v24  ;;  %v4884_v6 = vpop.eup %3207  ;;  %2618 = vmatprep.subr.bf16.mxu1 %v4871_v60  ;;  %v7446_v30 = vld [vmem:[#allocation40_spill] sm:$0xff]  ;;  %v7465_v19 = vld [vmem:[#allocation7_spill] sm:$0xff] }
  0xff   : > { %v829_v59 = vsub.f32 %v7443_v3, %v821_v24  ;;  %7444 = vst [vmem:[#allocation6_spill] sm:$0xff] %v4884_v6  ;;  %3227 = vpow2.f32 %v4751_v17  ;;  %v4888_v34 = vmul.f32 1.442695, %v1591_v25  ;;  %v643_v46 = vsub.f32 %v7445_v9, %v4160_v13  ;;  %v4894_v26 = vpop.eup %3209 }
 0x100   : > { %v645_v62 = vsub.f32 %v7446_v30, %v4160_v13  ;;  %7447 = vst [vmem:[#allocation5_spill] sm:$0xff] %v4894_v26  ;;  %v4899_v24 = vpack.c.bf16 %v4834_v32, %v4820_v39  ;;  %3229 = vpow2.f32 %v4753_v28  ;;  %v4902_v3 = vmul.f32 1.442695, %v1593_v2  ;;  %v4907_v52 = vpop.eup %3211 }
 0x101   : > { %v7449_v17 = vsub.f32 0.0, %v7423_v55  ;;  %7450 = vst [vmem:[#allocation40_spill] sm:$0xff] %v4907_v52  ;;  %v4912_v60 = vpack.c.bf16 %v4877_v35, %v4866_v27  ;;  %v4916_v15 = vpack.c.bf16 %v4894_v26, %v4884_v6  ;;  %3231 = vpow2.f32 %v4760_v61  ;;  %v4921_v2 = vpop.eup %3213  ;;  %v826_v26 = vpop.xlane.xlu1 %825 }
 0x102   : > { %7448 = vst [vmem:[#allocation39_spill] sm:$0xff] %v4899_v24  ;;  %v4919_v28 = vmul.f32 1.442695, %v827_v14  ;;  %7453 = vst [vmem:[#allocation120_spill] sm:$0xff] %v4921_v2  ;;  %3233 = vpow2.f32 %v4773_v23  ;;  %v4924_v55 = vmul.f32 1.442695, %v828_v54  ;;  %v4931_v27 = vpop.eup %3215  ;;  %2828 = vmatpush1.bf16.msra.mxu0 %v4899_v24 }
 0x103   : > { %v1596_v25 = vsub.f32 %v7449_v17, %v4375_v38  ;;  %7451 = vst [vmem:[#allocation118_spill] sm:$0xff] %v4912_v60  ;;  %7452 = vst [vmem:[#allocation119_spill] sm:$0xff] %v4916_v15  ;;  %v4926_v17 = vmul.f32 1.442695, %v829_v59  ;;  %v7454_v16 = vsub.f32 0.0, %v7425_v11  ;;  %2620 = vmatpush1.bf16.msra.mxu1 %v4916_v15  ;;  %3235 = vpow2.f32 %v4789_v7  ;;  %v7456_v23 = vld [vmem:[#allocation69_spill] sm:$0xff]  ;;  %v4941_v59 = vpop.eup %3217  ;;  %2830 = vmatprep.subr.bf16.mxu0 %v4912_v60 }
 0x104   : > { %7455 = vst [vmem:[#allocation121_spill] sm:$0xff] %v4931_v27  ;;  %v4935_v61 = vmul.f32 1.442695, %v643_v46  ;;  %v4937_v14 = vmul.f32 1.442695, %v645_v62  ;;  %v642_v54 = vsub.f32 %v7456_v23, %v4259_v50  ;;  %7457 = vst [vmem:[#allocation69_spill] sm:$0xff] %v4941_v59  ;;  %3237 = vpow2.f32 %v4793_v5 }
 0x105   : > { %v1598_v35 = vsub.f32 %v7454_v16, %v4375_v38  ;;  %v4946_v16 = vpack.c.bf16 %v4921_v2, %v4907_v52  ;;  %v4949_v11 = vmul.f32 1.442695, %v1596_v25  ;;  %v7459_v7 = vld [vmem:[#allocation70_spill] sm:$0xff]  ;;  %v4953_v62 = vpop.eup %3219  ;;  %v4958_v15 = vpack.c.bf16 %v4941_v59, %v4931_v27  ;;  %v1777_v52 = vpop.xlane.xlu0 %1776  ;;  %v7466_v27 = vld [vmem:[#allocation9_spill] sm:$0xff] }
 0x106   : > { %v644_v46 = vsub.f32 %v7459_v7, %v4259_v50  ;;  %7460 = vst [vmem:[#allocation70_spill] sm:$0xff] %v4953_v62  ;;  %3239 = vpow2.f32 %v4803_v20  ;;  %v7462_v24 = vsub.f32 0.0, %v7176_v58  ;;  %v7463_v5 = vsub.f32 0.0, %v7177_v53  ;;  %v4967_v6 = vpop.eup %3221 }
 0x107   : > { %7458 = vst [vmem:[#allocation122_spill] sm:$0xff] %v4946_v16  ;;  %7461 = vst [vmem:[#allocation123_spill] sm:$0xff] %v4958_v15  ;;  %3241 = vpow2.f32 %v4805_v40  ;;  %v4970_v60 = vmul.f32 1.442695, %v1598_v35  ;;  %v830_v59 = vsub.f32 %v7465_v19, %v826_v26  ;;  %v831_v32 = vsub.f32 %v7466_v27, %v826_v26  ;;  %v4974_v20 = vpop.eup %3223  ;;  %2622 = vmatprep.subr.bf16.mxu1 %v4958_v15  ;;  %v7471_v27 = vld [vmem:[#allocation10_spill] sm:$0xff]  ;;  %v7472_v15 = vld [vmem:[#allocation12_spill] sm:$0xff] }
 0x108   : > { %v1595_v2 = vsub.f32 %v7462_v24, %v4539_v31  ;;  %v1597_v25 = vsub.f32 %v7463_v5, %v4539_v31  ;;  %7464 = vst [vmem:[#allocation124_spill] sm:$0xff] %v4967_v6  ;;  %7467 = vst [vmem:[#allocation7_spill] sm:$0xff] %v4974_v20  ;;  %v4979_v58 = vpack.c.bf16 %v4967_v6, %v4953_v62  ;;  %3243 = vpow2.f32 %v4812_v37  ;;  %v7469_v24 = vld [vmem:[#allocation8_spill] sm:$0xff]  ;;  %v4985_v35 = vpop.eup %3225 }
 0x109   : > { %v4982_v53 = vmul.f32 1.442695, %v642_v54  ;;  %v832_v40 = vsub.f32 %v7469_v24, %v826_v26  ;;  %7470 = vst [vmem:[#allocation8_spill] sm:$0xff] %v4985_v35  ;;  %2832 = vmatpush1.bf16.msra.mxu0 %v4946_v16  ;;  %3245 = vpow2.f32 %v4836_v43  ;;  %v4989_v19 = vmul.f32 1.442695, %v644_v46  ;;  %v4993_v6 = vpop.eup %3227  ;;  %v7476_v24 = vld [vmem:[#allocation11_spill] sm:$0xff] }
 0x10a   : > { %7468 = vst [vmem:[#allocation9_spill] sm:$0xff] %v4979_v58  ;;  %v1783_v5 = vsub.f32 %v7471_v27, %v1777_v52  ;;  %v1784_v39 = vsub.f32 %v7472_v15, %v1777_v52  ;;  %7473 = vst [vmem:[#allocation10_spill] sm:$0xff] %v4993_v6  ;;  %2834 = vmatprep.subr.bf16.mxu0 %v4979_v58  ;;  %v4998_v37 = vpack.c.bf16 %v4985_v35, %v4974_v20  ;;  %v5005_v43 = vpop.eup %3229 }
 0x10b   : > { %3247 = vpow2.f32 %v4838_v4  ;;  %v5001_v26 = vmul.f32 1.442695, %v1595_v2  ;;  %v5003_v54 = vmul.f32 1.442695, %v1597_v25  ;;  %7475 = vst [vmem:[#allocation125_spill] sm:$0xff] %v5005_v43  ;;  %v1785_v27 = vsub.f32 %v7476_v24, %v1777_v52  ;;  %v5013_v58 = vpop.eup %3231  ;;  %v7481_v24 = vld [vmem:[#allocation42_spill] sm:$0xff] }
 0x10c   : > { %7474 = vst [vmem:[#allocation12_spill] sm:$0xff] %v4998_v37  ;;  %3249 = vpow2.f32 %v4850_v1  ;;  %v5008_v46 = vmul.f32 1.442695, %v830_v59  ;;  %v5010_v15 = vmul.f32 1.442695, %v831_v32  ;;  %7477 = vst [vmem:[#allocation11_spill] sm:$0xff] %v5013_v58  ;;  %2624 = vmatpush1.bf16.msra.mxu1 %v4998_v37  ;;  %v5018_v4 = vpack.c.bf16 %v5005_v43, %v4993_v6  ;;  %v5025_v25 = vpop.eup %3233  ;;  %v1782_v43 = vpop.xlane.xlu1 %1781 }
 0x10d   : > { %3251 = vpow2.f32 %v4859_v42  ;;  %v5021_v2 = vmul.f32 1.442695, %v832_v40  ;;  %v7479_v1 = vld [vmem:[#allocation41_spill] sm:$0xff]  ;;  %v5028_v32 = vmul.f32 1.442695, %v1783_v5  ;;  %v649_v37 = vsub.f32 %v7481_v24, %v4160_v13  ;;  %v5034_v16 = vpop.eup %3235 }
 0x10e   : > { %7478 = vst [vmem:[#allocation126_spill] sm:$0xff] %v5018_v4  ;;  %v647_v59 = vsub.f32 %v7479_v1, %v4160_v13  ;;  %7480 = vst [vmem:[#allocation41_spill] sm:$0xff] %v5025_v25  ;;  %3253 = vpow2.f32 %v4861_v36  ;;  %v5030_v52 = vmul.f32 1.442695, %v1784_v39  ;;  %2836 = vmatpush1.bf16.msra.mxu0 %v5018_v4  ;;  %v5039_v42 = vpack.c.bf16 %v5025_v25, %v5013_v58  ;;  %v5048_v6 = vpop.eup %3237 }
 0x10f   : > { %7482 = vst [vmem:[#allocation42_spill] sm:$0xff] %v5034_v16  ;;  %3255 = vpow2.f32 %v4874_v56  ;;  %v7484_v36 = vsub.f32 0.0, %v7445_v9  ;;  %v7485_v39 = vsub.f32 0.0, %v7446_v30  ;;  %7486 = vst [vmem:[#allocation128_spill] sm:$0xff] %v5048_v6  ;;  %v5051_v4 = vmul.f32 1.442695, %v1785_v27 }
 0x110   : > { %7483 = vst [vmem:[#allocation127_spill] sm:$0xff] %v5039_v42  ;;  %3257 = vpow2.f32 %v4880_v12  ;;  %v646_v25 = vsub.f32 %v4036_v47, %v4259_v50  ;;  %v7487_v56 = vld [vmem:[#allocation71_spill] sm:$0xff]  ;;  %v5057_v35 = vpop.eup %3239  ;;  %2626 = vmatprep.subr.bf16.mxu1 %v5039_v42  ;;  %v5062_v30 = vpack.c.bf16 %v5048_v6, %v5034_v16  ;;  %v5065_v9 = vmul.f32 1.442695, %v647_v59  ;;  %v7493_v6 = vld [vmem:[#allocation13_spill] sm:$0xff] }
 0x111   : > { %v1600_v40 = vsub.f32 %v7484_v36, %v4375_v38  ;;  %v1602_v5 = vsub.f32 %v7485_v39, %v4375_v38  ;;  %v648_v58 = vsub.f32 %v7487_v56, %v4259_v50  ;;  %7488 = vst [vmem:[#allocation71_spill] sm:$0xff] %v5057_v35  ;;  %3259 = vpow2.f32 %v4888_v34  ;;  %v5070_v36 = vpop.eup %3241  ;;  %v7497_v59 = vld [vmem:[#allocation15_spill] sm:$0xff] }
 0x112   : > { %7489 = vst [vmem:[#allocation129_spill] sm:$0xff] %v5062_v30  ;;  %v7490_v12 = vsub.f32 0.0, %v7456_v23  ;;  %7491 = vst [vmem:[#allocation130_spill] sm:$0xff] %v5070_v36  ;;  %3261 = vpow2.f32 %v4902_v3  ;;  %v5073_v39 = vmul.f32 1.442695, %v649_v37  ;;  %v7492_v42 = vsub.f32 0.0, %v7459_v7  ;;  %v5079_v62 = vpop.eup %3243  ;;  %2838 = vmatprep.subr.bf16.mxu0 %v5062_v30 }
 0x113   : > { %v1786_v16 = vsub.f32 %v7493_v6, %v1782_v43  ;;  %7494 = vst [vmem:[#allocation13_spill] sm:$0xff] %v5079_v62  ;;  %v5084_v34 = vpack.c.bf16 %v5070_v36, %v5057_v35  ;;  %3263 = vpow2.f32 %v4919_v28  ;;  %v5087_v23 = vmul.f32 1.442695, %v1600_v40  ;;  %v5091_v37 = vpop.eup %3245  ;;  %v7530_v35 = vld [vmem:[#allocation47_spill] sm:$0xff] }
 0x114   : > { %v1599_v27 = vsub.f32 %v7490_v12, %v4539_v31  ;;  %v1601_v20 = vsub.f32 %v7492_v42, %v4539_v31  ;;  %v5089_v3 = vmul.f32 1.442695, %v1602_v5  ;;  %7496 = vst [vmem:[#allocation132_spill] sm:$0xff] %v5091_v37  ;;  %3265 = vpow2.f32 %v4924_v55  ;;  %v7500_v5 = vld [vmem:[#allocation14_spill] sm:$0xff] }
 0x115   : > { %7495 = vst [vmem:[#allocation131_spill] sm:$0xff] %v5084_v34  ;;  %v5094_v7 = vmul.f32 1.442695, %v646_v25  ;;  %v5096_v6 = vmul.f32 1.442695, %v648_v58  ;;  %v1787_v42 = vsub.f32 %v7497_v59, %v1782_v43  ;;  %v5099_v12 = vpop.eup %3247  ;;  %2628 = vmatpush1.bf16.msra.mxu1 %v5084_v34  ;;  %v5104_v28 = vpack.c.bf16 %v5091_v37, %v5079_v62  ;;  %v7502_v34 = vld [vmem:[#allocation43_spill] sm:$0xff] }
 0x116   : > { %7498 = vst [vmem:[#allocation15_spill] sm:$0xff] %v5099_v12  ;;  %3267 = vpow2.f32 %v4926_v17  ;;  %v5107_v40 = vmul.f32 1.442695, %v1599_v27  ;;  %v1788_v55 = vsub.f32 %v7500_v5, %v1782_v43  ;;  %v5110_v25 = vpop.eup %3249  ;;  %v5113_v58 = vmul.f32 1.442695, %v1601_v20  ;;  %v7505_v43 = vld [vmem:[#allocation44_spill] sm:$0xff] }
 0x117   : > { %7499 = vst [vmem:[#allocation133_spill] sm:$0xff] %v5104_v28  ;;  %7501 = vst [vmem:[#allocation14_spill] sm:$0xff] %v5110_v25  ;;  %3269 = vpow2.f32 %v4935_v61  ;;  %v5115_v59 = vmul.f32 1.442695, %v1786_v16  ;;  %v651_v30 = vsub.f32 %v7502_v34, %v4160_v13  ;;  %v5119_v36 = vpop.eup %3251  ;;  %2840 = vmatpush1.bf16.msra.mxu0 %v5104_v28  ;;  %v5124_v17 = vpack.c.bf16 %v5110_v25, %v5099_v12 }
 0x118   : > { %7503 = vst [vmem:[#allocation43_spill] sm:$0xff] %v5119_v36  ;;  %3271 = vpow2.f32 %v4937_v14  ;;  %v653_v61 = vsub.f32 %v7505_v43, %v4160_v13  ;;  %v7506_v16 = vsub.f32 0.0, %v7479_v1  ;;  %v5132_v27 = vpop.eup %3253  ;;  %v5135_v5 = vmul.f32 1.442695, %v1787_v42  ;;  %v7511_v42 = vld [vmem:[#allocation72_spill] sm:$0xff] }
 0x119   : > { %7504 = vst [vmem:[#allocation134_spill] sm:$0xff] %v5124_v17  ;;  %7507 = vst [vmem:[#allocation44_spill] sm:$0xff] %v5132_v27  ;;  %3273 = vpow2.f32 %v4949_v11  ;;  %v7508_v28 = vsub.f32 0.0, %v7481_v24  ;;  %v650_v14 = vsub.f32 %v4040_v51, %v4259_v50  ;;  %v5142_v37 = vpop.eup %3255  ;;  %2630 = vmatprep.subr.bf16.mxu1 %v5124_v17  ;;  %v5147_v1 = vpack.c.bf16 %v5132_v27, %v5119_v36 }
 0x11a   : > { %v1604_v20 = vsub.f32 %v7506_v16, %v4375_v38  ;;  %7509 = vst [vmem:[#allocation135_spill] sm:$0xff] %v5142_v37  ;;  %3275 = vpow2.f32 %v4970_v60  ;;  %v5150_v11 = vmul.f32 1.442695, %v1788_v55  ;;  %v652_v16 = vsub.f32 %v7511_v42, %v4259_v50  ;;  %v5154_v24 = vpop.eup %3257 }
 0x11b   : > { %v1606_v25 = vsub.f32 %v7508_v28, %v4375_v38  ;;  %7510 = vst [vmem:[#allocation136_spill] sm:$0xff] %v5147_v1  ;;  %7512 = vst [vmem:[#allocation72_spill] sm:$0xff] %v5154_v24  ;;  %3277 = vpow2.f32 %v4982_v53  ;;  %v5157_v28 = vmul.f32 1.442695, %v651_v30  ;;  %v7513_v17 = vsub.f32 0.0, %v4036_v47  ;;  %v5165_v60 = vpop.eup %3259  ;;  %2842 = vmatprep.subr.bf16.mxu0 %v5147_v1 }
 0x11c   : > { %v7514_v27 = vsub.f32 0.0, %v7487_v56  ;;  %7515 = vst [vmem:[#allocation137_spill] sm:$0xff] %v5165_v60  ;;  %v5170_v55 = vpack.c.bf16 %v5154_v24, %v5142_v37  ;;  %3279 = vpow2.f32 %v4989_v19  ;;  %v5173_v53 = vmul.f32 1.442695, %v653_v61  ;;  %v5177_v47 = vpop.eup %3261 }
 0x11d   : > { %v1603_v12 = vsub.f32 %v7513_v17, %v4539_v31  ;;  %v5175_v30 = vmul.f32 1.442695, %v1604_v20  ;;  %7517 = vst [vmem:[#allocation139_spill] sm:$0xff] %v5177_v47  ;;  %3281 = vpow2.f32 %v5001_v26  ;;  %v5180_v56 = vmul.f32 1.442695, %v1606_v25  ;;  %v5186_v62 = vpop.eup %3263  ;;  %v7521_v26 = vld [vmem:[#allocation46_spill] sm:$0xff] }
 0x11e   : > { %v1605_v36 = vsub.f32 %v7514_v27, %v4539_v31  ;;  %7516 = vst [vmem:[#allocation138_spill] sm:$0xff] %v5170_v55  ;;  %v5182_v17 = vmul.f32 1.442695, %v650_v14  ;;  %v7518_v27 = vld [vmem:[#allocation45_spill] sm:$0xff]  ;;  %2632 = vmatpush1.bf16.msra.mxu1 %v5170_v55  ;;  %v5191_v19 = vpack.c.bf16 %v5177_v47, %v5165_v60  ;;  %3283 = vpow2.f32 %v5003_v54  ;;  %v5198_v20 = vpop.eup %3265 }
 0x11f   : > { %v655_v1 = vsub.f32 %v7518_v27, %v4160_v13  ;;  %7519 = vst [vmem:[#allocation45_spill] sm:$0xff] %v5186_v62  ;;  %v5194_v61 = vmul.f32 1.442695, %v652_v16  ;;  %v657_v25 = vsub.f32 %v7521_v26, %v4160_v13  ;;  %7522 = vst [vmem:[#allocation46_spill] sm:$0xff] %v5198_v20  ;;  %3285 = vpow2.f32 %v5008_v46  ;;  %915 = vmatprep.mubr.f32.mxu1 %v5198_v20 }
 0x120   : > { %7520 = vst [vmem:[#allocation140_spill] sm:$0xff] %v5191_v19  ;;  %v5201_v14 = vmul.f32 1.442695, %v1603_v12  ;;  %v5203_v24 = vmul.f32 1.442695, %v1605_v36  ;;  %v7523_v55 = vsub.f32 0.0, %v7502_v34  ;;  %v5208_v60 = vpop.eup %3267  ;;  %2844 = vmatpush1.bf16.msra.mxu0 %v5191_v19  ;;  %3287 = vpow2.f32 %v5010_v15 }
 0x121   : > { %7524 = vst [vmem:[#allocation141_spill] sm:$0xff] %v5208_v60  ;;  %v7525_v54 = vsub.f32 0.0, %v7505_v43  ;;  %v654_v46 = vsub.f32 %v4047_v18, %v4259_v50  ;;  %v656_v36 = vsub.f32 %v4049_v22, %v4259_v50  ;;  %v5220_v34 = vpop.eup %3269  ;;  %3289 = vpow2.f32 %v5021_v2  ;;  %v7531_v2 = vld [vmem:[#allocation48_spill] sm:$0xff] }
 0x122   : > { %v1608_v47 = vsub.f32 %v7523_v55, %v4375_v38  ;;  %7526 = vst [vmem:[#allocation142_spill] sm:$0xff] %v5220_v34  ;;  %v5223_v12 = vmul.f32 1.442695, %v655_v1  ;;  %v7527_v15 = vsub.f32 0.0, %v4040_v51  ;;  %v7528_v43 = vsub.f32 0.0, %v7511_v42  ;;  %v5231_v19 = vpop.eup %3271 }
 0x123   : > { %v1610_v16 = vsub.f32 %v7525_v54, %v4375_v38  ;;  %7529 = vst [vmem:[#allocation143_spill] sm:$0xff] %v5231_v19  ;;  %3291 = vpow2.f32 %v5028_v32  ;;  %v5234_v37 = vmul.f32 1.442695, %v657_v25  ;;  %v659_v20 = vsub.f32 %v7530_v35, %v4160_v13  ;;  %v5240_v60 = vpop.eup %3273 }
 0x124   : > { %v1607_v55 = vsub.f32 %v7527_v15, %v4539_v31  ;;  %v1609_v54 = vsub.f32 %v7528_v43, %v4539_v31  ;;  %v661_v1 = vsub.f32 %v7531_v2, %v4160_v13  ;;  %7532 = vst [vmem:[#allocation47_spill] sm:$0xff] %v5240_v60  ;;  %v5244_v51 = vpack.c.bf16 %v5231_v19, %v5220_v34  ;;  %v5252_v15 = vpop.eup %3275 }
 0x125   : > { %3293 = vpow2.f32 %v5030_v52  ;;  %v5247_v42 = vmul.f32 1.442695, %v1608_v47  ;;  %v7534_v32 = vsub.f32 0.0, %v7518_v27  ;;  %7535 = vst [vmem:[#allocation144_spill] sm:$0xff] %v5252_v15  ;;  %v5255_v43 = vmul.f32 1.442695, %v1610_v16  ;;  %v5261_v19 = vpop.eup %3277 }
 0x126   : > { %7533 = vst [vmem:[#allocation48_spill] sm:$0xff] %v5244_v51  ;;  %3295 = vpow2.f32 %v5051_v4  ;;  %v5257_v33 = vmul.f32 1.442695, %v654_v46  ;;  %v5259_v49 = vmul.f32 1.442695, %v656_v36  ;;  %7536 = vst [vmem:[#allocation145_spill] sm:$0xff] %v5261_v19  ;;  %2634 = vmatprep.subr.bf16.mxu1 %v5244_v51  ;;  %v5266_v52 = vpack.c.bf16 %v5252_v15, %v5240_v60  ;;  %v5273_v4 = vpop.eup %3279 }
 0x127   : > { %v1612_v25 = vsub.f32 %v7534_v32, %v4375_v38  ;;  %3297 = vpow2.f32 %v5065_v9  ;;  %v5269_v47 = vmul.f32 1.442695, %v1607_v55  ;;  %v5271_v27 = vmul.f32 1.442695, %v1609_v54  ;;  %7538 = vst [vmem:[#allocation147_spill] sm:$0xff] %v5273_v4  ;;  %v5283_v51 = vpop.eup %3281  ;;  %v7559_v15 = vld [vmem:[#allocation29_spill] sm:$0xff] }
 0x128   : > { %7537 = vst [vmem:[#allocation146_spill] sm:$0xff] %v5266_v52  ;;  %3299 = vpow2.f32 %v5073_v39  ;;  %v5276_v16 = vmul.f32 1.442695, %v659_v20  ;;  %v5278_v46 = vmul.f32 1.442695, %v661_v1  ;;  %v7539_v36 = vsub.f32 0.0, %v7521_v26  ;;  %2846 = vmatprep.subr.bf16.mxu0 %v5266_v52  ;;  %v5295_v20 = vpop.eup %3283 }
 0x129   : > { %7540 = vst [vmem:[#allocation148_spill] sm:$0xff] %v5283_v51  ;;  %v5288_v9 = vpack.c.bf16 %v5273_v4, %v5261_v19  ;;  %3301 = vpow2.f32 %v5087_v23  ;;  %v5291_v55 = vmul.f32 1.442695, %v1612_v25  ;;  %v658_v39 = vsub.f32 %v4051_v48, %v4259_v50  ;;  %7542 = vst [vmem:[#allocation150_spill] sm:$0xff] %v5295_v20  ;;  %v5306_v25 = vpop.eup %3285 }
 0x12a   : > { %v1614_v32 = vsub.f32 %v7539_v36, %v4375_v38  ;;  %3303 = vpow2.f32 %v5089_v3  ;;  %v660_v26 = vsub.f32 %v7199_v29, %v4259_v50  ;;  %v7543_v54 = vsub.f32 0.0, %v4047_v18  ;;  %7545 = vst [vmem:[#allocation151_spill] sm:$0xff] %v5306_v25  ;;  %v7547_v3 = vld [vmem:[#allocation49_spill] sm:$0xff]  ;;  %v7548_v18 = vld [vmem:[#allocation50_spill] sm:$0xff]  ;;  %v5318_v19 = vpop.eup %3287 }
 0x12b   : > { %7541 = vst [vmem:[#allocation149_spill] sm:$0xff] %v5288_v9  ;;  %v7544_v36 = vsub.f32 0.0, %v4049_v22  ;;  %2636 = vmatpush1.bf16.msra.mxu1 %v5288_v9  ;;  %v5311_v52 = vpack.c.bf16 %v5295_v20, %v5283_v51  ;;  %3305 = vpow2.f32 %v5094_v7  ;;  %v663_v4 = vsub.f32 %v7547_v3, %v4160_v13  ;;  %7549 = vst [vmem:[#allocation49_spill] sm:$0xff] %v5318_v19  ;;  %v5329_v51 = vpop.eup %3289 }
 0x12c   : > { %v1611_v1 = vsub.f32 %v7543_v54, %v4539_v31  ;;  %v665_v54 = vsub.f32 %v7548_v18, %v4160_v13  ;;  %3307 = vpow2.f32 %v5096_v6  ;;  %v5321_v22 = vmul.f32 1.442695, %v1614_v32  ;;  %7552 = vst [vmem:[#allocation50_spill] sm:$0xff] %v5329_v51 }
 0x12d   : > { %v1613_v23 = vsub.f32 %v7544_v36, %v4539_v31  ;;  %7546 = vst [vmem:[#allocation152_spill] sm:$0xff] %v5311_v52  ;;  %v7550_v36 = vsub.f32 0.0, %v7530_v35  ;;  %v7551_v20 = vsub.f32 0.0, %v7531_v2  ;;  %2848 = vmatpush1.bf16.msra.mxu0 %v5311_v52  ;;  %3309 = vpow2.f32 %v5107_v40  ;;  %v5339_v35 = vpop.eup %3291 }
 0x12e   : > { %v5333_v13 = vmul.f32 1.442695, %v658_v39  ;;  %v662_v6 = vsub.f32 %v7289_v21, %v4259_v50  ;;  %v664_v32 = vsub.f32 %v7205_v63, %v4259_v50  ;;  %7553 = vst [vmem:[#allocation153_spill] sm:$0xff] %v5339_v35  ;;  %3311 = vpow2.f32 %v5113_v58 }
 0x12f   : > { %v1616_v9 = vsub.f32 %v7550_v36, %v4375_v38  ;;  %v1618_v7 = vsub.f32 %v7551_v20, %v4375_v38  ;;  %v5342_v2 = vmul.f32 1.442695, %v660_v26  ;;  %v5344_v20 = vmul.f32 1.442695, %v1611_v1  ;;  %v5348_v40 = vpop.eup %3293 }
 0x130   : > { %v5346_v36 = vmul.f32 1.442695, %v1613_v23  ;;  %7554 = vst [vmem:[#allocation154_spill] sm:$0xff] %v5348_v40  ;;  %3313 = vpow2.f32 %v5115_v59  ;;  %v5351_v39 = vmul.f32 1.442695, %v663_v4  ;;  %v7555_v50 = vsub.f32 0.0, %v4051_v48  ;;  %v5358_v26 = vpop.eup %3295  ;;  %1871 = vmatprep.mubr.f32.mxu0 %v5348_v40 }
 0x131   : > { %v5353_v52 = vmul.f32 1.442695, %v665_v54  ;;  %7556 = vst [vmem:[#allocation155_spill] sm:$0xff] %v5358_v26  ;;  %3315 = vpow2.f32 %v5135_v5  ;;  %v5362_v1 = vmul.f32 1.442695, %v1616_v9  ;;  %v7557_v59 = vsub.f32 0.0, %v7199_v29  ;;  %v5369_v54 = vpop.eup %3297 }
 0x132   : > { %v1615_v58 = vsub.f32 %v7555_v50, %v4539_v31  ;;  %v5364_v23 = vmul.f32 1.442695, %v1618_v7  ;;  %7558 = vst [vmem:[#allocation156_spill] sm:$0xff] %v5369_v54  ;;  %3317 = vpow2.f32 %v5150_v11  ;;  %v5372_v48 = vmul.f32 1.442695, %v662_v6  ;;  %v3407_v5 = vld [vmem:[%s3808_s12 + $0x8] sm:$0xff]  ;;  %v5380_v9 = vpop.eup %3299 }
 0x133   : > { %v1617_v4 = vsub.f32 %v7557_v59, %v4539_v31  ;;  %v5374_v50 = vmul.f32 1.442695, %v664_v32  ;;  %v5378_v60 = vmul.f32 %v3407_v5, %v7559_v15  ;;  %7560 = vst [vmem:[#allocation29_spill] sm:$0xff] %v5380_v9  ;;  %3319 = vpow2.f32 %v5157_v28  ;;  %v3408_v29 = vld [vmem:[%s3808_s12 + $0x18] sm:$0xff]  ;;  %v7561_v7 = vld [vmem:[#allocation30_spill] sm:$0xff]  ;;  %v5393_v40 = vpop.eup %3301  ;;  %v7567_v26 = vld [vmem:[#allocation68_spill] sm:$0xff] }
 0x134   : > { %v5385_v59 = vmul.f32 %v3408_v29, %v7561_v7  ;;  %v7562_v11 = vsub.f32 0.0, %v7547_v3  ;;  %v7563_v32 = vsub.f32 0.0, %v7548_v18  ;;  %7564 = vst [vmem:[#allocation30_spill] sm:$0xff] %v5393_v40  ;;  %v5397_v15 = vpack.c.bf16 %v5380_v9, %v5369_v54  ;;  %v5402_v7 = vpop.eup %3303 }
 0x135   : > { %3321 = vpow2.f32 %v5173_v53  ;;  %v5400_v28 = vmul.f32 1.442695, %v1615_v58  ;;  %7566 = vst [vmem:[#allocation158_spill] sm:$0xff] %v5402_v7  ;;  %v5405_v3 = vmul.f32 1.442695, %v1617_v4  ;;  %v5415_v9 = vpop.eup %3305  ;;  %v5420_v53 = vpack.c.bf16 %v5402_v7, %v5393_v40 }
 0x136   : > { %v1620_v6 = vsub.f32 %v7562_v11, %v4375_v38  ;;  %v1622_v34 = vsub.f32 %v7563_v32, %v4375_v38  ;;  %7565 = vst [vmem:[#allocation157_spill] sm:$0xff] %v5397_v15  ;;  %3323 = vpow2.f32 %v5175_v30  ;;  %v3409_v11 = vld [vmem:[%s3808_s12] sm:$0xff]  ;;  %v3410_v38 = vld [vmem:[%s3808_s12 + $0x10] sm:$0xff]  ;;  %v7569_v32 = vld [vmem:[#allocation55_spill] sm:$0xff]  ;;  %2638 = vmatprep.subr.bf16.mxu1 %v5397_v15  ;;  %v7572_v30 = vsub.f32 0.0, %v7289_v21 }
 0x137   : > { %v5409_v18 = vmul.f32 %v3409_v11, %v7567_v26  ;;  %v5413_v51 = vmul.f32 %v3410_v38, %v7569_v32  ;;  %7570 = vst [vmem:[#allocation55_spill] sm:$0xff] %v5415_v9  ;;  %7571 = vst [vmem:[#allocation159_spill] sm:$0xff] %v5420_v53  ;;  %3325 = vpow2.f32 %v5180_v56  ;;  %v7573_v26 = vsub.f32 0.0, %v7205_v63  ;;  %v5429_v32 = vpop.eup %3307  ;;  %2850 = vmatprep.subr.bf16.mxu0 %v5420_v53  ;;  %v3412_v15 = vld [vmem:[%s3808_s12 + $0x38] sm:$0xff] }
 0x138   : > { %v1619_v58 = vsub.f32 %v7572_v30, %v4539_v31  ;;  %7574 = vst [vmem:[#allocation160_spill] sm:$0xff] %v5429_v32  ;;  %3327 = vpow2.f32 %v5182_v17  ;;  %v5434_v54 = vmul.f32 1.442695, %v1620_v6  ;;  %v5436_v7 = vmul.f32 1.442695, %v1622_v34  ;;  %v5438_v56 = vpop.eup %3309 }
 0x139   : > { %7568 = vst [vmem:[#allocation68_spill] sm:$0xff] %v5409_v18  ;;  %v1621_v4 = vsub.f32 %v7573_v26, %v4539_v31  ;;  %7575 = vst [vmem:[#allocation161_spill] sm:$0xff] %v5438_v56  ;;  %v5443_v21 = vpack.c.bf16 %v5429_v32, %v5415_v9  ;;  %3329 = vpow2.f32 %v5194_v61  ;;  %v1968_v63 = vsub.f32 0.0, %v3407_v5  ;;  %v5446_v17 = vpop.eup %3311  ;;  %v7592_v9 = vld [vmem:[#allocation62_spill] sm:$0xff] }
 0x13a   : > { %v1970_v31 = vsub.f32 0.0, %v3408_v29  ;;  %7577 = vst [vmem:[#allocation163_spill] sm:$0xff] %v5446_v17  ;;  %3331 = vpow2.f32 %v5201_v14  ;;  %v1967_v6 = vsub.f32 0.0, %v3409_v11  ;;  %v1969_v30 = vsub.f32 0.0, %v3410_v38  ;;  %v5451_v26 = vpop.eup %3313  ;;  %v3411_v11 = vld [vmem:[%s3808_s12 + $0x28] sm:$0xff]  ;;  %v7581_v38 = vld [vmem:[#allocation64_spill] sm:$0xff] }
 0x13b   : > { %7576 = vst [vmem:[#allocation162_spill] sm:$0xff] %v5443_v21  ;;  %7578 = vst [vmem:[#allocation164_spill] sm:$0xff] %v5451_v26  ;;  %2640 = vmatpush1.bf16.msra.mxu1 %v5443_v21  ;;  %v5456_v61 = vpack.c.bf16 %v5446_v17, %v5438_v56  ;;  %3333 = vpow2.f32 %v5203_v24  ;;  %v5459_v5 = vmul.f32 1.442695, %v1619_v58  ;;  %v5461_v14 = vmul.f32 1.442695, %v1621_v4  ;;  %v5463_v29 = vpop.eup %3315 }
 0x13c   : > { %7580 = vst [vmem:[#allocation166_spill] sm:$0xff] %v5463_v29  ;;  %3335 = vpow2.f32 %v5223_v12  ;;  %v5468_v34 = vmul.f32 %v3411_v11, %v7581_v38  ;;  %v7582_v21 = vld [vmem:[#allocation66_spill] sm:$0xff]  ;;  %v3413_v17 = vld [vmem:[%s3808_s12 + $0x20] sm:$0xff]  ;;  %v7583_v24 = vld [vmem:[#allocation73_spill] sm:$0xff]  ;;  %v5478_v58 = vpop.eup %3317  ;;  %v5483_v12 = vmul.f32 %v4498_v10, %v1968_v63  ;;  %v5486_v4 = vmul.f32 %v4502_v8, %v1970_v31 }
 0x13d   : > { %7579 = vst [vmem:[#allocation165_spill] sm:$0xff] %v5456_v61  ;;  %v5472_v53 = vmul.f32 %v3412_v15, %v7582_v21  ;;  %v5476_v56 = vmul.f32 %v3413_v17, %v7583_v24  ;;  %7584 = vst [vmem:[#allocation64_spill] sm:$0xff] %v5478_v58  ;;  %2852 = vmatpush1.bf16.msra.mxu0 %v5456_v61  ;;  %3337 = vpow2.f32 %v5234_v37  ;;  %v3414_v38 = vld [vmem:[%s3808_s12 + $0x30] sm:$0xff]  ;;  %v5492_v24 = vpop.eup %3319  ;;  %v5502_v10 = vld [vmem:[%s3808_s12 + $0x48] sm:$0xff] }
 0x13e   : > { %v7585_v21 = vld [vmem:[#allocation58_spill] sm:$0xff]  ;;  %7586 = vst [vmem:[#allocation66_spill] sm:$0xff] %v5492_v24  ;;  %3339 = vpow2.f32 %v5247_v42  ;;  %v5496_v61 = vmul.f32 %v4668_v44, %v1967_v6  ;;  %v5499_v37 = vmul.f32 %v4673_v41, %v1969_v30  ;;  %v7587_v8 = vld [vmem:[#allocation59_spill] sm:$0xff]  ;;  %v7589_v42 = vld [vmem:[#allocation61_spill] sm:$0xff]  ;;  %v1972_v44 = vsub.f32 0.0, %v3411_v11 }
 0x13f   : > { %v5490_v32 = vmul.f32 %v3414_v38, %v7585_v21  ;;  %v5506_v63 = vmul.f32 %v5502_v10, %v7587_v8  ;;  %v5508_v31 = vpop.eup %3321  ;;  %3341 = vpow2.f32 %v5255_v43  ;;  %v5512_v21 = vld [vmem:[%s3808_s12 + $0x58] sm:$0xff]  ;;  %v1974_v6 = vsub.f32 0.0, %v3412_v15  ;;  %v5526_v8 = vld [vmem:[%s3808_s12 + $0x40] sm:$0xff]  ;;  %v5533_v58 = vld [vmem:[%s3808_s12 + $0x50] sm:$0xff] }
 0x140   : > { %7588 = vst [vmem:[#allocation73_spill] sm:$0xff] %v5508_v31  ;;  %v5516_v40 = vmul.f32 %v5512_v21, %v7589_v42  ;;  %v5518_v41 = vpop.eup %3323  ;;  %v5522_v30 = vpack.c.bf16 %v5508_v31, %v5492_v24  ;;  %3343 = vpow2.f32 %v5257_v33  ;;  %v5530_v43 = vmul.f32 %v5526_v8, %v7592_v9  ;;  %v7593_v42 = vld [vmem:[#allocation20_spill] sm:$0xff] }
 0x141   : > { %7590 = vst [vmem:[#allocation58_spill] sm:$0xff] %v5518_v41  ;;  %v5537_v11 = vmul.f32 %v5533_v58, %v7593_v42  ;;  %v5539_v15 = vpop.eup %3325  ;;  %3345 = vpow2.f32 %v5259_v49  ;;  %v1971_v33 = vsub.f32 0.0, %v3413_v17  ;;  %v1973_v24 = vsub.f32 0.0, %v3414_v38  ;;  %v7598_v38 = vld [vmem:[#allocation28_spill] sm:$0xff]  ;;  %v3419_v17 = vld [vmem:[%s3808_s12 + $0x68] sm:$0xff] }
 0x142   : > { %7591 = vst [vmem:[#allocation59_spill] sm:$0xff] %v5522_v30  ;;  %7594 = vst [vmem:[#allocation61_spill] sm:$0xff] %v5539_v15  ;;  %v5544_v18 = vpop.eup %3327  ;;  %2642 = vmatprep.subr.bf16.mxu1 %v5522_v30  ;;  %v5549_v9 = vpack.c.bf16 %v5539_v15, %v5518_v41  ;;  %3347 = vpow2.f32 %v5269_v47  ;;  %v5562_v30 = vmul.f32 %v7598_v38, %v1972_v44  ;;  %v7599_v15 = vld [vmem:[#allocation76_spill] sm:$0xff] }
 0x143   : > { %7595 = vst [vmem:[#allocation62_spill] sm:$0xff] %v5544_v18  ;;  %v5556_v31 = vpop.eup %3329  ;;  %3349 = vpow2.f32 %v5271_v27  ;;  %v5565_v41 = vmul.f32 %v7599_v15, %v1974_v6  ;;  %v5583_v6 = vmul.f32 %v4678_v0, %v1971_v33  ;;  %v5586_v15 = vmul.f32 %v4687_v45, %v1973_v24  ;;  %v7604_v42 = vld [vmem:[#allocation56_spill] sm:$0xff]  ;;  %v7607_v0 = vld [vmem:[#allocation21_spill] sm:$0xff] }
 0x144   : > { %7596 = vst [vmem:[#allocation20_spill] sm:$0xff] %v5549_v9  ;;  %7597 = vst [vmem:[#allocation167_spill] sm:$0xff] %v5556_v31  ;;  %v5567_v47 = vpop.eup %3331  ;;  %2854 = vmatprep.subr.bf16.mxu0 %v5549_v9  ;;  %v5572_v49 = vpack.c.bf16 %v5556_v31, %v5544_v18  ;;  %3351 = vpow2.f32 %v5276_v16  ;;  %v5590_v16 = vmul.f32 %v3419_v17, %v7604_v42  ;;  %v1976_v45 = vsub.f32 0.0, %v5502_v10 }
 0x145   : > { %7600 = vst [vmem:[#allocation28_spill] sm:$0xff] %v5567_v47  ;;  %v5579_v38 = vpop.eup %3333  ;;  %3353 = vpow2.f32 %v5278_v46  ;;  %7603 = vst [vmem:[#allocation169_spill] sm:$0xff] %v5583_v6  ;;  %v3420_v46 = vld [vmem:[%s3808_s12 + $0x78] sm:$0xff]  ;;  %v1978_v27 = vsub.f32 0.0, %v5512_v21  ;;  %v1977_v21 = vsub.f32 0.0, %v5533_v58  ;;  %v1980_v42 = vsub.f32 0.0, %v3419_v17 }
 0x146   : > { %7601 = vst [vmem:[#allocation76_spill] sm:$0xff] %v5572_v49  ;;  %7602 = vst [vmem:[#allocation168_spill] sm:$0xff] %v5579_v38  ;;  %v5592_v9 = vpop.eup %3335  ;;  %2644 = vmatpush1.bf16.msra.mxu1 %v5572_v49  ;;  %v5597_v44 = vpack.c.bf16 %v5579_v38, %v5567_v47  ;;  %3355 = vpow2.f32 %v5291_v55  ;;  %v5602_v33 = vmul.f32 %v3420_v46, %v7607_v0  ;;  %v5612_v49 = vld [vmem:[%s3808_s12 + $0x60] sm:$0xff]  ;;  %v7609_v38 = vld [vmem:[#allocation22_spill] sm:$0xff] }
 0x147   : > { %7605 = vst [vmem:[#allocation56_spill] sm:$0xff] %v5592_v9  ;;  %v5605_v24 = vpop.eup %3337  ;;  %3357 = vpow2.f32 %v5321_v22  ;;  %v5616_v55 = vmul.f32 %v5612_v49, %v7609_v38  ;;  %v1975_v22 = vsub.f32 0.0, %v5526_v8  ;;  %v7615_v8 = vld [vmem:[#allocation77_spill] sm:$0xff]  ;;  %v7617_v17 = vld [vmem:[#allocation78_spill] sm:$0xff] }
 0x148   : > { %7606 = vst [vmem:[#allocation170_spill] sm:$0xff] %v5597_v44  ;;  %7608 = vst [vmem:[#allocation21_spill] sm:$0xff] %v5605_v24  ;;  %v5618_v47 = vpop.eup %3339  ;;  %2856 = vmatpush1.bf16.msra.mxu0 %v5597_v44  ;;  %v5623_v10 = vpack.c.bf16 %v5605_v24, %v5592_v9  ;;  %3359 = vpow2.f32 %v5333_v13  ;;  %v1982_v44 = vsub.f32 0.0, %v3420_v46  ;;  %v5650_v46 = vmul.f32 %v7617_v17, %v1978_v27  ;;  %v7618_v24 = vld [vmem:[#allocation24_spill] sm:$0xff]  ;;  %v7622_v27 = vld [vmem:[#allocation33_spill] sm:$0xff] }
 0x149   : > { %7610 = vst [vmem:[#allocation22_spill] sm:$0xff] %v5618_v47  ;;  %v5628_v0 = vpop.eup %3341  ;;  %3361 = vpow2.f32 %v5342_v2  ;;  %v5644_v2 = vmul.f32 %v7615_v8, %v1976_v45  ;;  %v7623_v8 = vld [vmem:[#allocation98_spill] sm:$0xff]  ;;  %v5681_v9 = vld [vmem:[%s3808_s12 + $0x98] sm:$0xff] }
 0x14a   : > { %7611 = vst [vmem:[#allocation171_spill] sm:$0xff] %v5623_v10  ;;  %7612 = vst [vmem:[#allocation172_spill] sm:$0xff] %v5628_v0  ;;  %v5633_v31 = vpop.eup %3343  ;;  %2646 = vmatprep.subr.bf16.mxu1 %v5623_v10  ;;  %v5638_v13 = vpack.c.bf16 %v5628_v0, %v5618_v47  ;;  %3363 = vpow2.f32 %v5344_v20  ;;  %v3422_v10 = vld [vmem:[%s3808_s12 + $0x70] sm:$0xff]  ;;  %v5657_v47 = vld [vmem:[%s3808_s12 + $0x88] sm:$0xff]  ;;  %v5675_v17 = vmul.f32 %v7623_v8, %v1977_v21 }
 0x14b   : > { %7613 = vst [vmem:[#allocation173_spill] sm:$0xff] %v5633_v31  ;;  %v5646_v38 = vpop.eup %3345  ;;  %3365 = vpow2.f32 %v5346_v36  ;;  %v5654_v0 = vmul.f32 %v3422_v10, %v7618_v24  ;;  %v7619_v20 = vld [vmem:[#allocation74_spill] sm:$0xff]  ;;  %v5672_v24 = vmul.f32 %v7622_v27, %v1975_v22 }
 0x14c   : > { %7614 = vst [vmem:[#allocation174_spill] sm:$0xff] %v5638_v13  ;;  %7616 = vst [vmem:[#allocation77_spill] sm:$0xff] %v5646_v38  ;;  %v5661_v58 = vmul.f32 %v5657_v47, %v7619_v20  ;;  %v5663_v45 = vpop.eup %3347  ;;  %2858 = vmatprep.subr.bf16.mxu0 %v5638_v13  ;;  %v5668_v36 = vpack.c.bf16 %v5646_v38, %v5633_v31  ;;  %3367 = vpow2.f32 %v5351_v39  ;;  %v7625_v13 = vld [vmem:[#allocation16_spill] sm:$0xff]  ;;  %v7626_v38 = vld [vmem:[#allocation79_spill] sm:$0xff] }
 0x14d   : > { %7620 = vst [vmem:[#allocation78_spill] sm:$0xff] %v5663_v45  ;;  %v5677_v20 = vpop.eup %3349  ;;  %3369 = vpow2.f32 %v5353_v52  ;;  %v5685_v18 = vmul.f32 %v5681_v9, %v7625_v13  ;;  %v5688_v31 = vmul.f32 %v7626_v38, %v1980_v42  ;;  %v7627_v39 = vld [vmem:[#allocation84_spill] sm:$0xff]  ;;  %v7630_v13 = vld [vmem:[#allocation18_spill] sm:$0xff] }
 0x14e   : > { %7621 = vst [vmem:[#allocation24_spill] sm:$0xff] %v5668_v36  ;;  %7624 = vst [vmem:[#allocation74_spill] sm:$0xff] %v5677_v20  ;;  %v5691_v6 = vmul.f32 %v7627_v39, %v1982_v44  ;;  %v5693_v22 = vpop.eup %3351  ;;  %2648 = vmatpush1.bf16.msra.mxu1 %v5668_v36  ;;  %v5698_v21 = vpack.c.bf16 %v5677_v20, %v5663_v45  ;;  %3371 = vpow2.f32 %v5362_v1  ;;  %v5702_v52 = vld [vmem:[%s3808_s12 + $0x80] sm:$0xff]  ;;  %v5709_v42 = vld [vmem:[%s3808_s12 + $0x90] sm:$0xff]  ;;  %v1979_v1 = vsub.f32 0.0, %v5612_v49 }
 0x14f   : > { %7628 = vst [vmem:[#allocation33_spill] sm:$0xff] %v5693_v22  ;;  %v5706_v27 = vmul.f32 %v5702_v52, %v7630_v13  ;;  %v7632_v44 = vld [vmem:[#allocation19_spill] sm:$0xff]  ;;  %v5715_v8 = vpop.eup %3353  ;;  %3373 = vpow2.f32 %v5364_v23  ;;  %v1981_v36 = vsub.f32 0.0, %v3422_v10  ;;  %v3427_v49 = vld [vmem:[%s3808_s12 + $0xa8] sm:$0xff]  ;;  %v7640_v23 = vld [vmem:[#allocation80_spill] sm:$0xff] }
 0x150   : > { %7629 = vst [vmem:[#allocation98_spill] sm:$0xff] %v5698_v21  ;;  %v5713_v38 = vmul.f32 %v5709_v42, %v7632_v44  ;;  %7634 = vst [vmem:[#allocation84_spill] sm:$0xff] %v5715_v8  ;;  %v5721_v20 = vpop.eup %3355  ;;  %2860 = vmatpush1.bf16.msra.mxu0 %v5698_v21  ;;  %v5726_v13 = vpack.c.bf16 %v5715_v8, %v5693_v22  ;;  %3375 = vpow2.f32 %v5372_v48  ;;  %v1984_v48 = vsub.f32 0.0, %v5657_v47  ;;  %v7658_v8 = vld [vmem:[#allocation53_spill] sm:$0xff] }
 0x151   : > { %7631 = vst [vmem:[#allocation16_spill] sm:$0xff] %v5706_v27  ;;  %7635 = vst [vmem:[#allocation18_spill] sm:$0xff] %v5721_v20  ;;  %v5733_v39 = vpop.eup %3357  ;;  %916 = vmatmul.mubr.f32.vlgmr.msra.gmra.mrb[0].mxu1 %v5186_v62  ;;  %3377 = vpow2.f32 %v5374_v50  ;;  %v5755_v10 = vmul.f32 %v3427_v49, %v7640_v23  ;;  %v7643_v62 = vld [vmem:[#allocation99_spill] sm:$0xff]  ;;  %v7649_v50 = vld [vmem:[#allocation86_spill] sm:$0xff] }
 0x152   : > { %7633 = vst [vmem:[#allocation79_spill] sm:$0xff] %v5713_v38  ;;  %7636 = vst [vmem:[#allocation19_spill] sm:$0xff] %v5726_v13  ;;  %v5742_v21 = vpop.eup %3359  ;;  %2650 = vmatprep.subr.bf16.mxu1 %v5726_v13  ;;  %v5747_v44 = vpack.c.bf16 %v5733_v39, %v5721_v20  ;;  %921 = vmatprep.mubr.f32.mxu1 %v5318_v19  ;;  %3379 = vpow2.f32 %v5400_v28  ;;  %v5761_v13 = vmul.f32 %v4712_v57, %v1979_v1  ;;  %v7677_v27 = vld [vmem:[#allocation31_spill] sm:$0xff] }
 0x153   : > { %7637 = vst [vmem:[#allocation175_spill] sm:$0xff] %v5733_v39  ;;  %7638 = vst [vmem:[#allocation176_spill] sm:$0xff] %v5742_v21  ;;  %v5757_v47 = vpop.eup %3361  ;;  %3381 = vpow2.f32 %v5405_v3  ;;  %v5764_v19 = vmul.f32 %v7643_v62, %v1981_v36  ;;  %v1986_v28 = vsub.f32 0.0, %v5681_v9  ;;  %v1983_v3 = vsub.f32 0.0, %v5702_v52  ;;  %v3428_v62 = vld [vmem:[%s3808_s12 + $0xb8] sm:$0xff]  ;;  %v7648_v9 = vld [vmem:[#allocation82_spill] sm:$0xff] }
 0x154   : > { %7639 = vst [vmem:[#allocation177_spill] sm:$0xff] %v5747_v44  ;;  %7641 = vst [vmem:[#allocation80_spill] sm:$0xff] %v5757_v47  ;;  %v5767_v39 = vpop.eup %3363  ;;  %2862 = vmatprep.subr.bf16.mxu0 %v5747_v44  ;;  %v5772_v23 = vpack.c.bf16 %v5757_v47, %v5742_v21  ;;  %3383 = vpow2.f32 %v5434_v54  ;;  %v1985_v57 = vsub.f32 0.0, %v5709_v42  ;;  %v5783_v36 = vmul.f32 %v3428_v62, %v7648_v9  ;;  %v5789_v54 = vld [vmem:[%s3808_s12 + $0xa0] sm:$0xff]  ;;  %v7650_v52 = vld [vmem:[#allocation51_spill] sm:$0xff] }
 0x155   : > { %7642 = vst [vmem:[#allocation178_spill] sm:$0xff] %v5761_v13  ;;  %7644 = vst [vmem:[#allocation99_spill] sm:$0xff] %v5764_v19  ;;  %v5777_v1 = vpop.eup %3365  ;;  %922 = vmatmul.mubr.f32.gmra.mrb[2].mxu1 %v5306_v25  ;;  %3385 = vpow2.f32 %v5436_v7  ;;  %v5786_v44 = vmul.f32 %v7649_v50, %v1984_v48  ;;  %v5793_v42 = vmul.f32 %v5789_v54, %v7650_v52  ;;  %v7027_v9 = vmov 0.0   ;;  %v7655_v52 = vld [vmem:[#allocation89_spill] sm:$0xff]  ;;  %v7656_v21 = vld [vmem:[#allocation52_spill] sm:$0xff] }
 0x156   : > { %7645 = vst [vmem:[#allocation179_spill] sm:$0xff] %v5767_v39  ;;  %7646 = vst [vmem:[#allocation180_spill] sm:$0xff] %v5772_v23  ;;  %v5795_v47 = vpop.eup %3367  ;;  %2652 = vmatpush1.bf16.msra.mxu1 %v5772_v23  ;;  %v5800_v7 = vpack.c.bf16 %v5777_v1, %v5767_v39  ;;  %992 = vmatprep.mubr.f32.mxu1 %v7027_v9  ;;  %3387 = vpow2.f32 %v5459_v5  ;;  %v1988_v48 = vsub.f32 0.0, %v3427_v49  ;;  %v1990_v50 = vsub.f32 0.0, %v3428_v62  ;;  %v3430_v23 = vld [vmem:[%s3808_s12 + $0xb0] sm:$0xff]  ;;  %v3431_v39 = vld [vmem:[%s3808_s12 + $0xc8] sm:$0xff] }
 0x157   : > { %7647 = vst [vmem:[#allocation181_spill] sm:$0xff] %v5777_v1  ;;  %7651 = vst [vmem:[#allocation82_spill] sm:$0xff] %v5793_v42  ;;  %v5804_v25 = vpop.eup %3369  ;;  %3389 = vpow2.f32 %v5461_v14  ;;  %v5808_v20 = vmul.f32 %v7655_v52, %v1986_v28  ;;  %v5812_v1 = vmul.f32 %v3430_v23, %v7656_v21  ;;  %v5816_v9 = vmul.f32 %v3431_v39, %v7658_v8  ;;  %v7662_v14 = vld [vmem:[#allocation35_spill] sm:$0xff]  ;;  %v7664_v28 = vld [vmem:[#allocation36_spill] sm:$0xff] }
 0x158   : > { %7652 = vst [vmem:[#allocation86_spill] sm:$0xff] %v5795_v47  ;;  %7653 = vst [vmem:[#allocation51_spill] sm:$0xff] %v5800_v7  ;;  %v5818_v45 = vpop.eup %3371  ;;  %2864 = vmatpush1.bf16.msra.mxu0 %v5800_v7  ;;  %v5823_v5 = vpack.c.bf16 %v5804_v25, %v5795_v47  ;;  %v5826_v49 = vmul.f32 %v7662_v14, %v1983_v3  ;;  %v5829_v62 = vmul.f32 %v7664_v28, %v1985_v57  ;;  %v3432_v21 = vld [vmem:[%s3808_s12 + $0xd8] sm:$0xff]  ;;  %v3433_v3 = vld [vmem:[%s3808_s12 + $0xc0] sm:$0xff] }
 0x159   : > { %7654 = vst [vmem:[#allocation182_spill] sm:$0xff] %v5804_v25  ;;  %7657 = vst [vmem:[#allocation89_spill] sm:$0xff] %v5812_v1  ;;  %v7666_v52 = vld [vmem:[#allocation87_spill] sm:$0xff]  ;;  %v5835_v8 = vpop.eup %3373  ;;  %v7671_v14 = vld [vmem:[#allocation92_spill] sm:$0xff] }
 0x15a   : > { %7659 = vst [vmem:[#allocation52_spill] sm:$0xff] %v5816_v9  ;;  %7660 = vst [vmem:[#allocation53_spill] sm:$0xff] %v5818_v45  ;;  %v5833_v22 = vmul.f32 %v3432_v21, %v7666_v52  ;;  %v7669_v25 = vld [vmem:[#allocation91_spill] sm:$0xff]  ;;  %v5846_v38 = vmul.f32 %v3433_v3, %v7671_v14  ;;  %v5848_v57 = vpop.eup %3375  ;;  %2654 = vmatprep.subr.bf16.mxu1 %v5823_v5  ;;  %v5853_v28 = vpack.c.bf16 %v5835_v8, %v5818_v45  ;;  %v7675_v52 = vld [vmem:[#allocation93_spill] sm:$0xff] }
 0x15b   : > { %7661 = vst [vmem:[#allocation183_spill] sm:$0xff] %v5823_v5  ;;  %7663 = vst [vmem:[#allocation35_spill] sm:$0xff] %v5826_v49  ;;  %v5842_v47 = vmul.f32 %v7669_v25, %v1988_v48  ;;  %v5856_v7 = vmul.f32 %v7675_v52, %v1990_v50  ;;  %v3434_v13 = vld [vmem:[%s3808_s12 + $0xd0] sm:$0xff]  ;;  %v1987_v25 = vsub.f32 0.0, %v5789_v54  ;;  %v5863_v48 = vpop.eup %3377  ;;  %1872 = vmatmul.mubr.f32.vlgmr.msra.gmra.mrb[0].mxu0 %v5339_v35  ;;  %v1989_v50 = vsub.f32 0.0, %v3430_v23  ;;  %v7683_v23 = vld [vmem:[#allocation95_spill] sm:$0xff] }
 0x15c   : > { %7665 = vst [vmem:[#allocation36_spill] sm:$0xff] %v5829_v62  ;;  %7667 = vst [vmem:[#allocation87_spill] sm:$0xff] %v5833_v22  ;;  %v5860_v19 = vmul.f32 %v3434_v13, %v7677_v27  ;;  %v1992_v52 = vsub.f32 0.0, %v3431_v39  ;;  %2866 = vmatprep.subr.bf16.mxu0 %v5853_v28  ;;  %v5875_v27 = vpack.c.bf16 %v5863_v48, %v5848_v57  ;;  %1877 = vmatprep.mubr.f32.mxu0 %v5463_v29  ;;  %v3435_v39 = vld [vmem:[%s3808_s12 + $0xe8] sm:$0xff]  ;;  %v7684_v42 = vld [vmem:[#allocation103_spill] sm:$0xff] }
 0x15d   : > { %7668 = vst [vmem:[#allocation184_spill] sm:$0xff] %v5835_v8  ;;  %7670 = vst [vmem:[#allocation91_spill] sm:$0xff] %v5842_v47  ;;  %v5870_v8 = vpop.eup %3379  ;;  %v1994_v35 = vsub.f32 0.0, %v3432_v21  ;;  %v5886_v45 = vmul.f32 %v3435_v39, %v7683_v23  ;;  %v1993_v29 = vsub.f32 0.0, %v3434_v13  ;;  %v7687_v14 = vld [vmem:[#allocation101_spill] sm:$0xff]  ;;  %v7689_v13 = vpack.c.bf16 %v5385_v59, %v5378_v60  ;;  %v3437_v47 = vld [vmem:[%s3808_s12 + $0xe0] sm:$0xff] }
 0x15e   : > { %7672 = vst [vmem:[#allocation92_spill] sm:$0xff] %v5846_v38  ;;  %7673 = vst [vmem:[#allocation185_spill] sm:$0xff] %v5848_v57  ;;  %v5882_v5 = vpop.eup %3381  ;;  %v1991_v57 = vsub.f32 0.0, %v3433_v3  ;;  %2656 = vmatpush1.bf16.msra.mxu1 %v5875_v27  ;;  %v7692_v23 = vld [vmem:[#allocation37_spill] sm:$0xff]  ;;  %v7695_v59 = vmov 0.0   ;;  %v3440_v49 = vld [vmem:[%s3808_s12 + $0x118] sm:$0xff] }
 0x15f   : > { %7674 = vst [vmem:[#allocation186_spill] sm:$0xff] %v5853_v28  ;;  %7676 = vst [vmem:[#allocation93_spill] sm:$0xff] %v5856_v7  ;;  %v3436_v28 = vld [vmem:[%s3808_s12 + $0xf8] sm:$0xff]  ;;  %v5892_v1 = vpop.eup %3383  ;;  %v5897_v21 = vpack.c.bf16 %v5882_v5, %v5870_v8  ;;  %2658 = vmatprep.subr.bf16.mxu1 %v7689_v13  ;;  %1878 = vmatmul.mubr.f32.gmra.mrb[2].mxu0 %v5451_v26  ;;  %v5920_v38 = vmul.f32 %v3437_v47, %v7692_v23  ;;  %v7699_v26 = vld [vmem:[#allocation141_spill] sm:$0xff] }
 0x160   : > { %7678 = vst [vmem:[#allocation31_spill] sm:$0xff] %v5860_v19  ;;  %7679 = vst [vmem:[#allocation187_spill] sm:$0xff] %v5863_v48  ;;  %v5890_v48 = vmul.f32 %v3436_v28, %v7684_v42  ;;  %v5904_v42 = vmul.f32 %v7687_v14, %v1987_v25  ;;  %v5906_v3 = vpop.eup %3385  ;;  %v1996_v25 = vsub.f32 0.0, %v3435_v39  ;;  %1948 = vmatprep.mubr.f32.mxu0 %v7695_v59  ;;  %v1998_v39 = vsub.f32 0.0, %v3436_v28  ;;  %v3439_v7 = vld [vmem:[%s3808_s12 + $0x108] sm:$0xff]  ;;  %v7703_v62 = vld [vmem:[#allocation115_spill] sm:$0xff] }
 0x161   : > { %7680 = vst [vmem:[#allocation188_spill] sm:$0xff] %v5870_v8  ;;  %7681 = vst [vmem:[#allocation189_spill] sm:$0xff] %v5875_v27  ;;  %v7690_v27 = vld [vmem:[#allocation102_spill] sm:$0xff]  ;;  %v7691_v8 = vld [vmem:[#allocation105_spill] sm:$0xff]  ;;  %v5922_v14 = vpop.eup %3387  ;;  %2868 = vmatpush1.bf16.msra.mxu0 %v5897_v21  ;;  %v5927_v60 = vpack.c.bf16 %v5906_v3, %v5892_v1  ;;  %2566 = vmatmul.mubr.msk.f32.vlgmr.msra.gmra.mrb[0].mxu1 %vm816_vm0, %v7699_v26 }
 0x162   : > { %7682 = vst [vmem:[#allocation190_spill] sm:$0xff] %v5882_v5  ;;  %7685 = vst [vmem:[#allocation95_spill] sm:$0xff] %v5892_v1  ;;  %v5913_v5 = vmul.f32 %v7690_v27, %v1989_v50  ;;  %v5916_v54 = vmul.f32 %v7691_v8, %v1992_v52  ;;  %v7696_v50 = vld [vmem:[#allocation108_spill] sm:$0xff]  ;;  %v3438_v52 = vld [vmem:[%s3808_s12 + $0xf0] sm:$0xff]  ;;  %v5937_v13 = vpop.eup %3389  ;;  %998 = vmatprep.mubr.f32.mxu1 %v7695_v59 }
 0x163   : > { %7686 = vst [vmem:[#allocation103_spill] sm:$0xff] %v5897_v21  ;;  %7688 = vst [vmem:[#allocation101_spill] sm:$0xff] %v5906_v3  ;;  %v5931_v8 = vmul.f32 %v7696_v50, %v1994_v35  ;;  %v7697_v27 = vld [vmem:[#allocation38_spill] sm:$0xff]  ;;  %v7700_v21 = vld [vmem:[#allocation109_spill] sm:$0xff]  ;;  %2870 = vmatprep.subr.bf16.mxu0 %v5927_v60 }
 0x164   : > { %7693 = vst [vmem:[#allocation102_spill] sm:$0xff] %v5922_v14  ;;  %7694 = vst [vmem:[#allocation105_spill] sm:$0xff] %v5927_v60  ;;  %v5935_v23 = vmul.f32 %v3438_v52, %v7697_v27  ;;  %v5942_v3 = vmul.f32 %v7700_v21, %v1991_v57  ;;  %v7701_v1 = vld [vmem:[#allocation112_spill] sm:$0xff]  ;;  %v7702_v35 = vld [vmem:[#allocation113_spill] sm:$0xff]  ;;  %v5953_v27 = vmul.f32 %v3440_v49, %v7703_v62 }
 0x165   : > { %7698 = vst [vmem:[#allocation37_spill] sm:$0xff] %v5937_v13  ;;  %v5945_v19 = vmul.f32 %v7701_v1, %v1993_v29  ;;  %v5949_v50 = vmul.f32 %v3439_v7, %v7702_v35  ;;  %v7704_v28 = vld [vmem:[#allocation68_spill] sm:$0xff]  ;;  %v5961_v57 = vpack.c.bf16 %v5937_v13, %v5922_v14  ;;  %v7707_v1 = vld [vmem:[#allocation6_spill] sm:$0xff]  ;;  %v7709_v26 = vld [vmem:[#allocation5_spill] sm:$0xff]  ;;  %v7710_v62 = vpack.c.bf16 %v5472_v53, %v5468_v34 }
 0x166   : > { %v7705_v9 = vpack.c.bf16 %v5413_v51, %v7704_v28  ;;  %v3441_v29 = vld [vmem:[%s3808_s12 + $0x100] sm:$0xff]  ;;  %v3442_v35 = vld [vmem:[%s3808_s12 + $0x110] sm:$0xff]  ;;  %v1997_v34 = vsub.f32 0.0, %v3438_v52  ;;  %v7713_v51 = vpack.c.bf16 %v5486_v4, %v5483_v12  ;;  %v3443_v52 = vld [vmem:[%s3808_s12 + $0x128] sm:$0xff] }
 0x167   : > { %7706 = vst [vmem:[#allocation108_spill] sm:$0xff] %v5961_v57  ;;  %v5965_v21 = vmul.f32 %v3441_v29, %v7707_v1  ;;  %v5969_v22 = vmul.f32 %v3442_v35, %v7709_v26  ;;  %v7712_v60 = vld [vmem:[#allocation4_spill] sm:$0xff]  ;;  %v1995_v1 = vsub.f32 0.0, %v3437_v47  ;;  %2872 = vmatpush1.bf16.msra.mxu0 %v5961_v57  ;;  %v7716_v12 = vld [vmem:[#allocation46_spill] sm:$0xff]  ;;  %v1999_v53 = vsub.f32 0.0, %v3441_v29  ;;  %v7718_v26 = vld [vmem:[#allocation155_spill] sm:$0xff] }
 0x168   : > { %2660 = vmatpush1.bf16.msra.mxu1 %v7705_v9  ;;  %v7711_v9 = vld [vmem:[#allocation116_spill] sm:$0xff]  ;;  %v5981_v13 = vmul.f32 %v7712_v60, %v1998_v39  ;;  %2874 = vmatprep.subr.bf16.mxu0 %v7713_v51  ;;  %v7717_v51 = vld [vmem:[#allocation121_spill] sm:$0xff]  ;;  %v2001_v60 = vsub.f32 0.0, %v3442_v35  ;;  %v3444_v4 = vld [vmem:[%s3808_s12 + $0x138] sm:$0xff]  ;;  %v2004_v29 = vsub.f32 0.0, %v3443_v52  ;;  %v7722_v35 = vpack.c.bf16 %v5499_v37, %v5496_v61 }
 0x169   : > { %7708 = vst [vmem:[#allocation38_spill] sm:$0xff] %v5965_v21  ;;  %2662 = vmatprep.subr.bf16.mxu1 %v7710_v62  ;;  %v5978_v28 = vmul.f32 %v7711_v9, %v1996_v25  ;;  %v2000_v62 = vsub.f32 0.0, %v3439_v7  ;;  %v7714_v25 = vld [vmem:[#allocation50_spill] sm:$0xff]  ;;  %v2002_v9 = vsub.f32 0.0, %v3440_v49  ;;  %v7715_v7 = vpack.c.bf16 %v5490_v32, %v5476_v56  ;;  %v7720_v56 = vld [vmem:[#allocation40_spill] sm:$0xff]  ;;  %v7745_v14 = vld [vmem:[#allocation15_spill] sm:$0xff] }
 0x16a   : > { %2567 = vmatmul.mubr.msk.f32.gmra.mrb[2].mxu1 %vm816_vm0, %v7714_v25  ;;  %v6007_v47 = vmul.f32 %v3443_v52, %v7717_v51  ;;  %2572 = vmatmul.mubr.msk.f32.vlgmr.msra.gmra.mrb[0].mxu0 %vm816_vm0, %v7718_v26  ;;  %v7719_v49 = vpack.c.bf16 %v5516_v40, %v5506_v63  ;;  %v7721_v51 = vld [vmem:[#allocation69_spill] sm:$0xff]  ;;  %v7723_v40 = vld [vmem:[#allocation120_spill] sm:$0xff]  ;;  %v7726_v52 = vpack.c.bf16 %v5565_v41, %v5562_v30  ;;  %v7731_v41 = vld [vmem:[#allocation10_spill] sm:$0xff] }
 0x16b   : > { %1147 = vmatprep.mubr.f32.mxu1 %v7716_v12  ;;  %v6021_v39 = vmul.f32 %v3444_v4, %v7721_v51  ;;  %2876 = vmatpush1.bf16.msra.mxu0 %v7722_v35  ;;  %v6028_v63 = vmul.f32 %v7723_v40, %v1997_v34  ;;  %v2006_v51 = vsub.f32 0.0, %v3444_v4  ;;  %v7727_v61 = vld [vmem:[#allocation124_spill] sm:$0xff]  ;;  %v3446_v35 = vld [vmem:[%s3808_s12 + $0x130] sm:$0xff]  ;;  %v7729_v40 = vld [vmem:[#allocation11_spill] sm:$0xff]  ;;  %v7730_v4 = vpack.c.bf16 %v5537_v11, %v5530_v43 }
 0x16c   : > { %2664 = vmatpush1.bf16.msra.mxu1 %v7715_v7  ;;  %v6017_v7 = vmul.f32 %v7720_v56, %v1995_v1  ;;  %1954 = vmatprep.mubr.f32.mxu0 %v7695_v59  ;;  %v3445_v1 = vld [vmem:[%s3808_s12 + $0x120] sm:$0xff]  ;;  %v7725_v56 = vld [vmem:[#allocation7_spill] sm:$0xff]  ;;  %v6041_v37 = vmul.f32 %v7727_v61, %v2002_v9  ;;  %v6055_v30 = vmul.f32 %v7731_v41, %v1999_v53  ;;  %v7733_v25 = vld [vmem:[#allocation41_spill] sm:$0xff]  ;;  %v2005_v12 = vsub.f32 0.0, %v3446_v35 }
 0x16d   : > { %2666 = vmatprep.subr.bf16.mxu1 %v7719_v49  ;;  %v7724_v49 = vld [vmem:[#allocation70_spill] sm:$0xff]  ;;  %v6035_v57 = vmul.f32 %v3445_v1, %v7725_v56  ;;  %2878 = vmatprep.subr.bf16.mxu0 %v7726_v52  ;;  %v7728_v26 = vld [vmem:[#allocation8_spill] sm:$0xff]  ;;  %v2003_v56 = vsub.f32 0.0, %v3445_v1  ;;  %v7732_v52 = vld [vmem:[#allocation125_spill] sm:$0xff]  ;;  %v7735_v1 = vpack.c.bf16 %v5602_v33, %v5590_v16 }
 0x16e   : > { %v6031_v32 = vmul.f32 %v7724_v49, %v2000_v62  ;;  %v6045_v34 = vmul.f32 %v3446_v35, %v7728_v26  ;;  %v3447_v62 = vld [vmem:[%s3808_s12 + $0x148] sm:$0xff]  ;;  %v6058_v9 = vmul.f32 %v7732_v52, %v2001_v60  ;;  %v3448_v61 = vld [vmem:[%s3808_s12 + $0x158] sm:$0xff]  ;;  %v7734_v59 = vld [vmem:[#allocation64_spill] sm:$0xff] }
 0x16f   : > { %v6049_v49 = vmul.f32 %v3447_v62, %v7729_v40  ;;  %v6062_v26 = vmul.f32 %v3448_v61, %v7733_v25  ;;  %2573 = vmatmul.mubr.msk.f32.gmra.mrb[2].mxu0 %vm816_vm0, %v7734_v59  ;;  %v7736_v43 = vld [vmem:[#allocation42_spill] sm:$0xff]  ;;  %v3449_v53 = vld [vmem:[%s3808_s12 + $0x140] sm:$0xff]  ;;  %v7737_v60 = vld [vmem:[#allocation71_spill] sm:$0xff]  ;;  %v2008_v41 = vsub.f32 0.0, %v3447_v62  ;;  %v7746_v62 = vpack.c.bf16 %v5650_v46, %v5644_v2 }
 0x170   : > { %2668 = vmatpush1.bf16.msra.mxu1 %v7730_v4  ;;  %v6070_v11 = vmul.f32 %v7736_v43, %v2004_v29  ;;  %v6074_v40 = vmul.f32 %v3449_v53, %v7737_v60  ;;  %v3450_v4 = vld [vmem:[%s3808_s12 + $0x150] sm:$0xff]  ;;  %v7739_v52 = vld [vmem:[#allocation169_spill] sm:$0xff]  ;;  %v7742_v33 = vld [vmem:[#allocation128_spill] sm:$0xff]  ;;  %v7756_v46 = vpack.c.bf16 %v5654_v0, %v5616_v55 }
 0x171   : > { %2670 = vmatprep.subr.bf16.mxu1 %v7735_v1  ;;  %v7738_v25 = vld [vmem:[#allocation130_spill] sm:$0xff]  ;;  %v7740_v59 = vpack.c.bf16 %v5586_v15, %v7739_v52  ;;  %v6085_v29 = vmul.f32 %v7742_v33, %v2006_v51  ;;  %v7743_v1 = vld [vmem:[#allocation13_spill] sm:$0xff]  ;;  %v7747_v15 = vld [vmem:[#allocation132_spill] sm:$0xff] }
 0x172   : > { %v6078_v35 = vmul.f32 %v3450_v4, %v7738_v25  ;;  %v7741_v16 = vld [vmem:[#allocation154_spill] sm:$0xff]  ;;  %v6088_v43 = vmul.f32 %v7743_v1, %v2003_v56  ;;  %v6091_v60 = vld [vmem:[%s3808_s12 + $0x168] sm:$0xff]  ;;  %v2010_v25 = vsub.f32 0.0, %v3448_v61  ;;  %v6104_v52 = vld [vmem:[%s3808_s12 + $0x178] sm:$0xff] }
 0x173   : > { %2880 = vmatpush1.bf16.msra.mxu0 %v7740_v59  ;;  %2175 = vmatprep.mubr.f32.mxu0 %v7741_v16  ;;  %v6095_v21 = vmul.f32 %v6091_v60, %v7745_v14  ;;  %v6101_v59 = vmul.f32 %v7747_v15, %v2005_v12  ;;  %v7749_v51 = vld [vmem:[#allocation14_spill] sm:$0xff]  ;;  %v6111_v33 = vld [vmem:[%s3808_s12 + $0x160] sm:$0xff]  ;;  %v7751_v1 = vld [vmem:[#allocation135_spill] sm:$0xff]  ;;  %v7762_v15 = vpack.c.bf16 %v5675_v17, %v5672_v24 }
 0x174   : > { %7744 = vst [vmem:[#allocation109_spill] sm:$0xff] %v6088_v43  ;;  %2882 = vmatprep.subr.bf16.mxu0 %v7746_v62  ;;  %v6108_v56 = vmul.f32 %v6104_v52, %v7749_v51  ;;  %7750 = vst [vmem:[#allocation113_spill] sm:$0xff] %v6111_v33  ;;  %v6115_v14 = vmul.f32 %v6111_v33, %v7751_v1  ;;  %v6118_v61 = vld [vmem:[%s3808_s12 + $0x170] sm:$0xff]  ;;  %v7754_v16 = vld [vmem:[#allocation72_spill] sm:$0xff]  ;;  %2672 = vmatpush1.bf16.msra.mxu1 %v7756_v46  ;;  %v2007_v51 = vsub.f32 0.0, %v3449_v53 }
 0x175   : > { %7748 = vst [vmem:[#allocation112_spill] sm:$0xff] %v6101_v59  ;;  %7753 = vst [vmem:[#allocation68_spill] sm:$0xff] %v6118_v61  ;;  %v6122_v2 = vmul.f32 %v6118_v61, %v7754_v16  ;;  %v7757_v1 = vpack.c.bf16 %v5685_v18, %v5661_v58  ;;  %v7758_v55 = vld [vmem:[#allocation43_spill] sm:$0xff]  ;;  %v7760_v46 = vld [vmem:[#allocation44_spill] sm:$0xff]  ;;  %v2009_v62 = vsub.f32 0.0, %v3450_v4  ;;  %v7763_v4 = vpack.c.bf16 %v5691_v6, %v5688_v31 }
 0x176   : > { %7752 = vst [vmem:[#allocation115_spill] sm:$0xff] %v6115_v14  ;;  %v6139_v0 = vmul.f32 %v7758_v55, %v2008_v41  ;;  %v6142_v12 = vmul.f32 %v7760_v46, %v2010_v25  ;;  %v7765_v46 = vld [vmem:[#allocation79_spill] sm:$0xff]  ;;  %v7766_v41 = vld [vmem:[#allocation16_spill] sm:$0xff]  ;;  %v7768_v31 = vld [vmem:[#allocation137_spill] sm:$0xff] }
 0x177   : > { %7755 = vst [vmem:[#allocation6_spill] sm:$0xff] %v6122_v2  ;;  %2674 = vmatprep.subr.bf16.mxu1 %v7757_v1  ;;  %2884 = vmatpush1.bf16.msra.mxu0 %v7762_v15  ;;  %v3455_v15 = vld [vmem:[%s3808_s12 + $0x188] sm:$0xff]  ;;  %v7764_v1 = vld [vmem:[#allocation142_spill] sm:$0xff]  ;;  %v7767_v53 = vpack.c.bf16 %v7765_v46, %v7766_v41  ;;  %v6172_v6 = vmul.f32 %v7768_v31, %v2007_v51  ;;  %v7770_v24 = vld [vmem:[#allocation143_spill] sm:$0xff] }
 0x178   : > { %7759 = vst [vmem:[#allocation5_spill] sm:$0xff] %v6139_v0  ;;  %7761 = vst [vmem:[#allocation116_spill] sm:$0xff] %v6142_v12  ;;  %2886 = vmatprep.subr.bf16.mxu0 %v7763_v4  ;;  %v6166_v55 = vmul.f32 %v3455_v15, %v7764_v1  ;;  %v3456_v4 = vld [vmem:[%s3808_s12 + $0x198] sm:$0xff]  ;;  %v3457_v58 = vld [vmem:[%s3808_s12 + $0x1a8] sm:$0xff]  ;;  %v7774_v1 = vpack.c.bf16 %v5783_v36, %v5755_v10  ;;  %v2016_v17 = vsub.f32 0.0, %v3455_v15 }
 0x179   : > { %2676 = vmatpush1.bf16.msra.mxu1 %v7767_v53  ;;  %7769 = vst [vmem:[#allocation4_spill] sm:$0xff] %v6172_v6  ;;  %v6176_v18 = vmul.f32 %v3456_v4, %v7770_v24  ;;  %v7772_v25 = vld [vmem:[#allocation156_spill] sm:$0xff]  ;;  %v7775_v53 = vld [vmem:[#allocation139_spill] sm:$0xff]  ;;  %v7777_v46 = vld [vmem:[#allocation29_spill] sm:$0xff]  ;;  %v2020_v61 = vsub.f32 0.0, %v3457_v58 }
 0x17a   : > { %v6181_v16 = vmul.f32 %v3457_v58, %v7772_v25  ;;  %2678 = vmatprep.subr.bf16.mxu1 %v7774_v1  ;;  %v6189_v41 = vmul.f32 %v7775_v53, %v2009_v62  ;;  %v3458_v24 = vld [vmem:[%s3808_s12 + $0x1b8] sm:$0xff]  ;;  %v7780_v25 = vld [vmem:[#allocation178_spill] sm:$0xff]  ;;  %v2018_v1 = vsub.f32 0.0, %v3456_v4  ;;  %v3459_v51 = vld [vmem:[%s3808_s12 + $0x1a0] sm:$0xff]  ;;  %v7784_v53 = vpack.c.bf16 %v5808_v20, %v5786_v44 }
 0x17b   : > { %7771 = vst [vmem:[#allocation121_spill] sm:$0xff] %v6176_v18  ;;  %v6193_v31 = vmul.f32 %v3458_v24, %v7777_v46  ;;  %v7779_v14 = vld [vmem:[#allocation99_spill] sm:$0xff]  ;;  %v3460_v46 = vld [vmem:[%s3808_s12 + $0x1b0] sm:$0xff]  ;;  %v6217_v4 = vld [vmem:[%s3808_s12 + $0x180] sm:$0xff] }
 0x17c   : > { %7773 = vst [vmem:[#allocation40_spill] sm:$0xff] %v6181_v16  ;;  %7776 = vst [vmem:[#allocation69_spill] sm:$0xff] %v6189_v41  ;;  %v7781_v2 = vpack.c.bf16 %v7779_v14, %v7780_v25  ;;  %v7782_v0 = vld [vmem:[#allocation55_spill] sm:$0xff]  ;;  %v7785_v14 = vld [vmem:[#allocation30_spill] sm:$0xff] }
 0x17d   : > { %7778 = vst [vmem:[#allocation120_spill] sm:$0xff] %v6193_v31  ;;  %v6202_v62 = vmul.f32 %v3459_v51, %v7782_v0  ;;  %v7787_v25 = vld [vmem:[#allocation160_spill] sm:$0xff]  ;;  %v2015_v0 = vsub.f32 0.0, %v6217_v4  ;;  %v7789_v10 = vld [vmem:[#allocation89_spill] sm:$0xff]  ;;  %v7790_v12 = vld [vmem:[#allocation82_spill] sm:$0xff] }
 0x17e   : > { %2888 = vmatpush1.bf16.msra.mxu0 %v7781_v2  ;;  %v6210_v2 = vmul.f32 %v7785_v14, %v2016_v17  ;;  %v6214_v36 = vmul.f32 %v3460_v46, %v7787_v25  ;;  %v7791_v33 = vpack.c.bf16 %v7789_v10, %v7790_v12  ;;  %v7792_v44 = vld [vmem:[#allocation158_spill] sm:$0xff]  ;;  %v3463_v25 = vld [vmem:[%s3808_s12 + $0x1c8] sm:$0xff]  ;;  %v7795_v31 = vld [vmem:[#allocation87_spill] sm:$0xff] }
 0x17f   : > { %7783 = vst [vmem:[#allocation70_spill] sm:$0xff] %v6202_v62  ;;  %2890 = vmatprep.subr.bf16.mxu0 %v7784_v53  ;;  %v6225_v53 = vmul.f32 %v7792_v44, %v2018_v1  ;;  %v6228_v17 = vld [vmem:[%s3808_s12 + $0x190] sm:$0xff]  ;;  %v7796_v41 = vld [vmem:[#allocation52_spill] sm:$0xff]  ;;  %v7798_v12 = vld [vmem:[#allocation161_spill] sm:$0xff] }
 0x180   : > { %7786 = vst [vmem:[#allocation7_spill] sm:$0xff] %v6210_v2  ;;  %7788 = vst [vmem:[#allocation124_spill] sm:$0xff] %v6214_v36  ;;  %2680 = vmatpush1.bf16.msra.mxu1 %v7791_v33  ;;  %v2017_v14 = vsub.f32 0.0, %v6228_v17  ;;  %v7793_v15 = vld [vmem:[#allocation66_spill] sm:$0xff]  ;;  %v7797_v6 = vpack.c.bf16 %v7795_v31, %v7796_v41  ;;  %v6241_v10 = vmul.f32 %v7798_v12, %v2015_v0  ;;  %v3464_v1 = vld [vmem:[%s3808_s12 + $0x1d8] sm:$0xff]  ;;  %v2022_v33 = vsub.f32 0.0, %v3458_v24 }
 0x181   : > { %v6233_v16 = vmul.f32 %v3463_v25, %v7793_v15  ;;  %v7799_v44 = vld [vmem:[#allocation73_spill] sm:$0xff]  ;;  %v7800_v43 = vld [vmem:[#allocation36_spill] sm:$0xff]  ;;  %v7801_v59 = vld [vmem:[#allocation35_spill] sm:$0xff]  ;;  %v2019_v24 = vsub.f32 0.0, %v3459_v51 }
 0x182   : > { %2682 = vmatprep.subr.bf16.mxu1 %v7797_v6  ;;  %v6245_v20 = vmul.f32 %v3464_v1, %v7799_v44  ;;  %v7802_v15 = vpack.c.bf16 %v7800_v43, %v7801_v59  ;;  %v7803_v6 = vld [vmem:[#allocation163_spill] sm:$0xff]  ;;  %v3465_v62 = vld [vmem:[%s3808_s12 + $0x1c0] sm:$0xff]  ;;  %v7804_v0 = vld [vmem:[#allocation62_spill] sm:$0xff]  ;;  %v2021_v43 = vsub.f32 0.0, %v3460_v46  ;;  %v2024_v46 = vsub.f32 0.0, %v3463_v25 }
 0x183   : > { %7794 = vst [vmem:[#allocation8_spill] sm:$0xff] %v6233_v16  ;;  %v6253_v31 = vmul.f32 %v7803_v6, %v2017_v14  ;;  %v6257_v12 = vmul.f32 %v3465_v62, %v7804_v0  ;;  %v7805_v36 = vld [vmem:[#allocation93_spill] sm:$0xff]  ;;  %v7806_v44 = vld [vmem:[#allocation91_spill] sm:$0xff]  ;;  %v7808_v59 = vld [vmem:[#allocation58_spill] sm:$0xff] }
 0x184   : > { %2892 = vmatpush1.bf16.msra.mxu0 %v7802_v15  ;;  %v7807_v18 = vpack.c.bf16 %v7805_v36, %v7806_v44  ;;  %v6265_v58 = vmul.f32 %v7808_v59, %v2020_v61  ;;  %v3466_v15 = vld [vmem:[%s3808_s12 + $0x1d0] sm:$0xff]  ;;  %v7809_v41 = vld [vmem:[#allocation167_spill] sm:$0xff]  ;;  %v7811_v2 = vld [vmem:[#allocation92_spill] sm:$0xff] }
 0x185   : > { %v6269_v14 = vmul.f32 %v3466_v15, %v7809_v41  ;;  %v7810_v6 = vld [vmem:[#allocation31_spill] sm:$0xff]  ;;  %v3467_v16 = vld [vmem:[%s3808_s12 + $0x1e8] sm:$0xff]  ;;  %v7814_v61 = vld [vmem:[#allocation56_spill] sm:$0xff]  ;;  %v7815_v41 = vpack.c.bf16 %v5890_v48, %v5886_v45 }
 0x186   : > { %2894 = vmatprep.subr.bf16.mxu0 %v7807_v18  ;;  %v7812_v0 = vpack.c.bf16 %v7810_v6, %v7811_v2  ;;  %v7813_v18 = vld [vmem:[#allocation61_spill] sm:$0xff]  ;;  %v6281_v59 = vmul.f32 %v3467_v16, %v7814_v61  ;;  %v7816_v2 = vld [vmem:[#allocation28_spill] sm:$0xff] }
 0x187   : > { %v6277_v44 = vmul.f32 %v7813_v18, %v2022_v33  ;;  %v6289_v6 = vmul.f32 %v7816_v2, %v2019_v24  ;;  %v7817_v36 = vld [vmem:[#allocation21_spill] sm:$0xff]  ;;  %v7818_v18 = vpack.c.bf16 %v5913_v5, %v5904_v42  ;;  %v7819_v48 = vld [vmem:[#allocation168_spill] sm:$0xff]  ;;  %v7822_v42 = vld [vmem:[#allocation22_spill] sm:$0xff] }
 0x188   : > { %2684 = vmatpush1.bf16.msra.mxu1 %v7812_v0  ;;  %v3468_v0 = vld [vmem:[%s3808_s12 + $0x1f8] sm:$0xff]  ;;  %v6301_v61 = vmul.f32 %v7819_v48, %v2021_v43  ;;  %v3469_v51 = vld [vmem:[%s3808_s12 + $0x1e0] sm:$0xff]  ;;  %v7820_v24 = vld [vmem:[#allocation173_spill] sm:$0xff]  ;;  %v6313_v25 = vmul.f32 %v7822_v42, %v2024_v46  ;;  %v7824_v48 = vpack.c.bf16 %v5935_v23, %v5920_v38 }
 0x189   : > { %2686 = vmatprep.subr.bf16.mxu1 %v7815_v41  ;;  %v6293_v33 = vmul.f32 %v3468_v0, %v7817_v36  ;;  %2896 = vmatpush1.bf16.msra.mxu0 %v7818_v18  ;;  %v2026_v41 = vsub.f32 0.0, %v3464_v1  ;;  %v6305_v2 = vmul.f32 %v3469_v51, %v7820_v24  ;;  %v7821_v36 = vpack.c.bf16 %v5931_v8, %v5916_v54  ;;  %v3470_v18 = vld [vmem:[%s3808_s12 + $0x1f0] sm:$0xff]  ;;  %v7823_v45 = vld [vmem:[#allocation77_spill] sm:$0xff]  ;;  %v7825_v8 = vld [vmem:[#allocation172_spill] sm:$0xff] }
 0x18a   : > { %v6317_v43 = vmul.f32 %v3470_v18, %v7823_v45  ;;  %v2023_v1 = vsub.f32 0.0, %v3465_v62  ;;  %v3471_v5 = vld [vmem:[%s3808_s12 + $0x208] sm:$0xff]  ;;  %v7828_v45 = vpack.c.bf16 %v5953_v27, %v5949_v50  ;;  %v7829_v23 = vld [vmem:[#allocation78_spill] sm:$0xff]  ;;  %v7830_v54 = vld [vmem:[#allocation84_spill] sm:$0xff] }
 0x18b   : > { %2898 = vmatprep.subr.bf16.mxu0 %v7821_v36  ;;  %v6325_v24 = vmul.f32 %v7825_v8, %v2026_v41  ;;  %v2025_v36 = vsub.f32 0.0, %v3466_v15  ;;  %v7826_v46 = vld [vmem:[#allocation33_spill] sm:$0xff]  ;;  %v2028_v15 = vsub.f32 0.0, %v3467_v16  ;;  %v7831_v8 = vpack.c.bf16 %v5945_v19, %v5942_v3  ;;  %v7832_v27 = vld [vmem:[#allocation74_spill] sm:$0xff]  ;;  %v3473_v38 = vld [vmem:[%s3808_s12 + $0x200] sm:$0xff] }
 0x18c   : > { %2688 = vmatpush1.bf16.msra.mxu1 %v7824_v48  ;;  %v6329_v42 = vmul.f32 %v3471_v5, %v7826_v46  ;;  %v6337_v62 = vmul.f32 %v7829_v23, %v2023_v1  ;;  %v3472_v48 = vld [vmem:[%s3808_s12 + $0x218] sm:$0xff]  ;;  %v7833_v1 = vld [vmem:[#allocation176_spill] sm:$0xff]  ;;  %v7836_v3 = vld [vmem:[#allocation18_spill] sm:$0xff]  ;;  %v2029_v19 = vsub.f32 0.0, %v3470_v18  ;;  %v2032_v18 = vsub.f32 0.0, %v3471_v5 }
 0x18d   : > { %2690 = vmatprep.subr.bf16.mxu1 %v7828_v45  ;;  %v6341_v41 = vmul.f32 %v3472_v48, %v7830_v54  ;;  %2900 = vmatpush1.bf16.msra.mxu0 %v7831_v8  ;;  %v6349_v46 = vmul.f32 %v7832_v27, %v2025_v36  ;;  %v2030_v45 = vsub.f32 0.0, %v3468_v0  ;;  %v6353_v23 = vmul.f32 %v3473_v38, %v7833_v1  ;;  %v3474_v8 = vld [vmem:[%s3808_s12 + $0x210] sm:$0xff]  ;;  %v7837_v50 = vld [vmem:[#allocation80_spill] sm:$0xff] }
 0x18e   : > { %7827 = vst [vmem:[#allocation11_spill] sm:$0xff] %v6329_v42  ;;  %v7835_v54 = vpack.c.bf16 %v5981_v13, %v5978_v28  ;;  %v6361_v16 = vmul.f32 %v7836_v3, %v2028_v15  ;;  %v6365_v36 = vmul.f32 %v3474_v8, %v7837_v50  ;;  %v2027_v0 = vsub.f32 0.0, %v3469_v51  ;;  %v7838_v27 = vld [vmem:[#allocation38_spill] sm:$0xff]  ;;  %v7840_v28 = vld [vmem:[#allocation175_spill] sm:$0xff]  ;;  %v3475_v42 = vld [vmem:[%s3808_s12 + $0x228] sm:$0xff] }
 0x18f   : > { %7834 = vst [vmem:[#allocation10_spill] sm:$0xff] %v6353_v23  ;;  %v7839_v1 = vpack.c.bf16 %v5969_v22, %v7838_v27  ;;  %v7841_v15 = vld [vmem:[#allocation86_spill] sm:$0xff]  ;;  %v7843_v50 = vpack.c.bf16 %v6021_v39, %v6007_v47  ;;  %v7844_v51 = vld [vmem:[#allocation179_spill] sm:$0xff]  ;;  %v7847_v39 = vld [vmem:[#allocation181_spill] sm:$0xff] }
 0x190   : > { %2902 = vmatprep.subr.bf16.mxu0 %v7835_v54  ;;  %v6373_v54 = vmul.f32 %v7840_v28, %v2030_v45  ;;  %v6377_v3 = vmul.f32 %v3475_v42, %v7841_v15  ;;  %v6385_v27 = vmul.f32 %v7844_v51, %v2027_v0  ;;  %v7845_v13 = vld [vmem:[#allocation182_spill] sm:$0xff]  ;;  %v7846_v28 = vpack.c.bf16 %v6028_v63, %v6017_v7  ;;  %v3477_v22 = vld [vmem:[%s3808_s12 + $0x220] sm:$0xff]  ;;  %v7848_v23 = vld [vmem:[#allocation185_spill] sm:$0xff] }
 0x191   : > { %2692 = vmatpush1.bf16.msra.mxu1 %v7839_v1  ;;  %v3476_v1 = vld [vmem:[%s3808_s12 + $0x238] sm:$0xff]  ;;  %v6397_v15 = vmul.f32 %v7847_v39, %v2029_v19  ;;  %v6401_v0 = vmul.f32 %v3477_v22, %v7848_v23  ;;  %v7850_v7 = vld [vmem:[#allocation53_spill] sm:$0xff]  ;;  %v3478_v51 = vld [vmem:[%s3808_s12 + $0x230] sm:$0xff]  ;;  %v2031_v19 = vsub.f32 0.0, %v3473_v38  ;;  %v2033_v39 = vsub.f32 0.0, %v3474_v8 }
 0x192   : > { %7842 = vst [vmem:[#allocation125_spill] sm:$0xff] %v6377_v3  ;;  %2694 = vmatprep.subr.bf16.mxu1 %v7843_v50  ;;  %v6389_v45 = vmul.f32 %v3476_v1, %v7845_v13  ;;  %2904 = vmatpush1.bf16.msra.mxu0 %v7846_v28  ;;  %v2034_v50 = vsub.f32 0.0, %v3472_v48  ;;  %v7849_v13 = vpack.c.bf16 %v6041_v37, %v6031_v32  ;;  %v7851_v28 = vld [vmem:[#allocation187_spill] sm:$0xff]  ;;  %v7853_v32 = vld [vmem:[#allocation184_spill] sm:$0xff]  ;;  %v2038_v5 = vsub.f32 0.0, %v3476_v1 }
 0x193   : > { %v6409_v63 = vmul.f32 %v7850_v7, %v2032_v18  ;;  %v6413_v47 = vmul.f32 %v3478_v51, %v7851_v28  ;;  %v7852_v48 = vpack.c.bf16 %v6045_v34, %v6035_v57  ;;  %v2935_v23 = vpack.c.bf16 %v6397_v15, %v6385_v27  ;;  %v7855_v28 = vld [vmem:[#allocation188_spill] sm:$0xff]  ;;  %v7857_v27 = vld [vmem:[#allocation190_spill] sm:$0xff] }
 0x194   : > { %2906 = vmatprep.subr.bf16.mxu0 %v7849_v13  ;;  %v2106_v37 = vmul.f32 %v7853_v32, %v2034_v50  ;;  %v2036_v13 = vsub.f32 0.0, %v3475_v42  ;;  %v7854_v18 = vpack.c.bf16 %v6062_v26, %v6049_v49  ;;  %v2103_v38 = vmul.f32 %v7855_v28, %v2031_v19  ;;  %v7858_v42 = vld [vmem:[#allocation95_spill] sm:$0xff]  ;;  %v7872_v28 = vld [vmem:[#allocation112_spill] sm:$0xff] }
 0x195   : > { %2696 = vmatpush1.bf16.msra.mxu1 %v7852_v48  ;;  %v2727_v7 = vpack.c.bf16 %v6413_v47, %v6401_v0  ;;  %v2035_v3 = vsub.f32 0.0, %v3477_v22  ;;  %v7856_v57 = vpack.c.bf16 %v6058_v9, %v6055_v30  ;;  %v2105_v8 = vmul.f32 %v7857_v27, %v2033_v39  ;;  %v7861_v47 = vld [vmem:[#allocation47_spill] sm:$0xff]  ;;  %v7863_v0 = vld [vmem:[#allocation144_spill] sm:$0xff]  ;;  %v7864_v9 = vld [vmem:[#allocation101_spill] sm:$0xff] }
 0x196   : > { %2698 = vmatprep.subr.bf16.mxu1 %v7854_v18  ;;  %v2937_v34 = vpack.c.bf16 %v2106_v37, %v6409_v63  ;;  %v2108_v15 = vmul.f32 %v7858_v42, %v2036_v13  ;;  %v2037_v50 = vsub.f32 0.0, %v3478_v51  ;;  %v7859_v49 = vpack.c.bf16 %v6085_v29, %v6070_v11  ;;  %v7865_v63 = vld [vmem:[#allocation102_spill] sm:$0xff]  ;;  %v7867_v51 = vld [vmem:[#allocation145_spill] sm:$0xff]  ;;  %v7868_v29 = vld [vmem:[#allocation147_spill] sm:$0xff] }
 0x197   : > { %2908 = vmatpush1.bf16.msra.mxu0 %v7856_v57  ;;  %v7860_v26 = vsub.f32 0.0, %v6091_v60  ;;  %v7862_v22 = vsub.f32 0.0, %v6104_v52  ;;  %v2110_v19 = vmul.f32 %v7864_v9, %v2038_v5  ;;  %v2107_v48 = vmul.f32 %v7865_v63, %v2035_v3  ;;  %v7869_v39 = vld [vmem:[#allocation37_spill] sm:$0xff]  ;;  %v7875_v57 = vld [vmem:[#allocation4_spill] sm:$0xff]  ;;  %v7887_v9 = vld [vmem:[#allocation115_spill] sm:$0xff] }
 0x198   : > { %2910 = vmatprep.subr.bf16.mxu0 %v7859_v49  ;;  %v7866_v32 = vpack.c.bf16 %v6078_v35, %v6074_v40  ;;  %v1059_v11 = vmul.f32 %v6217_v4, %v7867_v51  ;;  %v1061_v60 = vmul.f32 %v6228_v17, %v7868_v29  ;;  %v2939_v37 = vpack.c.bf16 %v2105_v8, %v2103_v38  ;;  %v7871_v5 = vld [vmem:[#allocation121_spill] sm:$0xff]  ;;  %v7879_v38 = vld [vmem:[#allocation148_spill] sm:$0xff] }
 0x199   : > { %v2084_v1 = vmul.f32 %v7861_v47, %v7860_v26  ;;  %v2086_v30 = vmul.f32 %v7863_v0, %v7862_v22  ;;  %v2109_v13 = vmul.f32 %v7869_v39, %v2037_v50  ;;  %v7870_v52 = vpack.c.bf16 %v6108_v56, %v6095_v21  ;;  %v7873_v40 = vld [vmem:[#allocation109_spill] sm:$0xff]  ;;  %v7880_v50 = vld [vmem:[#allocation68_spill] sm:$0xff]  ;;  %v7882_v26 = vld [vmem:[#allocation150_spill] sm:$0xff] }
 0x19a   : > { %2700 = vmatpush1.bf16.msra.mxu1 %v7866_v32  ;;  %v2705_v3 = vpack.c.bf16 %v7871_v5, %v6166_v55  ;;  %v2941_v18 = vpack.c.bf16 %v2110_v19, %v2108_v15  ;;  %v7874_v35 = vpack.c.bf16 %v7872_v28, %v7873_v40  ;;  %v7876_v4 = vld [vmem:[#allocation69_spill] sm:$0xff]  ;;  %v7881_v49 = vsub.f32 0.0, %v7880_v50  ;;  %v7883_v47 = vld [vmem:[#allocation116_spill] sm:$0xff]  ;;  %v7886_v0 = vld [vmem:[#allocation6_spill] sm:$0xff] }
 0x19b   : > { %2702 = vmatprep.subr.bf16.mxu1 %v7870_v52  ;;  %v2915_v27 = vpack.c.bf16 %v7876_v4, %v7875_v57  ;;  %v7877_v42 = vld [vmem:[#allocation113_spill] sm:$0xff]  ;;  %v2943_v56 = vpack.c.bf16 %v2109_v13, %v2107_v48  ;;  %v2917_v15 = vpack.c.bf16 %v2086_v30, %v2084_v1  ;;  %v7888_v19 = vpack.c.bf16 %v7886_v0, %v7887_v9  ;;  %v7889_v51 = vld [vmem:[#allocation120_spill] sm:$0xff]  ;;  %v7892_v48 = vld [vmem:[#allocation7_spill] sm:$0xff] }
 0x19c   : > { %2912 = vmatpush1.bf16.msra.mxu0 %v7874_v35  ;;  %v7878_v17 = vsub.f32 0.0, %v7877_v42  ;;  %v2085_v21 = vmul.f32 %v7882_v26, %v7881_v49  ;;  %v7884_v22 = vld [vmem:[#allocation5_spill] sm:$0xff]  ;;  %v2707_v63 = vpack.c.bf16 %v1061_v60, %v1059_v11  ;;  %v7890_v29 = vld [vmem:[#allocation40_spill] sm:$0xff]  ;;  %v7893_v13 = vpack.c.bf16 %v6225_v53, %v7892_v48  ;;  %v7895_v30 = vld [vmem:[#allocation70_spill] sm:$0xff] }
 0x19d   : > { %v7885_v55 = vpack.c.bf16 %v7883_v47, %v7884_v22  ;;  %v7891_v39 = vpack.c.bf16 %v7889_v51, %v7890_v29  ;;  %v7894_v1 = vld [vmem:[#allocation124_spill] sm:$0xff]  ;;  %v7899_v5 = vpack.c.bf16 %v6253_v31, %v6241_v10  ;;  %v7901_v53 = vpack.c.bf16 %v6269_v14, %v6257_v12  ;;  %v7929_v35 = vld [vmem:[#allocation155_spill] sm:$0xff]  ;;  %v7931_v4 = vld [vmem:[#allocation97_spill] sm:$0xff] }
 0x19e   : > { %v2083_v8 = vmul.f32 %v7879_v38, %v7878_v17  ;;  %2704 = vmatpush1.bf16.msra.mxu1 %v7888_v19  ;;  %v7896_v52 = vpack.c.bf16 %v7894_v1, %v7895_v30  ;;  %v7897_v11 = vld [vmem:[#allocation8_spill] sm:$0xff]  ;;  %v7902_v28 = vpack.c.bf16 %v6293_v33, %v6281_v59  ;;  %v7904_v10 = vpack.c.bf16 %v6325_v24, %v6313_v25  ;;  %v7912_v33 = vld [vmem:[#allocation10_spill] sm:$0xff]  ;;  %v7930_v57 = vld [vmem:[#allocation63_spill] sm:$0xff] }
 0x19f   : > { %2914 = vmatprep.subr.bf16.mxu0 %v7885_v55  ;;  %2706 = vmatprep.subr.bf16.mxu1 %v2705_v3  ;;  %v7898_v60 = vpack.c.bf16 %v6245_v20, %v7897_v11  ;;  %v7900_v3 = vpack.c.bf16 %v6277_v44, %v6265_v58  ;;  %v7903_v20 = vpack.c.bf16 %v6301_v61, %v6289_v6  ;;  %v7906_v58 = vld [vmem:[#allocation11_spill] sm:$0xff]  ;;  %v7909_v44 = vld [vmem:[#allocation45_spill] sm:$0xff]  ;;  %v7917_v24 = vmov 0.0   ;;  %v7928_v40 = vld [vmem:[#allocation60_spill] sm:$0xff] }
 0x1a0   : > { %2916 = vmatpush1.bf16.msra.mxu0 %v2915_v27  ;;  %v2919_v32 = vpack.c.bf16 %v2085_v21, %v2083_v8  ;;  %v7905_v31 = vpack.c.bf16 %v6317_v43, %v6305_v2  ;;  %v7907_v12 = vpack.c.bf16 %v6341_v41, %v7906_v58  ;;  %v7908_v14 = vpack.c.bf16 %v6349_v46, %v6337_v62  ;;  %v7911_v6 = vld [vmem:[#allocation49_spill] sm:$0xff]  ;;  %v7916_v43 = vld [vmem:[#allocation151_spill] sm:$0xff]  ;;  %v7920_v46 = vld [vmem:[#allocation166_spill] sm:$0xff] }
 0x1a1   : > { %2918 = vmatprep.subr.bf16.mxu0 %v2917_v15  ;;  %v7910_v59 = vpack.c.bf16 %v6373_v54, %v6361_v16  ;;  %v7913_v61 = vpack.c.bf16 %v6365_v36, %v7912_v33  ;;  %v7914_v2 = vld [vmem:[#allocation125_spill] sm:$0xff]  ;;  %v7922_v36 = vld [vmem:[#allocation75_spill] sm:$0xff]  ;;  %v7923_v54 = vld [vmem:[#allocation164_spill] sm:$0xff]  ;;  %v3516_v48 = vmov 0  }
 0x1a2   : > { %2708 = vmatpush1.bf16.msra.mxu1 %v2707_v63  ;;  %v7915_v25 = vpack.c.bf16 %v6389_v45, %v7914_v2  ;;  %v7918_v62 = vld [vmem:[#allocation153_spill] sm:$0xff]  ;;  %v7924_v45 = vld [vmem:[#allocation67_spill] sm:$0xff]  ;;  %v7934_v38 = vld [vmem:[#allocation154_spill] sm:$0xff]  ;;  %3077 = vset.pattern.permute.xlu0 %v3516_v48 }
 0x1a3   : > { %2710 = vmatprep.subr.bf16.mxu1 %v7891_v39  ;;  %v7919_v41 = vld [vmem:[#allocation65_spill] sm:$0xff]  ;;  %v7935_v50 = vld [vmem:[#allocation64_spill] sm:$0xff]  ;;  %v7936_v49 = vld [vmem:[#allocation23_spill] sm:$0xff]  ;;  %3078 = vset.pattern.permute.xlu1 %v3516_v48 }
 0x1a4   : > { %2920 = vmatpush1.bf16.msra.mxu0 %v2919_v32  ;;  %v7921_v16 = vld [vmem:[#allocation141_spill] sm:$0xff]  ;;  %v7937_v26 = vld [vmem:[#allocation34_spill] sm:$0xff]  ;;  %v7938_v21 = vld [vmem:[#allocation83_spill] sm:$0xff] }
 0x1a5   : > { %2922 = vmatprep.subr.bf16.mxu0 %v7893_v13  ;;  %v7932_v27 = vld [vmem:[#allocation81_spill] sm:$0xff]  ;;  %v7941_v22 = vld [vmem:[#allocation100_spill] sm:$0xff]  ;;  %v7943_v15 = vld [vmem:[#allocation26_spill] sm:$0xff] }
 0x1a6   : > { %2712 = vmatpush1.bf16.msra.mxu1 %v7896_v52  ;;  %v7933_v42 = vld [vmem:[#allocation57_spill] sm:$0xff]  ;;  %v7942_v55 = vld [vmem:[#allocation88_spill] sm:$0xff]  ;;  %v7947_v63 = vld [vmem:[#allocation54_spill] sm:$0xff] }
 0x1a7   : > { %2714 = vmatprep.subr.bf16.mxu1 %v7898_v60  ;;  %v3480_v17 = vld [vmem:[%s6695_s2 + $0x8] sm:$0xff]  ;;  %v7945_v9 = vld [vmem:[#allocation104_spill] sm:$0xff]  ;;  %v7948_v32 = vld [vmem:[#allocation90_spill] sm:$0xff] }
 0x1a8   : > { %2924 = vmatpush1.bf16.msra.mxu0 %v7899_v5  ;;  %v1962_v8 = vmul.f32 %v3480_v17, %v7934_v38  ;;  %v7940_v47 = vld [vmem:[#allocation17_spill] sm:$0xff]  ;;  %v7946_v19 = vld [vmem:[#allocation32_spill] sm:$0xff]  ;;  %v7949_v51 = vld [vmem:[#allocation106_spill] sm:$0xff] }
 0x1a9   : > { %2926 = vmatprep.subr.bf16.mxu0 %v7900_v3  ;;  %v7944_v0 = vld [vmem:[#allocation85_spill] sm:$0xff]  ;;  %v2445_v29 = vld [vmem:[%s6696_s3] sm:$0xff]  ;;  %v7951_v1 = vld [vmem:[#allocation94_spill] sm:$0xff] }
 0x1aa   : > { %2716 = vmatpush1.bf16.msra.mxu1 %v7901_v53  ;;  %v7950_v39 = vld [vmem:[#allocation96_spill] sm:$0xff]  ;;  %v2446_v13 = vld [vmem:[%s6696_s3 + $0x8] sm:$0xff]  ;;  %2449 = vperm.xlu0 %3077, %v2445_v29   ;;  %v7952_v30 = vld [vmem:[#allocation107_spill] sm:$0xff] }
 0x1ab   : > { %2718 = vmatprep.subr.bf16.mxu1 %v7902_v28  ;;  %v7953_v52 = vld [vmem:[#allocation110_spill] sm:$0xff]  ;;  %2454 = vperm.xlu1 %3078, %v2446_v13   ;;  %v7955_v60 = vld [vmem:[#allocation111_spill] sm:$0xff]  ;;  %v7956_v5 = vld [vmem:[#allocation117_spill] sm:$0xff] }
 0x1ac   : > { %2928 = vmatpush1.bf16.msra.mxu0 %v7903_v20  ;;  %v7954_v11 = vld [vmem:[#allocation114_spill] sm:$0xff]  ;;  %v7957_v3 = vld [vmem:[#allocation39_spill] sm:$0xff]  ;;  %v7963_v58 = vld [vmem:[#allocation12_spill] sm:$0xff] }
 0x1ad   : > { %2930 = vmatprep.subr.bf16.mxu0 %v7904_v10  ;;  %v7958_v53 = vld [vmem:[#allocation118_spill] sm:$0xff]  ;;  %v7959_v28 = vld [vmem:[#allocation119_spill] sm:$0xff]  ;;  %v7969_v2 = vld [vmem:[#allocation133_spill] sm:$0xff] }
 0x1ae   : > { %2720 = vmatpush1.bf16.msra.mxu1 %v7905_v31  ;;  %v7960_v20 = vld [vmem:[#allocation123_spill] sm:$0xff]  ;;  %v7961_v10 = vld [vmem:[#allocation122_spill] sm:$0xff]  ;;  %v7962_v31 = vld [vmem:[#allocation9_spill] sm:$0xff] }
 0x1af   : > { %2722 = vmatprep.subr.bf16.mxu1 %v7907_v12  ;;  %v7964_v12 = vld [vmem:[#allocation127_spill] sm:$0xff]  ;;  %v7983_v17 = vld [vmem:[#allocation76_spill] sm:$0xff]  ;;  %v7994_v29 = vld [vmem:[#allocation186_spill] sm:$0xff] }
 0x1b0   : > { %2932 = vmatpush1.bf16.msra.mxu0 %v7908_v14  ;;  %v7965_v14 = vld [vmem:[#allocation126_spill] sm:$0xff]  ;;  %v7967_v33 = vld [vmem:[#allocation131_spill] sm:$0xff]  ;;  %v3485_v48 = vld [vmem:[%s6695_s2 + $0x20] sm:$0xff] }
 0x1b1   : > { %1148 = vmatmul.mubr.f32.vlgmr.msra.gmra.mrb[4].mxu1 %v7909_v44  ;;  %2934 = vmatprep.subr.bf16.mxu0 %v7910_v59  ;;  %v7966_v59 = vld [vmem:[#allocation129_spill] sm:$0xff]  ;;  %v7984_v38 = vld [vmem:[#allocation171_spill] sm:$0xff]  ;;  %v3486_v13 = vld [vmem:[%s6694_s1 + $0x10] sm:$0xff] }
 0x1b2   : > { %1153 = vmatprep.mubr.f32.mxu1 %v7911_v6  ;;  %2724 = vmatpush1.bf16.msra.mxu1 %v7913_v61  ;;  %v7968_v61 = vld [vmem:[#allocation134_spill] sm:$0xff] }
 0x1b3   : > { %2726 = vmatprep.subr.bf16.mxu1 %v7915_v25  ;;  %v7970_v25 = vld [vmem:[#allocation136_spill] sm:$0xff] }
 0x1b4   : > { %2936 = vmatpush1.bf16.msra.mxu0 %v2935_v23  ;;  %v3479_v23 = vld [vmem:[%s6694_s1 + $0x8] sm:$0xff] }
 0x1b5   : > { %1154 = vmatmul.mubr.f32.gmra.mrb[6].mxu1 %v7916_v43  ;;  %2938 = vmatprep.subr.bf16.mxu0 %v2937_v34 }
 0x1b6   : > { %2728 = vmatpush1.bf16.msra.mxu1 %v2727_v7  ;;  %1224 = vmatprep.mubr.f32.mxu1 %v7917_v24  ;;  %v7925_v7 = vld [vmem:[#allocation46_spill] sm:$0xff] }
 0x1b7   : > { %2176 = vmatmul.mubr.f32.vlgmr.msra.gmra.mrb[4].mxu0 %v7918_v62  ;;  %2730 = vmatprep.subr.bf16.mxu1 %v7919_v41  ;;  %v1006_v34 = vmul.f32 %v3479_v23, %v7925_v7  ;;  %v7971_v41 = vld [vmem:[#allocation138_spill] sm:$0xff]  ;;  %v7975_v7 = vld [vmem:[#allocation149_spill] sm:$0xff] }
 0x1b8   : > { %2181 = vmatprep.mubr.f32.mxu0 %v7920_v46  ;;  %2940 = vmatpush1.bf16.msra.mxu0 %v2939_v37  ;;  %v7926_v37 = vld [vmem:[#allocation50_spill] sm:$0xff] }
 0x1b9   : > { %2568 = vmatmul.mubr.msk.f32.vlgmr.msra.gmra.mrb[4].mxu1 %vm816_vm0, %v7921_v16  ;;  %2942 = vmatprep.subr.bf16.mxu0 %v2941_v18  ;;  %v7927_v18 = vld [vmem:[#allocation27_spill] sm:$0xff]  ;;  %v7974_v23 = vld [vmem:[#allocation146_spill] sm:$0xff] }
 0x1ba   : > { %2732 = vmatpush1.bf16.msra.mxu1 %v7922_v36  ;;  %1230 = vmatprep.mubr.f32.mxu1 %v7917_v24  ;;  %v7972_v36 = vld [vmem:[#allocation48_spill] sm:$0xff] }
 0x1bb   : > { %2182 = vmatmul.mubr.f32.gmra.mrb[6].mxu0 %v7923_v54  ;;  %2734 = vmatprep.subr.bf16.mxu1 %v7924_v45  ;;  %v7973_v45 = vld [vmem:[#allocation140_spill] sm:$0xff] }
 0x1bc   : > { %2944 = vmatpush1.bf16.msra.mxu0 %v2943_v56  ;;  %2252 = vmatprep.mubr.f32.mxu0 %v7917_v24  ;;  %v7939_v56 = vld [vmem:[#allocation25_spill] sm:$0xff] }
 0x1bd   : > { %2569 = vmatmul.mubr.msk.f32.gmra.mrb[6].mxu1 %vm816_vm0, %v7926_v37  ;;  %2946 = vmatprep.subr.bf16.mxu0 %v7927_v18  ;;  %v7977_v18 = vld [vmem:[#allocation152_spill] sm:$0xff] }
 0x1be   : > { %2736 = vmatpush1.bf16.msra.mxu1 %v7928_v40  ;;  %1307 = vmatprep.mubr.f32.mxu1 %v1006_v34  ;;  %v7976_v34 = vld [vmem:[#allocation157_spill] sm:$0xff]  ;;  %v7978_v40 = vld [vmem:[#allocation159_spill] sm:$0xff] }
 0x1bf   : > { %2574 = vmatmul.mubr.msk.f32.vlgmr.msra.gmra.mrb[4].mxu0 %vm816_vm0, %v7929_v35  ;;  %2738 = vmatprep.subr.bf16.mxu1 %v7930_v57  ;;  %v7979_v57 = vld [vmem:[#allocation162_spill] sm:$0xff] }
 0x1c0   : > { %2948 = vmatpush1.bf16.msra.mxu0 %v7931_v4  ;;  %2258 = vmatprep.mubr.f32.mxu0 %v7917_v24  ;;  %v7980_v4 = vld [vmem:[#allocation59_spill] sm:$0xff] }
 0x1c1   : > { %2950 = vmatprep.subr.bf16.mxu0 %v7932_v27  ;;  %v7981_v27 = vld [vmem:[#allocation165_spill] sm:$0xff] }
 0x1c2   : > { %2740 = vmatpush1.bf16.msra.mxu1 %v7933_v42  ;;  %v7982_v42 = vld [vmem:[#allocation20_spill] sm:$0xff] }
 0x1c3   : > { %2575 = vmatmul.mubr.msk.f32.gmra.mrb[6].mxu0 %vm816_vm0, %v7935_v50  ;;  %2742 = vmatprep.subr.bf16.mxu1 %v7936_v49  ;;  %v7986_v49 = vld [vmem:[#allocation174_spill] sm:$0xff] }
 0x1c4   : > { %2952 = vmatpush1.bf16.msra.mxu0 %v7937_v26  ;;  %2335 = vmatprep.mubr.f32.mxu0 %v1962_v8  ;;  %v7985_v8 = vld [vmem:[#allocation170_spill] sm:$0xff]  ;;  %v7987_v26 = vld [vmem:[#allocation24_spill] sm:$0xff] }
 0x1c5   : > { %2954 = vmatprep.subr.bf16.mxu0 %v7938_v21  ;;  %v3481_v21 = vld [vmem:[%s6694_s1] sm:$0xff] }
 0x1c6   : > { %2744 = vmatpush1.bf16.msra.mxu1 %v7939_v56  ;;  %v1005_v56 = vmul.f32 %v3481_v21, %v7909_v44  ;;  %v3483_v44 = vld [vmem:[%s6694_s1 + $0x18] sm:$0xff] }
 0x1c7   : > { %2746 = vmatprep.subr.bf16.mxu1 %v7940_v47  ;;  %v7988_v47 = vld [vmem:[#allocation19_spill] sm:$0xff] }
 0x1c8   : > { %2956 = vmatpush1.bf16.msra.mxu0 %v7941_v22  ;;  %v7989_v22 = vld [vmem:[#allocation98_spill] sm:$0xff] }
 0x1c9   : > { %2958 = vmatprep.subr.bf16.mxu0 %v7942_v55  ;;  %v3482_v55 = vld [vmem:[%s6694_s1 + $0x20] sm:$0xff] }
 0x1ca   : > { %2748 = vmatpush1.bf16.msra.mxu1 %v7943_v15  ;;  %v1009_v15 = vmul.f32 %v3482_v55, %v7911_v6  ;;  %v3484_v6 = vld [vmem:[%s6695_s2] sm:$0xff] }
 0x1cb   : > { %2750 = vmatprep.subr.bf16.mxu1 %v7944_v0  ;;  %v7990_v0 = vld [vmem:[#allocation177_spill] sm:$0xff] }
 0x1cc   : > { %2960 = vmatpush1.bf16.msra.mxu0 %v7945_v9  ;;  %v7991_v9 = vld [vmem:[#allocation180_spill] sm:$0xff] }
 0x1cd   : > { %2962 = vmatprep.subr.bf16.mxu0 %v7946_v19  ;;  %v1008_v19 = vmul.f32 %v3483_v44, %v7916_v43  ;;  %v1965_v43 = vmul.f32 %v3485_v48, %v7920_v46 }
 0x1ce   : > { %2752 = vmatpush1.bf16.msra.mxu1 %v7947_v63  ;;  %v7992_v63 = vld [vmem:[#allocation183_spill] sm:$0xff] }
 0x1cf   : > { %2754 = vmatprep.subr.bf16.mxu1 %v7948_v32  ;;  %v7993_v32 = vld [vmem:[#allocation51_spill] sm:$0xff] }
 0x1d0   : > { %2964 = vmatpush1.bf16.msra.mxu0 %v7949_v51  ;;  %v1961_v51 = vmul.f32 %v3484_v6, %v7918_v62  ;;  %v7996_v62 = vld [vmem:[#allocation103_spill] sm:$0xff] }
 0x1d1   : > { %2966 = vmatprep.subr.bf16.mxu0 %v7950_v39  ;;  %v7995_v39 = vld [vmem:[#allocation189_spill] sm:$0xff] }
 0x1d2   : > { %2756 = vmatpush1.bf16.msra.mxu1 %v7951_v1  ;;  %v1007_v1 = vmul.f32 %v3486_v13, %v7921_v16  ;;  %v3488_v16 = vld [vmem:[%s6694_s1 + $0x28] sm:$0xff] }
 0x1d3   : > { %2758 = vmatprep.subr.bf16.mxu1 %v7952_v30  ;;  %v3487_v30 = vld [vmem:[%s6695_s2 + $0x18] sm:$0xff] }
 0x1d4   : > { %2968 = vmatpush1.bf16.msra.mxu0 %v7953_v52  ;;  %v1964_v46 = vmul.f32 %v3487_v30, %v7923_v54  ;;  %v7997_v52 = vld [vmem:[#allocation105_spill] sm:$0xff]  ;;  %v3489_v54 = vld [vmem:[%s6695_s2 + $0x10] sm:$0xff] }
 0x1d5   : > { %2970 = vmatprep.subr.bf16.mxu0 %v7954_v11  ;;  %v1010_v11 = vmul.f32 %v3488_v16, %v7926_v37  ;;  %v3490_v37 = vld [vmem:[%s6695_s2 + $0x28] sm:$0xff] }
 0x1d6   : > { %2760 = vmatpush1.bf16.msra.mxu1 %v7955_v60  ;;  %v7998_v60 = vld [vmem:[#allocation108_spill] sm:$0xff] }
 0x1d7   : > { %2762 = vmatprep.subr.bf16.mxu1 %v7956_v5  ;;  %v1963_v5 = vmul.f32 %v3489_v54, %v7929_v35 }
 0x1d8   : > { %2972 = vmatpush1.bf16.msra.mxu0 %v7957_v3  ;;  %v1966_v3 = vmul.f32 %v3490_v37, %v7935_v50 }
 0x1d9   : > { %2974 = vmatprep.subr.bf16.mxu0 %v7958_v53 }
 0x1da   : > { %2764 = vmatpush1.bf16.msra.mxu1 %v7959_v28 }
 0x1db   : > { %2766 = vmatprep.subr.bf16.mxu1 %v7960_v20 }
 0x1dc   : > { %2976 = vmatpush1.bf16.msra.mxu0 %v7961_v10 }
 0x1dd   : > { %2978 = vmatprep.subr.bf16.mxu0 %v7962_v31 }
 0x1de   : > { %2768 = vmatpush1.bf16.msra.mxu1 %v7963_v58 }
 0x1df   : > { %2770 = vmatprep.subr.bf16.mxu1 %v7964_v12 }
 0x1e0   : > { %2980 = vmatpush1.bf16.msra.mxu0 %v7965_v14 }
 0x1e1   : > { %2982 = vmatprep.subr.bf16.mxu0 %v7966_v59 }
 0x1e2   : > { %2772 = vmatpush1.bf16.msra.mxu1 %v7967_v33 }
 0x1e3   : > { %2774 = vmatprep.subr.bf16.mxu1 %v7968_v61 }
 0x1e4   : > { %2984 = vmatpush1.bf16.msra.mxu0 %v7969_v2 }
 0x1e5   : > { %2986 = vmatprep.subr.bf16.mxu0 %v7970_v25 }
 0x1e6   : > { %2776 = vmatpush1.bf16.msra.mxu1 %v7971_v41 }
 0x1e7   : > { %2778 = vmatprep.subr.bf16.mxu1 %v7972_v36 }
 0x1e8   : > { %2988 = vmatpush1.bf16.msra.mxu0 %v7973_v45 }
 0x1e9   : > { %2990 = vmatprep.subr.bf16.mxu0 %v7974_v23 }
 0x1ea   : > { %2780 = vmatpush1.bf16.msra.mxu1 %v7975_v7 }
 0x1eb   : > { %2782 = vmatprep.subr.bf16.mxu1 %v7976_v34 }
 0x1ec   : > { %2992 = vmatpush1.bf16.msra.mxu0 %v7977_v18 }
 0x1ed   : > { %2994 = vmatprep.subr.bf16.mxu0 %v7978_v40 }
 0x1ee   : > { %2784 = vmatpush1.bf16.msra.mxu1 %v7979_v57 }
 0x1ef   : > { %2786 = vmatprep.subr.bf16.mxu1 %v7980_v4 }
 0x1f0   : > { %2996 = vmatpush1.bf16.msra.mxu0 %v7981_v27 }
 0x1f1   : > { %2998 = vmatprep.subr.bf16.mxu0 %v7982_v42 }
 0x1f2   : > { %2788 = vmatpush1.bf16.msra.mxu1 %v7983_v17 }
 0x1f3   : > { %2790 = vmatprep.subr.bf16.mxu1 %v7984_v38 }
 0x1f4   : > { %3000 = vmatpush1.bf16.msra.mxu0 %v7985_v8 }
 0x1f5   : > { %3002 = vmatprep.subr.bf16.mxu0 %v7986_v49 }
 0x1f6   : > { %2792 = vmatpush1.bf16.msra.mxu1 %v7987_v26 }
 0x1f7   : > { %2794 = vmatprep.subr.bf16.mxu1 %v7988_v47 }
 0x1f8   : > { %3004 = vmatpush1.bf16.msra.mxu0 %v7989_v22 }
 0x1f9   : > { %1308 = vmatmul.mubr.f32.vlgmr.msra.gmra.mrb[4].mxu1 %v1005_v56  ;;  %3006 = vmatprep.subr.bf16.mxu0 %v7990_v0 }
 0x1fa   : > { %1313 = vmatprep.mubr.f32.mxu1 %v1009_v15  ;;  %2796 = vmatpush1.bf16.msra.mxu1 %v7991_v9 }
 0x1fb   : > { %2798 = vmatprep.subr.bf16.mxu1 %v7992_v63 }
 0x1fc   : > { %3008 = vmatpush1.bf16.msra.mxu0 %v7993_v32 }
 0x1fd   : > { %1314 = vmatmul.mubr.f32.gmra.mrb[6].mxu1 %v1008_v19  ;;  %3010 = vmatprep.subr.bf16.mxu0 %v7994_v29 }
 0x1fe   : > { %2800 = vmatpush1.bf16.msra.mxu1 %v7995_v39  ;;  %1384 = vmatprep.mubr.f32.mxu1 %v7917_v24 }
 0x1ff   : > { %2336 = vmatmul.mubr.f32.vlgmr.msra.gmra.mrb[4].mxu0 %v1961_v51 }
 0x200   : > { %2341 = vmatprep.mubr.f32.mxu0 %v1965_v43  ;;  %3012 = vmatpush1.bf16.msra.mxu0 %v7996_v62 }
 0x201   : > { %2570 = vmatmul.mubr.msk.f32.vlgmr.msra.gmra.mrb[4].mxu1 %vm816_vm0, %v1007_v1  ;;  %3014 = vmatprep.subr.bf16.mxu0 %v7997_v52 }
 0x202   : > { %1390 = vmatprep.mubr.f32.mxu1 %v7917_v24 }
 0x203   : > { %2342 = vmatmul.mubr.f32.gmra.mrb[6].mxu0 %v1964_v46 }
 0x204   : > { %3016 = vmatpush1.bf16.msra.mxu0 %v7998_v60  ;;  %2412 = vmatprep.mubr.f32.mxu0 %v7917_v24 }
 0x205   : > { %2571 = vmatmul.mubr.msk.f32.gmra.mrb[6].mxu1 %vm816_vm0, %v1010_v11 }
 0x207   : > { %2576 = vmatmul.mubr.msk.f32.vlgmr.msra.gmra.mrb[4].mxu0 %vm816_vm0, %v1963_v5 }
 0x208   : > { %2418 = vmatprep.mubr.f32.mxu0 %v7917_v24 }
 0x20b   : > { %2577 = vmatmul.mubr.msk.f32.gmra.mrb[6].mxu0 %vm816_vm0, %v1966_v3 }
 0x229   : > { %v2450_v27 = vpop.permute.xlu0 %2449 }
 0x22a   : > { %v2455_v55 = vpop.permute.xlu1 %2454 }
 0x234   : > { %v994_v53 = vpop.f32.mrb[0].mxu1 }
 0x235   : > { %v996_v28 = vpop.f32.mrb[1].mxu1  ;;  %3391 = vrcp.f32 %v994_v53 }
 0x236   : > { %3393 = vrcp.f32 %v996_v28 }
 0x23d   : > { %v1000_v20 = vpop.f32.mrb[2].mxu1  ;;  %v1950_v31 = vpop.f32.mrb[0].mxu0 }
 0x23e   : > { %v1002_v10 = vpop.f32.mrb[3].mxu1  ;;  %v1952_v58 = vpop.f32.mrb[1].mxu0  ;;  %3395 = vrcp.f32 %v1000_v20 }
 0x23f   : > { %3397 = vrcp.f32 %v1002_v10  ;;  %v3392_v24 = vpop.eup %3391 }
 0x240   : > { %3399 = vrcp.f32 %v1950_v31  ;;  %v3394_v50 = vpop.eup %3393 }
 0x241   : > { %3401 = vrcp.f32 %v1952_v58 }
 0x242   : > { %v1956_v12 = vpop.f32.mrb[2].mxu0 }
 0x243   : > { %v1958_v35 = vpop.f32.mrb[3].mxu0  ;;  %3403 = vrcp.f32 %v1956_v12 }
 0x244   : > { %3405 = vrcp.f32 %v1958_v35 }
 0x248   : > { %v3396_v2 = vpop.eup %3395 }
 0x249   : > { %v3398_v41 = vpop.eup %3397 }
 0x24a   : > { %v3400_v23 = vpop.eup %3399 }
 0x24b   : > { %v3402_v18 = vpop.eup %3401 }
 0x24d   : > { %v3404_v17 = vpop.eup %3403 }
 0x24e   : > { %v3406_v49 = vpop.eup %3405 }
 0x2d4   : > { %v1386_v14 = vpop.f32.mrb[4].mxu1 }
 0x2d5   : > { %v2426_v59 = vmul.f32 %v3392_v24, %v1386_v14  ;;  %v1388_v33 = vpop.f32.mrb[5].mxu1 }
 0x2d6   : > { %v2428_v61 = vmul.f32 %v3394_v50, %v1388_v33 }
 0x2d8   : > { %v1392_v25 = vpop.f32.mrb[6].mxu1 }
 0x2d9   : > { %v2430_v36 = vmul.f32 %v3396_v2, %v1392_v25  ;;  %v1394_v45 = vpop.f32.mrb[7].mxu1 }
 0x2da   : > { %v2414_v7 = vpop.f32.mrb[4].mxu0  ;;  %v2432_v34 = vmul.f32 %v3398_v41, %v1394_v45 }
 0x2db   : > { %v2434_v40 = vmul.f32 %v3400_v23, %v2414_v7  ;;  %v2416_v57 = vpop.f32.mrb[5].mxu0 }
 0x2dc   : > { %v2436_v4 = vmul.f32 %v3402_v18, %v2416_v57 }
 0x2dd   : > { %v2441_v42 = vadd.f32 %v2434_v40, %v2426_v59 }
 0x2de   : > { %v2442_v38 = vadd.f32 %v2436_v4, %v2428_v61  ;;  %v2420_v8 = vpop.f32.mrb[6].mxu0 }
 0x2df   : > { %v2457_v26 = vadd.f32 %v2450_v27, %v2441_v42  ;;  %v2438_v21 = vmul.f32 %v3404_v17, %v2420_v8  ;;  %v2422_v56 = vpop.f32.mrb[7].mxu0 }
 0x2e0   : > { %v2458_v47 = vadd.f32 %v2450_v27, %v2442_v38  ;;  %v2440_v22 = vmul.f32 %v3406_v49, %v2422_v56 }
 0x2e1   : > { %v2461_v15 = vmax.f32 %v2457_v26, 0.0  ;;  %v2443_v0 = vadd.f32 %v2438_v21, %v2430_v36 }
 0x2e2   : > { %v2462_v9 = vmax.f32 %v2458_v47, 0.0  ;;  %v2444_v44 = vadd.f32 %v2440_v22, %v2432_v34  ;;  %2475 = sbr.rel (!%p3572_p5) target bundleno = 753 (0x2f1), region = 63 }
 0x2e3   : > { %2465 = vst [vmem:[%s353_s6] sm:$0xff] %v2461_v15  ;;  %v2459_v19 = vadd.f32 %v2455_v55, %v2443_v0 }
 0x2e4   : > { %2466 = vst [vmem:[%s353_s6 + $0x8] sm:$0xff] %v2462_v9  ;;  %v2460_v63 = vadd.f32 %v2455_v55, %v2444_v44 }
 0x2e5   : > { %v2463_v32 = vmax.f32 %v2459_v19, 0.0 }
 0x2e6   : > { %v2464_v6 = vmax.f32 %v2460_v63, 0.0 }
 0x2e7   : > { %2467 = vst [vmem:[%s353_s6 + $0x10] sm:$0xff] %v2463_v32 }
 0x2e8   : > { %2468 = vst [vmem:[%s353_s6 + $0x18] sm:$0xff] %v2464_v6 }
 0x2ea   : > { %v2491_v51 = vld [vmem:[%s353_s6] sm:$0xff] }
 0x2eb   : > { %v2493_v29 = vld [vmem:[%s353_s6 + $0x8] sm:$0xff]  ;;  %2492 = vst [vmem:[%s2478_s8] sm:$0xff] %v2491_v51 }
 0x2ec   : > { %2494 = vst [vmem:[%s2478_s8 + $0x8] sm:$0xff] %v2493_v29 }
 0x2ee   : > { %v2495_v39 = vld [vmem:[%s353_s6 + $0x10] sm:$0xff] }
 0x2ef   : > { %v2497_v48 = vld [vmem:[%s353_s6 + $0x18] sm:$0xff]  ;;  %2496 = vst [vmem:[%s2478_s8 + $0x20] sm:$0xff] %v2495_v39 }
 0x2f0   : > { %2498 = vst [vmem:[%s2478_s8 + $0x28] sm:$0xff] %v2497_v48 }
 0x2f1 PF: > { %p11_p10 = scmp.ge.s32.totalorder %s3559_s19, 4   ;;  %s7999_s15 = smov %s3509_s16 }
 0x2f2   : > { %s8000_s16 = smov %s3570_s22  ;;  %s8001_s17 = smov %s3559_s19 }
 0x2f3   :  { %13 = sbr.rel (!%p11_p10) target bundleno = 2 (0x2), region = 117 }

// kernel: _lambda_.5
= control target key start
LH: loop header
LB: loop body
LE: loop exit
PB: predicated region body
PF: predicated region fallthrough
CT: control target
= control target key end

     0   :  { %s2523_s1 = inlined_call_operand.vmem [shape: f32[2304,128], index: 1, kind: input, shape index: {}]   ;;  %s2524_s0 = inlined_call_operand.vmem [shape: f32[8,2304], index: 0, kind: input, shape index: {}]   ;;  %s2525_s2 = inlined_call_operand.vmem [shape: f32[1,128], index: 2, kind: input, shape index: {}]   ;;  %s2526_s3 = inlined_call_operand.vmem [shape: f32[8,128], index: 3, kind: output, shape index: {}]  }
   0x1   :  { %v48_v0 = vld [vmem:[%s2523_s1 + $0x80] sm:$0xff]  ;;  %v49_v1 = vld [vmem:[%s2523_s1 + $0x88] sm:$0xff]  ;;  %v50_v11 = vld [vmem:[%s2523_s1 + $0x90] sm:$0xff] }
   0x2   :  { %v32_v2 = vld [vmem:[%s2523_s1] sm:$0xff]  ;;  %v1287_v3 = vpack.c.bf16 %v49_v1, %v48_v0  ;;  %v33_v4 = vld [vmem:[%s2523_s1 + $0x8] sm:$0xff]  ;;  %v51_v13 = vld [vmem:[%s2523_s1 + $0x98] sm:$0xff] }
   0x3   :  { %v80_v5 = vld [vmem:[%s2523_s1 + $0x180] sm:$0xff]  ;;  %v81_v6 = vld [vmem:[%s2523_s1 + $0x188] sm:$0xff]  ;;  %v1289_v7 = vpack.c.bf16 %v33_v4, %v32_v2  ;;  %v34_v14 = vld [vmem:[%s2523_s1 + $0x10] sm:$0xff]  ;;  %v1291_v16 = vpack.c.bf16 %v51_v13, %v50_v11 }
   0x4   :  { %v1319_v8 = vpack.c.bf16 %v81_v6, %v80_v5  ;;  %v64_v9 = vld [vmem:[%s2523_s1 + $0x100] sm:$0xff]  ;;  %v65_v10 = vld [vmem:[%s2523_s1 + $0x108] sm:$0xff]  ;;  %1288 = vmatprep.subr.bf16.mxu0 %v1287_v3  ;;  %v35_v15 = vld [vmem:[%s2523_s1 + $0x18] sm:$0xff] }
   0x5   :  { %v1321_v12 = vpack.c.bf16 %v65_v10, %v64_v9  ;;  %1290 = vmatpush3.bf16.msra.mxu0 %v1289_v7  ;;  %v1293_v17 = vpack.c.bf16 %v35_v15, %v34_v14  ;;  %v82_v18 = vld [vmem:[%s2523_s1 + $0x190] sm:$0xff]  ;;  %v83_v19 = vld [vmem:[%s2523_s1 + $0x198] sm:$0xff]  ;;  %v52_v23 = vld [vmem:[%s2523_s1 + $0xa0] sm:$0xff] }
   0x6   :  { %1320 = vmatprep.subr.bf16.mxu1 %v1319_v8  ;;  %v66_v20 = vld [vmem:[%s2523_s1 + $0x110] sm:$0xff]  ;;  %v1323_v21 = vpack.c.bf16 %v83_v19, %v82_v18  ;;  %v67_v22 = vld [vmem:[%s2523_s1 + $0x118] sm:$0xff]  ;;  %v53_v24 = vld [vmem:[%s2523_s1 + $0xa8] sm:$0xff]  ;;  %1292 = vmatprep.subr.bf16.mxu0 %v1291_v16 }
   0x7   :  { %1322 = vmatpush3.bf16.msra.mxu1 %v1321_v12  ;;  %v1325_v25 = vpack.c.bf16 %v67_v22, %v66_v20  ;;  %v1295_v26 = vpack.c.bf16 %v53_v24, %v52_v23  ;;  %v36_v27 = vld [vmem:[%s2523_s1 + $0x20] sm:$0xff]  ;;  %v37_v28 = vld [vmem:[%s2523_s1 + $0x28] sm:$0xff]  ;;  %v54_v35 = vld [vmem:[%s2523_s1 + $0xb0] sm:$0xff] }
   0x8   :  { %v84_v29 = vld [vmem:[%s2523_s1 + $0x1a0] sm:$0xff]  ;;  %1324 = vmatprep.subr.bf16.mxu1 %v1323_v21  ;;  %v85_v30 = vld [vmem:[%s2523_s1 + $0x1a8] sm:$0xff]  ;;  %v1297_v33 = vpack.c.bf16 %v37_v28, %v36_v27  ;;  %v55_v36 = vld [vmem:[%s2523_s1 + $0xb8] sm:$0xff] }
   0x9   :  { %v68_v31 = vld [vmem:[%s2523_s1 + $0x120] sm:$0xff]  ;;  %v69_v32 = vld [vmem:[%s2523_s1 + $0x128] sm:$0xff]  ;;  %1294 = vmatpush3.bf16.msra.mxu0 %v1293_v17  ;;  %v1327_v34 = vpack.c.bf16 %v85_v30, %v84_v29  ;;  %v38_v37 = vld [vmem:[%s2523_s1 + $0x30] sm:$0xff]  ;;  %v1299_v39 = vpack.c.bf16 %v55_v36, %v54_v35 }
   0xa   :  { %1296 = vmatprep.subr.bf16.mxu0 %v1295_v26  ;;  %v1329_v38 = vpack.c.bf16 %v69_v32, %v68_v31  ;;  %v39_v40 = vld [vmem:[%s2523_s1 + $0x38] sm:$0xff]  ;;  %v86_v41 = vld [vmem:[%s2523_s1 + $0x1b0] sm:$0xff]  ;;  %v56_v46 = vld [vmem:[%s2523_s1 + $0xc0] sm:$0xff] }
   0xb   :  { %1326 = vmatpush3.bf16.msra.mxu1 %v1325_v25  ;;  %v87_v42 = vld [vmem:[%s2523_s1 + $0x1b8] sm:$0xff]  ;;  %v70_v44 = vld [vmem:[%s2523_s1 + $0x130] sm:$0xff]  ;;  %v57_v47 = vld [vmem:[%s2523_s1 + $0xc8] sm:$0xff]  ;;  %v1301_v48 = vpack.c.bf16 %v39_v40, %v38_v37 }
   0xc   :  { %1328 = vmatprep.subr.bf16.mxu1 %v1327_v34  ;;  %v1331_v43 = vpack.c.bf16 %v87_v42, %v86_v41  ;;  %v71_v45 = vld [vmem:[%s2523_s1 + $0x138] sm:$0xff]  ;;  %v88_v49 = vld [vmem:[%s2523_s1 + $0x1c0] sm:$0xff]  ;;  %v89_v50 = vld [vmem:[%s2523_s1 + $0x1c8] sm:$0xff]  ;;  %v1303_v52 = vpack.c.bf16 %v57_v47, %v56_v46 }
   0xd   :  { %1298 = vmatpush3.bf16.msra.mxu0 %v1297_v33  ;;  %v1333_v51 = vpack.c.bf16 %v71_v45, %v70_v44  ;;  %v40_v53 = vld [vmem:[%s2523_s1 + $0x40] sm:$0xff]  ;;  %v41_v54 = vld [vmem:[%s2523_s1 + $0x48] sm:$0xff]  ;;  %v1335_v56 = vpack.c.bf16 %v89_v50, %v88_v49  ;;  %v58_v58 = vld [vmem:[%s2523_s1 + $0xd0] sm:$0xff] }
   0xe   :  { %1300 = vmatprep.subr.bf16.mxu0 %v1299_v39  ;;  %v72_v55 = vld [vmem:[%s2523_s1 + $0x140] sm:$0xff]  ;;  %v73_v57 = vld [vmem:[%s2523_s1 + $0x148] sm:$0xff]  ;;  %v59_v59 = vld [vmem:[%s2523_s1 + $0xd8] sm:$0xff]  ;;  %v1305_v62 = vpack.c.bf16 %v41_v54, %v40_v53 }
   0xf   :  { %1330 = vmatpush3.bf16.msra.mxu1 %v1329_v38  ;;  %v90_v60 = vld [vmem:[%s2523_s1 + $0x1d0] sm:$0xff]  ;;  %v91_v61 = vld [vmem:[%s2523_s1 + $0x1d8] sm:$0xff]  ;;  %v1337_v63 = vpack.c.bf16 %v73_v57, %v72_v55  ;;  %v1307_v0 = vpack.c.bf16 %v59_v59, %v58_v58  ;;  %v60_v6 = vld [vmem:[%s2523_s1 + $0xe0] sm:$0xff] }
  0x10   :  { %1332 = vmatprep.subr.bf16.mxu1 %v1331_v43  ;;  %v42_v1 = vld [vmem:[%s2523_s1 + $0x50] sm:$0xff]  ;;  %v43_v2 = vld [vmem:[%s2523_s1 + $0x58] sm:$0xff]  ;;  %v1339_v4 = vpack.c.bf16 %v91_v61, %v90_v60  ;;  %v61_v7 = vld [vmem:[%s2523_s1 + $0xe8] sm:$0xff] }
  0x11   :  { %1302 = vmatpush3.bf16.msra.mxu0 %v1301_v48  ;;  %v74_v3 = vld [vmem:[%s2523_s1 + $0x150] sm:$0xff]  ;;  %v75_v5 = vld [vmem:[%s2523_s1 + $0x158] sm:$0xff]  ;;  %v92_v8 = vld [vmem:[%s2523_s1 + $0x1e0] sm:$0xff]  ;;  %v1309_v10 = vpack.c.bf16 %v43_v2, %v42_v1  ;;  %v1311_v14 = vpack.c.bf16 %v61_v7, %v60_v6 }
  0x12   :  { %1304 = vmatprep.subr.bf16.mxu0 %v1303_v52  ;;  %v93_v9 = vld [vmem:[%s2523_s1 + $0x1e8] sm:$0xff]  ;;  %v44_v11 = vld [vmem:[%s2523_s1 + $0x60] sm:$0xff]  ;;  %v1341_v13 = vpack.c.bf16 %v75_v5, %v74_v3  ;;  %v62_v19 = vld [vmem:[%s2523_s1 + $0xf0] sm:$0xff] }
  0x13   :  { %1334 = vmatpush3.bf16.msra.mxu1 %v1333_v51  ;;  %v15_v12 = vld [vmem:[%s2524_s0 + $0x8] sm:$0xff]  ;;  %v76_v16 = vld [vmem:[%s2523_s1 + $0x160] sm:$0xff]  ;;  %v1343_v18 = vpack.c.bf16 %v93_v9, %v92_v8  ;;  %v63_v20 = vld [vmem:[%s2523_s1 + $0xf8] sm:$0xff] }
  0x14   :  { %1336 = vmatprep.subr.bf16.mxu1 %v1335_v56  ;;  %v45_v15 = vld [vmem:[%s2523_s1 + $0x68] sm:$0xff]  ;;  %391 = vmatprep.mubr.f32.mxu0 %v15_v12  ;;  %v17_v21 = vld [vmem:[%s2524_s0 + $0x18] sm:$0xff]  ;;  %v94_v22 = vld [vmem:[%s2523_s1 + $0x1f0] sm:$0xff]  ;;  %v1315_v26 = vpack.c.bf16 %v63_v20, %v62_v19 }
  0x15   :  { %1306 = vmatpush3.bf16.msra.mxu0 %v1305_v62  ;;  %v77_v17 = vld [vmem:[%s2523_s1 + $0x168] sm:$0xff]  ;;  %v95_v23 = vld [vmem:[%s2523_s1 + $0x1f8] sm:$0xff]  ;;  %461 = vmatprep.mubr.f32.mxu1 %v17_v21  ;;  %v1313_v24 = vpack.c.bf16 %v45_v15, %v44_v11  ;;  %v46_v27 = vld [vmem:[%s2523_s1 + $0x70] sm:$0xff] }
  0x16   :  { %1308 = vmatprep.subr.bf16.mxu0 %v1307_v0  ;;  %v1345_v25 = vpack.c.bf16 %v77_v17, %v76_v16  ;;  %v47_v28 = vld [vmem:[%s2523_s1 + $0x78] sm:$0xff]  ;;  %v78_v29 = vld [vmem:[%s2523_s1 + $0x170] sm:$0xff]  ;;  %v1347_v30 = vpack.c.bf16 %v95_v23, %v94_v22  ;;  %v112_v32 = vld [vmem:[%s2523_s1 + $0x280] sm:$0xff] }
  0x17   :  { %1338 = vmatpush3.bf16.msra.mxu1 %v1337_v63  ;;  %v79_v31 = vld [vmem:[%s2523_s1 + $0x178] sm:$0xff]  ;;  %v113_v33 = vld [vmem:[%s2523_s1 + $0x288] sm:$0xff]  ;;  %v144_v34 = vld [vmem:[%s2523_s1 + $0x380] sm:$0xff]  ;;  %v1317_v36 = vpack.c.bf16 %v47_v28, %v46_v27 }
  0x18   :  { %1340 = vmatprep.subr.bf16.mxu1 %v1339_v4  ;;  %v145_v35 = vld [vmem:[%s2523_s1 + $0x388] sm:$0xff]  ;;  %v1349_v37 = vpack.c.bf16 %v79_v31, %v78_v29  ;;  %v1351_v38 = vpack.c.bf16 %v113_v33, %v112_v32  ;;  %v96_v39 = vld [vmem:[%s2523_s1 + $0x200] sm:$0xff]  ;;  %v114_v44 = vld [vmem:[%s2523_s1 + $0x290] sm:$0xff] }
  0x19   :  { %1310 = vmatpush3.bf16.msra.mxu0 %v1309_v10  ;;  %v97_v40 = vld [vmem:[%s2523_s1 + $0x208] sm:$0xff]  ;;  %v128_v41 = vld [vmem:[%s2523_s1 + $0x300] sm:$0xff]  ;;  %v1383_v42 = vpack.c.bf16 %v145_v35, %v144_v34  ;;  %v115_v45 = vld [vmem:[%s2523_s1 + $0x298] sm:$0xff] }
  0x1a   :  { %1312 = vmatprep.subr.bf16.mxu0 %v1311_v14  ;;  %v129_v43 = vld [vmem:[%s2523_s1 + $0x308] sm:$0xff]  ;;  %v146_v46 = vld [vmem:[%s2523_s1 + $0x390] sm:$0xff]  ;;  %v147_v47 = vld [vmem:[%s2523_s1 + $0x398] sm:$0xff]  ;;  %v1353_v49 = vpack.c.bf16 %v97_v40, %v96_v39  ;;  %v1355_v52 = vpack.c.bf16 %v115_v45, %v114_v44 }
  0x1b   :  { %1342 = vmatpush3.bf16.msra.mxu1 %v1341_v13  ;;  %v14_v48 = vld [vmem:[%s2524_s0] sm:$0xff]  ;;  %v16_v50 = vld [vmem:[%s2524_s0 + $0x10] sm:$0xff]  ;;  %v1385_v51 = vpack.c.bf16 %v129_v43, %v128_v41  ;;  %v99_v54 = vld [vmem:[%s2523_s1 + $0x218] sm:$0xff]  ;;  %v1387_v56 = vpack.c.bf16 %v147_v47, %v146_v46 }
  0x1c   :  { %1344 = vmatprep.subr.bf16.mxu1 %v1343_v18  ;;  %v98_v53 = vld [vmem:[%s2523_s1 + $0x210] sm:$0xff]  ;;  %v131_v57 = vld [vmem:[%s2523_s1 + $0x318] sm:$0xff]  ;;  %v116_v58 = vld [vmem:[%s2523_s1 + $0x2a0] sm:$0xff] }
  0x1d   :  { %1314 = vmatpush3.bf16.msra.mxu0 %v1313_v24  ;;  %v130_v55 = vld [vmem:[%s2523_s1 + $0x310] sm:$0xff]  ;;  %v117_v59 = vld [vmem:[%s2523_s1 + $0x2a8] sm:$0xff]  ;;  %v148_v60 = vld [vmem:[%s2523_s1 + $0x3a0] sm:$0xff]  ;;  %v1357_v62 = vpack.c.bf16 %v99_v54, %v98_v53 }
  0x1e   :  { %1316 = vmatprep.subr.bf16.mxu0 %v1315_v26  ;;  %v149_v61 = vld [vmem:[%s2523_s1 + $0x3a8] sm:$0xff]  ;;  %v1389_v63 = vpack.c.bf16 %v131_v57, %v130_v55  ;;  %v1359_v0 = vpack.c.bf16 %v117_v59, %v116_v58  ;;  %v100_v1 = vld [vmem:[%s2523_s1 + $0x220] sm:$0xff]  ;;  %v118_v6 = vld [vmem:[%s2523_s1 + $0x2b0] sm:$0xff] }
  0x1f   :  { %1346 = vmatpush3.bf16.msra.mxu1 %v1345_v25  ;;  %v101_v2 = vld [vmem:[%s2523_s1 + $0x228] sm:$0xff]  ;;  %v132_v3 = vld [vmem:[%s2523_s1 + $0x320] sm:$0xff]  ;;  %v1391_v4 = vpack.c.bf16 %v149_v61, %v148_v60  ;;  %v119_v7 = vld [vmem:[%s2523_s1 + $0x2b8] sm:$0xff] }
  0x20   :  { %1348 = vmatprep.subr.bf16.mxu1 %v1347_v30  ;;  %v133_v5 = vld [vmem:[%s2523_s1 + $0x328] sm:$0xff]  ;;  %v150_v8 = vld [vmem:[%s2523_s1 + $0x3b0] sm:$0xff]  ;;  %v151_v9 = vld [vmem:[%s2523_s1 + $0x3b8] sm:$0xff]  ;;  %v1361_v10 = vpack.c.bf16 %v101_v2, %v100_v1  ;;  %v1363_v12 = vpack.c.bf16 %v119_v7, %v118_v6 }
  0x21   :  { %1318 = vmatpush3.bf16.msra.mxu0 %v1317_v36  ;;  %v1393_v11 = vpack.c.bf16 %v133_v5, %v132_v3  ;;  %v102_v13 = vld [vmem:[%s2523_s1 + $0x230] sm:$0xff]  ;;  %v103_v14 = vld [vmem:[%s2523_s1 + $0x238] sm:$0xff]  ;;  %v1395_v16 = vpack.c.bf16 %v151_v9, %v150_v8  ;;  %v120_v18 = vld [vmem:[%s2523_s1 + $0x2c0] sm:$0xff] }
  0x22   :  { %1352 = vmatprep.subr.bf16.mxu0 %v1351_v38  ;;  %v134_v15 = vld [vmem:[%s2523_s1 + $0x330] sm:$0xff]  ;;  %v135_v17 = vld [vmem:[%s2523_s1 + $0x338] sm:$0xff]  ;;  %v121_v19 = vld [vmem:[%s2523_s1 + $0x2c8] sm:$0xff]  ;;  %v1365_v23 = vpack.c.bf16 %v103_v14, %v102_v13 }
  0x23   :  { %1350 = vmatpush3.bf16.msra.mxu1 %v1349_v37  ;;  %v152_v20 = vld [vmem:[%s2523_s1 + $0x3c0] sm:$0xff]  ;;  %v153_v21 = vld [vmem:[%s2523_s1 + $0x3c8] sm:$0xff]  ;;  %v1397_v25 = vpack.c.bf16 %v135_v17, %v134_v15  ;;  %v1367_v26 = vpack.c.bf16 %v121_v19, %v120_v18  ;;  %v21_v29 = vld [vmem:[%s2524_s0 + $0x38] sm:$0xff] }
  0x24   :  { %1384 = vmatprep.subr.bf16.mxu1 %v1383_v42  ;;  %392 = vmatmul.mubr.f32.vlgmr.msra.gmra.mrb[0].mxu0 %v14_v48  ;;  %v19_v22 = vld [vmem:[%s2524_s0 + $0x28] sm:$0xff]  ;;  %v104_v24 = vld [vmem:[%s2523_s1 + $0x240] sm:$0xff]  ;;  %v1399_v30 = vpack.c.bf16 %v153_v21, %v152_v20  ;;  %v122_v32 = vld [vmem:[%s2523_s1 + $0x2d0] sm:$0xff] }
  0x25   :  { %1354 = vmatpush3.bf16.msra.mxu0 %v1353_v49  ;;  %531 = vmatprep.mubr.f32.mxu0 %v19_v22  ;;  %v105_v27 = vld [vmem:[%s2523_s1 + $0x248] sm:$0xff]  ;;  %v136_v28 = vld [vmem:[%s2523_s1 + $0x340] sm:$0xff]  ;;  %v123_v33 = vld [vmem:[%s2523_s1 + $0x2d8] sm:$0xff] }
  0x26   :  { %462 = vmatmul.mubr.f32.vlgmr.msra.gmra.mrb[0].mxu1 %v16_v50  ;;  %1356 = vmatprep.subr.bf16.mxu0 %v1355_v52  ;;  %v137_v31 = vld [vmem:[%s2523_s1 + $0x348] sm:$0xff]  ;;  %v154_v34 = vld [vmem:[%s2523_s1 + $0x3d0] sm:$0xff]  ;;  %v155_v35 = vld [vmem:[%s2523_s1 + $0x3d8] sm:$0xff]  ;;  %v1369_v36 = vpack.c.bf16 %v105_v27, %v104_v24  ;;  %v1371_v38 = vpack.c.bf16 %v123_v33, %v122_v32 }
  0x27   :  { %1386 = vmatpush3.bf16.msra.mxu1 %v1385_v51  ;;  %601 = vmatprep.mubr.f32.mxu1 %v21_v29  ;;  %v1401_v37 = vpack.c.bf16 %v137_v31, %v136_v28  ;;  %v106_v39 = vld [vmem:[%s2523_s1 + $0x250] sm:$0xff]  ;;  %v107_v40 = vld [vmem:[%s2523_s1 + $0x258] sm:$0xff]  ;;  %v1403_v42 = vpack.c.bf16 %v155_v35, %v154_v34  ;;  %v124_v44 = vld [vmem:[%s2523_s1 + $0x2e0] sm:$0xff] }
  0x28   :  { %1388 = vmatprep.subr.bf16.mxu1 %v1387_v56  ;;  %v138_v41 = vld [vmem:[%s2523_s1 + $0x350] sm:$0xff]  ;;  %v139_v43 = vld [vmem:[%s2523_s1 + $0x358] sm:$0xff]  ;;  %v125_v45 = vld [vmem:[%s2523_s1 + $0x2e8] sm:$0xff]  ;;  %v1373_v48 = vpack.c.bf16 %v107_v40, %v106_v39 }
  0x29   :  { %1358 = vmatpush3.bf16.msra.mxu0 %v1357_v62  ;;  %v156_v46 = vld [vmem:[%s2523_s1 + $0x3e0] sm:$0xff]  ;;  %v157_v47 = vld [vmem:[%s2523_s1 + $0x3e8] sm:$0xff]  ;;  %v1405_v49 = vpack.c.bf16 %v139_v43, %v138_v41  ;;  %v1375_v50 = vpack.c.bf16 %v125_v45, %v124_v44  ;;  %v126_v56 = vld [vmem:[%s2523_s1 + $0x2f0] sm:$0xff] }
  0x2a   :  { %1360 = vmatprep.subr.bf16.mxu0 %v1359_v0  ;;  %v108_v51 = vld [vmem:[%s2523_s1 + $0x260] sm:$0xff]  ;;  %v109_v52 = vld [vmem:[%s2523_s1 + $0x268] sm:$0xff]  ;;  %v1407_v54 = vpack.c.bf16 %v157_v47, %v156_v46  ;;  %v127_v57 = vld [vmem:[%s2523_s1 + $0x2f8] sm:$0xff] }
  0x2b   :  { %1390 = vmatpush3.bf16.msra.mxu1 %v1389_v63  ;;  %v140_v53 = vld [vmem:[%s2523_s1 + $0x360] sm:$0xff]  ;;  %v141_v55 = vld [vmem:[%s2523_s1 + $0x368] sm:$0xff]  ;;  %v158_v58 = vld [vmem:[%s2523_s1 + $0x3f0] sm:$0xff]  ;;  %v1377_v60 = vpack.c.bf16 %v109_v52, %v108_v51  ;;  %v1379_v62 = vpack.c.bf16 %v127_v57, %v126_v56 }
  0x2c   :  { %1392 = vmatprep.subr.bf16.mxu1 %v1391_v4  ;;  %v159_v59 = vld [vmem:[%s2523_s1 + $0x3f8] sm:$0xff]  ;;  %v1409_v61 = vpack.c.bf16 %v141_v55, %v140_v53  ;;  %v110_v63 = vld [vmem:[%s2523_s1 + $0x270] sm:$0xff]  ;;  %v176_v4 = vld [vmem:[%s2523_s1 + $0x480] sm:$0xff] }
  0x2d   :  { %1362 = vmatpush3.bf16.msra.mxu0 %v1361_v10  ;;  %v111_v0 = vld [vmem:[%s2523_s1 + $0x278] sm:$0xff]  ;;  %v142_v1 = vld [vmem:[%s2523_s1 + $0x370] sm:$0xff]  ;;  %v1411_v2 = vpack.c.bf16 %v159_v59, %v158_v58  ;;  %v177_v5 = vld [vmem:[%s2523_s1 + $0x488] sm:$0xff] }
  0x2e   :  { %1364 = vmatprep.subr.bf16.mxu0 %v1363_v12  ;;  %v143_v3 = vld [vmem:[%s2523_s1 + $0x378] sm:$0xff]  ;;  %v208_v6 = vld [vmem:[%s2523_s1 + $0x580] sm:$0xff]  ;;  %v209_v7 = vld [vmem:[%s2523_s1 + $0x588] sm:$0xff]  ;;  %v1381_v8 = vpack.c.bf16 %v111_v0, %v110_v63  ;;  %v1415_v10 = vpack.c.bf16 %v177_v5, %v176_v4 }
  0x2f   :  { %1394 = vmatpush3.bf16.msra.mxu1 %v1393_v11  ;;  %v1413_v9 = vpack.c.bf16 %v143_v3, %v142_v1  ;;  %v160_v11 = vld [vmem:[%s2523_s1 + $0x400] sm:$0xff]  ;;  %v161_v12 = vld [vmem:[%s2523_s1 + $0x408] sm:$0xff]  ;;  %v1447_v14 = vpack.c.bf16 %v209_v7, %v208_v6  ;;  %v179_v17 = vld [vmem:[%s2523_s1 + $0x498] sm:$0xff] }
  0x30   :  { %1396 = vmatprep.subr.bf16.mxu1 %v1395_v16  ;;  %v192_v13 = vld [vmem:[%s2523_s1 + $0x500] sm:$0xff]  ;;  %v193_v15 = vld [vmem:[%s2523_s1 + $0x508] sm:$0xff]  ;;  %v178_v16 = vld [vmem:[%s2523_s1 + $0x490] sm:$0xff]  ;;  %v1417_v21 = vpack.c.bf16 %v161_v12, %v160_v11 }
  0x31   :  { %1366 = vmatpush3.bf16.msra.mxu0 %v1365_v23  ;;  %v210_v18 = vld [vmem:[%s2523_s1 + $0x590] sm:$0xff]  ;;  %v211_v19 = vld [vmem:[%s2523_s1 + $0x598] sm:$0xff]  ;;  %v18_v20 = vld [vmem:[%s2524_s0 + $0x20] sm:$0xff]  ;;  %v1449_v23 = vpack.c.bf16 %v193_v15, %v192_v13  ;;  %v1419_v24 = vpack.c.bf16 %v179_v17, %v178_v16 }
  0x32   :  { %1368 = vmatprep.subr.bf16.mxu0 %v1367_v26  ;;  %v20_v22 = vld [vmem:[%s2524_s0 + $0x30] sm:$0xff]  ;;  %v163_v26 = vld [vmem:[%s2523_s1 + $0x418] sm:$0xff]  ;;  %v1451_v28 = vpack.c.bf16 %v211_v19, %v210_v18  ;;  %v181_v31 = vld [vmem:[%s2523_s1 + $0x4a8] sm:$0xff] }
  0x33   :  { %1398 = vmatpush3.bf16.msra.mxu1 %v1397_v25  ;;  %v162_v25 = vld [vmem:[%s2523_s1 + $0x410] sm:$0xff]  ;;  %v195_v29 = vld [vmem:[%s2523_s1 + $0x518] sm:$0xff]  ;;  %v212_v32 = vld [vmem:[%s2523_s1 + $0x5a0] sm:$0xff] }
  0x34   :  { %1400 = vmatprep.subr.bf16.mxu1 %v1399_v30  ;;  %v194_v27 = vld [vmem:[%s2523_s1 + $0x510] sm:$0xff]  ;;  %v180_v30 = vld [vmem:[%s2523_s1 + $0x4a0] sm:$0xff]  ;;  %v213_v33 = vld [vmem:[%s2523_s1 + $0x5a8] sm:$0xff]  ;;  %v1421_v35 = vpack.c.bf16 %v163_v26, %v162_v25 }
  0x35   :  { %1370 = vmatpush3.bf16.msra.mxu0 %v1369_v36  ;;  %v23_v34 = vld [vmem:[%s2524_s0 + $0x48] sm:$0xff]  ;;  %v25_v36 = vld [vmem:[%s2524_s0 + $0x58] sm:$0xff]  ;;  %v164_v39 = vld [vmem:[%s2523_s1 + $0x420] sm:$0xff] }
  0x36   :  { %1372 = vmatprep.subr.bf16.mxu0 %v1371_v38  ;;  %v1423_v38 = vpack.c.bf16 %v181_v31, %v180_v30  ;;  %v165_v40 = vld [vmem:[%s2523_s1 + $0x428] sm:$0xff]  ;;  %v196_v41 = vld [vmem:[%s2523_s1 + $0x520] sm:$0xff]  ;;  %v182_v44 = vld [vmem:[%s2523_s1 + $0x4b0] sm:$0xff] }
  0x37   :  { %1402 = vmatpush3.bf16.msra.mxu1 %v1401_v37  ;;  %v1453_v37 = vpack.c.bf16 %v195_v29, %v194_v27  ;;  %v197_v43 = vld [vmem:[%s2523_s1 + $0x528] sm:$0xff]  ;;  %v183_v45 = vld [vmem:[%s2523_s1 + $0x4b8] sm:$0xff]  ;;  %v214_v46 = vld [vmem:[%s2523_s1 + $0x5b0] sm:$0xff] }
  0x38   :  { %1404 = vmatprep.subr.bf16.mxu1 %v1403_v42  ;;  %v1455_v42 = vpack.c.bf16 %v213_v33, %v212_v32  ;;  %v215_v47 = vld [vmem:[%s2523_s1 + $0x5b8] sm:$0xff]  ;;  %v166_v51 = vld [vmem:[%s2523_s1 + $0x430] sm:$0xff]  ;;  %v184_v56 = vld [vmem:[%s2523_s1 + $0x4c0] sm:$0xff] }
  0x39   :  { %1374 = vmatpush3.bf16.msra.mxu0 %v1373_v48  ;;  %v1425_v48 = vpack.c.bf16 %v165_v40, %v164_v39  ;;  %v167_v52 = vld [vmem:[%s2523_s1 + $0x438] sm:$0xff]  ;;  %v198_v53 = vld [vmem:[%s2523_s1 + $0x530] sm:$0xff]  ;;  %v185_v57 = vld [vmem:[%s2523_s1 + $0x4c8] sm:$0xff] }
  0x3a   :  { %1376 = vmatprep.subr.bf16.mxu0 %v1375_v50  ;;  %v1427_v50 = vpack.c.bf16 %v183_v45, %v182_v44  ;;  %v199_v55 = vld [vmem:[%s2523_s1 + $0x538] sm:$0xff]  ;;  %v216_v58 = vld [vmem:[%s2523_s1 + $0x5c0] sm:$0xff]  ;;  %v217_v59 = vld [vmem:[%s2523_s1 + $0x5c8] sm:$0xff] }
  0x3b   :  { %1406 = vmatpush3.bf16.msra.mxu1 %v1405_v49  ;;  %v1457_v49 = vpack.c.bf16 %v197_v43, %v196_v41  ;;  %v168_v63 = vld [vmem:[%s2523_s1 + $0x440] sm:$0xff]  ;;  %v169_v0 = vld [vmem:[%s2523_s1 + $0x448] sm:$0xff]  ;;  %v186_v4 = vld [vmem:[%s2523_s1 + $0x4d0] sm:$0xff] }
  0x3c   :  { %1408 = vmatprep.subr.bf16.mxu1 %v1407_v54  ;;  %v1459_v54 = vpack.c.bf16 %v215_v47, %v214_v46  ;;  %v200_v1 = vld [vmem:[%s2523_s1 + $0x540] sm:$0xff]  ;;  %v201_v3 = vld [vmem:[%s2523_s1 + $0x548] sm:$0xff]  ;;  %v187_v5 = vld [vmem:[%s2523_s1 + $0x4d8] sm:$0xff] }
  0x3d   :  { %1378 = vmatpush3.bf16.msra.mxu0 %v1377_v60  ;;  %v1429_v60 = vpack.c.bf16 %v167_v52, %v166_v51  ;;  %v218_v6 = vld [vmem:[%s2523_s1 + $0x5d0] sm:$0xff]  ;;  %v219_v7 = vld [vmem:[%s2523_s1 + $0x5d8] sm:$0xff]  ;;  %v188_v16 = vld [vmem:[%s2523_s1 + $0x4e0] sm:$0xff] }
  0x3e   :  { %1380 = vmatprep.subr.bf16.mxu0 %v1379_v62  ;;  %v1431_v62 = vpack.c.bf16 %v185_v57, %v184_v56  ;;  %v170_v11 = vld [vmem:[%s2523_s1 + $0x450] sm:$0xff]  ;;  %v171_v12 = vld [vmem:[%s2523_s1 + $0x458] sm:$0xff]  ;;  %v189_v17 = vld [vmem:[%s2523_s1 + $0x4e8] sm:$0xff] }
  0x3f   :  { %1410 = vmatpush3.bf16.msra.mxu1 %v1409_v61  ;;  %v1461_v61 = vpack.c.bf16 %v199_v55, %v198_v53  ;;  %v202_v13 = vld [vmem:[%s2523_s1 + $0x550] sm:$0xff]  ;;  %v203_v15 = vld [vmem:[%s2523_s1 + $0x558] sm:$0xff]  ;;  %v220_v18 = vld [vmem:[%s2523_s1 + $0x5e0] sm:$0xff] }
  0x40   :  { %1412 = vmatprep.subr.bf16.mxu1 %v1411_v2  ;;  %v1463_v2 = vpack.c.bf16 %v217_v59, %v216_v58  ;;  %v221_v19 = vld [vmem:[%s2523_s1 + $0x5e8] sm:$0xff]  ;;  %v204_v25 = vld [vmem:[%s2523_s1 + $0x560] sm:$0xff]  ;;  %v191_v29 = vld [vmem:[%s2523_s1 + $0x4f8] sm:$0xff] }
  0x41   :  { %1382 = vmatpush3.bf16.msra.mxu0 %v1381_v8  ;;  %v1433_v8 = vpack.c.bf16 %v169_v0, %v168_v63  ;;  %v1471_v26 = vpack.c.bf16 %v221_v19, %v220_v18  ;;  %v205_v27 = vld [vmem:[%s2523_s1 + $0x568] sm:$0xff]  ;;  %v222_v30 = vld [vmem:[%s2523_s1 + $0x5f0] sm:$0xff]  ;;  %v223_v31 = vld [vmem:[%s2523_s1 + $0x5f8] sm:$0xff] }
  0x42   :  { %1416 = vmatprep.subr.bf16.mxu0 %v1415_v10  ;;  %v1435_v10 = vpack.c.bf16 %v187_v5, %v186_v4  ;;  %v1473_v33 = vpack.c.bf16 %v205_v27, %v204_v25  ;;  %v207_v39 = vld [vmem:[%s2523_s1 + $0x578] sm:$0xff]  ;;  %v240_v40 = vld [vmem:[%s2523_s1 + $0x680] sm:$0xff]  ;;  %v241_v41 = vld [vmem:[%s2523_s1 + $0x688] sm:$0xff] }
  0x43   :  { %1414 = vmatpush3.bf16.msra.mxu1 %v1413_v9  ;;  %v1465_v9 = vpack.c.bf16 %v201_v3, %v200_v1  ;;  %v273_v43 = vld [vmem:[%s2523_s1 + $0x788] sm:$0xff]  ;;  %v1479_v46 = vpack.c.bf16 %v241_v41, %v240_v40  ;;  %v224_v47 = vld [vmem:[%s2523_s1 + $0x600] sm:$0xff]  ;;  %v242_v52 = vld [vmem:[%s2523_s1 + $0x690] sm:$0xff] }
  0x44   :  { %1448 = vmatprep.subr.bf16.mxu1 %v1447_v14  ;;  %532 = vmatmul.mubr.f32.vlgmr.msra.gmra.mrb[2].mxu0 %v18_v20  ;;  %v1467_v14 = vpack.c.bf16 %v219_v7, %v218_v6  ;;  %v1437_v20 = vpack.c.bf16 %v171_v12, %v170_v11  ;;  %v257_v51 = vld [vmem:[%s2523_s1 + $0x708] sm:$0xff]  ;;  %v243_v53 = vld [vmem:[%s2523_s1 + $0x698] sm:$0xff]  ;;  %v22_v56 = vld [vmem:[%s2524_s0 + $0x40] sm:$0xff] }
  0x45   :  { %1418 = vmatpush3.bf16.msra.mxu0 %v1417_v21  ;;  %671 = vmatprep.mubr.f32.mxu0 %v23_v34  ;;  %v1469_v21 = vpack.c.bf16 %v203_v15, %v202_v13  ;;  %v275_v55 = vld [vmem:[%s2523_s1 + $0x798] sm:$0xff]  ;;  %v24_v58 = vld [vmem:[%s2524_s0 + $0x50] sm:$0xff]  ;;  %v245_v3 = vld [vmem:[%s2523_s1 + $0x6a8] sm:$0xff] }
  0x46   :  { %602 = vmatmul.mubr.f32.vlgmr.msra.gmra.mrb[2].mxu1 %v20_v22  ;;  %1420 = vmatprep.subr.bf16.mxu0 %v1419_v24  ;;  %v1439_v22 = vpack.c.bf16 %v189_v17, %v188_v16  ;;  %v173_v24 = vld [vmem:[%s2523_s1 + $0x468] sm:$0xff]  ;;  %v258_v63 = vld [vmem:[%s2523_s1 + $0x710] sm:$0xff]  ;;  %v259_v1 = vld [vmem:[%s2523_s1 + $0x718] sm:$0xff] }
  0x47   :  { %1450 = vmatpush3.bf16.msra.mxu1 %v1449_v23  ;;  %741 = vmatprep.mubr.f32.mxu1 %v25_v36  ;;  %v172_v23 = vld [vmem:[%s2523_s1 + $0x460] sm:$0xff]  ;;  %v175_v36 = vld [vmem:[%s2523_s1 + $0x478] sm:$0xff]  ;;  %v277_v5 = vld [vmem:[%s2523_s1 + $0x7a8] sm:$0xff] }
  0x48   :  { %1452 = vmatprep.subr.bf16.mxu1 %v1451_v28  ;;  %v190_v28 = vld [vmem:[%s2523_s1 + $0x4f0] sm:$0xff]  ;;  %v1441_v32 = vpack.c.bf16 %v173_v24, %v172_v23  ;;  %v276_v4 = vld [vmem:[%s2523_s1 + $0x7a0] sm:$0xff]  ;;  %v27_v6 = vld [vmem:[%s2524_s0 + $0x68] sm:$0xff] }
  0x49   :  { %1422 = vmatpush3.bf16.msra.mxu0 %v1421_v35  ;;  %v1443_v34 = vpack.c.bf16 %v191_v29, %v190_v28  ;;  %v174_v35 = vld [vmem:[%s2523_s1 + $0x470] sm:$0xff]  ;;  %v228_v11 = vld [vmem:[%s2523_s1 + $0x620] sm:$0xff]  ;;  %v229_v12 = vld [vmem:[%s2523_s1 + $0x628] sm:$0xff] }
  0x4a   :  { %1424 = vmatprep.subr.bf16.mxu0 %v1423_v38  ;;  %v1475_v38 = vpack.c.bf16 %v223_v31, %v222_v30  ;;  %v1445_v44 = vpack.c.bf16 %v175_v36, %v174_v35  ;;  %v260_v13 = vld [vmem:[%s2523_s1 + $0x720] sm:$0xff]  ;;  %v261_v15 = vld [vmem:[%s2523_s1 + $0x728] sm:$0xff]  ;;  %v246_v16 = vld [vmem:[%s2523_s1 + $0x6b0] sm:$0xff] }
  0x4b   :  { %1454 = vmatpush3.bf16.msra.mxu1 %v1453_v37  ;;  %v206_v37 = vld [vmem:[%s2523_s1 + $0x570] sm:$0xff]  ;;  %v247_v17 = vld [vmem:[%s2523_s1 + $0x6b8] sm:$0xff]  ;;  %v248_v28 = vld [vmem:[%s2523_s1 + $0x6c0] sm:$0xff] }
  0x4c   :  { %1456 = vmatprep.subr.bf16.mxu1 %v1455_v42  ;;  %v272_v42 = vld [vmem:[%s2523_s1 + $0x780] sm:$0xff]  ;;  %v1477_v45 = vpack.c.bf16 %v207_v39, %v206_v37  ;;  %v278_v18 = vld [vmem:[%s2523_s1 + $0x7b0] sm:$0xff]  ;;  %v279_v19 = vld [vmem:[%s2523_s1 + $0x7b8] sm:$0xff] }
  0x4d   :  { %1426 = vmatpush3.bf16.msra.mxu0 %v1425_v48  ;;  %v225_v48 = vld [vmem:[%s2523_s1 + $0x608] sm:$0xff]  ;;  %v230_v23 = vld [vmem:[%s2523_s1 + $0x630] sm:$0xff]  ;;  %v231_v24 = vld [vmem:[%s2523_s1 + $0x638] sm:$0xff] }
  0x4e   :  { %1428 = vmatprep.subr.bf16.mxu0 %v1427_v50  ;;  %v1511_v50 = vpack.c.bf16 %v273_v43, %v272_v42  ;;  %v1481_v57 = vpack.c.bf16 %v225_v48, %v224_v47  ;;  %v262_v25 = vld [vmem:[%s2523_s1 + $0x730] sm:$0xff]  ;;  %v263_v27 = vld [vmem:[%s2523_s1 + $0x738] sm:$0xff]  ;;  %v249_v29 = vld [vmem:[%s2523_s1 + $0x6c8] sm:$0xff] }
  0x4f   :  { %1458 = vmatpush3.bf16.msra.mxu1 %v1457_v49  ;;  %v256_v49 = vld [vmem:[%s2523_s1 + $0x700] sm:$0xff]  ;;  %v281_v31 = vld [vmem:[%s2523_s1 + $0x7c8] sm:$0xff]  ;;  %v250_v40 = vld [vmem:[%s2523_s1 + $0x6d0] sm:$0xff] }
  0x50   :  { %1460 = vmatprep.subr.bf16.mxu1 %v1459_v54  ;;  %v274_v54 = vld [vmem:[%s2523_s1 + $0x790] sm:$0xff]  ;;  %v1513_v59 = vpack.c.bf16 %v257_v51, %v256_v49  ;;  %v280_v30 = vld [vmem:[%s2523_s1 + $0x7c0] sm:$0xff]  ;;  %v233_v36 = vld [vmem:[%s2523_s1 + $0x648] sm:$0xff] }
  0x51   :  { %1430 = vmatpush3.bf16.msra.mxu0 %v1429_v60  ;;  %v1483_v60 = vpack.c.bf16 %v243_v53, %v242_v52  ;;  %v1515_v0 = vpack.c.bf16 %v275_v55, %v274_v54  ;;  %v232_v35 = vld [vmem:[%s2523_s1 + $0x640] sm:$0xff]  ;;  %v265_v39 = vld [vmem:[%s2523_s1 + $0x748] sm:$0xff]  ;;  %v251_v41 = vld [vmem:[%s2523_s1 + $0x6d8] sm:$0xff] }
  0x52   :  { %1432 = vmatprep.subr.bf16.mxu0 %v1431_v62  ;;  %v227_v62 = vld [vmem:[%s2523_s1 + $0x618] sm:$0xff]  ;;  %v264_v37 = vld [vmem:[%s2523_s1 + $0x740] sm:$0xff]  ;;  %v282_v42 = vld [vmem:[%s2523_s1 + $0x7d0] sm:$0xff] }
  0x53   :  { %1462 = vmatpush3.bf16.msra.mxu1 %v1461_v61  ;;  %v226_v61 = vld [vmem:[%s2523_s1 + $0x610] sm:$0xff]  ;;  %v283_v43 = vld [vmem:[%s2523_s1 + $0x7d8] sm:$0xff]  ;;  %v252_v52 = vld [vmem:[%s2523_s1 + $0x6e0] sm:$0xff] }
  0x54   :  { %1464 = vmatprep.subr.bf16.mxu1 %v1463_v2  ;;  %v244_v2 = vld [vmem:[%s2523_s1 + $0x6a0] sm:$0xff]  ;;  %v1485_v7 = vpack.c.bf16 %v227_v62, %v226_v61  ;;  %v234_v47 = vld [vmem:[%s2523_s1 + $0x650] sm:$0xff]  ;;  %v235_v48 = vld [vmem:[%s2523_s1 + $0x658] sm:$0xff] }
  0x55   :  { %1434 = vmatpush3.bf16.msra.mxu0 %v1433_v8  ;;  %v29_v8 = vld [vmem:[%s2524_s0 + $0x78] sm:$0xff]  ;;  %v266_v49 = vld [vmem:[%s2523_s1 + $0x750] sm:$0xff]  ;;  %v253_v53 = vld [vmem:[%s2523_s1 + $0x6e8] sm:$0xff] }
  0x56   :  { %1436 = vmatprep.subr.bf16.mxu0 %v1435_v10  ;;  %v1487_v10 = vpack.c.bf16 %v245_v3, %v244_v2  ;;  %v267_v51 = vld [vmem:[%s2523_s1 + $0x758] sm:$0xff]  ;;  %v284_v54 = vld [vmem:[%s2523_s1 + $0x7e0] sm:$0xff]  ;;  %v285_v55 = vld [vmem:[%s2523_s1 + $0x7e8] sm:$0xff] }
  0x57   :  { %1466 = vmatpush3.bf16.msra.mxu1 %v1465_v9  ;;  %v1517_v9 = vpack.c.bf16 %v259_v1, %v258_v63  ;;  %v268_v61 = vld [vmem:[%s2523_s1 + $0x760] sm:$0xff]  ;;  %v1535_v62 = vpack.c.bf16 %v285_v55, %v284_v54  ;;  %v269_v63 = vld [vmem:[%s2523_s1 + $0x768] sm:$0xff]  ;;  %v255_v1 = vld [vmem:[%s2523_s1 + $0x6f8] sm:$0xff] }
  0x58   :  { %1468 = vmatprep.subr.bf16.mxu1 %v1467_v14  ;;  %v1519_v14 = vpack.c.bf16 %v277_v5, %v276_v4  ;;  %v286_v2 = vld [vmem:[%s2523_s1 + $0x7f0] sm:$0xff]  ;;  %v287_v3 = vld [vmem:[%s2523_s1 + $0x7f8] sm:$0xff]  ;;  %v1537_v5 = vpack.c.bf16 %v269_v63, %v268_v61 }
  0x59   :  { %1438 = vmatpush3.bf16.msra.mxu0 %v1437_v20  ;;  %v1489_v20 = vpack.c.bf16 %v229_v12, %v228_v11  ;;  %v271_v11 = vld [vmem:[%s2523_s1 + $0x778] sm:$0xff]  ;;  %v304_v12 = vld [vmem:[%s2523_s1 + $0x880] sm:$0xff] }
  0x5a   :  { %1440 = vmatprep.subr.bf16.mxu0 %v1439_v22  ;;  %v1491_v22 = vpack.c.bf16 %v247_v17, %v246_v16  ;;  %v288_v17 = vld [vmem:[%s2523_s1 + $0x800] sm:$0xff]  ;;  %v303_v63 = vld [vmem:[%s2523_s1 + $0x878] sm:$0xff] }
  0x5b   :  { %1470 = vmatpush3.bf16.msra.mxu1 %v1469_v21  ;;  %v1521_v21 = vpack.c.bf16 %v261_v15, %v260_v13  ;;  %v305_v13 = vld [vmem:[%s2523_s1 + $0x888] sm:$0xff] }
  0x5c   :  { %1472 = vmatprep.subr.bf16.mxu1 %v1471_v26  ;;  %v1523_v26 = vpack.c.bf16 %v279_v19, %v278_v18  ;;  %v1543_v16 = vpack.c.bf16 %v305_v13, %v304_v12  ;;  %v289_v18 = vld [vmem:[%s2523_s1 + $0x808] sm:$0xff]  ;;  %v306_v19 = vld [vmem:[%s2523_s1 + $0x890] sm:$0xff] }
  0x5d   :  { %1442 = vmatpush3.bf16.msra.mxu0 %v1441_v32  ;;  %v1493_v32 = vpack.c.bf16 %v231_v24, %v230_v23  ;;  %v28_v23 = vld [vmem:[%s2524_s0 + $0x70] sm:$0xff] }
  0x5e   :  { %1444 = vmatprep.subr.bf16.mxu0 %v1443_v34  ;;  %v1495_v34 = vpack.c.bf16 %v249_v29, %v248_v28  ;;  %v309_v28 = vld [vmem:[%s2523_s1 + $0x8a8] sm:$0xff] }
  0x5f   :  { %1474 = vmatpush3.bf16.msra.mxu1 %v1473_v33  ;;  %v1525_v33 = vpack.c.bf16 %v263_v27, %v262_v25  ;;  %v290_v25 = vld [vmem:[%s2523_s1 + $0x810] sm:$0xff]  ;;  %v308_v27 = vld [vmem:[%s2523_s1 + $0x8a0] sm:$0xff]  ;;  %v31_v29 = vld [vmem:[%s2524_s0 + $0x88] sm:$0xff] }
  0x60   :  { %1476 = vmatprep.subr.bf16.mxu1 %v1475_v38  ;;  %v1527_v38 = vpack.c.bf16 %v281_v31, %v280_v30  ;;  %v1551_v31 = vpack.c.bf16 %v309_v28, %v308_v27 }
  0x61   :  { %1446 = vmatpush3.bf16.msra.mxu0 %v1445_v44  ;;  %v1497_v44 = vpack.c.bf16 %v233_v36, %v232_v35  ;;  %v311_v35 = vld [vmem:[%s2523_s1 + $0x8b8] sm:$0xff] }
  0x62   :  { %1480 = vmatprep.subr.bf16.mxu0 %v1479_v46  ;;  %v1499_v46 = vpack.c.bf16 %v251_v41, %v250_v40  ;;  %v312_v40 = vld [vmem:[%s2523_s1 + $0x8c0] sm:$0xff]  ;;  %v313_v41 = vld [vmem:[%s2523_s1 + $0x8c8] sm:$0xff] }
  0x63   :  { %1478 = vmatpush3.bf16.msra.mxu1 %v1477_v45  ;;  %v1529_v45 = vpack.c.bf16 %v265_v39, %v264_v37  ;;  %v295_v39 = vld [vmem:[%s2523_s1 + $0x838] sm:$0xff] }
  0x64   :  { %1512 = vmatprep.subr.bf16.mxu1 %v1511_v50  ;;  %672 = vmatmul.mubr.f32.vlgmr.msra.gmra.mrb[4].mxu0 %v22_v56  ;;  %v1531_v50 = vpack.c.bf16 %v283_v43, %v282_v42  ;;  %v1501_v56 = vpack.c.bf16 %v235_v48, %v234_v47  ;;  %v1559_v43 = vpack.c.bf16 %v313_v41, %v312_v40  ;;  %v315_v47 = vld [vmem:[%s2523_s1 + $0x8d8] sm:$0xff] }
  0x65   :  { %1482 = vmatpush3.bf16.msra.mxu0 %v1481_v57  ;;  %811 = vmatprep.mubr.f32.mxu0 %v27_v6  ;;  %v1533_v57 = vpack.c.bf16 %v267_v51, %v266_v49  ;;  %v299_v51 = vld [vmem:[%s2523_s1 + $0x858] sm:$0xff] }
  0x66   :  { %742 = vmatmul.mubr.f32.vlgmr.msra.gmra.mrb[4].mxu1 %v24_v58  ;;  %1484 = vmatprep.subr.bf16.mxu0 %v1483_v60  ;;  %v1503_v58 = vpack.c.bf16 %v253_v53, %v252_v52  ;;  %v237_v60 = vld [vmem:[%s2523_s1 + $0x668] sm:$0xff]  ;;  %v316_v52 = vld [vmem:[%s2523_s1 + $0x8e0] sm:$0xff] }
  0x67   :  { %1514 = vmatpush3.bf16.msra.mxu1 %v1513_v59  ;;  %881 = vmatprep.mubr.f32.mxu1 %v29_v8  ;;  %v236_v59 = vld [vmem:[%s2523_s1 + $0x660] sm:$0xff]  ;;  %v239_v8 = vld [vmem:[%s2523_s1 + $0x678] sm:$0xff]  ;;  %v317_v53 = vld [vmem:[%s2523_s1 + $0x8e8] sm:$0xff] }
  0x68   :  { %1516 = vmatprep.subr.bf16.mxu1 %v1515_v0  ;;  %v254_v0 = vld [vmem:[%s2523_s1 + $0x6f0] sm:$0xff]  ;;  %v1505_v4 = vpack.c.bf16 %v237_v60, %v236_v59  ;;  %v1567_v55 = vpack.c.bf16 %v317_v53, %v316_v52  ;;  %v319_v59 = vld [vmem:[%s2523_s1 + $0x8f8] sm:$0xff] }
  0x69   :  { %1486 = vmatpush3.bf16.msra.mxu0 %v1485_v7  ;;  %v1507_v6 = vpack.c.bf16 %v255_v1, %v254_v0  ;;  %v238_v7 = vld [vmem:[%s2523_s1 + $0x670] sm:$0xff]  ;;  %v30_v1 = vld [vmem:[%s2524_s0 + $0x80] sm:$0xff] }
  0x6a   :  { %1488 = vmatprep.subr.bf16.mxu0 %v1487_v10  ;;  %v1539_v10 = vpack.c.bf16 %v287_v3, %v286_v2  ;;  %v971_v3 = vld [vmem:[%s2525_s2] ss:$0 sm:$0xff] }
  0x6b   :  { %1518 = vmatpush3.bf16.msra.mxu1 %v1517_v9  ;;  %v270_v9 = vld [vmem:[%s2523_s1 + $0x770] sm:$0xff] }
  0x6c   :  { %1520 = vmatprep.subr.bf16.mxu1 %v1519_v14  ;;  %v1509_v14 = vpack.c.bf16 %v239_v8, %v238_v7  ;;  %v1541_v15 = vpack.c.bf16 %v271_v11, %v270_v9 }
  0x6d   :  { %1490 = vmatpush3.bf16.msra.mxu0 %v1489_v20  ;;  %v307_v20 = vld [vmem:[%s2523_s1 + $0x898] sm:$0xff] }
  0x6e   :  { %1492 = vmatprep.subr.bf16.mxu0 %v1491_v22  ;;  %v1545_v22 = vpack.c.bf16 %v289_v18, %v288_v17  ;;  %v1547_v24 = vpack.c.bf16 %v307_v20, %v306_v19 }
  0x6f   :  { %1522 = vmatpush3.bf16.msra.mxu1 %v1521_v21  ;;  %v26_v21 = vld [vmem:[%s2524_s0 + $0x60] sm:$0xff] }
  0x70   :  { %1524 = vmatprep.subr.bf16.mxu1 %v1523_v26  ;;  %v291_v26 = vld [vmem:[%s2523_s1 + $0x818] sm:$0xff] }
  0x71   :  { %1494 = vmatpush3.bf16.msra.mxu0 %v1493_v32  ;;  %v1549_v30 = vpack.c.bf16 %v291_v26, %v290_v25  ;;  %v292_v32 = vld [vmem:[%s2523_s1 + $0x820] sm:$0xff] }
  0x72   :  { %1496 = vmatprep.subr.bf16.mxu0 %v1495_v34  ;;  %v310_v34 = vld [vmem:[%s2523_s1 + $0x8b0] sm:$0xff] }
  0x73   :  { %1526 = vmatpush3.bf16.msra.mxu1 %v1525_v33  ;;  %v293_v33 = vld [vmem:[%s2523_s1 + $0x828] sm:$0xff]  ;;  %v1555_v37 = vpack.c.bf16 %v311_v35, %v310_v34 }
  0x74   :  { %1528 = vmatprep.subr.bf16.mxu1 %v1527_v38  ;;  %v1553_v36 = vpack.c.bf16 %v293_v33, %v292_v32  ;;  %v294_v38 = vld [vmem:[%s2523_s1 + $0x830] sm:$0xff] }
  0x75   :  { %1498 = vmatpush3.bf16.msra.mxu0 %v1497_v44  ;;  %v1557_v42 = vpack.c.bf16 %v295_v39, %v294_v38  ;;  %v296_v44 = vld [vmem:[%s2523_s1 + $0x840] sm:$0xff] }
  0x76   :  { %1500 = vmatprep.subr.bf16.mxu0 %v1499_v46  ;;  %v314_v46 = vld [vmem:[%s2523_s1 + $0x8d0] sm:$0xff] }
  0x77   :  { %1530 = vmatpush3.bf16.msra.mxu1 %v1529_v45  ;;  %v297_v45 = vld [vmem:[%s2523_s1 + $0x848] sm:$0xff]  ;;  %v1563_v49 = vpack.c.bf16 %v315_v47, %v314_v46 }
  0x78   :  { %1532 = vmatprep.subr.bf16.mxu1 %v1531_v50  ;;  %v1561_v48 = vpack.c.bf16 %v297_v45, %v296_v44  ;;  %v298_v50 = vld [vmem:[%s2523_s1 + $0x850] sm:$0xff] }
  0x79   :  { %1502 = vmatpush3.bf16.msra.mxu0 %v1501_v56  ;;  %v1565_v54 = vpack.c.bf16 %v299_v51, %v298_v50  ;;  %v300_v56 = vld [vmem:[%s2523_s1 + $0x860] sm:$0xff] }
  0x7a   :  { %1504 = vmatprep.subr.bf16.mxu0 %v1503_v58  ;;  %v318_v58 = vld [vmem:[%s2523_s1 + $0x8f0] sm:$0xff] }
  0x7b   :  { %1534 = vmatpush3.bf16.msra.mxu1 %v1533_v57  ;;  %v301_v57 = vld [vmem:[%s2523_s1 + $0x868] sm:$0xff]  ;;  %v1571_v61 = vpack.c.bf16 %v319_v59, %v318_v58 }
  0x7c   :  { %1536 = vmatprep.subr.bf16.mxu1 %v1535_v62  ;;  %v1569_v60 = vpack.c.bf16 %v301_v57, %v300_v56  ;;  %v302_v62 = vld [vmem:[%s2523_s1 + $0x870] sm:$0xff] }
  0x7d   :  { %1506 = vmatpush3.bf16.msra.mxu0 %v1505_v4  ;;  %v1573_v0 = vpack.c.bf16 %v303_v63, %v302_v62 }
  0x7e   :  { %1508 = vmatprep.subr.bf16.mxu0 %v1507_v6 }
  0x7f   :  { %1538 = vmatpush3.bf16.msra.mxu1 %v1537_v5 }
  0x80   :  { %1540 = vmatprep.subr.bf16.mxu1 %v1539_v10 }
  0x81   :  { %1510 = vmatpush3.bf16.msra.mxu0 %v1509_v14 }
  0x82   :  { %1544 = vmatprep.subr.bf16.mxu0 %v1543_v16 }
  0x83   :  { %1542 = vmatpush3.bf16.msra.mxu1 %v1541_v15 }
  0x84   :  { %812 = vmatmul.mubr.f32.vlgmr.msra.gmra.mrb[6].mxu0 %v26_v21 }
  0x85   :  { %1546 = vmatpush3.bf16.msra.mxu0 %v1545_v22  ;;  %951 = vmatprep.mubr.f32.mxu0 %v31_v29 }
  0x86   :  { %882 = vmatmul.mubr.f32.vlgmr.msra.gmra.mrb[6].mxu1 %v28_v23  ;;  %1548 = vmatprep.subr.bf16.mxu0 %v1547_v24 }
  0x89   :  { %1550 = vmatpush3.bf16.msra.mxu0 %v1549_v30 }
  0x8a   :  { %1552 = vmatprep.subr.bf16.mxu0 %v1551_v31 }
  0x8d   :  { %1554 = vmatpush3.bf16.msra.mxu0 %v1553_v36 }
  0x8e   :  { %1556 = vmatprep.subr.bf16.mxu0 %v1555_v37 }
  0x91   :  { %1558 = vmatpush3.bf16.msra.mxu0 %v1557_v42 }
  0x92   :  { %1560 = vmatprep.subr.bf16.mxu0 %v1559_v43 }
  0x95   :  { %1562 = vmatpush3.bf16.msra.mxu0 %v1561_v48 }
  0x96   :  { %1564 = vmatprep.subr.bf16.mxu0 %v1563_v49 }
  0x99   :  { %1566 = vmatpush3.bf16.msra.mxu0 %v1565_v54 }
  0x9a   :  { %1568 = vmatprep.subr.bf16.mxu0 %v1567_v55 }
  0x9d   :  { %1570 = vmatpush3.bf16.msra.mxu0 %v1569_v60 }
  0x9e   :  { %1572 = vmatprep.subr.bf16.mxu0 %v1571_v61 }
  0xa1   :  { %1574 = vmatpush3.bf16.msra.mxu0 %v1573_v0 }
  0xa4   :  { %952 = vmatmul.mubr.f32.vlgmr.msra.gmra.mrb[8].mxu0 %v30_v1 }
  0xf7   :  { %v1004_v2 = vpop.f32.mrb[0].mxu0 }
  0xf8   :  { %v1005_v4 = vpop.f32.mrb[1].mxu0 }
  0xf9   :  { %v1039_v5 = vpop.f32.mrb[0].mxu1  ;;  %v1006_v6 = vadd.f32 %v1005_v4, %v1004_v2 }
  0xfa   :  { %v1040_v7 = vpop.f32.mrb[1].mxu1 }
  0xfb   :  { %v1041_v8 = vadd.f32 %v1040_v7, %v1039_v5  ;;  %v394_v9 = vadd.f32 %v1006_v6, %v971_v3 }
  0xfd   :  { %v464_v10 = vadd.f32 %v1041_v8, %v394_v9 }
 0x117   :  { %v1074_v11 = vpop.f32.mrb[2].mxu0 }
 0x118   :  { %v1075_v12 = vpop.f32.mrb[3].mxu0 }
 0x119   :  { %v1109_v13 = vpop.f32.mrb[2].mxu1  ;;  %v1076_v14 = vadd.f32 %v1075_v12, %v1074_v11 }
 0x11a   :  { %v1110_v15 = vpop.f32.mrb[3].mxu1 }
 0x11b   :  { %v1111_v16 = vadd.f32 %v1110_v15, %v1109_v13  ;;  %v534_v17 = vadd.f32 %v1076_v14, %v464_v10 }
 0x11d   :  { %v604_v18 = vadd.f32 %v1111_v16, %v534_v17 }
 0x137   :  { %v1144_v19 = vpop.f32.mrb[4].mxu0 }
 0x138   :  { %v1145_v20 = vpop.f32.mrb[5].mxu0 }
 0x139   :  { %v1179_v21 = vpop.f32.mrb[4].mxu1  ;;  %v1146_v22 = vadd.f32 %v1145_v20, %v1144_v19 }
 0x13a   :  { %v1180_v23 = vpop.f32.mrb[5].mxu1 }
 0x13b   :  { %v1181_v24 = vadd.f32 %v1180_v23, %v1179_v21  ;;  %v674_v25 = vadd.f32 %v1146_v22, %v604_v18 }
 0x13d   :  { %v744_v26 = vadd.f32 %v1181_v24, %v674_v25 }
 0x157   :  { %v1214_v27 = vpop.f32.mrb[6].mxu0 }
 0x158   :  { %v1215_v28 = vpop.f32.mrb[7].mxu0 }
 0x159   :  { %v1249_v29 = vpop.f32.mrb[6].mxu1  ;;  %v1216_v30 = vadd.f32 %v1215_v28, %v1214_v27 }
 0x15a   :  { %v1250_v31 = vpop.f32.mrb[7].mxu1 }
 0x15b   :  { %v1251_v32 = vadd.f32 %v1250_v31, %v1249_v29  ;;  %v814_v33 = vadd.f32 %v1216_v30, %v744_v26 }
 0x15d   :  { %v884_v34 = vadd.f32 %v1251_v32, %v814_v33 }
 0x177   :  { %v1284_v35 = vpop.f32.mrb[8].mxu0 }
 0x178   :  { %v1285_v36 = vpop.f32.mrb[9].mxu0 }
 0x179   :  { %v1286_v37 = vadd.f32 %v1285_v36, %v1284_v35 }
 0x17b   :  { %v954_v38 = vadd.f32 %v1286_v37, %v884_v34 }
 0x17d   :  { %957 = vmax.xlane.f32.xlu0 %v954_v38 }
 0x20a   :  { %v958_v39 = vpop.xlane.xlu0 %957 }
 0x20b   :  { %v959_v40 = vsub.f32 %v954_v38, %v958_v39 }
 0x20d   :  { %v960_v41 = vmul.f32 1.442695, %v959_v40 }
 0x20f   :  { %1575 = vpow2.f32 %v960_v41 }
 0x219   :  { %v1576_v42 = vpop.eup %1575 }
 0x21a   :  { %962 = vadd.xlane.f32.xlu0 %v1576_v42 }
 0x2a7   :  { %v963_v43 = vpop.xlane.xlu0 %962 }
 0x2a8   :  { %1577 = vrcp.f32 %v963_v43 }
 0x2b2   :  { %v1578_v44 = vpop.eup %1577 }
 0x2b3   :  { %v965_v45 = vmul.f32 %v1578_v44, %v1576_v42 }
 0x2b5   :  { %966 = vst [vmem:[%s2526_s3] sm:$0xff] %v965_v45 }

</bundles_post_ra>
